<compile_context>
chip_gen: v7x
topology: tpu7x:2x2x1
jax: 0.10.0
libtpu: 0.0.40
codegen_flags: <defaults>
</compile_context>

<pallas_src>
import math
import functools

import jax
import jax.numpy as jnp
from jax import lax
from jax.experimental import pallas as pl
from jax.experimental.pallas import tpu as pltpu


# -----------------------------------------------------------------------------
# Fused forward kernel
# -----------------------------------------------------------------------------
def transformer_kernel(x_ref, pe_ref, w_in_ref, b_in_ref,
                       wqkv_ref, bqkv_ref, wo_ref, bo_ref,
                       ln1w_ref, ln1b_ref,
                       w1_ref, b1_ref, w2_ref, b2_ref,
                       ln2w_ref, ln2b_ref,
                       w_out_ref, b_out_ref,        # b_out lives in SMEM
                       o_ref,
                       *, nhead, num_layers, batch, seq, out_pad):
    f32 = jnp.float32
    B, S = batch, seq
    BS = B * S
    D = w_in_ref.shape[1]
    Dh = D // nhead
    scale = 1.0 / math.sqrt(Dh)

    # --- input projection (Linear(1, D)) + positional encoding ------------------
    x = x_ref[...]                                         # (B, S)
    base = b_in_ref[...] + pe_ref[...]                     # (S, D)
    h = x[:, :, None] * w_in_ref[...][None, :, :] + base[None]   # (B, S, D)
    h = h.reshape(BS, D)                                   # fold batch into M

    # --- encoder layers (static unroll over num_layers) -------------------------
    for l in range(num_layers):
        # self-attention: one QKV matmul on the (BS, D) slab
        qkv = jnp.dot(h, wqkv_ref[l], preferred_element_type=f32) + bqkv_ref[l]  # (BS, 3D)
        qkv3 = qkv.reshape(B, S, 3 * D)

        heads = []
        for hh in range(nhead):                            # static; dots batched over B
            q = qkv3[:, :, hh * Dh:(hh + 1) * Dh] * scale
            k = qkv3[:, :, D + hh * Dh:D + (hh + 1) * Dh]
            v = qkv3[:, :, 2 * D + hh * Dh:2 * D + (hh + 1) * Dh]
            s = jnp.einsum('bqd,bkd->bqk', q, k,
                           preferred_element_type=f32)     # (B, S, S)
            s = s - jnp.max(s, axis=-1, keepdims=True)
            p = jnp.exp(s)
            p = p * pl.reciprocal(jnp.sum(p, axis=-1, keepdims=True), approx=True)
            heads.append(jnp.einsum('bqk,bkd->bqd', p, v,
                                    preferred_element_type=f32))  # (B, S, Dh)

        ctx = jnp.concatenate(heads, axis=-1).reshape(BS, D)       # concat heads
        attn = jnp.dot(ctx, wo_ref[l], preferred_element_type=f32) + bo_ref[l]
        h = h + attn                                       # residual (dropout=id)

        # LayerNorm 1 (post-LN)
        mu = jnp.mean(h, axis=-1, keepdims=True)
        var = jnp.mean(jnp.square(h - mu), axis=-1, keepdims=True)
        h = (h - mu) * lax.rsqrt(var + 1e-5) * ln1w_ref[l] + ln1b_ref[l]

        # feed-forward: linear1 -> relu -> linear2
        ff = jnp.dot(h, w1_ref[l], preferred_element_type=f32) + b1_ref[l]
        ff = jnp.maximum(ff, 0.0)
        ff = jnp.dot(ff, w2_ref[l], preferred_element_type=f32) + b2_ref[l]
        h = h + ff                                         # residual

        # LayerNorm 2
        mu = jnp.mean(h, axis=-1, keepdims=True)
        var = jnp.mean(jnp.square(h - mu), axis=-1, keepdims=True)
        h = (h - mu) * lax.rsqrt(var + 1e-5) * ln2w_ref[l] + ln2b_ref[l]

    # --- output projection (Linear(D, 1)), stored lane-dense as (1, out_pad) ----
    out = lax.dot_general(w_out_ref[...], h, (((1,), (1,)), ((), ())),
                          preferred_element_type=f32)      # (1, BS)
    out = out + b_out_ref[0]                               # scalar bias from SMEM
    if out_pad > BS:
        out = jnp.concatenate(
            [out, jnp.zeros((1, out_pad - BS), f32)], axis=-1)
    o_ref[...] = out                                       # single unmasked 128-lane store


# -----------------------------------------------------------------------------
# Wrappers
# -----------------------------------------------------------------------------
def positional_encoding(seq_len, d_model):
    position = jnp.arange(seq_len, dtype=jnp.float32)[:, None]
    div_term = jnp.exp(jnp.arange(0, d_model, 2, dtype=jnp.float32)
                       * (-math.log(10000.0) / d_model))
    pe = jnp.zeros((seq_len, d_model), jnp.float32)
    pe = pe.at[:, 0::2].set(jnp.sin(position * div_term))
    pe = pe.at[:, 1::2].set(jnp.cos(position * div_term))
    return pe


def transformer_forward(x, params, nhead):
    B, S = x.shape
    D = params["w_in"].shape[1]
    L = params["wqkv_t"].shape[0]
    BS = B * S
    out_pad = max(128, ((BS + 127) // 128) * 128)

    pe = positional_encoding(S, D)

    # eval-mode mask (identity); kept only to match the PyTorch return signature
    mask = jnp.ones_like(x)

    kernel = functools.partial(transformer_kernel, nhead=nhead, num_layers=L,
                               batch=B, seq=S, out_pad=out_pad)

    vmem = pl.BlockSpec(memory_space=pltpu.MemorySpace.VMEM)
    smem = pl.BlockSpec(memory_space=pltpu.MemorySpace.SMEM)

    out_padded = pl.pallas_call(
        kernel,
        out_shape=jax.ShapeDtypeStruct((1, out_pad), jnp.float32),
        in_specs=[vmem] * 17 + [smem],        # last arg (b_out scalar) -> SMEM
        out_specs=vmem,
    )(x, pe, params["w_in"], params["b_in"],
      params["wqkv_t"], params["bqkv"], params["wo_t"], params["bo"],
      params["ln1w"], params["ln1b"],
      params["w1_t"], params["b1"], params["w2_t"], params["b2"],
      params["ln2w"], params["ln2b"],
      params["w_out"], params["b_out"])

    out = out_padded[0, :BS].reshape(B, S)
    return out, mask


# -----------------------------------------------------------------------------
# Deterministic parameter construction (synthetic, not a checkpoint)
# -----------------------------------------------------------------------------
def init_params(key, d_model, num_layers, dff=2048):
    D = d_model
    ks = iter(jax.random.split(key, 8))

    def nrm(shape, scale=0.02):
        return scale * jax.random.normal(next(ks), shape, dtype=jnp.float32)

    return {
        "w_in": nrm((1, D)),                               # Linear(1, D).weight^T
        "b_in": jnp.zeros((1, D), jnp.float32),
        "w_out": nrm((1, D)),                              # Linear(D, 1).weight
        "b_out": jnp.zeros((1,), jnp.float32),
        # per-layer weights stacked on a leading L axis (kept VMEM-resident)
        "wqkv_t": nrm((num_layers, D, 3 * D)),             # in_proj_weight^T
        "bqkv": jnp.zeros((num_layers, 1, 3 * D), jnp.float32),
        "wo_t": nrm((num_layers, D, D)),                   # out_proj.weight^T
        "bo": jnp.zeros((num_layers, 1, D), jnp.float32),
        "ln1w": jnp.ones((num_layers, 1, D), jnp.float32),
        "ln1b": jnp.zeros((num_layers, 1, D), jnp.float32),
        "w1_t": nrm((num_layers, D, dff)),                 # linear1.weight^T
        "b1": jnp.zeros((num_layers, 1, dff), jnp.float32),
        "w2_t": nrm((num_layers, dff, D)),                 # linear2.weight^T
        "b2": jnp.zeros((num_layers, 1, D), jnp.float32),
        "ln2w": jnp.ones((num_layers, 1, D), jnp.float32),
        "ln2b": jnp.zeros((num_layers, 1, D), jnp.float32),
    }


# -----------------------------------------------------------------------------
if __name__ == "__main__":
    # Transformer(input_dim=16, d_model=32, nhead=4, num_layers=2)
    B, S, D, H, L = 2, 16, 32, 4, 2

    key = jax.random.PRNGKey(0)
    kx, kp = jax.random.split(key)
    x = jax.random.normal(kx, (B, S), dtype=jnp.float32)
    params = init_params(kp, d_model=D, num_layers=L)

    fwd = jax.jit(transformer_forward, static_argnames=("nhead",))
    out, mask = fwd(x, params, nhead=H)
    out = jax.block_until_ready(out)
    mask = jax.block_until_ready(mask)

    assert out.shape == (B, S) and out.dtype == jnp.float32
    assert mask.shape == (B, S)
    assert bool(jnp.all(jnp.isfinite(out)))
    print("KERNEL_OK")
</pallas_src>

<mosaic_0001>
module attributes {stable_mosaic.version = 11 : i64} {
  func.func @transformer_kernel(%arg0: memref<2x16xf32, #tpu.memory_space<vmem>>, %arg1: memref<16x32xf32, #tpu.memory_space<vmem>>, %arg2: memref<1x32xf32, #tpu.memory_space<vmem>>, %arg3: memref<1x32xf32, #tpu.memory_space<vmem>>, %arg4: memref<2x32x96xf32, #tpu.memory_space<vmem>>, %arg5: memref<2x1x96xf32, #tpu.memory_space<vmem>>, %arg6: memref<2x32x32xf32, #tpu.memory_space<vmem>>, %arg7: memref<2x1x32xf32, #tpu.memory_space<vmem>>, %arg8: memref<2x1x32xf32, #tpu.memory_space<vmem>>, %arg9: memref<2x1x32xf32, #tpu.memory_space<vmem>>, %arg10: memref<2x32x2048xf32, #tpu.memory_space<vmem>>, %arg11: memref<2x1x2048xf32, #tpu.memory_space<vmem>>, %arg12: memref<2x2048x32xf32, #tpu.memory_space<vmem>>, %arg13: memref<2x1x32xf32, #tpu.memory_space<vmem>>, %arg14: memref<2x1x32xf32, #tpu.memory_space<vmem>>, %arg15: memref<2x1x32xf32, #tpu.memory_space<vmem>>, %arg16: memref<1x32xf32, #tpu.memory_space<vmem>>, %arg17: memref<1xf32, #tpu.memory_space<smem>>, %arg18: memref<1x128xf32, #tpu.memory_space<vmem>>) attributes {dimension_semantics = [], scalar_prefetch = 0 : i64, scratch_operands = 0 : i64, tpu.core_type = #tpu.core_type<tc>} {
    %c0 = arith.constant 0 : index
    %c0_0 = arith.constant 0 : index
    %0 = vector.load %arg0[%c0, %c0_0] : memref<2x16xf32, #tpu.memory_space<vmem>>, vector<2x16xf32>
    %c0_1 = arith.constant 0 : index
    %c0_2 = arith.constant 0 : index
    %1 = vector.load %arg3[%c0_1, %c0_2] : memref<1x32xf32, #tpu.memory_space<vmem>>, vector<1x32xf32>
    %c0_3 = arith.constant 0 : index
    %c0_4 = arith.constant 0 : index
    %2 = vector.load %arg1[%c0_3, %c0_4] : memref<16x32xf32, #tpu.memory_space<vmem>>, vector<16x32xf32>
    %3 = vector.broadcast %1 : vector<1x32xf32> to vector<16x32xf32>
    %4 = arith.addf %3, %2 : vector<16x32xf32>
    %5 = vector.shape_cast %0 : vector<2x16xf32> to vector<2x16x1xf32>
    %c0_5 = arith.constant 0 : index
    %c0_6 = arith.constant 0 : index
    %6 = vector.load %arg2[%c0_5, %c0_6] : memref<1x32xf32, #tpu.memory_space<vmem>>, vector<1x32xf32>
    %7 = vector.shape_cast %6 : vector<1x32xf32> to vector<1x1x32xf32>
    %8 = vector.broadcast %5 : vector<2x16x1xf32> to vector<2x16x32xf32>
    %9 = vector.broadcast %7 : vector<1x1x32xf32> to vector<2x16x32xf32>
    %10 = arith.mulf %8, %9 : vector<2x16x32xf32>
    %11 = vector.shape_cast %4 : vector<16x32xf32> to vector<1x16x32xf32>
    %12 = vector.broadcast %11 : vector<1x16x32xf32> to vector<2x16x32xf32>
    %13 = arith.addf %10, %12 : vector<2x16x32xf32>
    %14 = vector.shape_cast %13 : vector<2x16x32xf32> to vector<32x32xf32>
    %c0_7 = arith.constant 0 : index
    %c0_8 = arith.constant 0 : index
    %c0_9 = arith.constant 0 : index
    %15 = vector.load %arg4[%c0_7, %c0_8, %c0_9] : memref<2x32x96xf32, #tpu.memory_space<vmem>>, vector<1x32x96xf32>
    %16 = vector.shape_cast %15 : vector<1x32x96xf32> to vector<32x96xf32>
    %cst = arith.constant dense<0.000000e+00> : vector<32x96xf32>
    %17 = tpu.matmul %14, %16, %cst {dimension_numbers = #tpu.dot_dimension_numbers<[1], [0], [0], [1], [0, 0, 1, 1], [], []>} : vector<32x32xf32>, vector<32x96xf32>, vector<32x96xf32> -> vector<32x96xf32>
    %c0_10 = arith.constant 0 : index
    %c0_11 = arith.constant 0 : index
    %c0_12 = arith.constant 0 : index
    %18 = vector.load %arg5[%c0_10, %c0_11, %c0_12] : memref<2x1x96xf32, #tpu.memory_space<vmem>>, vector<1x1x96xf32>
    %19 = vector.shape_cast %18 : vector<1x1x96xf32> to vector<1x96xf32>
    %20 = vector.broadcast %19 : vector<1x96xf32> to vector<32x96xf32>
    %21 = arith.addf %17, %20 : vector<32x96xf32>
    %22 = vector.shape_cast %21 : vector<32x96xf32> to vector<2x16x96xf32>
    %23 = vector.extract_strided_slice %22 {offsets = [0, 0, 0], sizes = [2, 16, 8], strides = [1, 1, 1]} : vector<2x16x96xf32> to vector<2x16x8xf32>
    %cst_13 = arith.constant 0.353553385 : f32
    %24 = vector.broadcast %cst_13 : f32 to vector<2x16x8xf32>
    %25 = arith.mulf %23, %24 : vector<2x16x8xf32>
    %26 = vector.extract_strided_slice %22 {offsets = [0, 0, 32], sizes = [2, 16, 8], strides = [1, 1, 1]} : vector<2x16x96xf32> to vector<2x16x8xf32>
    %27 = vector.extract_strided_slice %22 {offsets = [0, 0, 64], sizes = [2, 16, 8], strides = [1, 1, 1]} : vector<2x16x96xf32> to vector<2x16x8xf32>
    "tpu.trace_start"() <{level = 10 : i32, message = "bqd,bkd->bqk"}> : () -> ()
    %cst_14 = arith.constant dense<0.000000e+00> : vector<2x16x16xf32>
    %28 = tpu.matmul %25, %26, %cst_14 {dimension_numbers = #tpu.dot_dimension_numbers<[2], [2], [1], [1], [0, 0, 0, 1, 1, 1], [0], [0]>} : vector<2x16x8xf32>, vector<2x16x8xf32>, vector<2x16x16xf32> -> vector<2x16x16xf32>
    "tpu.trace_stop"() : () -> ()
    %cst_15 = arith.constant dense<0xFF800000> : vector<2x16xf32>
    %29 = vector.multi_reduction <maximumf>, %28, %cst_15 [2] : vector<2x16x16xf32> to vector<2x16xf32>
    %30 = vector.shape_cast %29 : vector<2x16xf32> to vector<2x16x1xf32>
    %31 = vector.broadcast %30 : vector<2x16x1xf32> to vector<2x16x16xf32>
    %32 = arith.subf %28, %31 : vector<2x16x16xf32>
    %33 = math.exp %32 : vector<2x16x16xf32>
    %cst_16 = arith.constant dense<0.000000e+00> : vector<2x16xf32>
    %34 = vector.multi_reduction <add>, %33, %cst_16 [2] : vector<2x16x16xf32> to vector<2x16xf32>
    %35 = vector.shape_cast %34 : vector<2x16xf32> to vector<2x16x1xf32>
    %36 = tpu.reciprocal %35 {approx = true} : vector<2x16x1xf32> -> vector<2x16x1xf32>
    %37 = vector.broadcast %36 : vector<2x16x1xf32> to vector<2x16x16xf32>
    %38 = arith.mulf %33, %37 : vector<2x16x16xf32>
    "tpu.trace_start"() <{level = 10 : i32, message = "bqk,bkd->bqd"}> : () -> ()
    %cst_17 = arith.constant dense<0.000000e+00> : vector<2x16x8xf32>
    %39 = tpu.matmul %38, %27, %cst_17 {dimension_numbers = #tpu.dot_dimension_numbers<[2], [1], [1], [2], [0, 0, 0, 1, 1, 2], [0], [0]>} : vector<2x16x16xf32>, vector<2x16x8xf32>, vector<2x16x8xf32> -> vector<2x16x8xf32>
    "tpu.trace_stop"() : () -> ()
    %40 = vector.extract_strided_slice %22 {offsets = [0, 0, 8], sizes = [2, 16, 8], strides = [1, 1, 1]} : vector<2x16x96xf32> to vector<2x16x8xf32>
    %cst_18 = arith.constant 0.353553385 : f32
    %41 = vector.broadcast %cst_18 : f32 to vector<2x16x8xf32>
    %42 = arith.mulf %40, %41 : vector<2x16x8xf32>
    %43 = vector.extract_strided_slice %22 {offsets = [0, 0, 40], sizes = [2, 16, 8], strides = [1, 1, 1]} : vector<2x16x96xf32> to vector<2x16x8xf32>
    %44 = vector.extract_strided_slice %22 {offsets = [0, 0, 72], sizes = [2, 16, 8], strides = [1, 1, 1]} : vector<2x16x96xf32> to vector<2x16x8xf32>
    "tpu.trace_start"() <{level = 10 : i32, message = "bqd,bkd->bqk"}> : () -> ()
    %cst_19 = arith.constant dense<0.000000e+00> : vector<2x16x16xf32>
    %45 = tpu.matmul %42, %43, %cst_19 {dimension_numbers = #tpu.dot_dimension_numbers<[2], [2], [1], [1], [0, 0, 0, 1, 1, 1], [0], [0]>} : vector<2x16x8xf32>, vector<2x16x8xf32>, vector<2x16x16xf32> -> vector<2x16x16xf32>
    "tpu.trace_stop"() : () -> ()
    %cst_20 = arith.constant dense<0xFF800000> : vector<2x16xf32>
    %46 = vector.multi_reduction <maximumf>, %45, %cst_20 [2] : vector<2x16x16xf32> to vector<2x16xf32>
    %47 = vector.shape_cast %46 : vector<2x16xf32> to vector<2x16x1xf32>
    %48 = vector.broadcast %47 : vector<2x16x1xf32> to vector<2x16x16xf32>
    %49 = arith.subf %45, %48 : vector<2x16x16xf32>
    %50 = math.exp %49 : vector<2x16x16xf32>
    %cst_21 = arith.constant dense<0.000000e+00> : vector<2x16xf32>
    %51 = vector.multi_reduction <add>, %50, %cst_21 [2] : vector<2x16x16xf32> to vector<2x16xf32>
    %52 = vector.shape_cast %51 : vector<2x16xf32> to vector<2x16x1xf32>
    %53 = tpu.reciprocal %52 {approx = true} : vector<2x16x1xf32> -> vector<2x16x1xf32>
    %54 = vector.broadcast %53 : vector<2x16x1xf32> to vector<2x16x16xf32>
    %55 = arith.mulf %50, %54 : vector<2x16x16xf32>
    "tpu.trace_start"() <{level = 10 : i32, message = "bqk,bkd->bqd"}> : () -> ()
    %cst_22 = arith.constant dense<0.000000e+00> : vector<2x16x8xf32>
    %56 = tpu.matmul %55, %44, %cst_22 {dimension_numbers = #tpu.dot_dimension_numbers<[2], [1], [1], [2], [0, 0, 0, 1, 1, 2], [0], [0]>} : vector<2x16x16xf32>, vector<2x16x8xf32>, vector<2x16x8xf32> -> vector<2x16x8xf32>
    "tpu.trace_stop"() : () -> ()
    %57 = vector.extract_strided_slice %22 {offsets = [0, 0, 16], sizes = [2, 16, 8], strides = [1, 1, 1]} : vector<2x16x96xf32> to vector<2x16x8xf32>
    %cst_23 = arith.constant 0.353553385 : f32
    %58 = vector.broadcast %cst_23 : f32 to vector<2x16x8xf32>
    %59 = arith.mulf %57, %58 : vector<2x16x8xf32>
    %60 = vector.extract_strided_slice %22 {offsets = [0, 0, 48], sizes = [2, 16, 8], strides = [1, 1, 1]} : vector<2x16x96xf32> to vector<2x16x8xf32>
    %61 = vector.extract_strided_slice %22 {offsets = [0, 0, 80], sizes = [2, 16, 8], strides = [1, 1, 1]} : vector<2x16x96xf32> to vector<2x16x8xf32>
    "tpu.trace_start"() <{level = 10 : i32, message = "bqd,bkd->bqk"}> : () -> ()
    %cst_24 = arith.constant dense<0.000000e+00> : vector<2x16x16xf32>
    %62 = tpu.matmul %59, %60, %cst_24 {dimension_numbers = #tpu.dot_dimension_numbers<[2], [2], [1], [1], [0, 0, 0, 1, 1, 1], [0], [0]>} : vector<2x16x8xf32>, vector<2x16x8xf32>, vector<2x16x16xf32> -> vector<2x16x16xf32>
    "tpu.trace_stop"() : () -> ()
    %cst_25 = arith.constant dense<0xFF800000> : vector<2x16xf32>
    %63 = vector.multi_reduction <maximumf>, %62, %cst_25 [2] : vector<2x16x16xf32> to vector<2x16xf32>
    %64 = vector.shape_cast %63 : vector<2x16xf32> to vector<2x16x1xf32>
    %65 = vector.broadcast %64 : vector<2x16x1xf32> to vector<2x16x16xf32>
    %66 = arith.subf %62, %65 : vector<2x16x16xf32>
    %67 = math.exp %66 : vector<2x16x16xf32>
    %cst_26 = arith.constant dense<0.000000e+00> : vector<2x16xf32>
    %68 = vector.multi_reduction <add>, %67, %cst_26 [2] : vector<2x16x16xf32> to vector<2x16xf32>
    %69 = vector.shape_cast %68 : vector<2x16xf32> to vector<2x16x1xf32>
    %70 = tpu.reciprocal %69 {approx = true} : vector<2x16x1xf32> -> vector<2x16x1xf32>
    %71 = vector.broadcast %70 : vector<2x16x1xf32> to vector<2x16x16xf32>
    %72 = arith.mulf %67, %71 : vector<2x16x16xf32>
    "tpu.trace_start"() <{level = 10 : i32, message = "bqk,bkd->bqd"}> : () -> ()
    %cst_27 = arith.constant dense<0.000000e+00> : vector<2x16x8xf32>
    %73 = tpu.matmul %72, %61, %cst_27 {dimension_numbers = #tpu.dot_dimension_numbers<[2], [1], [1], [2], [0, 0, 0, 1, 1, 2], [0], [0]>} : vector<2x16x16xf32>, vector<2x16x8xf32>, vector<2x16x8xf32> -> vector<2x16x8xf32>
    "tpu.trace_stop"() : () -> ()
    %74 = vector.extract_strided_slice %22 {offsets = [0, 0, 24], sizes = [2, 16, 8], strides = [1, 1, 1]} : vector<2x16x96xf32> to vector<2x16x8xf32>
    %cst_28 = arith.constant 0.353553385 : f32
    %75 = vector.broadcast %cst_28 : f32 to vector<2x16x8xf32>
    %76 = arith.mulf %74, %75 : vector<2x16x8xf32>
    %77 = vector.extract_strided_slice %22 {offsets = [0, 0, 56], sizes = [2, 16, 8], strides = [1, 1, 1]} : vector<2x16x96xf32> to vector<2x16x8xf32>
    %78 = vector.extract_strided_slice %22 {offsets = [0, 0, 88], sizes = [2, 16, 8], strides = [1, 1, 1]} : vector<2x16x96xf32> to vector<2x16x8xf32>
    "tpu.trace_start"() <{level = 10 : i32, message = "bqd,bkd->bqk"}> : () -> ()
    %cst_29 = arith.constant dense<0.000000e+00> : vector<2x16x16xf32>
    %79 = tpu.matmul %76, %77, %cst_29 {dimension_numbers = #tpu.dot_dimension_numbers<[2], [2], [1], [1], [0, 0, 0, 1, 1, 1], [0], [0]>} : vector<2x16x8xf32>, vector<2x16x8xf32>, vector<2x16x16xf32> -> vector<2x16x16xf32>
    "tpu.trace_stop"() : () -> ()
    %cst_30 = arith.constant dense<0xFF800000> : vector<2x16xf32>
    %80 = vector.multi_reduction <maximumf>, %79, %cst_30 [2] : vector<2x16x16xf32> to vector<2x16xf32>
    %81 = vector.shape_cast %80 : vector<2x16xf32> to vector<2x16x1xf32>
    %82 = vector.broadcast %81 : vector<2x16x1xf32> to vector<2x16x16xf32>
    %83 = arith.subf %79, %82 : vector<2x16x16xf32>
    %84 = math.exp %83 : vector<2x16x16xf32>
    %cst_31 = arith.constant dense<0.000000e+00> : vector<2x16xf32>
    %85 = vector.multi_reduction <add>, %84, %cst_31 [2] : vector<2x16x16xf32> to vector<2x16xf32>
    %86 = vector.shape_cast %85 : vector<2x16xf32> to vector<2x16x1xf32>
    %87 = tpu.reciprocal %86 {approx = true} : vector<2x16x1xf32> -> vector<2x16x1xf32>
    %88 = vector.broadcast %87 : vector<2x16x1xf32> to vector<2x16x16xf32>
    %89 = arith.mulf %84, %88 : vector<2x16x16xf32>
    "tpu.trace_start"() <{level = 10 : i32, message = "bqk,bkd->bqd"}> : () -> ()
    %cst_32 = arith.constant dense<0.000000e+00> : vector<2x16x8xf32>
    %90 = tpu.matmul %89, %78, %cst_32 {dimension_numbers = #tpu.dot_dimension_numbers<[2], [1], [1], [2], [0, 0, 0, 1, 1, 2], [0], [0]>} : vector<2x16x16xf32>, vector<2x16x8xf32>, vector<2x16x8xf32> -> vector<2x16x8xf32>
    "tpu.trace_stop"() : () -> ()
    %91 = tpu.concatenate %39, %56, %73, %90 in 2 : vector<2x16x8xf32>, vector<2x16x8xf32>, vector<2x16x8xf32>, vector<2x16x8xf32> -> vector<2x16x32xf32>
    %92 = vector.shape_cast %91 : vector<2x16x32xf32> to vector<32x32xf32>
    %c0_33 = arith.constant 0 : index
    %c0_34 = arith.constant 0 : index
    %c0_35 = arith.constant 0 : index
    %93 = vector.load %arg6[%c0_33, %c0_34, %c0_35] : memref<2x32x32xf32, #tpu.memory_space<vmem>>, vector<1x32x32xf32>
    %94 = vector.shape_cast %93 : vector<1x32x32xf32> to vector<32x32xf32>
    %cst_36 = arith.constant dense<0.000000e+00> : vector<32x32xf32>
    %95 = tpu.matmul %92, %94, %cst_36 {dimension_numbers = #tpu.dot_dimension_numbers<[1], [0], [0], [1], [0, 0, 1, 1], [], []>} : vector<32x32xf32>, vector<32x32xf32>, vector<32x32xf32> -> vector<32x32xf32>
    %c0_37 = arith.constant 0 : index
    %c0_38 = arith.constant 0 : index
    %c0_39 = arith.constant 0 : index
    %96 = vector.load %arg7[%c0_37, %c0_38, %c0_39] : memref<2x1x32xf32, #tpu.memory_space<vmem>>, vector<1x1x32xf32>
    %97 = vector.shape_cast %96 : vector<1x1x32xf32> to vector<1x32xf32>
    %98 = vector.broadcast %97 : vector<1x32xf32> to vector<32x32xf32>
    %99 = arith.addf %95, %98 : vector<32x32xf32>
    %100 = arith.addf %14, %99 : vector<32x32xf32>
    %cst_40 = arith.constant dense<0.000000e+00> : vector<32xf32>
    %101 = vector.multi_reduction <add>, %100, %cst_40 [1] : vector<32x32xf32> to vector<32xf32>
    %102 = vector.shape_cast %101 : vector<32xf32> to vector<32x1xf32>
    %cst_41 = arith.constant 3.200000e+01 : f32
    %103 = vector.broadcast %cst_41 : f32 to vector<32x1xf32>
    %104 = arith.divf %102, %103 : vector<32x1xf32>
    %105 = vector.broadcast %104 : vector<32x1xf32> to vector<32x32xf32>
    %106 = arith.subf %100, %105 : vector<32x32xf32>
    %107 = arith.mulf %106, %106 : vector<32x32xf32>
    %cst_42 = arith.constant dense<0.000000e+00> : vector<32xf32>
    %108 = vector.multi_reduction <add>, %107, %cst_42 [1] : vector<32x32xf32> to vector<32xf32>
    %109 = vector.shape_cast %108 : vector<32xf32> to vector<32x1xf32>
    %cst_43 = arith.constant 3.200000e+01 : f32
    %110 = vector.broadcast %cst_43 : f32 to vector<32x1xf32>
    %111 = arith.divf %109, %110 : vector<32x1xf32>
    %112 = vector.broadcast %104 : vector<32x1xf32> to vector<32x32xf32>
    %113 = arith.subf %100, %112 : vector<32x32xf32>
    %cst_44 = arith.constant 9.99999974E-6 : f32
    %114 = vector.broadcast %cst_44 : f32 to vector<32x1xf32>
    %115 = arith.addf %111, %114 : vector<32x1xf32>
    %116 = math.rsqrt %115 : vector<32x1xf32>
    %117 = vector.broadcast %116 : vector<32x1xf32> to vector<32x32xf32>
    %118 = arith.mulf %113, %117 : vector<32x32xf32>
    %c0_45 = arith.constant 0 : index
    %c0_46 = arith.constant 0 : index
    %c0_47 = arith.constant 0 : index
    %119 = vector.load %arg8[%c0_45, %c0_46, %c0_47] : memref<2x1x32xf32, #tpu.memory_space<vmem>>, vector<1x1x32xf32>
    %120 = vector.shape_cast %119 : vector<1x1x32xf32> to vector<1x32xf32>
    %121 = vector.broadcast %120 : vector<1x32xf32> to vector<32x32xf32>
    %122 = arith.mulf %118, %121 : vector<32x32xf32>
    %c0_48 = arith.constant 0 : index
    %c0_49 = arith.constant 0 : index
    %c0_50 = arith.constant 0 : index
    %123 = vector.load %arg9[%c0_48, %c0_49, %c0_50] : memref<2x1x32xf32, #tpu.memory_space<vmem>>, vector<1x1x32xf32>
    %124 = vector.shape_cast %123 : vector<1x1x32xf32> to vector<1x32xf32>
    %125 = vector.broadcast %124 : vector<1x32xf32> to vector<32x32xf32>
    %126 = arith.addf %122, %125 : vector<32x32xf32>
    %c0_51 = arith.constant 0 : index
    %c0_52 = arith.constant 0 : index
    %c0_53 = arith.constant 0 : index
    %127 = vector.load %arg10[%c0_51, %c0_52, %c0_53] : memref<2x32x2048xf32, #tpu.memory_space<vmem>>, vector<1x32x2048xf32>
    %128 = vector.shape_cast %127 : vector<1x32x2048xf32> to vector<32x2048xf32>
    %cst_54 = arith.constant dense<0.000000e+00> : vector<32x2048xf32>
    %129 = tpu.matmul %126, %128, %cst_54 {dimension_numbers = #tpu.dot_dimension_numbers<[1], [0], [0], [1], [0, 0, 1, 1], [], []>} : vector<32x32xf32>, vector<32x2048xf32>, vector<32x2048xf32> -> vector<32x2048xf32>
    %c0_55 = arith.constant 0 : index
    %c0_56 = arith.constant 0 : index
    %c0_57 = arith.constant 0 : index
    %130 = vector.load %arg11[%c0_55, %c0_56, %c0_57] : memref<2x1x2048xf32, #tpu.memory_space<vmem>>, vector<1x1x2048xf32>
    %131 = vector.shape_cast %130 : vector<1x1x2048xf32> to vector<1x2048xf32>
    %132 = vector.broadcast %131 : vector<1x2048xf32> to vector<32x2048xf32>
    %133 = arith.addf %129, %132 : vector<32x2048xf32>
    %cst_58 = arith.constant 0.000000e+00 : f32
    %134 = vector.broadcast %cst_58 : f32 to vector<32x2048xf32>
    %135 = arith.maximumf %133, %134 : vector<32x2048xf32>
    %c0_59 = arith.constant 0 : index
    %c0_60 = arith.constant 0 : index
    %c0_61 = arith.constant 0 : index
    %136 = vector.load %arg12[%c0_59, %c0_60, %c0_61] : memref<2x2048x32xf32, #tpu.memory_space<vmem>>, vector<1x2048x32xf32>
    %137 = vector.shape_cast %136 : vector<1x2048x32xf32> to vector<2048x32xf32>
    %cst_62 = arith.constant dense<0.000000e+00> : vector<32x32xf32>
    %138 = tpu.matmul %135, %137, %cst_62 {dimension_numbers = #tpu.dot_dimension_numbers<[1], [0], [0], [1], [0, 0, 1, 1], [], []>} : vector<32x2048xf32>, vector<2048x32xf32>, vector<32x32xf32> -> vector<32x32xf32>
    %c0_63 = arith.constant 0 : index
    %c0_64 = arith.constant 0 : index
    %c0_65 = arith.constant 0 : index
    %139 = vector.load %arg13[%c0_63, %c0_64, %c0_65] : memref<2x1x32xf32, #tpu.memory_space<vmem>>, vector<1x1x32xf32>
    %140 = vector.shape_cast %139 : vector<1x1x32xf32> to vector<1x32xf32>
    %141 = vector.broadcast %140 : vector<1x32xf32> to vector<32x32xf32>
    %142 = arith.addf %138, %141 : vector<32x32xf32>
    %143 = arith.addf %126, %142 : vector<32x32xf32>
    %cst_66 = arith.constant dense<0.000000e+00> : vector<32xf32>
    %144 = vector.multi_reduction <add>, %143, %cst_66 [1] : vector<32x32xf32> to vector<32xf32>
    %145 = vector.shape_cast %144 : vector<32xf32> to vector<32x1xf32>
    %cst_67 = arith.constant 3.200000e+01 : f32
    %146 = vector.broadcast %cst_67 : f32 to vector<32x1xf32>
    %147 = arith.divf %145, %146 : vector<32x1xf32>
    %148 = vector.broadcast %147 : vector<32x1xf32> to vector<32x32xf32>
    %149 = arith.subf %143, %148 : vector<32x32xf32>
    %150 = arith.mulf %149, %149 : vector<32x32xf32>
    %cst_68 = arith.constant dense<0.000000e+00> : vector<32xf32>
    %151 = vector.multi_reduction <add>, %150, %cst_68 [1] : vector<32x32xf32> to vector<32xf32>
    %152 = vector.shape_cast %151 : vector<32xf32> to vector<32x1xf32>
    %cst_69 = arith.constant 3.200000e+01 : f32
    %153 = vector.broadcast %cst_69 : f32 to vector<32x1xf32>
    %154 = arith.divf %152, %153 : vector<32x1xf32>
    %155 = vector.broadcast %147 : vector<32x1xf32> to vector<32x32xf32>
    %156 = arith.subf %143, %155 : vector<32x32xf32>
    %cst_70 = arith.constant 9.99999974E-6 : f32
    %157 = vector.broadcast %cst_70 : f32 to vector<32x1xf32>
    %158 = arith.addf %154, %157 : vector<32x1xf32>
    %159 = math.rsqrt %158 : vector<32x1xf32>
    %160 = vector.broadcast %159 : vector<32x1xf32> to vector<32x32xf32>
    %161 = arith.mulf %156, %160 : vector<32x32xf32>
    %c0_71 = arith.constant 0 : index
    %c0_72 = arith.constant 0 : index
    %c0_73 = arith.constant 0 : index
    %162 = vector.load %arg14[%c0_71, %c0_72, %c0_73] : memref<2x1x32xf32, #tpu.memory_space<vmem>>, vector<1x1x32xf32>
    %163 = vector.shape_cast %162 : vector<1x1x32xf32> to vector<1x32xf32>
    %164 = vector.broadcast %163 : vector<1x32xf32> to vector<32x32xf32>
    %165 = arith.mulf %161, %164 : vector<32x32xf32>
    %c0_74 = arith.constant 0 : index
    %c0_75 = arith.constant 0 : index
    %c0_76 = arith.constant 0 : index
    %166 = vector.load %arg15[%c0_74, %c0_75, %c0_76] : memref<2x1x32xf32, #tpu.memory_space<vmem>>, vector<1x1x32xf32>
    %167 = vector.shape_cast %166 : vector<1x1x32xf32> to vector<1x32xf32>
    %168 = vector.broadcast %167 : vector<1x32xf32> to vector<32x32xf32>
    %169 = arith.addf %165, %168 : vector<32x32xf32>
    %c1 = arith.constant 1 : index
    %c0_77 = arith.constant 0 : index
    %c0_78 = arith.constant 0 : index
    %170 = vector.load %arg4[%c1, %c0_77, %c0_78] : memref<2x32x96xf32, #tpu.memory_space<vmem>>, vector<1x32x96xf32>
    %171 = vector.shape_cast %170 : vector<1x32x96xf32> to vector<32x96xf32>
    %cst_79 = arith.constant dense<0.000000e+00> : vector<32x96xf32>
    %172 = tpu.matmul %169, %171, %cst_79 {dimension_numbers = #tpu.dot_dimension_numbers<[1], [0], [0], [1], [0, 0, 1, 1], [], []>} : vector<32x32xf32>, vector<32x96xf32>, vector<32x96xf32> -> vector<32x96xf32>
    %c1_80 = arith.constant 1 : index
    %c0_81 = arith.constant 0 : index
    %c0_82 = arith.constant 0 : index
    %173 = vector.load %arg5[%c1_80, %c0_81, %c0_82] : memref<2x1x96xf32, #tpu.memory_space<vmem>>, vector<1x1x96xf32>
    %174 = vector.shape_cast %173 : vector<1x1x96xf32> to vector<1x96xf32>
    %175 = vector.broadcast %174 : vector<1x96xf32> to vector<32x96xf32>
    %176 = arith.addf %172, %175 : vector<32x96xf32>
    %177 = vector.shape_cast %176 : vector<32x96xf32> to vector<2x16x96xf32>
    %178 = vector.extract_strided_slice %177 {offsets = [0, 0, 0], sizes = [2, 16, 8], strides = [1, 1, 1]} : vector<2x16x96xf32> to vector<2x16x8xf32>
    %cst_83 = arith.constant 0.353553385 : f32
    %179 = vector.broadcast %cst_83 : f32 to vector<2x16x8xf32>
    %180 = arith.mulf %178, %179 : vector<2x16x8xf32>
    %181 = vector.extract_strided_slice %177 {offsets = [0, 0, 32], sizes = [2, 16, 8], strides = [1, 1, 1]} : vector<2x16x96xf32> to vector<2x16x8xf32>
    %182 = vector.extract_strided_slice %177 {offsets = [0, 0, 64], sizes = [2, 16, 8], strides = [1, 1, 1]} : vector<2x16x96xf32> to vector<2x16x8xf32>
    "tpu.trace_start"() <{level = 10 : i32, message = "bqd,bkd->bqk"}> : () -> ()
    %cst_84 = arith.constant dense<0.000000e+00> : vector<2x16x16xf32>
    %183 = tpu.matmul %180, %181, %cst_84 {dimension_numbers = #tpu.dot_dimension_numbers<[2], [2], [1], [1], [0, 0, 0, 1, 1, 1], [0], [0]>} : vector<2x16x8xf32>, vector<2x16x8xf32>, vector<2x16x16xf32> -> vector<2x16x16xf32>
    "tpu.trace_stop"() : () -> ()
    %cst_85 = arith.constant dense<0xFF800000> : vector<2x16xf32>
    %184 = vector.multi_reduction <maximumf>, %183, %cst_85 [2] : vector<2x16x16xf32> to vector<2x16xf32>
    %185 = vector.shape_cast %184 : vector<2x16xf32> to vector<2x16x1xf32>
    %186 = vector.broadcast %185 : vector<2x16x1xf32> to vector<2x16x16xf32>
    %187 = arith.subf %183, %186 : vector<2x16x16xf32>
    %188 = math.exp %187 : vector<2x16x16xf32>
    %cst_86 = arith.constant dense<0.000000e+00> : vector<2x16xf32>
    %189 = vector.multi_reduction <add>, %188, %cst_86 [2] : vector<2x16x16xf32> to vector<2x16xf32>
    %190 = vector.shape_cast %189 : vector<2x16xf32> to vector<2x16x1xf32>
    %191 = tpu.reciprocal %190 {approx = true} : vector<2x16x1xf32> -> vector<2x16x1xf32>
    %192 = vector.broadcast %191 : vector<2x16x1xf32> to vector<2x16x16xf32>
    %193 = arith.mulf %188, %192 : vector<2x16x16xf32>
    "tpu.trace_start"() <{level = 10 : i32, message = "bqk,bkd->bqd"}> : () -> ()
    %cst_87 = arith.constant dense<0.000000e+00> : vector<2x16x8xf32>
    %194 = tpu.matmul %193, %182, %cst_87 {dimension_numbers = #tpu.dot_dimension_numbers<[2], [1], [1], [2], [0, 0, 0, 1, 1, 2], [0], [0]>} : vector<2x16x16xf32>, vector<2x16x8xf32>, vector<2x16x8xf32> -> vector<2x16x8xf32>
    "tpu.trace_stop"() : () -> ()
    %195 = vector.extract_strided_slice %177 {offsets = [0, 0, 8], sizes = [2, 16, 8], strides = [1, 1, 1]} : vector<2x16x96xf32> to vector<2x16x8xf32>
    %cst_88 = arith.constant 0.353553385 : f32
    %196 = vector.broadcast %cst_88 : f32 to vector<2x16x8xf32>
    %197 = arith.mulf %195, %196 : vector<2x16x8xf32>
    %198 = vector.extract_strided_slice %177 {offsets = [0, 0, 40], sizes = [2, 16, 8], strides = [1, 1, 1]} : vector<2x16x96xf32> to vector<2x16x8xf32>
    %199 = vector.extract_strided_slice %177 {offsets = [0, 0, 72], sizes = [2, 16, 8], strides = [1, 1, 1]} : vector<2x16x96xf32> to vector<2x16x8xf32>
    "tpu.trace_start"() <{level = 10 : i32, message = "bqd,bkd->bqk"}> : () -> ()
    %cst_89 = arith.constant dense<0.000000e+00> : vector<2x16x16xf32>
    %200 = tpu.matmul %197, %198, %cst_89 {dimension_numbers = #tpu.dot_dimension_numbers<[2], [2], [1], [1], [0, 0, 0, 1, 1, 1], [0], [0]>} : vector<2x16x8xf32>, vector<2x16x8xf32>, vector<2x16x16xf32> -> vector<2x16x16xf32>
    "tpu.trace_stop"() : () -> ()
    %cst_90 = arith.constant dense<0xFF800000> : vector<2x16xf32>
    %201 = vector.multi_reduction <maximumf>, %200, %cst_90 [2] : vector<2x16x16xf32> to vector<2x16xf32>
    %202 = vector.shape_cast %201 : vector<2x16xf32> to vector<2x16x1xf32>
    %203 = vector.broadcast %202 : vector<2x16x1xf32> to vector<2x16x16xf32>
    %204 = arith.subf %200, %203 : vector<2x16x16xf32>
    %205 = math.exp %204 : vector<2x16x16xf32>
    %cst_91 = arith.constant dense<0.000000e+00> : vector<2x16xf32>
    %206 = vector.multi_reduction <add>, %205, %cst_91 [2] : vector<2x16x16xf32> to vector<2x16xf32>
    %207 = vector.shape_cast %206 : vector<2x16xf32> to vector<2x16x1xf32>
    %208 = tpu.reciprocal %207 {approx = true} : vector<2x16x1xf32> -> vector<2x16x1xf32>
    %209 = vector.broadcast %208 : vector<2x16x1xf32> to vector<2x16x16xf32>
    %210 = arith.mulf %205, %209 : vector<2x16x16xf32>
    "tpu.trace_start"() <{level = 10 : i32, message = "bqk,bkd->bqd"}> : () -> ()
    %cst_92 = arith.constant dense<0.000000e+00> : vector<2x16x8xf32>
    %211 = tpu.matmul %210, %199, %cst_92 {dimension_numbers = #tpu.dot_dimension_numbers<[2], [1], [1], [2], [0, 0, 0, 1, 1, 2], [0], [0]>} : vector<2x16x16xf32>, vector<2x16x8xf32>, vector<2x16x8xf32> -> vector<2x16x8xf32>
    "tpu.trace_stop"() : () -> ()
    %212 = vector.extract_strided_slice %177 {offsets = [0, 0, 16], sizes = [2, 16, 8], strides = [1, 1, 1]} : vector<2x16x96xf32> to vector<2x16x8xf32>
    %cst_93 = arith.constant 0.353553385 : f32
    %213 = vector.broadcast %cst_93 : f32 to vector<2x16x8xf32>
    %214 = arith.mulf %212, %213 : vector<2x16x8xf32>
    %215 = vector.extract_strided_slice %177 {offsets = [0, 0, 48], sizes = [2, 16, 8], strides = [1, 1, 1]} : vector<2x16x96xf32> to vector<2x16x8xf32>
    %216 = vector.extract_strided_slice %177 {offsets = [0, 0, 80], sizes = [2, 16, 8], strides = [1, 1, 1]} : vector<2x16x96xf32> to vector<2x16x8xf32>
    "tpu.trace_start"() <{level = 10 : i32, message = "bqd,bkd->bqk"}> : () -> ()
    %cst_94 = arith.constant dense<0.000000e+00> : vector<2x16x16xf32>
    %217 = tpu.matmul %214, %215, %cst_94 {dimension_numbers = #tpu.dot_dimension_numbers<[2], [2], [1], [1], [0, 0, 0, 1, 1, 1], [0], [0]>} : vector<2x16x8xf32>, vector<2x16x8xf32>, vector<2x16x16xf32> -> vector<2x16x16xf32>
    "tpu.trace_stop"() : () -> ()
    %cst_95 = arith.constant dense<0xFF800000> : vector<2x16xf32>
    %218 = vector.multi_reduction <maximumf>, %217, %cst_95 [2] : vector<2x16x16xf32> to vector<2x16xf32>
    %219 = vector.shape_cast %218 : vector<2x16xf32> to vector<2x16x1xf32>
    %220 = vector.broadcast %219 : vector<2x16x1xf32> to vector<2x16x16xf32>
    %221 = arith.subf %217, %220 : vector<2x16x16xf32>
    %222 = math.exp %221 : vector<2x16x16xf32>
    %cst_96 = arith.constant dense<0.000000e+00> : vector<2x16xf32>
    %223 = vector.multi_reduction <add>, %222, %cst_96 [2] : vector<2x16x16xf32> to vector<2x16xf32>
    %224 = vector.shape_cast %223 : vector<2x16xf32> to vector<2x16x1xf32>
    %225 = tpu.reciprocal %224 {approx = true} : vector<2x16x1xf32> -> vector<2x16x1xf32>
    %226 = vector.broadcast %225 : vector<2x16x1xf32> to vector<2x16x16xf32>
    %227 = arith.mulf %222, %226 : vector<2x16x16xf32>
    "tpu.trace_start"() <{level = 10 : i32, message = "bqk,bkd->bqd"}> : () -> ()
    %cst_97 = arith.constant dense<0.000000e+00> : vector<2x16x8xf32>
    %228 = tpu.matmul %227, %216, %cst_97 {dimension_numbers = #tpu.dot_dimension_numbers<[2], [1], [1], [2], [0, 0, 0, 1, 1, 2], [0], [0]>} : vector<2x16x16xf32>, vector<2x16x8xf32>, vector<2x16x8xf32> -> vector<2x16x8xf32>
    "tpu.trace_stop"() : () -> ()
    %229 = vector.extract_strided_slice %177 {offsets = [0, 0, 24], sizes = [2, 16, 8], strides = [1, 1, 1]} : vector<2x16x96xf32> to vector<2x16x8xf32>
    %cst_98 = arith.constant 0.353553385 : f32
    %230 = vector.broadcast %cst_98 : f32 to vector<2x16x8xf32>
    %231 = arith.mulf %229, %230 : vector<2x16x8xf32>
    %232 = vector.extract_strided_slice %177 {offsets = [0, 0, 56], sizes = [2, 16, 8], strides = [1, 1, 1]} : vector<2x16x96xf32> to vector<2x16x8xf32>
    %233 = vector.extract_strided_slice %177 {offsets = [0, 0, 88], sizes = [2, 16, 8], strides = [1, 1, 1]} : vector<2x16x96xf32> to vector<2x16x8xf32>
    "tpu.trace_start"() <{level = 10 : i32, message = "bqd,bkd->bqk"}> : () -> ()
    %cst_99 = arith.constant dense<0.000000e+00> : vector<2x16x16xf32>
    %234 = tpu.matmul %231, %232, %cst_99 {dimension_numbers = #tpu.dot_dimension_numbers<[2], [2], [1], [1], [0, 0, 0, 1, 1, 1], [0], [0]>} : vector<2x16x8xf32>, vector<2x16x8xf32>, vector<2x16x16xf32> -> vector<2x16x16xf32>
    "tpu.trace_stop"() : () -> ()
    %cst_100 = arith.constant dense<0xFF800000> : vector<2x16xf32>
    %235 = vector.multi_reduction <maximumf>, %234, %cst_100 [2] : vector<2x16x16xf32> to vector<2x16xf32>
    %236 = vector.shape_cast %235 : vector<2x16xf32> to vector<2x16x1xf32>
    %237 = vector.broadcast %236 : vector<2x16x1xf32> to vector<2x16x16xf32>
    %238 = arith.subf %234, %237 : vector<2x16x16xf32>
    %239 = math.exp %238 : vector<2x16x16xf32>
    %cst_101 = arith.constant dense<0.000000e+00> : vector<2x16xf32>
    %240 = vector.multi_reduction <add>, %239, %cst_101 [2] : vector<2x16x16xf32> to vector<2x16xf32>
    %241 = vector.shape_cast %240 : vector<2x16xf32> to vector<2x16x1xf32>
    %242 = tpu.reciprocal %241 {approx = true} : vector<2x16x1xf32> -> vector<2x16x1xf32>
    %243 = vector.broadcast %242 : vector<2x16x1xf32> to vector<2x16x16xf32>
    %244 = arith.mulf %239, %243 : vector<2x16x16xf32>
    "tpu.trace_start"() <{level = 10 : i32, message = "bqk,bkd->bqd"}> : () -> ()
    %cst_102 = arith.constant dense<0.000000e+00> : vector<2x16x8xf32>
    %245 = tpu.matmul %244, %233, %cst_102 {dimension_numbers = #tpu.dot_dimension_numbers<[2], [1], [1], [2], [0, 0, 0, 1, 1, 2], [0], [0]>} : vector<2x16x16xf32>, vector<2x16x8xf32>, vector<2x16x8xf32> -> vector<2x16x8xf32>
    "tpu.trace_stop"() : () -> ()
    %246 = tpu.concatenate %194, %211, %228, %245 in 2 : vector<2x16x8xf32>, vector<2x16x8xf32>, vector<2x16x8xf32>, vector<2x16x8xf32> -> vector<2x16x32xf32>
    %247 = vector.shape_cast %246 : vector<2x16x32xf32> to vector<32x32xf32>
    %c1_103 = arith.constant 1 : index
    %c0_104 = arith.constant 0 : index
    %c0_105 = arith.constant 0 : index
    %248 = vector.load %arg6[%c1_103, %c0_104, %c0_105] : memref<2x32x32xf32, #tpu.memory_space<vmem>>, vector<1x32x32xf32>
    %249 = vector.shape_cast %248 : vector<1x32x32xf32> to vector<32x32xf32>
    %cst_106 = arith.constant dense<0.000000e+00> : vector<32x32xf32>
    %250 = tpu.matmul %247, %249, %cst_106 {dimension_numbers = #tpu.dot_dimension_numbers<[1], [0], [0], [1], [0, 0, 1, 1], [], []>} : vector<32x32xf32>, vector<32x32xf32>, vector<32x32xf32> -> vector<32x32xf32>
    %c1_107 = arith.constant 1 : index
    %c0_108 = arith.constant 0 : index
    %c0_109 = arith.constant 0 : index
    %251 = vector.load %arg7[%c1_107, %c0_108, %c0_109] : memref<2x1x32xf32, #tpu.memory_space<vmem>>, vector<1x1x32xf32>
    %252 = vector.shape_cast %251 : vector<1x1x32xf32> to vector<1x32xf32>
    %253 = vector.broadcast %252 : vector<1x32xf32> to vector<32x32xf32>
    %254 = arith.addf %250, %253 : vector<32x32xf32>
    %255 = arith.addf %169, %254 : vector<32x32xf32>
    %cst_110 = arith.constant dense<0.000000e+00> : vector<32xf32>
    %256 = vector.multi_reduction <add>, %255, %cst_110 [1] : vector<32x32xf32> to vector<32xf32>
    %257 = vector.shape_cast %256 : vector<32xf32> to vector<32x1xf32>
    %cst_111 = arith.constant 3.200000e+01 : f32
    %258 = vector.broadcast %cst_111 : f32 to vector<32x1xf32>
    %259 = arith.divf %257, %258 : vector<32x1xf32>
    %260 = vector.broadcast %259 : vector<32x1xf32> to vector<32x32xf32>
    %261 = arith.subf %255, %260 : vector<32x32xf32>
    %262 = arith.mulf %261, %261 : vector<32x32xf32>
    %cst_112 = arith.constant dense<0.000000e+00> : vector<32xf32>
    %263 = vector.multi_reduction <add>, %262, %cst_112 [1] : vector<32x32xf32> to vector<32xf32>
    %264 = vector.shape_cast %263 : vector<32xf32> to vector<32x1xf32>
    %cst_113 = arith.constant 3.200000e+01 : f32
    %265 = vector.broadcast %cst_113 : f32 to vector<32x1xf32>
    %266 = arith.divf %264, %265 : vector<32x1xf32>
    %267 = vector.broadcast %259 : vector<32x1xf32> to vector<32x32xf32>
    %268 = arith.subf %255, %267 : vector<32x32xf32>
    %cst_114 = arith.constant 9.99999974E-6 : f32
    %269 = vector.broadcast %cst_114 : f32 to vector<32x1xf32>
    %270 = arith.addf %266, %269 : vector<32x1xf32>
    %271 = math.rsqrt %270 : vector<32x1xf32>
    %272 = vector.broadcast %271 : vector<32x1xf32> to vector<32x32xf32>
    %273 = arith.mulf %268, %272 : vector<32x32xf32>
    %c1_115 = arith.constant 1 : index
    %c0_116 = arith.constant 0 : index
    %c0_117 = arith.constant 0 : index
    %274 = vector.load %arg8[%c1_115, %c0_116, %c0_117] : memref<2x1x32xf32, #tpu.memory_space<vmem>>, vector<1x1x32xf32>
    %275 = vector.shape_cast %274 : vector<1x1x32xf32> to vector<1x32xf32>
    %276 = vector.broadcast %275 : vector<1x32xf32> to vector<32x32xf32>
    %277 = arith.mulf %273, %276 : vector<32x32xf32>
    %c1_118 = arith.constant 1 : index
    %c0_119 = arith.constant 0 : index
    %c0_120 = arith.constant 0 : index
    %278 = vector.load %arg9[%c1_118, %c0_119, %c0_120] : memref<2x1x32xf32, #tpu.memory_space<vmem>>, vector<1x1x32xf32>
    %279 = vector.shape_cast %278 : vector<1x1x32xf32> to vector<1x32xf32>
    %280 = vector.broadcast %279 : vector<1x32xf32> to vector<32x32xf32>
    %281 = arith.addf %277, %280 : vector<32x32xf32>
    %c1_121 = arith.constant 1 : index
    %c0_122 = arith.constant 0 : index
    %c0_123 = arith.constant 0 : index
    %282 = vector.load %arg10[%c1_121, %c0_122, %c0_123] : memref<2x32x2048xf32, #tpu.memory_space<vmem>>, vector<1x32x2048xf32>
    %283 = vector.shape_cast %282 : vector<1x32x2048xf32> to vector<32x2048xf32>
    %cst_124 = arith.constant dense<0.000000e+00> : vector<32x2048xf32>
    %284 = tpu.matmul %281, %283, %cst_124 {dimension_numbers = #tpu.dot_dimension_numbers<[1], [0], [0], [1], [0, 0, 1, 1], [], []>} : vector<32x32xf32>, vector<32x2048xf32>, vector<32x2048xf32> -> vector<32x2048xf32>
    %c1_125 = arith.constant 1 : index
    %c0_126 = arith.constant 0 : index
    %c0_127 = arith.constant 0 : index
    %285 = vector.load %arg11[%c1_125, %c0_126, %c0_127] : memref<2x1x2048xf32, #tpu.memory_space<vmem>>, vector<1x1x2048xf32>
    %286 = vector.shape_cast %285 : vector<1x1x2048xf32> to vector<1x2048xf32>
    %287 = vector.broadcast %286 : vector<1x2048xf32> to vector<32x2048xf32>
    %288 = arith.addf %284, %287 : vector<32x2048xf32>
    %cst_128 = arith.constant 0.000000e+00 : f32
    %289 = vector.broadcast %cst_128 : f32 to vector<32x2048xf32>
    %290 = arith.maximumf %288, %289 : vector<32x2048xf32>
    %c1_129 = arith.constant 1 : index
    %c0_130 = arith.constant 0 : index
    %c0_131 = arith.constant 0 : index
    %291 = vector.load %arg12[%c1_129, %c0_130, %c0_131] : memref<2x2048x32xf32, #tpu.memory_space<vmem>>, vector<1x2048x32xf32>
    %292 = vector.shape_cast %291 : vector<1x2048x32xf32> to vector<2048x32xf32>
    %cst_132 = arith.constant dense<0.000000e+00> : vector<32x32xf32>
    %293 = tpu.matmul %290, %292, %cst_132 {dimension_numbers = #tpu.dot_dimension_numbers<[1], [0], [0], [1], [0, 0, 1, 1], [], []>} : vector<32x2048xf32>, vector<2048x32xf32>, vector<32x32xf32> -> vector<32x32xf32>
    %c1_133 = arith.constant 1 : index
    %c0_134 = arith.constant 0 : index
    %c0_135 = arith.constant 0 : index
    %294 = vector.load %arg13[%c1_133, %c0_134, %c0_135] : memref<2x1x32xf32, #tpu.memory_space<vmem>>, vector<1x1x32xf32>
    %295 = vector.shape_cast %294 : vector<1x1x32xf32> to vector<1x32xf32>
    %296 = vector.broadcast %295 : vector<1x32xf32> to vector<32x32xf32>
    %297 = arith.addf %293, %296 : vector<32x32xf32>
    %298 = arith.addf %281, %297 : vector<32x32xf32>
    %cst_136 = arith.constant dense<0.000000e+00> : vector<32xf32>
    %299 = vector.multi_reduction <add>, %298, %cst_136 [1] : vector<32x32xf32> to vector<32xf32>
    %300 = vector.shape_cast %299 : vector<32xf32> to vector<32x1xf32>
    %cst_137 = arith.constant 3.200000e+01 : f32
    %301 = vector.broadcast %cst_137 : f32 to vector<32x1xf32>
    %302 = arith.divf %300, %301 : vector<32x1xf32>
    %303 = vector.broadcast %302 : vector<32x1xf32> to vector<32x32xf32>
    %304 = arith.subf %298, %303 : vector<32x32xf32>
    %305 = arith.mulf %304, %304 : vector<32x32xf32>
    %cst_138 = arith.constant dense<0.000000e+00> : vector<32xf32>
    %306 = vector.multi_reduction <add>, %305, %cst_138 [1] : vector<32x32xf32> to vector<32xf32>
    %307 = vector.shape_cast %306 : vector<32xf32> to vector<32x1xf32>
    %cst_139 = arith.constant 3.200000e+01 : f32
    %308 = vector.broadcast %cst_139 : f32 to vector<32x1xf32>
    %309 = arith.divf %307, %308 : vector<32x1xf32>
    %310 = vector.broadcast %302 : vector<32x1xf32> to vector<32x32xf32>
    %311 = arith.subf %298, %310 : vector<32x32xf32>
    %cst_140 = arith.constant 9.99999974E-6 : f32
    %312 = vector.broadcast %cst_140 : f32 to vector<32x1xf32>
    %313 = arith.addf %309, %312 : vector<32x1xf32>
    %314 = math.rsqrt %313 : vector<32x1xf32>
    %315 = vector.broadcast %314 : vector<32x1xf32> to vector<32x32xf32>
    %316 = arith.mulf %311, %315 : vector<32x32xf32>
    %c1_141 = arith.constant 1 : index
    %c0_142 = arith.constant 0 : index
    %c0_143 = arith.constant 0 : index
    %317 = vector.load %arg14[%c1_141, %c0_142, %c0_143] : memref<2x1x32xf32, #tpu.memory_space<vmem>>, vector<1x1x32xf32>
    %318 = vector.shape_cast %317 : vector<1x1x32xf32> to vector<1x32xf32>
    %319 = vector.broadcast %318 : vector<1x32xf32> to vector<32x32xf32>
    %320 = arith.mulf %316, %319 : vector<32x32xf32>
    %c1_144 = arith.constant 1 : index
    %c0_145 = arith.constant 0 : index
    %c0_146 = arith.constant 0 : index
    %321 = vector.load %arg15[%c1_144, %c0_145, %c0_146] : memref<2x1x32xf32, #tpu.memory_space<vmem>>, vector<1x1x32xf32>
    %322 = vector.shape_cast %321 : vector<1x1x32xf32> to vector<1x32xf32>
    %323 = vector.broadcast %322 : vector<1x32xf32> to vector<32x32xf32>
    %324 = arith.addf %320, %323 : vector<32x32xf32>
    %c0_147 = arith.constant 0 : index
    %c0_148 = arith.constant 0 : index
    %325 = vector.load %arg16[%c0_147, %c0_148] : memref<1x32xf32, #tpu.memory_space<vmem>>, vector<1x32xf32>
    %cst_149 = arith.constant dense<0.000000e+00> : vector<1x32xf32>
    %326 = tpu.matmul %325, %324, %cst_149 {dimension_numbers = #tpu.dot_dimension_numbers<[1], [1], [0], [0], [0, 0, 1, 0], [], []>} : vector<1x32xf32>, vector<32x32xf32>, vector<1x32xf32> -> vector<1x32xf32>
    %c0_150 = arith.constant 0 : index
    %327 = memref.load %arg17[%c0_150] : memref<1xf32, #tpu.memory_space<smem>>
    %328 = vector.broadcast %327 : f32 to vector<1x32xf32>
    %329 = arith.addf %326, %328 : vector<1x32xf32>
    %cst_151 = arith.constant 0.000000e+00 : f32
    %330 = vector.broadcast %cst_151 : f32 to vector<1x96xf32>
    %331 = tpu.concatenate %329, %330 in 1 : vector<1x32xf32>, vector<1x96xf32> -> vector<1x128xf32>
    %c0_152 = arith.constant 0 : index
    %c0_153 = arith.constant 0 : index
    %332 = vector.load %arg18[%c0_152, %c0_153] : memref<1x128xf32, #tpu.memory_space<vmem>>, vector<1x128xf32>
    tpu.vector_store %arg18[%c0_152, %c0_153], %331 {strides = array<i32>} : memref<1x128xf32, #tpu.memory_space<vmem>>, vector<1x128xf32>,
    return
  }
}

</mosaic_0001>

<bundles_post_ra>
// kernel: squeeze.1
= control target key start
LH: loop header
LB: loop body
LE: loop exit
PB: predicated region body
PF: predicated region fallthrough
CT: control target
= control target key end

     0   :  { %s85_s0 = inlined_call_operand.vmem [shape: f32[32], index: 0, kind: input, shape index: {}]   ;;  %s86_s1 = inlined_call_operand.hbm [shape: f32[2,16], index: 1, kind: output, shape index: {}]  }
   0x1   :  { %v5_v0 = vld [vmem:[%s85_s0] sm:$0x1] }
   0x2   :  { %2 = vsyncpa [#allocation1], 0  ;;  %6 = vst [vmem:[#allocation3] sm:$0x1] %v5_v0  ;;  %vm8_vm0 = vcmask 130048   ;;  %s58_s0 = smov 112  }
   0x3   :  { %s59_s8 = smov [#allocation0]  }
   0x4   :  { %s26_s9 = sshll.u32 %s59_s8, 4  ;;  %s27_s9 = int_to_ptr.vmem [resolvable:$true] %s26_s9 }
   0x5   :  { %s34_s10 = scalar_lea.vmem %s27_s9, 32  ;;  %p39_p1 = scmp.lt.s32.totalorder %s27_s9, %s27_s9 }
   0x6   :  { %p35_p0 = scmp.ne.s32.totalorder %s27_s9, %s34_s10  ;;  %p40_p2 = scmp.lt.s32.totalorder %s34_s10, %s34_s10 }
   0x8   :  { %p41_p3 = por %p40_p2, %p39_p1 }
   0x9   :  { %v10_v1 = vld [vmem:[#allocation3] sm:$0x1]  }
   0xa   :  { %v7_v2 = vld [vmem:[#allocation3] sm:$0x1]   ;;  %11 = vrot.lane.b32.xlu0 %v10_v1, %s58_s0  ;;  %p42_p4 = pnand %p41_p3, %p35_p0 }
   0xb   :  { %9 = vst.msk [vmem:[#allocation2] sm:$0x1] %vm8_vm0, %v7_v2  }
  0x7c   :  { %v12_v3 = vpop.permute.xlu0 %11  }
  0x7d   :  { %15 = vst.msk [vmem:[#allocation2 + $0x1] sm:$0x1] %vm8_vm0, %v12_v3  }
  0x84   :  { %v19_v4 = vld [vmem:[#allocation2] sm:$0x3] }
  0x85   :  { %21 = vst [vmem:[#allocation0] sm:$0x3] %v19_v4 }
  0x86   :  { %45 = shalt.err (!%p42_p4)
}
  0x87   :  { %s46_s13 = scalar_lea.hbm %s86_s1, 32 }
  0x88   :  { %p47_p5 = scmp.ne.s32.totalorder %s86_s1, %s46_s13  ;;  %p50_p6 = scmp.lt.u32.totalorder %s46_s13, %s86_s1 }
  0x8a   :  { %p52_p7 = pnand %p50_p6, %p47_p5 }
  0x8c   :  { %55 = shalt.err (!%p52_p7)
}
  0x8d   :  { %29 = dma.vmem_to_hbm [thread:$0]  %s27_s9, 32, %s86_s1, [#allocation1]  }
  0x8e   :  { %56 = dma.done.wait [#allocation1], 32  }
  0x8f   :  { %57 = vsyncadd [#allocation1], 4294967264 }
  0x90   :  { %31 = vsyncpa [#allocation1], 1 }

// kernel: transformer_forward.1
= control target key start
LH: loop header
LB: loop body
LE: loop exit
PB: predicated region body
PF: predicated region fallthrough
CT: control target
= control target key end

     0   :  { %v72_v0 = vlaneseq  ;;  %vm120_vm0 = vcmask 261120   ;;  %vm228_vm1 = vcmask 64512   ;;  %vm405_vm3 = vcmask 130048   ;;  %s10922_s21 = smov 88   ;;  %s10923_s22 = smov 120   ;;  %s14528_s0 = inlined_call_operand.vmem [shape: f32[2,16], index: 0, kind: input, shape index: {}]   ;;  %s14529_s4 = inlined_call_operand.vmem [shape: f32[2,32,96], index: 4, kind: input, shape index: {}]   ;;  %s14530_s1 = inlined_call_operand.vmem [shape: f32[16,32], index: 1, kind: input, shape index: {}]   ;;  %s14531_s3 = inlined_call_operand.vmem [shape: f32[1,32], index: 3, kind: input, shape index: {}]   ;;  %s14532_s2 = inlined_call_operand.vmem [shape: f32[1,32], index: 2, kind: input, shape index: {}]   ;;  %s14533_s5 = inlined_call_operand.vmem [shape: f32[2,1,96], index: 5, kind: input, shape index: {}]   ;;  %s14534_s6 = inlined_call_operand.vmem [shape: f32[2,32,32], index: 6, kind: input, shape index: {}]   ;;  %s14535_s7 = inlined_call_operand.vmem [shape: f32[2,1,32], index: 7, kind: input, shape index: {}]   ;;  %s14536_s10 = inlined_call_operand.vmem [shape: f32[2,32,2048], index: 10, kind: input, shape index: {}]   ;;  %s14537_s8 = inlined_call_operand.vmem [shape: f32[2,1,32], index: 8, kind: input, shape index: {}]   ;;  %s14538_s9 = inlined_call_operand.vmem [shape: f32[2,1,32], index: 9, kind: input, shape index: {}]   ;;  %s14539_s12 = inlined_call_operand.vmem [shape: f32[2,2048,32], index: 12, kind: input, shape index: {}]   ;;  %s14540_s11 = inlined_call_operand.vmem [shape: f32[2,1,2048], index: 11, kind: input, shape index: {}]   ;;  %s14541_s13 = inlined_call_operand.vmem [shape: f32[2,1,32], index: 13, kind: input, shape index: {}]   ;;  %s14542_s14 = inlined_call_operand.vmem [shape: f32[2,1,32], index: 14, kind: input, shape index: {}]   ;;  %s14543_s15 = inlined_call_operand.vmem [shape: f32[2,1,32], index: 15, kind: input, shape index: {}]   ;;  %s14544_s16 = inlined_call_operand.vmem [shape: f32[1,32], index: 16, kind: input, shape index: {}]   ;;  %s14545_s17 = inlined_call_operand.<no memory space> [shape: f32[1], index: 17, kind: input, shape index: {}]   ;;  %s14546_s18 = inlined_call_operand.vmem [shape: f32[1,128], index: 18, kind: output, shape index: {}]  }
   0x1   :  { %14583 = sst [smem:[#allocation9_spill]] %s14528_s0  ;;  %v8050_v13 = vld [vmem:[%s14531_s3] ss:$0 sm:$0xff]  ;;  %vm11107_vm2 = vmpackc.low %vm228_vm1, %vm228_vm1  ;;  %s14567_s23 = smov 56   ;;  %vm1880_vm4 = vcmask 195584   ;;  %vm10937_vm5 = vmmov 0  }
   0x2   :  { %14584 = sst [smem:[#allocation10_spill]] %s14529_s4  ;;  %v11036_v2 = vshrl.u32 %v72_v0, 7  ;;  %s14587_s20 = sld [smem:[#allocation9_spill]]  ;;  %v8051_v15 = vld [vmem:[%s14532_s2] ss:$0 sm:$0xff]  ;;  %vm10578_vm6 = vmpackc.low %vm120_vm0, %vm120_vm0 }
   0x3   :  { %14585 = sst [smem:[#allocation11_spill]] %s14530_s1  ;;  %s14586_s29 = sld [smem:[#allocation10_spill]]  ;;  %v8052_v31 = vld [vmem:[%s14533_s5] ss:$0 sm:$0xff] }
   0x4   :  { %v11051_v8 = vsub.s32 0, %v11036_v2  ;;  %v11054_v9 = vsub.s32 1, %v11036_v2  ;;  %s14590_s28 = sld [smem:[#allocation11_spill]]  ;;  %s10924_s1 = smov 64  }
   0x5   :  { %s14565_s24 = smov 112   ;;  %s14557_s25 = smov 80  }
   0x6   :  { %14588 = vst [vmem:[#allocation3_spill] sm:$0xff] %v11051_v8  ;;  %14589 = vst [vmem:[#allocation4_spill] sm:$0xff] %v11054_v9  ;;  %s14555_s26 = smov 48   ;;  %s14553_s27 = smov 104  }
   0x7   :  { %s14549_s30 = smov 40   ;;  %s14563_s0 = smov 8  }
   0x8   :  { %v60_v4 = vld [vmem:[%s14587_s20] sm:$0x3]  ;;  %s10921_s20 = smov 96   ;;  %s14561_s19 = smov 16  }
   0x9   :  { %v109_v1 = vld [vmem:[%s14586_s29] sm:$0xff]  ;;  %v110_v3 = vld [vmem:[%s14586_s29 + $0x8] sm:$0xff]  ;;  %v111_v6 = vld [vmem:[%s14586_s29 + $0x10] sm:$0xff]  ;;  %v75_v11 = vrot.slane %v60_v4, %v11051_v8  ;;  %v86_v12 = vrot.slane %v60_v4, %v11054_v9  ;;  %s14559_s4 = smov 24  }
   0xa   :  { %v9744_v5 = vpack.c.bf16 %v110_v3, %v109_v1  ;;  %v112_v7 = vld [vmem:[%s14586_s29 + $0x18] sm:$0xff]  ;;  %v62_v14 = vld [vmem:[%s14590_s28] sm:$0xff]  ;;  %v63_v19 = vld [vmem:[%s14590_s28 + $0x8] sm:$0xff]  ;;  %s14551_s28 = smov 72  }
   0xb   :  { %v9748_v10 = vpack.c.bf16 %v112_v7, %v111_v6  ;;  %77 = vbcast.lane.b32.xlu0 %v75_v11, 256  ;;  %88 = vbcast.lane.b32.xlu1 %v86_v12, 256  ;;  %v70_v16 = vadd.f32 %v8050_v13, %v62_v14  ;;  %v71_v22 = vadd.f32 %v8050_v13, %v63_v19 }
   0xc   :  { %9745 = vmatprep.subr.bf16.mxu0 %v9744_v5 }
   0xd   :  { %9747 = vmatpush3.bf16.msra.mxu0 %v9744_v5 }
   0xe   :  { %9749 = vmatprep.subr.bf16.mxu0 %v9748_v10 }
   0xf   :  { %81 = vbcast.lane.b32.xlu0 %v75_v11, 264  ;;  %92 = vbcast.lane.b32.xlu1 %v86_v12, 264 }
  0x11   :  { %9751 = vmatpush3.bf16.msra.mxu0 %v9748_v10 }
  0x7d   :  { %v78_v17 = vpop.permute.xlu0 %77  ;;  %v89_v18 = vpop.permute.xlu1 %88 }
  0x7e   :  { %v101_v20 = vmul.f32 %v8051_v15, %v78_v17  ;;  %v103_v21 = vmul.f32 %v8051_v15, %v89_v18 }
  0x80   :  { %v11070_v23 = vadd.f32 %v101_v20, %v70_v16  ;;  %v11074_v28 = vadd.f32 %v103_v21, %v70_v16 }
  0x81   :  { %v82_v24 = vpop.permute.xlu0 %81  ;;  %v93_v25 = vpop.permute.xlu1 %92 }
  0x82   :  { %v102_v26 = vmul.f32 %v8051_v15, %v82_v24  ;;  %9461 = vmatprep.mubr.msk.f32.mxu0 %vm120_vm0, %v11070_v23  ;;  %v104_v27 = vmul.f32 %v8051_v15, %v93_v25 }
  0x84   :  { %v11076_v29 = vadd.f32 %v102_v26, %v71_v22  ;;  %v11078_v30 = vadd.f32 %v104_v27, %v71_v22 }
  0x86   :  { %9462 = vmatmul.mubr.msk.f32.vlgmr.msra.gmra.mrb[0].mxu0 %vm120_vm0, %v11076_v29 }
  0x87   :  { %9464 = vmatprep.mubr.msk.f32.mxu0 %vm120_vm0, %v11074_v28 }
  0x8a   :  { %9465 = vmatmul.mubr.msk.f32.gmra.mrb[2].mxu0 %vm120_vm0, %v11078_v30 }
 0x159   :  { %v9463_v32 = vpop.f32.mrb[0].mxu0 }
 0x15a   :  { %v205_v33 = vadd.f32 %v9463_v32, %v8052_v31  ;;  %v199_v34 = vpop.f32.mrb[1].mxu0 }
 0x15b   :  { %v200_v35 = vadd.f32 %v8052_v31, %v199_v34 }
 0x15c   :  { %v11119_v53 = vmul.f32 0.35355338, %v205_v33 }
 0x15d   :  { %v9466_v36 = vpop.f32.mrb[2].mxu0  ;;  %v11089_v37 = vpack.i.bf16 %v205_v33, %v200_v35  ;;  %v11091_v38 = vmul.f32 0.35355338, %v200_v35 }
 0x15e   :  { %v215_v39 = vadd.f32 %v9466_v36, %v8052_v31  ;;  %v209_v40 = vpop.f32.mrb[3].mxu0 }
 0x15f   :  { %v210_v41 = vadd.f32 %v8052_v31, %v209_v40  ;;  %10602 = vrot.lane.b32.xlu0 %v11089_v37, %s10921_s20  ;;  %9471 = vmatprep.mubr.msk.f32.mxu1 %vm228_vm1, %v11091_v38 }
 0x160   :  { %v11123_v54 = vmul.f32 0.35355338, %v215_v39 }
 0x161   :  { %v11097_v42 = vpack.i.bf16 %v215_v39, %v210_v41  ;;  %v11099_v43 = vmul.f32 0.35355338, %v210_v41 }
 0x163   :  { %10607 = vrot.lane.b32.xlu1 %v11097_v42, %s10921_s20  ;;  %9478 = vmatprep.mubr.msk.f32.mxu0 %vm228_vm1, %v11099_v43 }
 0x1d1   :  { %v10603_v44 = vpop.permute.xlu0 %10602 }
 0x1d2   :  { %v10605_v45 = vunpack.i.h.bf16 %v10603_v44  ;;  %v10604_v46 = vunpack.i.l.bf16 %v10603_v44 }
 0x1d4   :  { %v9752_v48 = vpack.c.bf16 %v10605_v45, %v10604_v46 }
 0x1d5   :  { %v10608_v49 = vpop.permute.xlu1 %10607 }
 0x1d6   :  { %v10610_v50 = vunpack.i.h.bf16 %v10608_v49  ;;  %v10609_v51 = vunpack.i.l.bf16 %v10608_v49  ;;  %9754 = vmatprep.subr.msk.bf16.mxu1 %vm11107_vm2, %v9752_v48 }
 0x1d7   :  { %9757 = vmatpush3.bf16.xpose.msk.msra.mxu1 %vm11107_vm2, %v9752_v48 }
 0x1d8   :  { %v9758_v52 = vpack.c.bf16 %v10610_v50, %v10609_v51 }
 0x1da   :  { %9760 = vmatprep.subr.msk.bf16.mxu0 %vm11107_vm2, %v9758_v52 }
 0x1db   :  { %9763 = vmatpush3.bf16.xpose.msk.msra.mxu0 %vm11107_vm2, %v9758_v52 }
 0x1de   :  { %9472 = vmatmul.mubr.msk.f32.vlgmr.msra.gmra.mrb[0].mxu1 %vm228_vm1, %v11119_v53 }
 0x1e2   :  { %9479 = vmatmul.mubr.msk.f32.vlgmr.msra.gmra.mrb[4].mxu0 %vm228_vm1, %v11123_v54 }
 0x2b1   :  { %v9473_v55 = vpop.f32.mrb[0].mxu1 }
 0x2b2   :  { %v305_v56 = vpop.f32.mrb[1].mxu1  ;;  %v409_v57 = vsel %vm405_vm3, %v9473_v55, -inf }
 0x2b3   :  { %410 = vmax.xlane.f32.xlu1 %v409_v57  ;;  %v406_v58 = vsel %vm405_vm3, %v305_v56, -inf }
 0x2b4   :  { %407 = vmax.xlane.f32.xlu0 %v406_v58 }
 0x2b5   :  { %v9480_v59 = vpop.f32.mrb[4].mxu0 }
 0x2b6   :  { %v396_v60 = vpop.f32.mrb[5].mxu0  ;;  %v415_v62 = vsel %vm405_vm3, %v9480_v59, -inf }
 0x2b7   :  { %v412_v61 = vsel %vm405_vm3, %v396_v60, -inf }
 0x2b8   :  { %413 = vmax.xlane.f32.xlu0 %v412_v61 }
 0x2bc   :  { %416 = vmax.xlane.f32.xlu0 %v415_v62 }
 0x2c4   :  { %10612 = vrot.lane.b32.xlu1 %v11089_v37, %s10922_s21 }
 0x2c8   :  { %626 = vrot.lane.b32.xlu1 %v11119_v53, %s10923_s22 }
 0x2cc   :  { %10617 = vrot.lane.b32.xlu1 %v11089_v37, %s10924_s1 }
 0x2d2   :  { %624 = vrot.lane.b32.xlu0 %v11091_v38, %s10923_s22 }
 0x340   :  { %v411_v63 = vpop.xlane.xlu1 %410 }
 0x341   :  { %v419_v0 = vsub.f32 %v9473_v55, %v411_v63  ;;  %v408_v1 = vpop.xlane.xlu0 %407 }
 0x342   :  { %v418_v3 = vsub.f32 %v305_v56, %v408_v1 }
 0x343   :  { %v424_v4 = vmul.f32 1.442695, %v419_v0 }
 0x344   :  { %v422_v5 = vmul.f32 1.442695, %v418_v3  ;;  %v10613_v6 = vpop.permute.xlu1 %10612 }
 0x345   :  { %10761 = vpow2.f32 %v424_v4  ;;  %v10615_v7 = vunpack.i.h.bf16 %v10613_v6  ;;  %v10614_v10 = vunpack.i.l.bf16 %v10613_v6  ;;  %v414_v11 = vpop.xlane.xlu0 %413 }
 0x346   :  { %10763 = vpow2.f32 %v422_v5  ;;  %v420_v32 = vsub.f32 %v396_v60, %v414_v11 }
 0x347   :  { %v9772_v12 = vpack.c.bf16 %v10615_v7, %v10614_v10 }
 0x348   :  { %v627_v13 = vpop.permute.xlu1 %626  ;;  %v426_v33 = vmul.f32 1.442695, %v420_v32 }
 0x349   :  { %9774 = vmatprep.subr.msk.bf16.mxu0 %vm11107_vm2, %v9772_v12  ;;  %v417_v14 = vpop.xlane.xlu0 %416 }
 0x34a   :  { %v421_v15 = vsub.f32 %v9480_v59, %v417_v14  ;;  %9777 = vmatpush3.bf16.xpose.msk.msra.mxu0 %vm11107_vm2, %v9772_v12 }
 0x34c   :  { %v428_v16 = vmul.f32 1.442695, %v421_v15  ;;  %v10618_v17 = vpop.permute.xlu1 %10617 }
 0x34d   :  { %v10620_v18 = vunpack.i.h.bf16 %v10618_v17  ;;  %v10619_v19 = vunpack.i.l.bf16 %v10618_v17  ;;  %v625_v20 = vpop.permute.xlu0 %624 }
 0x34e   :  { %10765 = vpow2.f32 %v428_v16  ;;  %9499 = vmatprep.mubr.msk.f32.mxu0 %vm228_vm1, %v625_v20 }
 0x34f   :  { %v10762_v21 = vpop.eup %10761  ;;  %v9764_v22 = vpack.c.bf16 %v10620_v18, %v10619_v19  ;;  %10767 = vpow2.f32 %v426_v33 }
 0x350   :  { %v10764_v24 = vpop.eup %10763  ;;  %v433_v25 = vsel %vm405_vm3, %v10762_v21, 0.0 }
 0x351   :  { %9765 = vmatprep.subr.bf16.mxu1 %v9764_v22  ;;  %434 = vadd.xlane.f32.xlu0 %v433_v25  ;;  %v430_v26 = vsel %vm405_vm3, %v10764_v24, 0.0 }
 0x352   :  { %9500 = vmatmul.mubr.msk.f32.vlgmr.msra.gmra.mrb[6].mxu0 %vm228_vm1, %v627_v13  ;;  %9767 = vmatpush3.bf16.msra.mxu1 %v9764_v22 }
 0x353   :  { %431 = vadd.xlane.f32.xlu1 %v430_v26 }
 0x358   :  { %v10766_v27 = vpop.eup %10765 }
 0x359   :  { %v439_v31 = vsel %vm405_vm3, %v10766_v27, 0.0  ;;  %v10768_v34 = vpop.eup %10767 }
 0x35a   :  { %440 = vadd.xlane.f32.xlu0 %v439_v31  ;;  %v436_v35 = vsel %vm405_vm3, %v10768_v34, 0.0 }
 0x364   :  { %10627 = vrot.lane.b32.xlu1 %v11097_v42, %s10922_s21 }
 0x370   :  { %10622 = vrot.lane.b32.xlu0 %v11097_v42, %s10924_s1 }
 0x374   :  { %715 = vrot.lane.b32.xlu0 %v11099_v43, %s10923_s22 }
 0x388   :  { %437 = vadd.xlane.f32.xlu1 %v436_v35 }
 0x399   :  { %717 = vrot.lane.b32.xlu1 %v11123_v54, %s10923_s22 }
 0x3de   :  { %v435_v36 = vpop.xlane.xlu0 %434 }
 0x3df   :  { %10769 = vrcp.f32 %v435_v36 }
 0x3e0   :  { %v432_v39 = vpop.xlane.xlu1 %431 }
 0x3e1   :  { %10771 = vrcp.f32 %v432_v39 }
 0x3e4   :  { %v10628_v41 = vpop.permute.xlu1 %10627 }
 0x3e5   :  { %v10630_v46 = vunpack.i.h.bf16 %v10628_v41  ;;  %v10629_v49 = vunpack.i.l.bf16 %v10628_v41 }
 0x3e7   :  { %v441_v40 = vpop.xlane.xlu0 %440  ;;  %v9778_v57 = vpack.c.bf16 %v10630_v46, %v10629_v49 }
 0x3e8   :  { %10773 = vrcp.f32 %v441_v40 }
 0x3e9   :  { %v10770_v44 = vpop.eup %10769 }
 0x3ea   :  { %v447_v55 = vmul.f32 %v10770_v44, %v10762_v21 }
 0x3eb   :  { %v10772_v45 = vpop.eup %10771  ;;  %v10623_v48 = vpop.permute.xlu0 %10622 }
 0x3ec   :  { %v10625_v50 = vunpack.i.h.bf16 %v10623_v48  ;;  %v10624_v51 = vunpack.i.l.bf16 %v10623_v48  ;;  %v446_v52 = vmul.f32 %v10772_v45, %v10764_v24 }
 0x3ee   :  { %9485 = vmatprep.mubr.msk.f32.mxu1 %vm405_vm3, %v446_v52  ;;  %v9768_v56 = vpack.c.bf16 %v10625_v50, %v10624_v51 }
 0x3ef   :  { %9486 = vmatmul.mubr.msk.f32.vlgmr.msra.gmra.mrb[2].mxu1 %vm405_vm3, %v447_v55  ;;  %v716_v63 = vpop.permute.xlu0 %715 }
 0x3f0   :  { %9769 = vmatprep.subr.bf16.mxu1 %v9768_v56 }
 0x3f1   :  { %9771 = vmatpush3.bf16.msra.mxu1 %v9768_v56 }
 0x3f2   :  { %9780 = vmatprep.subr.msk.bf16.mxu1 %vm11107_vm2, %v9778_v57  ;;  %v10774_v59 = vpop.eup %10773 }
 0x3f3   :  { %v449_v62 = vmul.f32 %v10774_v59, %v10766_v27 }
 0x415   :  { %v438_v58 = vpop.xlane.xlu1 %437 }
 0x416   :  { %10775 = vrcp.f32 %v438_v58 }
 0x419   :  { %v718_v5 = vpop.permute.xlu1 %717 }
 0x420   :  { %v10776_v60 = vpop.eup %10775 }
 0x421   :  { %v448_v61 = vmul.f32 %v10776_v60, %v10768_v34 }
 0x423   :  { %9492 = vmatprep.mubr.msk.f32.mxu1 %vm405_vm3, %v448_v61 }
 0x424   :  { %9493 = vmatmul.mubr.msk.f32.vlgmr.msra.gmra.mrb[4].mxu1 %vm405_vm3, %v449_v62 }
 0x425   :  { %9783 = vmatpush3.bf16.xpose.msk.msra.mxu1 %vm11107_vm2, %v9778_v57  ;;  %v9501_v0 = vpop.f32.mrb[6].mxu0  ;;  %9506 = vmatprep.mubr.msk.f32.mxu1 %vm228_vm1, %v716_v63 }
 0x426   :  { %v706_v1 = vpop.f32.mrb[7].mxu0  ;;  %v809_v3 = vsel %vm405_vm3, %v9501_v0, -inf }
 0x427   :  { %810 = vmax.xlane.f32.xlu1 %v809_v3  ;;  %v806_v4 = vsel %vm405_vm3, %v706_v1, -inf }
 0x428   :  { %807 = vmax.xlane.f32.xlu0 %v806_v4 }
 0x42c   :  { %9507 = vmatmul.mubr.msk.f32.vlgmr.msra.gmra.mrb[6].mxu1 %vm228_vm1, %v718_v5 }
 0x4b4   :  { %v811_v15 = vpop.xlane.xlu1 %810 }
 0x4b5   :  { %v808_v6 = vpop.xlane.xlu0 %807  ;;  %v819_v16 = vsub.f32 %v9501_v0, %v811_v15 }
 0x4b6   :  { %v818_v7 = vsub.f32 %v706_v1, %v808_v6 }
 0x4b7   :  { %v824_v18 = vmul.f32 1.442695, %v819_v16 }
 0x4b8   :  { %v822_v10 = vmul.f32 1.442695, %v818_v7 }
 0x4ba   :  { %10777 = vpow2.f32 %v822_v10 }
 0x4bb   :  { %10779 = vpow2.f32 %v824_v18 }
 0x4c2   :  { %v11169_v11 = vpop.f32.mrb[2].mxu1 }
 0x4c3   :  { %v11171_v12 = vpop.f32.mrb[3].mxu1 }
 0x4c4   :  { %v10778_v13 = vpop.eup %10777 }
 0x4c5   :  { %v830_v14 = vsel %vm405_vm3, %v10778_v13, 0.0  ;;  %v10780_v25 = vpop.eup %10779 }
 0x4c6   :  { %831 = vadd.xlane.f32.xlu1 %v830_v14  ;;  %v833_v26 = vsel %vm405_vm3, %v10780_v25, 0.0 }
 0x4d7   :  { %10632 = vrot.lane.b32.xlu1 %v11089_v37, %s14567_s23 }
 0x4db   :  { %1024 = vrot.lane.b32.xlu1 %v11091_v38, %s14565_s24 }
 0x4df   :  { %1026 = vrot.lane.b32.xlu1 %v11119_v53, %s14565_s24 }
 0x4e3   :  { %10642 = vrot.lane.b32.xlu1 %v11097_v42, %s14567_s23  ;;  %s14607_s23 = smov 24  }
 0x4e7   :  { %10647 = vrot.lane.b32.xlu1 %v11097_v42, %s14557_s25 }
 0x4eb   :  { %1117 = vrot.lane.b32.xlu1 %v11123_v54, %s14565_s24 }
 0x4f7   :  { %v11186_v17 = vpop.f32.mrb[4].mxu1 }
 0x4f8   :  { %v11188_v19 = vpop.f32.mrb[5].mxu1 }
 0x4ff   :  { %v9508_v20 = vpop.f32.mrb[6].mxu1 }
 0x500   :  { %v797_v21 = vpop.f32.mrb[7].mxu1  ;;  %v815_v24 = vsel %vm405_vm3, %v9508_v20, -inf }
 0x501   :  { %v812_v22 = vsel %vm405_vm3, %v797_v21, -inf }
 0x502   :  { %813 = vmax.xlane.f32.xlu0 %v812_v22 }
 0x506   :  { %816 = vmax.xlane.f32.xlu0 %v815_v24 }
 0x50a   :  { %834 = vadd.xlane.f32.xlu0 %v833_v26 }
 0x553   :  { %v832_v27 = vpop.xlane.xlu1 %831 }
 0x554   :  { %10781 = vrcp.f32 %v832_v27 }
 0x557   :  { %v10633_v31 = vpop.permute.xlu1 %10632 }
 0x558   :  { %v10635_v32 = vunpack.i.h.bf16 %v10633_v31  ;;  %v10634_v33 = vunpack.i.l.bf16 %v10633_v31 }
 0x55a   :  { %v9784_v34 = vpack.c.bf16 %v10635_v32, %v10634_v33 }
 0x55b   :  { %v1025_v35 = vpop.permute.xlu1 %1024 }
 0x55c   :  { %9785 = vmatprep.subr.bf16.mxu0 %v9784_v34 }
 0x55d   :  { %9787 = vmatpush3.bf16.msra.mxu0 %v9784_v34 }
 0x55e   :  { %v10782_v36 = vpop.eup %10781 }
 0x55f   :  { %v1027_v39 = vpop.permute.xlu1 %1026  ;;  %v846_v40 = vmul.f32 %v10782_v36, %v10778_v13 }
 0x561   :  { %9513 = vmatprep.mubr.msk.f32.mxu0 %vm405_vm3, %v846_v40 }
 0x563   :  { %v10643_v41 = vpop.permute.xlu1 %10642 }
 0x564   :  { %v10645_v44 = vunpack.i.h.bf16 %v10643_v41  ;;  %v10644_v45 = vunpack.i.l.bf16 %v10643_v41 }
 0x566   :  { %v9788_v46 = vpack.c.bf16 %v10645_v44, %v10644_v45 }
 0x567   :  { %v10648_v48 = vpop.permute.xlu1 %10647 }
 0x568   :  { %v10650_v49 = vunpack.i.h.bf16 %v10648_v48  ;;  %v10649_v50 = vunpack.i.l.bf16 %v10648_v48  ;;  %9789 = vmatprep.subr.bf16.mxu1 %v9788_v46 }
 0x569   :  { %9791 = vmatpush3.bf16.msra.mxu1 %v9788_v46 }
 0x56a   :  { %v9798_v51 = vpack.c.bf16 %v10650_v49, %v10649_v50 }
 0x56c   :  { %9800 = vmatprep.subr.msk.bf16.mxu1 %vm11107_vm2, %v9798_v51 }
 0x58f   :  { %v814_v52 = vpop.xlane.xlu0 %813 }
 0x590   :  { %v820_v55 = vsub.f32 %v797_v21, %v814_v52  ;;  %v1118_v21 = vpop.permute.xlu1 %1117 }
 0x592   :  { %v826_v58 = vmul.f32 1.442695, %v820_v55 }
 0x593   :  { %v817_v56 = vpop.xlane.xlu0 %816 }
 0x594   :  { %v821_v57 = vsub.f32 %v9508_v20, %v817_v56 }
 0x596   :  { %v828_v59 = vmul.f32 1.442695, %v821_v57 }
 0x597   :  { %v835_v60 = vpop.xlane.xlu0 %834 }
 0x598   :  { %10783 = vpow2.f32 %v828_v59 }
 0x599   :  { %10785 = vrcp.f32 %v835_v60 }
 0x59a   :  { %10787 = vpow2.f32 %v826_v58 }
 0x5a2   :  { %v10784_v61 = vpop.eup %10783 }
 0x5a3   :  { %v10786_v62 = vpop.eup %10785  ;;  %v839_v63 = vsel %vm405_vm3, %v10784_v61, 0.0 }
 0x5a4   :  { %v10788_v0 = vpop.eup %10787  ;;  %840 = vadd.xlane.f32.xlu0 %v839_v63  ;;  %v847_v1 = vmul.f32 %v10786_v62, %v10780_v25 }
 0x5a5   :  { %v836_v3 = vsel %vm405_vm3, %v10788_v0, 0.0 }
 0x5a6   :  { %9514 = vmatmul.mubr.msk.f32.vlgmr.msra.gmra.mrb[8].mxu0 %vm405_vm3, %v847_v1 }
 0x5a7   :  { %9527 = vmatprep.mubr.msk.f32.mxu0 %vm228_vm1, %v1025_v35 }
 0x5a8   :  { %837 = vadd.xlane.f32.xlu0 %v836_v3 }
 0x5be   :  { %10637 = vrot.lane.b32.xlu0 %v11089_v37, %s14557_s25 }
 0x5c2   :  { %1115 = vrot.lane.b32.xlu0 %v11099_v43, %s14565_s24 }
 0x631   :  { %v841_v4 = vpop.xlane.xlu0 %840 }
 0x632   :  { %10789 = vrcp.f32 %v841_v4 }
 0x635   :  { %v838_v5 = vpop.xlane.xlu0 %837 }
 0x636   :  { %10791 = vrcp.f32 %v838_v5 }
 0x639   :  { %v10638_v6 = vpop.permute.xlu0 %10637 }
 0x63a   :  { %v10640_v7 = vunpack.i.h.bf16 %v10638_v6  ;;  %v10639_v10 = vunpack.i.l.bf16 %v10638_v6 }
 0x63c   :  { %v9792_v13 = vpack.c.bf16 %v10640_v7, %v10639_v10  ;;  %v10790_v14 = vpop.eup %10789 }
 0x63d   :  { %v849_v18 = vmul.f32 %v10790_v14, %v10784_v61  ;;  %v1116_v20 = vpop.permute.xlu0 %1115 }
 0x63e   :  { %9794 = vmatprep.subr.msk.bf16.mxu0 %vm11107_vm2, %v9792_v13 }
 0x63f   :  { %9797 = vmatpush3.bf16.xpose.msk.msra.mxu0 %vm11107_vm2, %v9792_v13 }
 0x640   :  { %v10792_v15 = vpop.eup %10791 }
 0x641   :  { %v848_v16 = vmul.f32 %v10792_v15, %v10788_v0 }
 0x643   :  { %9520 = vmatprep.mubr.msk.f32.mxu1 %vm405_vm3, %v848_v16 }
 0x644   :  { %9521 = vmatmul.mubr.msk.f32.vlgmr.msra.gmra.mrb[8].mxu1 %vm405_vm3, %v849_v18 }
 0x645   :  { %9803 = vmatpush3.bf16.xpose.msk.msra.mxu1 %vm11107_vm2, %v9798_v51  ;;  %9534 = vmatprep.mubr.msk.f32.mxu1 %vm228_vm1, %v1116_v20 }
 0x646   :  { %9528 = vmatmul.mubr.msk.f32.vlgmr.msra.gmra.mrb[10].mxu0 %vm228_vm1, %v1027_v39 }
 0x64c   :  { %9535 = vmatmul.mubr.msk.f32.vlgmr.msra.gmra.mrb[10].mxu1 %vm228_vm1, %v1118_v21 }
 0x679   :  { %v11215_v22 = vpop.f32.mrb[8].mxu0 }
 0x67a   :  { %v11217_v24 = vpop.f32.mrb[9].mxu0 }
 0x717   :  { %v11219_v25 = vpop.f32.mrb[8].mxu1 }
 0x718   :  { %v11221_v26 = vpop.f32.mrb[9].mxu1 }
 0x719   :  { %v9529_v27 = vpop.f32.mrb[10].mxu0 }
 0x71a   :  { %v1106_v31 = vpop.f32.mrb[11].mxu0  ;;  %v1209_v32 = vsel %vm405_vm3, %v9529_v27, -inf }
 0x71b   :  { %1210 = vmax.xlane.f32.xlu1 %v1209_v32  ;;  %v1206_v33 = vsel %vm405_vm3, %v1106_v31, -inf }
 0x71c   :  { %1207 = vmax.xlane.f32.xlu0 %v1206_v33 }
 0x71f   :  { %v9536_v34 = vpop.f32.mrb[10].mxu1 }
 0x720   :  { %v1197_v35 = vpop.f32.mrb[11].mxu1  ;;  %v1215_v39 = vsel %vm405_vm3, %v9536_v34, -inf }
 0x721   :  { %v1212_v36 = vsel %vm405_vm3, %v1197_v35, -inf }
 0x722   :  { %1213 = vmax.xlane.f32.xlu0 %v1212_v36 }
 0x726   :  { %1216 = vmax.xlane.f32.xlu0 %v1215_v39 }
 0x7a8   :  { %v1211_v40 = vpop.xlane.xlu1 %1210 }
 0x7a9   :  { %v1219_v41 = vsub.f32 %v9529_v27, %v1211_v40  ;;  %v1208_v44 = vpop.xlane.xlu0 %1207 }
 0x7aa   :  { %v1218_v45 = vsub.f32 %v1106_v31, %v1208_v44 }
 0x7ab   :  { %v1224_v46 = vmul.f32 1.442695, %v1219_v41 }
 0x7ac   :  { %v1222_v48 = vmul.f32 1.442695, %v1218_v45 }
 0x7ad   :  { %10793 = vpow2.f32 %v1224_v46 }
 0x7ae   :  { %10795 = vpow2.f32 %v1222_v48 }
 0x7af   :  { %v1214_v49 = vpop.xlane.xlu0 %1213 }
 0x7b0   :  { %v1220_v50 = vsub.f32 %v1197_v35, %v1214_v49 }
 0x7b2   :  { %v1226_v55 = vmul.f32 1.442695, %v1220_v50 }
 0x7b3   :  { %v1217_v51 = vpop.xlane.xlu0 %1216 }
 0x7b4   :  { %v1221_v52 = vsub.f32 %v9536_v34, %v1217_v51 }
 0x7b6   :  { %v1228_v56 = vmul.f32 1.442695, %v1221_v52 }
 0x7b7   :  { %v10794_v57 = vpop.eup %10793 }
 0x7b8   :  { %v10796_v58 = vpop.eup %10795  ;;  %10797 = vpow2.f32 %v1228_v56  ;;  %v1233_v59 = vsel %vm405_vm3, %v10794_v57, 0.0 }
 0x7b9   :  { %1234 = vadd.xlane.f32.xlu0 %v1233_v59  ;;  %v1230_v60 = vsel %vm405_vm3, %v10796_v58, 0.0  ;;  %10799 = vpow2.f32 %v1226_v55 }
 0x7ba   :  { %1231 = vadd.xlane.f32.xlu1 %v1230_v60 }
 0x7c2   :  { %v10798_v61 = vpop.eup %10797 }
 0x7c3   :  { %v1239_v62 = vsel %vm405_vm3, %v10798_v61, 0.0  ;;  %v10800_v63 = vpop.eup %10799 }
 0x7c4   :  { %1240 = vadd.xlane.f32.xlu0 %v1239_v62  ;;  %v1236_v0 = vsel %vm405_vm3, %v10800_v63, 0.0 }
 0x7c8   :  { %1237 = vadd.xlane.f32.xlu0 %v1236_v0 }
 0x7cb   :  { %10652 = vrot.lane.b32.xlu1 %v11089_v37, %s14555_s26 }
 0x7cf   :  { %1424 = vrot.lane.b32.xlu1 %v11091_v38, %s14553_s27 }
 0x7d3   :  { %1426 = vrot.lane.b32.xlu1 %v11119_v53, %s14553_s27 }
 0x7d7   :  { %10662 = vrot.lane.b32.xlu1 %v11097_v42, %s14555_s26  ;;  %s14602_s26 = smov 72  }
 0x7db   :  { %10667 = vrot.lane.b32.xlu1 %v11097_v42, %s14551_s28 }
 0x7de   :  { %10657 = vrot.lane.b32.xlu0 %v11089_v37, %s14551_s28  ;;  %s14604_s28 = smov 8  }
 0x7df   :  { %1517 = vrot.lane.b32.xlu1 %v11123_v54, %s14553_s27 }
 0x7e2   :  { %1515 = vrot.lane.b32.xlu0 %v11099_v43, %s14553_s27  ;;  %s14603_s27 = smov 40  }
 0x846   :  { %v1235_v38 = vpop.xlane.xlu0 %1234 }
 0x847   :  { %10801 = vrcp.f32 %v1235_v38  ;;  %v1232_v1 = vpop.xlane.xlu1 %1231 }
 0x848   :  { %10803 = vrcp.f32 %v1232_v1 }
 0x84b   :  { %v10653_v53 = vpop.permute.xlu1 %10652 }
 0x84c   :  { %v10655_v3 = vunpack.i.h.bf16 %v10653_v53  ;;  %v10654_v4 = vunpack.i.l.bf16 %v10653_v53 }
 0x84e   :  { %v9804_v5 = vpack.c.bf16 %v10655_v3, %v10654_v4 }
 0x84f   :  { %v1425_v6 = vpop.permute.xlu1 %1424 }
 0x850   :  { %9805 = vmatprep.subr.bf16.mxu0 %v9804_v5 }
 0x851   :  { %v10802_v7 = vpop.eup %10801  ;;  %v1241_v10 = vpop.xlane.xlu0 %1240  ;;  %9807 = vmatpush3.bf16.msra.mxu0 %v9804_v5 }
 0x852   :  { %v10804_v13 = vpop.eup %10803  ;;  %v1247_v54 = vmul.f32 %v10802_v7, %v10794_v57  ;;  %10805 = vrcp.f32 %v1241_v10 }
 0x853   :  { %v1427_v14 = vpop.permute.xlu1 %1426  ;;  %v1246_v15 = vmul.f32 %v10804_v13, %v10796_v58 }
 0x855   :  { %v1238_v16 = vpop.xlane.xlu0 %1237  ;;  %9541 = vmatprep.mubr.msk.f32.mxu0 %vm405_vm3, %v1246_v15 }
 0x856   :  { %10807 = vrcp.f32 %v1238_v16  ;;  %9542 = vmatmul.mubr.msk.f32.vlgmr.msra.gmra.mrb[12].mxu0 %vm405_vm3, %v1247_v54 }
 0x857   :  { %v10663_v43 = vpop.permute.xlu1 %10662  ;;  %9555 = vmatprep.mubr.msk.f32.mxu0 %vm228_vm1, %v1425_v6 }
 0x858   :  { %v10665_v18 = vunpack.i.h.bf16 %v10663_v43  ;;  %v10664_v20 = vunpack.i.l.bf16 %v10663_v43 }
 0x859   :  { %v10658_v21 = vpop.permute.xlu0 %10657 }
 0x85a   :  { %v10660_v27 = vunpack.i.h.bf16 %v10658_v21  ;;  %v10659_v31 = vunpack.i.l.bf16 %v10658_v21  ;;  %v9808_v32 = vpack.c.bf16 %v10665_v18, %v10664_v20 }
 0x85b   :  { %v10668_v33 = vpop.permute.xlu1 %10667 }
 0x85c   :  { %v9812_v34 = vpack.c.bf16 %v10660_v27, %v10659_v31  ;;  %v10670_v35 = vunpack.i.h.bf16 %v10668_v33  ;;  %v10669_v36 = vunpack.i.l.bf16 %v10668_v33  ;;  %9809 = vmatprep.subr.bf16.mxu1 %v9808_v32  ;;  %v10806_v40 = vpop.eup %10805 }
 0x85d   :  { %9811 = vmatpush3.bf16.msra.mxu1 %v9808_v32  ;;  %v1249_v45 = vmul.f32 %v10806_v40, %v10798_v61  ;;  %v1516_v46 = vpop.permute.xlu0 %1515 }
 0x85e   :  { %v9818_v39 = vpack.c.bf16 %v10670_v35, %v10669_v36  ;;  %9814 = vmatprep.subr.msk.bf16.mxu0 %vm11107_vm2, %v9812_v34 }
 0x85f   :  { %9817 = vmatpush3.bf16.xpose.msk.msra.mxu0 %vm11107_vm2, %v9812_v34  ;;  %v1518_v48 = vpop.permute.xlu1 %1517 }
 0x860   :  { %v10808_v41 = vpop.eup %10807  ;;  %9820 = vmatprep.subr.msk.bf16.mxu1 %vm11107_vm2, %v9818_v39 }
 0x861   :  { %v1248_v44 = vmul.f32 %v10808_v41, %v10800_v63 }
 0x863   :  { %9548 = vmatprep.mubr.msk.f32.mxu1 %vm405_vm3, %v1248_v44 }
 0x864   :  { %9549 = vmatmul.mubr.msk.f32.vlgmr.msra.gmra.mrb[12].mxu1 %vm405_vm3, %v1249_v45 }
 0x865   :  { %9562 = vmatprep.mubr.msk.f32.mxu1 %vm228_vm1, %v1516_v46 }
 0x866   :  { %9556 = vmatmul.mubr.msk.f32.vlgmr.msra.gmra.mrb[14].mxu0 %vm228_vm1, %v1427_v14  ;;  %9823 = vmatpush3.bf16.xpose.msk.msra.mxu1 %vm11107_vm2, %v9818_v39 }
 0x86d   :  { %9563 = vmatmul.mubr.msk.f32.vlgmr.msra.gmra.mrb[14].mxu1 %vm228_vm1, %v1518_v48 }
 0x929   :  { %v9543_v49 = vpop.f32.mrb[12].mxu0 }
 0x92a   :  { %v1328_v50 = vpop.f32.mrb[13].mxu0 }
 0x937   :  { %v11263_v51 = vpop.f32.mrb[12].mxu1 }
 0x938   :  { %v11265_v52 = vpop.f32.mrb[13].mxu1 }
 0x939   :  { %v9557_v55 = vpop.f32.mrb[14].mxu0 }
 0x93a   :  { %v1506_v56 = vpop.f32.mrb[15].mxu0  ;;  %v1609_v57 = vsel %vm405_vm3, %v9557_v55, -inf }
 0x93b   :  { %1610 = vmax.xlane.f32.xlu1 %v1609_v57  ;;  %v1606_v58 = vsel %vm405_vm3, %v1506_v56, -inf  ;;  %v1887_v57 = vld [vmem:[%s14534_s6 + $0x10] sm:$0xff] }
 0x93c   :  { %1607 = vmax.xlane.f32.xlu0 %v1606_v58 }
 0x940   :  { %v9564_v59 = vpop.f32.mrb[14].mxu1 }
 0x941   :  { %v1597_v60 = vpop.f32.mrb[15].mxu1  ;;  %v1615_v62 = vsel %vm405_vm3, %v9564_v59, -inf }
 0x942   :  { %v1612_v61 = vsel %vm405_vm3, %v1597_v60, -inf }
 0x943   :  { %1613 = vmax.xlane.f32.xlu0 %v1612_v61 }
 0x947   :  { %1616 = vmax.xlane.f32.xlu0 %v1615_v62 }
 0x9c8   :  { %v1611_v63 = vpop.xlane.xlu1 %1610 }
 0x9c9   :  { %v1619_v0 = vsub.f32 %v9557_v55, %v1611_v63  ;;  %v1608_v38 = vpop.xlane.xlu0 %1607  ;;  %v1885_v55 = vld [vmem:[%s14534_s6] sm:$0xff] }
 0x9ca   :  { %v1618_v1 = vsub.f32 %v1506_v56, %v1608_v38  ;;  %v1886_v56 = vld [vmem:[%s14534_s6 + $0x8] sm:$0xff] }
 0x9cb   :  { %v1624_v53 = vmul.f32 1.442695, %v1619_v0  ;;  %v9832_v58 = vpack.c.bf16 %v1886_v56, %v1885_v55 }
 0x9cc   :  { %v1622_v3 = vmul.f32 1.442695, %v1618_v1 }
 0x9cd   :  { %10809 = vpow2.f32 %v1624_v53 }
 0x9ce   :  { %10811 = vpow2.f32 %v1622_v3 }
 0x9d0   :  { %v1614_v4 = vpop.xlane.xlu0 %1613 }
 0x9d1   :  { %v1620_v5 = vsub.f32 %v1597_v60, %v1614_v4 }
 0x9d3   :  { %v1626_v13 = vmul.f32 1.442695, %v1620_v5 }
 0x9d4   :  { %v1617_v6 = vpop.xlane.xlu0 %1616 }
 0x9d5   :  { %v1621_v7 = vsub.f32 %v9564_v59, %v1617_v6  ;;  %v1888_v59 = vld [vmem:[%s14534_s6 + $0x18] sm:$0xff] }
 0x9d6   :  { %v9836_v60 = vpack.c.bf16 %v1888_v59, %v1887_v57 }
 0x9d7   :  { %v10810_v10 = vpop.eup %10809  ;;  %v1628_v14 = vmul.f32 1.442695, %v1621_v7 }
 0x9d8   :  { %v10812_v15 = vpop.eup %10811  ;;  %v1633_v54 = vsel %vm405_vm3, %v10810_v10, 0.0 }
 0x9d9   :  { %10813 = vpow2.f32 %v1628_v14  ;;  %1634 = vadd.xlane.f32.xlu0 %v1633_v54  ;;  %v1630_v16 = vsel %vm405_vm3, %v10812_v15, 0.0 }
 0x9da   :  { %1631 = vadd.xlane.f32.xlu1 %v1630_v16  ;;  %10815 = vpow2.f32 %v1626_v13 }
 0x9e3   :  { %v10814_v43 = vpop.eup %10813 }
 0x9e4   :  { %v1639_v18 = vsel %vm405_vm3, %v10814_v43, 0.0  ;;  %v10816_v20 = vpop.eup %10815 }
 0x9e5   :  { %1640 = vadd.xlane.f32.xlu0 %v1639_v18  ;;  %v1636_v21 = vsel %vm405_vm3, %v10816_v20, 0.0 }
 0x9e9   :  { %1637 = vadd.xlane.f32.xlu0 %v1636_v21 }
 0x9eb   :  { %10672 = vrot.lane.b32.xlu1 %v11089_v37, %s14549_s30 }
 0x9ef   :  { %1828 = vrot.lane.b32.xlu1 %v11217_v24, %s14563_s0 }
 0x9f3   :  { %1830 = vrot.lane.b32.xlu1 %v11215_v22, %s14563_s0 }
 0x9f7   :  { %1844 = vrot.lane.b32.xlu1 %v1328_v50, %s14561_s19 }
 0x9fb   :  { %1846 = vrot.lane.b32.xlu1 %v9543_v49, %s14561_s19 }
 0x9ff   :  { %10677 = vrot.lane.b32.xlu0 %v11097_v42, %s14549_s30  ;;  %s14605_s30 = smov 16  }
 0xa66   :  { %v1635_v27 = vpop.xlane.xlu0 %1634 }
 0xa67   :  { %10817 = vrcp.f32 %v1635_v27  ;;  %v1632_v31 = vpop.xlane.xlu1 %1631 }
 0xa68   :  { %10819 = vrcp.f32 %v1632_v31 }
 0xa6b   :  { %v10673_v37 = vpop.permute.xlu1 %10672 }
 0xa6c   :  { %v10675_v32 = vunpack.i.h.bf16 %v10673_v37  ;;  %v10674_v33 = vunpack.i.l.bf16 %v10673_v37 }
 0xa6e   :  { %v9824_v34 = vpack.c.bf16 %v10675_v32, %v10674_v33 }
 0xa6f   :  { %v1829_v38 = vpop.permute.xlu1 %1828 }
 0xa70   :  { %9825 = vmatprep.subr.bf16.mxu0 %v9824_v34 }
 0xa71   :  { %v10818_v24 = vpop.eup %10817  ;;  %9827 = vmatpush3.bf16.msra.mxu0 %v9824_v34 }
 0xa72   :  { %v10820_v22 = vpop.eup %10819  ;;  %v1641_v35 = vpop.xlane.xlu0 %1640  ;;  %v1647_v39 = vmul.f32 %v10818_v24, %v10810_v10  ;;  %9833 = vmatprep.subr.bf16.mxu0 %v9832_v58 }
 0xa73   :  { %v1646_v36 = vmul.f32 %v10820_v22, %v10812_v15  ;;  %10821 = vrcp.f32 %v1641_v35  ;;  %v1831_v1 = vpop.permute.xlu1 %1830 }
 0xa75   :  { %9569 = vmatprep.mubr.msk.f32.mxu0 %vm405_vm3, %v1646_v36 }
 0xa76   :  { %9570 = vmatmul.mubr.msk.f32.vlgmr.msra.gmra.mrb[16].mxu0 %vm405_vm3, %v1647_v39  ;;  %v1638_v42 = vpop.xlane.xlu0 %1637 }
 0xa77   :  { %10823 = vrcp.f32 %v1638_v42  ;;  %9835 = vmatpush3.bf16.msra.mxu0 %v9832_v58  ;;  %v1845_v53 = vpop.permute.xlu1 %1844 }
 0xa78   :  { %9837 = vmatprep.subr.bf16.mxu0 %v9836_v60 }
 0xa7a   :  { %v10678_v40 = vpop.permute.xlu0 %10677 }
 0xa7b   :  { %v10680_v41 = vunpack.i.h.bf16 %v10678_v40  ;;  %v10679_v44 = vunpack.i.l.bf16 %v10678_v40  ;;  %9839 = vmatpush3.bf16.msra.mxu0 %v9836_v60  ;;  %v1847_v3 = vpop.permute.xlu1 %1846 }
 0xa7d   :  { %v9828_v45 = vpack.c.bf16 %v10680_v41, %v10679_v44  ;;  %v10822_v46 = vpop.eup %10821 }
 0xa7e   :  { %v1649_v50 = vmul.f32 %v10822_v46, %v10814_v43 }
 0xa7f   :  { %9829 = vmatprep.subr.bf16.mxu1 %v9828_v45 }
 0xa80   :  { %9831 = vmatpush3.bf16.msra.mxu1 %v9828_v45 }
 0xa81   :  { %v10824_v48 = vpop.eup %10823 }
 0xa82   :  { %v1648_v49 = vmul.f32 %v10824_v48, %v10816_v20 }
 0xa84   :  { %9576 = vmatprep.mubr.msk.f32.mxu1 %vm405_vm3, %v1648_v49 }
 0xa85   :  { %9577 = vmatmul.mubr.msk.f32.vlgmr.msra.gmra.mrb[16].mxu1 %vm405_vm3, %v1649_v50 }
 0xb49   :  { %v9571_v61 = vpop.f32.mrb[16].mxu0 }
 0xb4a   :  { %1862 = vrot.lane.b32.xlu1 %v9571_v61, %s14559_s4  ;;  %v1728_v62 = vpop.f32.mrb[17].mxu0 }
 0xb4b   :  { %1860 = vrot.lane.b32.xlu0 %v1728_v62, %s14559_s4 }
 0xb4e   :  { %1834 = vrot.lane.b32.xlu1 %v11219_v25, %s14563_s0  ;;  %v1872_v25 = vsel %vm228_vm1, %v11171_v12, %v1829_v38 }
 0xb4f   :  { %1832 = vrot.lane.b32.xlu0 %v11221_v26, %s14563_s0 }
 0xb52   :  { %1850 = vrot.lane.b32.xlu1 %v11263_v51, %s14561_s19  ;;  %v1873_v51 = vsel %vm228_vm1, %v11169_v11, %v1831_v1  ;;  %v2073_v1 = vld [vmem:[%s14536_s10 + $0x8] sm:$0xff] }
 0xb53   :  { %1848 = vrot.lane.b32.xlu0 %v11265_v52, %s14561_s19  ;;  %v1876_v52 = vsel %vm405_vm3, %v1872_v25, %v1845_v53  ;;  %v1877_v5 = vsel %vm405_vm3, %v1873_v51, %v1847_v3  ;;  %v2089_v53 = vld [vmem:[%s14536_s10 + $0x88] sm:$0xff]  ;;  %v2075_v3 = vld [vmem:[%s14536_s10 + $0x18] sm:$0xff]  ;;  %v2072_v51 = vld [vmem:[%s14536_s10] sm:$0xff] }
 0xb54   :  { %v9840_v25 = vpack.c.bf16 %v2089_v53, %v2073_v1 }
 0xb56   :  { %9841 = vmatprep.subr.bf16.mxu1 %v9840_v25  ;;  %v2108_v25 = vld [vmem:[%s14536_s10 + $0x120] sm:$0xff] }
 0xb58   :  { %v9578_v63 = vpop.f32.mrb[16].mxu1 }
 0xb59   :  { %1866 = vrot.lane.b32.xlu1 %v9578_v63, %s14559_s4  ;;  %v1815_v0 = vpop.f32.mrb[17].mxu1 }
 0xb5a   :  { %1864 = vrot.lane.b32.xlu0 %v1815_v0, %s14559_s4 }
 0xbbc   :  { %v1863_v26 = vpop.permute.xlu1 %1862 }
 0xbbd   :  { %v1861_v4 = vpop.permute.xlu0 %1860  ;;  %v1882_v7 = vsel %vm1880_vm4, %v1877_v5, %v1863_v26  ;;  %v2091_v26 = vld [vmem:[%s14536_s10 + $0x98] sm:$0xff] }
 0xbbe   :  { %v1881_v6 = vsel %vm1880_vm4, %v1876_v52, %v1861_v4  ;;  %v2088_v52 = vld [vmem:[%s14536_s10 + $0x80] sm:$0xff]  ;;  %v9848_v4 = vpack.c.bf16 %v2091_v26, %v2075_v3 }
 0xbbf   :  { %9587 = vmatprep.mubr.msk.f32.mxu0 %vm120_vm0, %v1881_v6  ;;  %v9842_v5 = vpack.c.bf16 %v2088_v52, %v2072_v51  ;;  %v2074_v6 = vld [vmem:[%s14536_s10 + $0x10] sm:$0xff]  ;;  %v2124_v26 = vld [vmem:[%s14536_s10 + $0x1a0] sm:$0xff] }
 0xbc0   :  { %9588 = vmatmul.mubr.msk.f32.vlgmr.msra.gmra.mrb[18].mxu0 %vm120_vm0, %v1882_v7  ;;  %v1835_v10 = vpop.permute.xlu1 %1834  ;;  %v2090_v7 = vld [vmem:[%s14536_s10 + $0x90] sm:$0xff]  ;;  %9849 = vmatprep.subr.bf16.mxu0 %v9848_v4 }
 0xbc1   :  { %v1833_v13 = vpop.permute.xlu0 %1832  ;;  %v1875_v54 = vsel %vm228_vm1, %v11186_v17, %v1835_v10  ;;  %v9850_v10 = vpack.c.bf16 %v2090_v7, %v2074_v6  ;;  %9843 = vmatpush1.bf16.msra.mxu1 %v9842_v5  ;;  %v2110_v4 = vld [vmem:[%s14536_s10 + $0x130] sm:$0xff]  ;;  %v2081_v6 = vld [vmem:[%s14536_s10 + $0x48] sm:$0xff] }
 0xbc2   :  { %v1874_v11 = vsel %vm228_vm1, %v11188_v19, %v1833_v13  ;;  %v8105_v19 = vld [vmem:[%s14535_s7] ss:$0 sm:$0xff]  ;;  %v2105_v13 = vld [vmem:[%s14536_s10 + $0x108] sm:$0xff]  ;;  %v2126_v5 = vld [vmem:[%s14536_s10 + $0x1b0] sm:$0xff] }
 0xbc3   :  { %9851 = vmatpush1.bf16.msra.mxu0 %v9850_v10  ;;  %v2097_v10 = vld [vmem:[%s14536_s10 + $0xc8] sm:$0xff] }
 0xbc4   :  { %v1851_v12 = vpop.permute.xlu1 %1850 }
 0xbc5   :  { %v1849_v14 = vpop.permute.xlu0 %1848  ;;  %v1879_v18 = vsel %vm405_vm3, %v1875_v54, %v1851_v12  ;;  %v2121_v12 = vld [vmem:[%s14536_s10 + $0x188] sm:$0xff]  ;;  %v2104_v54 = vld [vmem:[%s14536_s10 + $0x100] sm:$0xff] }
 0xbc6   :  { %v1878_v16 = vsel %vm405_vm3, %v1874_v11, %v1849_v14  ;;  %v2107_v14 = vld [vmem:[%s14536_s10 + $0x118] sm:$0xff]  ;;  %v9844_v11 = vpack.c.bf16 %v2121_v12, %v2105_v13 }
 0xbc7   :  { %v2083_v13 = vld [vmem:[%s14536_s10 + $0x58] sm:$0xff] }
 0xbc8   :  { %9845 = vmatprep.subr.bf16.mxu1 %v9844_v11  ;;  %v2099_v12 = vld [vmem:[%s14536_s10 + $0xd8] sm:$0xff]  ;;  %v9862_v11 = vpack.c.bf16 %v2124_v26, %v2108_v25  ;;  %v2116_v25 = vld [vmem:[%s14536_s10 + $0x160] sm:$0xff] }
 0xbc9   :  { %v2132_v26 = vld [vmem:[%s14536_s10 + $0x1e0] sm:$0xff] }
 0xbcb   :  { %v1867_v15 = vpop.permute.xlu1 %1866 }
 0xbcc   :  { %v1865_v43 = vpop.permute.xlu0 %1864  ;;  %v1884_v21 = vsel %vm1880_vm4, %v1879_v18, %v1867_v15  ;;  %v2123_v15 = vld [vmem:[%s14536_s10 + $0x198] sm:$0xff] }
 0xbcd   :  { %v1883_v20 = vsel %vm1880_vm4, %v1878_v16, %v1865_v43  ;;  %v2120_v16 = vld [vmem:[%s14536_s10 + $0x180] sm:$0xff]  ;;  %v9852_v43 = vpack.c.bf16 %v2123_v15, %v2107_v14  ;;  %v9870_v15 = vpack.c.bf16 %v2126_v5, %v2110_v4  ;;  %v2118_v4 = vld [vmem:[%s14536_s10 + $0x170] sm:$0xff] }
 0xbce   :  { %9590 = vmatprep.mubr.msk.f32.mxu0 %vm120_vm0, %v1883_v20  ;;  %v9846_v18 = vpack.c.bf16 %v2120_v16, %v2104_v54  ;;  %v2106_v20 = vld [vmem:[%s14536_s10 + $0x110] sm:$0xff]  ;;  %v9872_v54 = vpack.c.bf16 %v2097_v10, %v2081_v6  ;;  %v9880_v16 = vpack.c.bf16 %v2099_v12, %v2083_v13  ;;  %v3024_v6 = vld [vmem:[%s14539_s12 + $0x80] sm:$0xff]  ;;  %v3057_v13 = vld [vmem:[%s14539_s12 + $0x188] sm:$0xff]  ;;  %v9894_v12 = vpack.c.bf16 %v2132_v26, %v2116_v25 }
 0xbcf   :  { %9591 = vmatmul.mubr.msk.f32.gmra.mrb[20].mxu0 %vm120_vm0, %v1884_v21  ;;  %v2122_v21 = vld [vmem:[%s14536_s10 + $0x190] sm:$0xff]  ;;  %9853 = vmatprep.subr.bf16.mxu0 %v9852_v43  ;;  %v3056_v10 = vld [vmem:[%s14539_s12 + $0x180] sm:$0xff]  ;;  %v3033_v25 = vld [vmem:[%s14539_s12 + $0xc8] sm:$0xff] }
 0xbd0   :  { %9847 = vmatpush1.bf16.msra.mxu1 %v9846_v18  ;;  %v2134_v5 = vld [vmem:[%s14536_s10 + $0x1f0] sm:$0xff]  ;;  %v3064_v26 = vld [vmem:[%s14539_s12 + $0x1c0] sm:$0xff] }
 0xc93   :  { %v9589_v27 = vpop.f32.mrb[18].mxu0 }
 0xc94   :  { %v1980_v31 = vadd.f32 %v9589_v27, %v8105_v19  ;;  %v1974_v17 = vpop.f32.mrb[19].mxu0  ;;  %v14569_v27 = vmov 0.0  }
 0xc95   :  { %v1975_v37 = vadd.f32 %v8105_v19, %v1974_v17  ;;  %2296 = vmatprep.mubr.f32.mxu1 %v14569_v27  ;;  %2385 = vmatprep.mubr.f32.mxu0 %v14569_v27  ;;  %v2093_v17 = vld [vmem:[%s14536_s10 + $0xa8] sm:$0xff] }
 0xc96   :  { %v1994_v32 = vadd.f32 %v1980_v31, %v11076_v29  ;;  %v2077_v31 = vld [vmem:[%s14536_s10 + $0x28] sm:$0xff] }
 0xc97   :  { %v1993_v33 = vadd.f32 %v1975_v37, %v11070_v23  ;;  %v2079_v37 = vld [vmem:[%s14536_s10 + $0x38] sm:$0xff] }
 0xc98   :  { %v2000_v34 = vsel %vm120_vm0, %v1994_v32, 0.0 }
 0xc99   :  { %2001 = vadd.xlane.f32.xlu1 %v2000_v34  ;;  %v1997_v24 = vsel %vm120_vm0, %v1993_v33, 0.0 }
 0xc9a   :  { %1998 = vadd.xlane.f32.xlu0 %v1997_v24 }
 0xca2   :  { %v9592_v22 = vpop.f32.mrb[20].mxu0 }
 0xca3   :  { %v1984_v35 = vpop.f32.mrb[21].mxu0  ;;  %v1990_v36 = vadd.f32 %v9592_v22, %v8105_v19 }
 0xca4   :  { %v1985_v39 = vadd.f32 %v8105_v19, %v1984_v35  ;;  %v9854_v19 = vpack.c.bf16 %v2122_v21, %v2106_v20 }
 0xca5   :  { %v1996_v41 = vadd.f32 %v1990_v36, %v11078_v30 }
 0xca6   :  { %v1995_v42 = vadd.f32 %v1985_v39, %v11074_v28  ;;  %9855 = vmatpush1.bf16.msra.mxu0 %v9854_v19 }
 0xca7   :  { %v2006_v29 = vsel %vm120_vm0, %v1996_v41, 0.0 }
 0xca8   :  { %v2003_v40 = vsel %vm120_vm0, %v1995_v42, 0.0 }
 0xca9   :  { %2004 = vadd.xlane.f32.xlu0 %v2003_v40 }
 0xcad   :  { %2007 = vadd.xlane.f32.xlu0 %v2006_v29  ;;  %v8110_v29 = vld [vmem:[%s14537_s8] ss:$0 sm:$0xff] }
 0xd26   :  { %v2002_v23 = vpop.xlane.xlu1 %2001 }
 0xd27   :  { %v2011_v44 = vmul.f32 0.03125, %v2002_v23  ;;  %v1999_v45 = vpop.xlane.xlu0 %1998 }
 0xd28   :  { %v2010_v46 = vmul.f32 0.03125, %v1999_v45 }
 0xd29   :  { %v11344_v48 = vsub.f32 %v1994_v32, %v2011_v44  ;;  %v9856_v32 = vpack.c.bf16 %v2093_v17, %v2077_v31  ;;  %v2076_v44 = vld [vmem:[%s14536_s10 + $0x20] sm:$0xff] }
 0xd2a   :  { %v11346_v49 = vsub.f32 %v1993_v33, %v2010_v46  ;;  %v2095_v33 = vld [vmem:[%s14536_s10 + $0xb8] sm:$0xff] }
 0xd2b   :  { %v2019_v50 = vmul.f32 %v11344_v48, %v11344_v48  ;;  %v9864_v34 = vpack.c.bf16 %v2095_v33, %v2079_v37  ;;  %9857 = vmatprep.subr.bf16.mxu1 %v9856_v32  ;;  %v2082_v32 = vld [vmem:[%s14536_s10 + $0x50] sm:$0xff] }
 0xd2c   :  { %v2018_v28 = vmul.f32 %v11346_v49, %v11346_v49  ;;  %v2098_v33 = vld [vmem:[%s14536_s10 + $0xd0] sm:$0xff] }
 0xd2d   :  { %v2025_v30 = vsel %vm120_vm0, %v2019_v50, 0.0  ;;  %9865 = vmatprep.subr.bf16.mxu0 %v9864_v34  ;;  %v2113_v34 = vld [vmem:[%s14536_s10 + $0x148] sm:$0xff] }
 0xd2e   :  { %2026 = vadd.xlane.f32.xlu0 %v2025_v30  ;;  %v2022_v55 = vsel %vm120_vm0, %v2018_v28, 0.0  ;;  %v2092_v28 = vld [vmem:[%s14536_s10 + $0xa0] sm:$0xff]  ;;  %v2078_v30 = vld [vmem:[%s14536_s10 + $0x30] sm:$0xff] }
 0xd2f   :  { %2023 = vadd.xlane.f32.xlu1 %v2022_v55  ;;  %v2094_v55 = vld [vmem:[%s14536_s10 + $0xb0] sm:$0xff] }
 0xd36   :  { %v2005_v56 = vpop.xlane.xlu0 %2004 }
 0xd37   :  { %v2012_v57 = vmul.f32 0.03125, %v2005_v56  ;;  %v8111_v56 = vld [vmem:[%s14538_s9] ss:$0 sm:$0xff] }
 0xd39   :  { %v11354_v58 = vsub.f32 %v1995_v42, %v2012_v57 }
 0xd3a   :  { %v2008_v59 = vpop.xlane.xlu0 %2007 }
 0xd3b   :  { %v2013_v60 = vmul.f32 0.03125, %v2008_v59  ;;  %v2020_v61 = vmul.f32 %v11354_v58, %v11354_v58  ;;  %v2125_v59 = vld [vmem:[%s14536_s10 + $0x1a8] sm:$0xff] }
 0xd3d   :  { %v11358_v62 = vsub.f32 %v1996_v41, %v2013_v60  ;;  %v2028_v63 = vsel %vm120_vm0, %v2020_v61, 0.0  ;;  %v2111_v60 = vld [vmem:[%s14536_s10 + $0x138] sm:$0xff] }
 0xd3e   :  { %2029 = vadd.xlane.f32.xlu1 %v2028_v63  ;;  %v2127_v61 = vld [vmem:[%s14536_s10 + $0x1b8] sm:$0xff] }
 0xd3f   :  { %v2021_v0 = vmul.f32 %v11358_v62, %v11358_v62  ;;  %v9868_v52 = vpack.c.bf16 %v2127_v61, %v2111_v60  ;;  %v2102_v60 = vld [vmem:[%s14536_s10 + $0xf0] sm:$0xff]  ;;  %v2117_v61 = vld [vmem:[%s14536_s10 + $0x168] sm:$0xff] }
 0xd41   :  { %v2031_v38 = vsel %vm120_vm0, %v2021_v0, 0.0  ;;  %v9858_v0 = vpack.c.bf16 %v2092_v28, %v2076_v44  ;;  %v2130_v44 = vld [vmem:[%s14536_s10 + $0x1d0] sm:$0xff]  ;;  %v2103_v28 = vld [vmem:[%s14536_s10 + $0xf8] sm:$0xff] }
 0xd42   :  { %2032 = vadd.xlane.f32.xlu0 %v2031_v38  ;;  %v9866_v38 = vpack.c.bf16 %v2094_v55, %v2078_v30 }
 0xdbb   :  { %v2027_v24 = vpop.xlane.xlu0 %2026 }
 0xdbc   :  { %v2035_v22 = vmul.f32 0.03125, %v2027_v24  ;;  %v2024_v35 = vpop.xlane.xlu1 %2023  ;;  %v2129_v24 = vld [vmem:[%s14536_s10 + $0x1c8] sm:$0xff] }
 0xdbd   :  { %v2034_v36 = vmul.f32 0.03125, %v2024_v35  ;;  %v2131_v35 = vld [vmem:[%s14536_s10 + $0x1d8] sm:$0xff] }
 0xdbe   :  { %v2039_v39 = vadd.f32 1e-05, %v2035_v22  ;;  %v2115_v22 = vld [vmem:[%s14536_s10 + $0x158] sm:$0xff] }
 0xdbf   :  { %v2038_v42 = vadd.f32 1e-05, %v2034_v36 }
 0xdc0   :  { %10825 = vrsqrt.f32 %v2039_v39  ;;  %v9882_v39 = vpack.c.bf16 %v2098_v33, %v2082_v32  ;;  %v3010_v33 = vld [vmem:[%s14539_s12 + $0x10] sm:$0xff] }
 0xdc1   :  { %10827 = vrsqrt.f32 %v2038_v42  ;;  %v2112_v42 = vld [vmem:[%s14536_s10 + $0x140] sm:$0xff] }
 0xdca   :  { %v10826_v40 = vpop.eup %10825 }
 0xdcb   :  { %v10828_v41 = vpop.eup %10827  ;;  %v2030_v23 = vpop.xlane.xlu1 %2029  ;;  %v2047_v45 = vmul.f32 %v10826_v40, %v11344_v48  ;;  %v2109_v48 = vld [vmem:[%s14536_s10 + $0x128] sm:$0xff]  ;;  %v2128_v40 = vld [vmem:[%s14536_s10 + $0x1c0] sm:$0xff] }
 0xdcc   :  { %v2046_v46 = vmul.f32 %v10828_v41, %v11346_v49  ;;  %v2036_v50 = vmul.f32 0.03125, %v2030_v23  ;;  %v9860_v51 = vpack.c.bf16 %v2125_v59, %v2109_v48  ;;  %v9876_v41 = vpack.c.bf16 %v2129_v24, %v2113_v34  ;;  %v2114_v23 = vld [vmem:[%s14536_s10 + $0x150] sm:$0xff]  ;;  %v3011_v34 = vld [vmem:[%s14539_s12 + $0x18] sm:$0xff] }
 0xdcd   :  { %v2058_v1 = vmul.f32 %v8110_v29, %v2047_v45  ;;  %v2085_v45 = vld [vmem:[%s14536_s10 + $0x68] sm:$0xff]  ;;  %v9878_v30 = vpack.c.bf16 %v2128_v40, %v2112_v42  ;;  %v9886_v55 = vpack.c.bf16 %v2130_v44, %v2114_v23  ;;  %v2086_v59 = vld [vmem:[%s14536_s10 + $0x70] sm:$0xff]  ;;  %v3060_v40 = vld [vmem:[%s14539_s12 + $0x1a0] sm:$0xff] }
 0xdce   :  { %v2057_v49 = vmul.f32 %v8110_v29, %v2046_v46  ;;  %v2040_v57 = vadd.f32 1e-05, %v2036_v50  ;;  %v2101_v46 = vld [vmem:[%s14536_s10 + $0xe8] sm:$0xff]  ;;  %v2087_v50 = vld [vmem:[%s14536_s10 + $0x78] sm:$0xff]  ;;  %v3012_v44 = vld [vmem:[%s14539_s12 + $0x20] sm:$0xff] }
 0xdcf   :  { %v2033_v63 = vpop.xlane.xlu0 %2032  ;;  %v11490_v14 = vadd.f32 %v8111_v56, %v2058_v1  ;;  %v9896_v48 = vpack.c.bf16 %v2103_v28, %v2087_v50  ;;  %v3029_v42 = vld [vmem:[%s14539_s12 + $0xa8] sm:$0xff]  ;;  %v3044_v28 = vld [vmem:[%s14539_s12 + $0x120] sm:$0xff] }
 0xdd0   :  { %v11458_v53 = vadd.f32 %v8111_v56, %v2057_v49  ;;  %10829 = vrsqrt.f32 %v2040_v57  ;;  %v2037_v3 = vmul.f32 0.03125, %v2033_v63  ;;  %v2084_v49 = vld [vmem:[%s14536_s10 + $0x60] sm:$0xff]  ;;  %v2133_v63 = vld [vmem:[%s14536_s10 + $0x1e8] sm:$0xff] }
 0xdd1   :  { %v2100_v57 = vld [vmem:[%s14536_s10 + $0xe0] sm:$0xff] }
 0xdd2   :  { %v2041_v7 = vadd.f32 1e-05, %v2037_v3  ;;  %8112 = vmatmul.mubr.msk.f32.vlgmr.msra.gmra.mrb[18].mxu1 %vm120_vm0, %v11458_v53  ;;  %8116 = vmatmul.mubr.msk.f32.vlgmr.msra.gmra.mrb[22].mxu0 %vm120_vm0, %v11458_v53  ;;  %v9890_v1 = vpack.c.bf16 %v2100_v57, %v2084_v49  ;;  %v9898_v3 = vpack.c.bf16 %v2102_v60, %v2086_v59  ;;  %v3063_v49 = vld [vmem:[%s14539_s12 + $0x1b8] sm:$0xff]  ;;  %v3014_v60 = vld [vmem:[%s14539_s12 + $0x30] sm:$0xff] }
 0xdd3   :  { %2302 = vmatprep.mubr.f32.mxu1 %v14569_v27  ;;  %2391 = vmatprep.mubr.f32.mxu0 %v14569_v27 }
 0xdd4   :  { %10831 = vrsqrt.f32 %v2041_v7  ;;  %9859 = vmatpush1.bf16.msra.mxu1 %v9858_v0  ;;  %9867 = vmatpush1.bf16.msra.mxu0 %v9866_v38  ;;  %v2119_v0 = vld [vmem:[%s14536_s10 + $0x178] sm:$0xff]  ;;  %v3025_v7 = vld [vmem:[%s14539_s12 + $0x88] sm:$0xff] }
 0xdd5   :  { %9861 = vmatprep.subr.bf16.mxu1 %v9860_v51  ;;  %9869 = vmatprep.subr.bf16.mxu0 %v9868_v52  ;;  %v2135_v38 = vld [vmem:[%s14536_s10 + $0x1f8] sm:$0xff]  ;;  %v9892_v51 = vpack.c.bf16 %v2133_v63, %v2117_v61 }
 0xdd6   :  { %8113 = vmatmul.mubr.msk.f32.gmra.mrb[20].mxu1 %vm120_vm0, %v11490_v14  ;;  %8117 = vmatmul.mubr.msk.f32.gmra.mrb[24].mxu0 %vm120_vm0, %v11490_v14  ;;  %v9900_v52 = vpack.c.bf16 %v2135_v38, %v2119_v0  ;;  %v3015_v61 = vld [vmem:[%s14539_s12 + $0x38] sm:$0xff]  ;;  %v3046_v38 = vld [vmem:[%s14539_s12 + $0x130] sm:$0xff] }
 0xdd7   :  { %2308 = vmatprep.mubr.f32.mxu1 %v14569_v27  ;;  %2397 = vmatprep.mubr.f32.mxu0 %v14569_v27 }
 0xdd8   :  { %9863 = vmatpush1.bf16.msra.mxu1 %v9862_v11  ;;  %9871 = vmatpush1.bf16.msra.mxu0 %v9870_v15  ;;  %v9902_v11 = vpack.c.bf16 %v2134_v5, %v2118_v4  ;;  %v9904_v15 = vpack.c.bf16 %v3025_v7, %v3024_v6  ;;  %v3016_v5 = vld [vmem:[%s14539_s12 + $0x40] sm:$0xff]  ;;  %v3017_v6 = vld [vmem:[%s14539_s12 + $0x48] sm:$0xff] }
 0xdd9   :  { %9873 = vmatprep.subr.bf16.mxu1 %v9872_v54  ;;  %9881 = vmatprep.subr.bf16.mxu0 %v9880_v16  ;;  %v9936_v54 = vpack.c.bf16 %v3057_v13, %v3056_v10  ;;  %v3008_v16 = vld [vmem:[%s14539_s12] sm:$0xff] }
 0xdda   :  { %v10830_v43 = vpop.eup %10829  ;;  %v3048_v13 = vld [vmem:[%s14539_s12 + $0x140] sm:$0xff] }
 0xddb   :  { %v2048_v18 = vmul.f32 %v10830_v43, %v11354_v58  ;;  %v2080_v58 = vld [vmem:[%s14536_s10 + $0x40] sm:$0xff]  ;;  %v3009_v43 = vld [vmem:[%s14539_s12 + $0x8] sm:$0xff] }
 0xddd   :  { %v2059_v20 = vmul.f32 %v8110_v29, %v2048_v18  ;;  %v3040_v18 = vld [vmem:[%s14539_s12 + $0x100] sm:$0xff] }
 0xdde   :  { %v10832_v21 = vpop.eup %10831 }
 0xddf   :  { %v11499_v19 = vadd.f32 %v8111_v56, %v2059_v20  ;;  %v2049_v31 = vmul.f32 %v10832_v21, %v11358_v62  ;;  %v2096_v62 = vld [vmem:[%s14536_s10 + $0xc0] sm:$0xff]  ;;  %v3041_v20 = vld [vmem:[%s14539_s12 + $0x108] sm:$0xff]  ;;  %v3026_v21 = vld [vmem:[%s14539_s12 + $0x90] sm:$0xff] }
 0xde0   :  { %v9874_v36 = vpack.c.bf16 %v2096_v62, %v2080_v58  ;;  %v3059_v58 = vld [vmem:[%s14539_s12 + $0x198] sm:$0xff]  ;;  %v9906_v62 = vpack.c.bf16 %v3009_v43, %v3008_v16  ;;  %v9938_v32 = vpack.c.bf16 %v3041_v20, %v3040_v18  ;;  %v9922_v43 = vpack.c.bf16 %v3017_v6, %v3016_v5  ;;  %v3018_v20 = vld [vmem:[%s14539_s12 + $0x50] sm:$0xff] }
 0xde1   :  { %v2060_v17 = vmul.f32 %v8110_v29, %v2049_v31  ;;  %8114 = vmatmul.mubr.msk.f32.gmra.mrb[22].mxu1 %vm120_vm0, %v11499_v19  ;;  %8118 = vmatmul.mubr.msk.f32.gmra.mrb[26].mxu0 %vm120_vm0, %v11499_v19  ;;  %v9884_v29 = vpack.c.bf16 %v2131_v35, %v2115_v22  ;;  %v3027_v31 = vld [vmem:[%s14539_s12 + $0x98] sm:$0xff]  ;;  %v3042_v35 = vld [vmem:[%s14539_s12 + $0x110] sm:$0xff] }
 0xde2   :  { %2314 = vmatprep.mubr.f32.mxu1 %v14569_v27  ;;  %2403 = vmatprep.mubr.f32.mxu0 %v14569_v27  ;;  %v9908_v24 = vpack.c.bf16 %v3027_v31, %v3026_v21  ;;  %v3067_v16 = vld [vmem:[%s14539_s12 + $0x1d8] sm:$0xff] }
 0xde3   :  { %v11508_v37 = vadd.f32 %v8111_v56, %v2060_v17  ;;  %v9888_v56 = vpack.c.bf16 %v2101_v46, %v2085_v45  ;;  %v3058_v17 = vld [vmem:[%s14539_s12 + $0x190] sm:$0xff]  ;;  %v3013_v45 = vld [vmem:[%s14539_s12 + $0x28] sm:$0xff]  ;;  %v3019_v21 = vld [vmem:[%s14539_s12 + $0x58] sm:$0xff] }
 0xde4   :  { %v9940_v22 = vpack.c.bf16 %v3059_v58, %v3058_v17  ;;  %v9914_v57 = vpack.c.bf16 %v3013_v45, %v3012_v44  ;;  %v3050_v58 = vld [vmem:[%s14539_s12 + $0x150] sm:$0xff] }
 0xde5   :  { %8115 = vmatmul.mubr.msk.f32.gmra.mrb[24].mxu1 %vm120_vm0, %v11508_v37  ;;  %8119 = vmatmul.mubr.msk.f32.gmra.mrb[28].mxu0 %vm120_vm0, %v11508_v37  ;;  %v3038_v45 = vld [vmem:[%s14539_s12 + $0xf0] sm:$0xff] }
 0xde6   :  { %2474 = vmatprep.mubr.f32.mxu1 %v14569_v27  ;;  %2563 = vmatprep.mubr.f32.mxu0 %v14569_v27 }
 0xde9   :  { %8120 = vmatmul.mubr.msk.f32.vlgmr.msra.gmra.mrb[26].mxu1 %vm120_vm0, %v11458_v53  ;;  %8124 = vmatmul.mubr.msk.f32.vlgmr.msra.gmra.mrb[30].mxu0 %vm120_vm0, %v11458_v53 }
 0xdea   :  { %2480 = vmatprep.mubr.f32.mxu1 %v14569_v27  ;;  %2569 = vmatprep.mubr.f32.mxu0 %v14569_v27 }
 0xdeb   :  { %9875 = vmatpush1.bf16.msra.mxu1 %v9874_v36  ;;  %9883 = vmatpush1.bf16.msra.mxu0 %v9882_v39  ;;  %v3043_v36 = vld [vmem:[%s14539_s12 + $0x118] sm:$0xff]  ;;  %v3028_v39 = vld [vmem:[%s14539_s12 + $0xa0] sm:$0xff] }
 0xdec   :  { %9877 = vmatprep.subr.bf16.mxu1 %v9876_v41  ;;  %9885 = vmatprep.subr.bf16.mxu0 %v9884_v29  ;;  %v3061_v41 = vld [vmem:[%s14539_s12 + $0x1a8] sm:$0xff]  ;;  %v9910_v29 = vpack.c.bf16 %v3011_v34, %v3010_v33  ;;  %v9942_v23 = vpack.c.bf16 %v3043_v36, %v3042_v35  ;;  %v9912_v46 = vpack.c.bf16 %v3029_v42, %v3028_v39  ;;  %v3068_v34 = vld [vmem:[%s14539_s12 + $0x1e0] sm:$0xff] }
 0xded   :  { %8121 = vmatmul.mubr.msk.f32.gmra.mrb[28].mxu1 %vm120_vm0, %v11490_v14  ;;  %8125 = vmatmul.mubr.msk.f32.gmra.mrb[32].mxu0 %vm120_vm0, %v11490_v14  ;;  %v9944_v50 = vpack.c.bf16 %v3061_v41, %v3060_v40  ;;  %v3037_v33 = vld [vmem:[%s14539_s12 + $0xe8] sm:$0xff]  ;;  %v3020_v36 = vld [vmem:[%s14539_s12 + $0x60] sm:$0xff] }
 0xdee   :  { %2486 = vmatprep.mubr.f32.mxu1 %v14569_v27  ;;  %2575 = vmatprep.mubr.f32.mxu0 %v14569_v27  ;;  %v3021_v40 = vld [vmem:[%s14539_s12 + $0x68] sm:$0xff]  ;;  %v3052_v41 = vld [vmem:[%s14539_s12 + $0x160] sm:$0xff] }
 0xdef   :  { %9879 = vmatpush1.bf16.msra.mxu1 %v9878_v30  ;;  %9887 = vmatpush1.bf16.msra.mxu0 %v9886_v55  ;;  %v3045_v30 = vld [vmem:[%s14539_s12 + $0x128] sm:$0xff]  ;;  %v3030_v55 = vld [vmem:[%s14539_s12 + $0xb0] sm:$0xff] }
 0xdf0   :  { %9889 = vmatprep.subr.bf16.mxu1 %v9888_v56  ;;  %9897 = vmatprep.subr.bf16.mxu0 %v9896_v48  ;;  %v3031_v56 = vld [vmem:[%s14539_s12 + $0xb8] sm:$0xff]  ;;  %v3062_v48 = vld [vmem:[%s14539_s12 + $0x1b0] sm:$0xff]  ;;  %v9946_v59 = vpack.c.bf16 %v3045_v30, %v3044_v28 }
 0xdf1   :  { %8122 = vmatmul.mubr.msk.f32.gmra.mrb[30].mxu1 %vm120_vm0, %v11499_v19  ;;  %8126 = vmatmul.mubr.msk.f32.gmra.mrb[34].mxu0 %vm120_vm0, %v11499_v19  ;;  %v9916_v63 = vpack.c.bf16 %v3031_v56, %v3030_v55  ;;  %v9948_v0 = vpack.c.bf16 %v3063_v49, %v3062_v48  ;;  %v3071_v30 = vld [vmem:[%s14539_s12 + $0x1f8] sm:$0xff]  ;;  %v3022_v55 = vld [vmem:[%s14539_s12 + $0x70] sm:$0xff] }
 0xdf2   :  { %2492 = vmatprep.mubr.f32.mxu1 %v14569_v27  ;;  %2581 = vmatprep.mubr.f32.mxu0 %v14569_v27  ;;  %v3023_v56 = vld [vmem:[%s14539_s12 + $0x78] sm:$0xff] }
 0xdf3   :  { %v9934_v49 = vpack.c.bf16 %v3023_v56, %v3022_v55 }
 0xdf5   :  { %8123 = vmatmul.mubr.msk.f32.gmra.mrb[32].mxu1 %vm120_vm0, %v11508_v37  ;;  %8127 = vmatmul.mubr.msk.f32.gmra.mrb[36].mxu0 %vm120_vm0, %v11508_v37 }
 0xdf6   :  { %2652 = vmatprep.mubr.f32.mxu1 %v14569_v27  ;;  %2741 = vmatprep.mubr.f32.mxu0 %v14569_v27 }
 0xdf9   :  { %8128 = vmatmul.mubr.msk.f32.vlgmr.msra.gmra.mrb[34].mxu1 %vm120_vm0, %v11458_v53  ;;  %8132 = vmatmul.mubr.msk.f32.vlgmr.msra.gmra.mrb[38].mxu0 %vm120_vm0, %v11458_v53 }
 0xdfa   :  { %2658 = vmatprep.mubr.f32.mxu1 %v14569_v27  ;;  %2747 = vmatprep.mubr.f32.mxu0 %v14569_v27 }
 0xdfb   :  { %9891 = vmatpush1.bf16.msra.mxu1 %v9890_v1  ;;  %9899 = vmatpush1.bf16.msra.mxu0 %v9898_v3  ;;  %v3047_v1 = vld [vmem:[%s14539_s12 + $0x138] sm:$0xff]  ;;  %v3032_v3 = vld [vmem:[%s14539_s12 + $0xc0] sm:$0xff] }
 0xdfc   :  { %9893 = vmatprep.subr.bf16.mxu1 %v9892_v51  ;;  %9901 = vmatprep.subr.bf16.mxu0 %v9900_v52  ;;  %v3065_v51 = vld [vmem:[%s14539_s12 + $0x1c8] sm:$0xff]  ;;  %v9918_v52 = vpack.c.bf16 %v3015_v61, %v3014_v60  ;;  %v9950_v4 = vpack.c.bf16 %v3047_v1, %v3046_v38  ;;  %v9920_v7 = vpack.c.bf16 %v3033_v25, %v3032_v3  ;;  %v3088_v61 = vld [vmem:[%s14539_s12 + $0x280] sm:$0xff]  ;;  %v11875_v25 = vsub.s32 2, %v11036_v2 }
 0xdfd   :  { %8129 = vmatmul.mubr.msk.f32.gmra.mrb[36].mxu1 %vm120_vm0, %v11490_v14  ;;  %8133 = vmatmul.mubr.msk.f32.gmra.mrb[40].mxu0 %vm120_vm0, %v11490_v14  ;;  %v9952_v10 = vpack.c.bf16 %v3065_v51, %v3064_v26  ;;  %v3121_v1 = vld [vmem:[%s14539_s12 + $0x388] sm:$0xff]  ;;  %v11880_v26 = vld [vmem:[%s14540_s11] sm:$0xff]  ;;  %v11883_v51 = vsub.s32 3, %v11036_v2 }
 0xdfe   :  { %2664 = vmatprep.mubr.f32.mxu1 %v14569_v27  ;;  %2753 = vmatprep.mubr.f32.mxu0 %v14569_v27  ;;  %14593 = vst [vmem:[#allocation5_spill] sm:$0xff] %v11875_v25  ;;  %v11895_v5 = vrot.slane %v11880_v26, %v11054_v9 }
 0xdff   :  { %9895 = vmatpush1.bf16.msra.mxu1 %v9894_v12  ;;  %9903 = vmatpush1.bf16.msra.mxu0 %v9902_v11  ;;  %v3049_v12 = vld [vmem:[%s14539_s12 + $0x148] sm:$0xff]  ;;  %v3034_v11 = vld [vmem:[%s14539_s12 + $0xd0] sm:$0xff]  ;;  %14594 = vst [vmem:[#allocation6_spill] sm:$0xff] %v11883_v51  ;;  %v11899_v6 = vrot.slane %v11880_v26, %v11883_v51 }
 0xe00   :  { %9905 = vmatprep.subr.bf16.mxu1 %v9904_v15  ;;  %9937 = vmatprep.subr.bf16.mxu0 %v9936_v54  ;;  %v3035_v15 = vld [vmem:[%s14539_s12 + $0xd8] sm:$0xff]  ;;  %v3066_v54 = vld [vmem:[%s14539_s12 + $0x1d0] sm:$0xff]  ;;  %v9954_v18 = vpack.c.bf16 %v3049_v12, %v3048_v13 }
 0xe01   :  { %8130 = vmatmul.mubr.msk.f32.gmra.mrb[38].mxu1 %vm120_vm0, %v11499_v19  ;;  %8134 = vmatmul.mubr.msk.f32.gmra.mrb[42].mxu0 %vm120_vm0, %v11499_v19  ;;  %v9924_v31 = vpack.c.bf16 %v3035_v15, %v3034_v11  ;;  %v9956_v17 = vpack.c.bf16 %v3067_v16, %v3066_v54  ;;  %v3104_v11 = vld [vmem:[%s14539_s12 + $0x300] sm:$0xff]  ;;  %v3105_v15 = vld [vmem:[%s14539_s12 + $0x308] sm:$0xff]  ;;  %v3090_v54 = vld [vmem:[%s14539_s12 + $0x290] sm:$0xff] }
 0xe02   :  { %2670 = vmatprep.mubr.f32.mxu1 %v14569_v27  ;;  %2759 = vmatprep.mubr.f32.mxu0 %v14569_v27 }
 0xe05   :  { %8131 = vmatmul.mubr.msk.f32.gmra.mrb[40].mxu1 %vm120_vm0, %v11508_v37  ;;  %8135 = vmatmul.mubr.msk.f32.gmra.mrb[44].mxu0 %vm120_vm0, %v11508_v37 }
 0xe06   :  { %2830 = vmatprep.mubr.f32.mxu1 %v14569_v27  ;;  %2919 = vmatprep.mubr.f32.mxu0 %v14569_v27 }
 0xe09   :  { %8136 = vmatmul.mubr.msk.f32.vlgmr.msra.gmra.mrb[42].mxu1 %vm120_vm0, %v11458_v53  ;;  %8140 = vmatmul.mubr.msk.f32.vlgmr.msra.gmra.mrb[46].mxu0 %vm120_vm0, %v11458_v53 }
 0xe0a   :  { %2836 = vmatprep.mubr.f32.mxu1 %v14569_v27  ;;  %2925 = vmatprep.mubr.f32.mxu0 %v14569_v27 }
 0xe0b   :  { %9907 = vmatpush3.bf16.msra.mxu1 %v9906_v62  ;;  %9939 = vmatpush3.bf16.msra.mxu0 %v9938_v32  ;;  %v3051_v62 = vld [vmem:[%s14539_s12 + $0x158] sm:$0xff]  ;;  %v3036_v32 = vld [vmem:[%s14539_s12 + $0xe0] sm:$0xff] }
 0xe0c   :  { %9909 = vmatprep.subr.bf16.mxu1 %v9908_v24  ;;  %9941 = vmatprep.subr.bf16.mxu0 %v9940_v22  ;;  %v3069_v24 = vld [vmem:[%s14539_s12 + $0x1e8] sm:$0xff]  ;;  %v9926_v22 = vpack.c.bf16 %v3019_v21, %v3018_v20  ;;  %v9958_v35 = vpack.c.bf16 %v3051_v62, %v3050_v58  ;;  %v9928_v39 = vpack.c.bf16 %v3037_v33, %v3036_v32  ;;  %v3091_v21 = vld [vmem:[%s14539_s12 + $0x298] sm:$0xff] }
 0xe0d   :  { %8137 = vmatmul.mubr.msk.f32.gmra.mrb[44].mxu1 %vm120_vm0, %v11490_v14  ;;  %8141 = vmatmul.mubr.msk.f32.gmra.mrb[48].mxu0 %vm120_vm0, %v11490_v14  ;;  %v9960_v42 = vpack.c.bf16 %v3069_v24, %v3068_v34  ;;  %v10002_v33 = vpack.c.bf16 %v3105_v15, %v3104_v11  ;;  %v3074_v34 = vld [vmem:[%s14539_s12 + $0x210] sm:$0xff]  ;;  %v3095_v15 = vld [vmem:[%s14539_s12 + $0x2b8] sm:$0xff] }
 0xe0e   :  { %2842 = vmatprep.mubr.f32.mxu1 %v14569_v27  ;;  %2931 = vmatprep.mubr.f32.mxu0 %v14569_v27  ;;  %v3094_v11 = vld [vmem:[%s14539_s12 + $0x2b0] sm:$0xff] }
 0xe0f   :  { %9911 = vmatpush3.bf16.msra.mxu1 %v9910_v29  ;;  %9943 = vmatpush3.bf16.msra.mxu0 %v9942_v23  ;;  %v3053_v29 = vld [vmem:[%s14539_s12 + $0x168] sm:$0xff]  ;;  %v9930_v23 = vpack.c.bf16 %v3021_v40, %v3020_v36  ;;  %v3075_v40 = vld [vmem:[%s14539_s12 + $0x218] sm:$0xff] }
 0xe10   :  { %9913 = vmatprep.subr.bf16.mxu1 %v9912_v46  ;;  %9945 = vmatprep.subr.bf16.mxu0 %v9944_v50  ;;  %v9962_v44 = vpack.c.bf16 %v3053_v29, %v3052_v41  ;;  %v3039_v46 = vld [vmem:[%s14539_s12 + $0xf8] sm:$0xff]  ;;  %v3070_v50 = vld [vmem:[%s14539_s12 + $0x1f0] sm:$0xff] }
 0xe11   :  { %8138 = vmatmul.mubr.msk.f32.gmra.mrb[46].mxu1 %vm120_vm0, %v11499_v19  ;;  %8142 = vmatmul.mubr.msk.f32.gmra.mrb[50].mxu0 %vm120_vm0, %v11499_v19  ;;  %v9932_v28 = vpack.c.bf16 %v3039_v46, %v3038_v45  ;;  %v9964_v48 = vpack.c.bf16 %v3071_v30, %v3070_v50  ;;  %v3106_v41 = vld [vmem:[%s14539_s12 + $0x310] sm:$0xff]  ;;  %v3092_v30 = vld [vmem:[%s14539_s12 + $0x2a0] sm:$0xff] }
 0xe12   :  { %2848 = vmatprep.mubr.f32.mxu1 %v14569_v27  ;;  %2937 = vmatprep.mubr.f32.mxu0 %v14569_v27  ;;  %v12520_v27 = vld [vmem:[%s14539_s12 + $0x690] sm:$0xff] }
 0xe13   :  { %9915 = vmatpush3.bf16.msra.mxu1 %v9914_v57  ;;  %9947 = vmatpush3.bf16.msra.mxu0 %v9946_v59  ;;  %v3054_v57 = vld [vmem:[%s14539_s12 + $0x170] sm:$0xff]  ;;  %v3055_v59 = vld [vmem:[%s14539_s12 + $0x178] sm:$0xff] }
 0xe14   :  { %9917 = vmatprep.subr.bf16.mxu1 %v9916_v63  ;;  %9949 = vmatprep.subr.bf16.mxu0 %v9948_v0  ;;  %v9966_v60 = vpack.c.bf16 %v3055_v59, %v3054_v57  ;;  %v3089_v63 = vld [vmem:[%s14539_s12 + $0x288] sm:$0xff]  ;;  %v3120_v0 = vld [vmem:[%s14539_s12 + $0x380] sm:$0xff] }
 0xe15   :  { %8139 = vmatmul.mubr.msk.f32.gmra.mrb[48].mxu1 %vm120_vm0, %v11508_v37  ;;  %8143 = vmatmul.mubr.msk.f32.gmra.mrb[52].mxu0 %vm120_vm0, %v11508_v37  ;;  %v9968_v38 = vpack.c.bf16 %v3089_v63, %v3088_v61  ;;  %v10000_v3 = vpack.c.bf16 %v3121_v1, %v3120_v0  ;;  %v3125_v57 = vld [vmem:[%s14539_s12 + $0x3a8] sm:$0xff]  ;;  %v9974_v61 = vpack.c.bf16 %v3075_v40, %v3074_v34  ;;  %v3076_v0 = vld [vmem:[%s14539_s12 + $0x220] sm:$0xff] }
 0xe16   :  { %v3128_v34 = vld [vmem:[%s14539_s12 + $0x3c0] sm:$0xff] }
 0xe17   :  { %9919 = vmatpush3.bf16.msra.mxu1 %v9918_v52  ;;  %9951 = vmatpush3.bf16.msra.mxu0 %v9950_v4  ;;  %v11887_v52 = vrot.slane %v11880_v26, %v11051_v8  ;;  %v11891_v4 = vrot.slane %v11880_v26, %v11875_v25 }
 0xe18   :  { %9921 = vmatprep.subr.bf16.mxu1 %v9920_v7  ;;  %9953 = vmatprep.subr.bf16.mxu0 %v9952_v10  ;;  %v3072_v7 = vld [vmem:[%s14539_s12 + $0x200] sm:$0xff]  ;;  %v3073_v10 = vld [vmem:[%s14539_s12 + $0x208] sm:$0xff] }
 0xe19   :  { %v9970_v32 = vpack.c.bf16 %v3073_v10, %v3072_v7 }
 0xe1b   :  { %9923 = vmatpush3.bf16.msra.mxu1 %v9922_v43  ;;  %9955 = vmatpush3.bf16.msra.mxu0 %v9954_v18 }
 0xe1c   :  { %9925 = vmatprep.subr.bf16.mxu1 %v9924_v31  ;;  %9957 = vmatprep.subr.bf16.mxu0 %v9956_v17  ;;  %v3122_v31 = vld [vmem:[%s14539_s12 + $0x390] sm:$0xff]  ;;  %v3123_v17 = vld [vmem:[%s14539_s12 + $0x398] sm:$0xff] }
 0xe1f   :  { %9927 = vmatpush3.bf16.msra.mxu1 %v9926_v22  ;;  %9959 = vmatpush3.bf16.msra.mxu0 %v9958_v35 }
 0xe20   :  { %9929 = vmatprep.subr.bf16.mxu1 %v9928_v39  ;;  %9961 = vmatprep.subr.bf16.mxu0 %v9960_v42  ;;  %v9972_v39 = vpack.c.bf16 %v3091_v21, %v3090_v54  ;;  %v10004_v42 = vpack.c.bf16 %v3123_v17, %v3122_v31  ;;  %v3126_v54 = vld [vmem:[%s14539_s12 + $0x3b0] sm:$0xff]  ;;  %v3079_v21 = vld [vmem:[%s14539_s12 + $0x238] sm:$0xff]  ;;  %v9980_v31 = vpack.c.bf16 %v3095_v15, %v3094_v11 }
 0xe23   :  { %9931 = vmatpush3.bf16.msra.mxu1 %v9930_v23  ;;  %9963 = vmatpush3.bf16.msra.mxu0 %v9962_v44 }
 0xe24   :  { %9933 = vmatprep.subr.bf16.mxu1 %v9932_v28  ;;  %9965 = vmatprep.subr.bf16.mxu0 %v9964_v48  ;;  %v3107_v28 = vld [vmem:[%s14539_s12 + $0x318] sm:$0xff]  ;;  %v3093_v48 = vld [vmem:[%s14539_s12 + $0x2a8] sm:$0xff] }
 0xe25   :  { %v10006_v63 = vpack.c.bf16 %v3107_v28, %v3106_v41  ;;  %v9976_v7 = vpack.c.bf16 %v3093_v48, %v3092_v30 }
 0xe27   :  { %9935 = vmatpush3.bf16.msra.mxu1 %v9934_v49  ;;  %9967 = vmatpush3.bf16.msra.mxu0 %v9966_v60  ;;  %v3124_v49 = vld [vmem:[%s14539_s12 + $0x3a0] sm:$0xff] }
 0xe28   :  { %9969 = vmatprep.subr.bf16.mxu1 %v9968_v38  ;;  %10001 = vmatprep.subr.bf16.mxu0 %v10000_v3  ;;  %v3077_v38 = vld [vmem:[%s14539_s12 + $0x228] sm:$0xff]  ;;  %v10008_v10 = vpack.c.bf16 %v3125_v57, %v3124_v49  ;;  %v3098_v49 = vld [vmem:[%s14539_s12 + $0x2d0] sm:$0xff]  ;;  %v3099_v57 = vld [vmem:[%s14539_s12 + $0x2d8] sm:$0xff] }
 0xea5   :  { %v2298_v13 = vpop.f32.mrb[18].mxu1  ;;  %v2387_v12 = vpop.f32.mrb[22].mxu0 }
 0xea6   :  { %v2299_v16 = vadd.f32 %v2298_v13, %v11887_v52  ;;  %v2388_v43 = vadd.f32 %v2387_v12, %v11891_v4  ;;  %v2300_v18 = vpop.f32.mrb[19].mxu1  ;;  %v2389_v20 = vpop.f32.mrb[23].mxu0  ;;  %v3108_v13 = vld [vmem:[%s14539_s12 + $0x320] sm:$0xff]  ;;  %v3109_v12 = vld [vmem:[%s14539_s12 + $0x328] sm:$0xff] }
 0xea7   :  { %v2301_v58 = vadd.f32 %v2300_v18, %v11895_v5  ;;  %v2390_v62 = vadd.f32 %v2389_v20, %v11899_v6  ;;  %v10010_v18 = vpack.c.bf16 %v3109_v12, %v3108_v13  ;;  %v3078_v20 = vld [vmem:[%s14539_s12 + $0x230] sm:$0xff] }
 0xea8   :  { %v2944_v29 = vmax.f32 %v2299_v16, 0.0  ;;  %v2946_v23 = vmax.f32 %v2388_v43, 0.0  ;;  %v3127_v16 = vld [vmem:[%s14539_s12 + $0x3b8] sm:$0xff]  ;;  %v9978_v43 = vpack.c.bf16 %v3077_v38, %v3076_v0 }
 0xea9   :  { %v2945_v24 = vmax.f32 %v2301_v58, 0.0  ;;  %v2947_v22 = vmax.f32 %v2390_v62, 0.0  ;;  %v2304_v35 = vpop.f32.mrb[20].mxu1  ;;  %v2393_v36 = vpop.f32.mrb[24].mxu0  ;;  %v10012_v17 = vpack.c.bf16 %v3127_v16, %v3126_v54  ;;  %v3110_v58 = vld [vmem:[%s14539_s12 + $0x330] sm:$0xff]  ;;  %v3111_v62 = vld [vmem:[%s14539_s12 + $0x338] sm:$0xff] }
 0xeaa   :  { %v2305_v44 = vadd.f32 %v2304_v35, %v11887_v52  ;;  %v2394_v45 = vadd.f32 %v2393_v36, %v11891_v4  ;;  %v2306_v46 = vpop.f32.mrb[21].mxu1  ;;  %v2395_v50 = vpop.f32.mrb[25].mxu0  ;;  %v9982_v35 = vpack.c.bf16 %v3079_v21, %v3078_v20  ;;  %v3129_v36 = vld [vmem:[%s14539_s12 + $0x3c8] sm:$0xff]  ;;  %v3082_v54 = vld [vmem:[%s14539_s12 + $0x250] sm:$0xff]  ;;  %v3083_v16 = vld [vmem:[%s14539_s12 + $0x258] sm:$0xff] }
 0xeab   :  { %v2307_v55 = vadd.f32 %v2306_v46, %v11895_v5  ;;  %v2396_v56 = vadd.f32 %v2395_v50, %v11899_v6  ;;  %3335 = vmatprep.mubr.f32.mxu1 %v2945_v24  ;;  %3420 = vmatprep.mubr.f32.mxu0 %v2947_v22  ;;  %v12019_v46 = vsub.s32 5, %v11036_v2  ;;  %v12022_v50 = vsub.s32 7, %v11036_v2 }
 0xeac   :  { %3336 = vmatmul.mubr.f32.vlgmr.msra.gmra.mrb[50].mxu1 %v2944_v29  ;;  %3421 = vmatmul.mubr.f32.vlgmr.msra.gmra.mrb[54].mxu0 %v2946_v23  ;;  %v2960_v1 = vmax.f32 %v2305_v44, 0.0  ;;  %v2962_v3 = vmax.f32 %v2394_v45, 0.0  ;;  %v10014_v23 = vpack.c.bf16 %v3111_v62, %v3110_v58  ;;  %v3112_v44 = vld [vmem:[%s14539_s12 + $0x340] sm:$0xff]  ;;  %v3113_v45 = vld [vmem:[%s14539_s12 + $0x348] sm:$0xff]  ;;  %v10016_v48 = vpack.c.bf16 %v3129_v36, %v3128_v34 }
 0xead   :  { %v2961_v59 = vmax.f32 %v2307_v55, 0.0  ;;  %v2963_v60 = vmax.f32 %v2396_v56, 0.0  ;;  %9971 = vmatpush3.bf16.msra.mxu1 %v9970_v32  ;;  %10003 = vmatpush3.bf16.msra.mxu0 %v10002_v33  ;;  %v3096_v32 = vld [vmem:[%s14539_s12 + $0x2c0] sm:$0xff]  ;;  %v3097_v33 = vld [vmem:[%s14539_s12 + $0x2c8] sm:$0xff]  ;;  %14595 = vst [vmem:[#allocation7_spill] sm:$0xff] %v12019_v46  ;;  %14596 = vst [vmem:[#allocation8_spill] sm:$0xff] %v12022_v50  ;;  %v10018_v38 = vpack.c.bf16 %v3113_v45, %v3112_v44 }
 0xeae   :  { %9973 = vmatprep.subr.bf16.mxu1 %v9972_v39  ;;  %10005 = vmatprep.subr.bf16.mxu0 %v10004_v42  ;;  %v3080_v39 = vld [vmem:[%s14539_s12 + $0x240] sm:$0xff]  ;;  %v3081_v42 = vld [vmem:[%s14539_s12 + $0x248] sm:$0xff]  ;;  %v9984_v56 = vpack.c.bf16 %v3097_v33, %v3096_v32  ;;  %v12042_v11 = vrot.slane %v11880_v26, %v12019_v46  ;;  %v12046_v15 = vrot.slane %v11880_v26, %v12022_v50 }
 0xeaf   :  { %3340 = vmatprep.mubr.f32.mxu1 %v2961_v59  ;;  %3425 = vmatprep.mubr.f32.mxu0 %v2963_v60  ;;  %v9986_v0 = vpack.c.bf16 %v3081_v42, %v3080_v39  ;;  %v3101_v58 = vld [vmem:[%s14539_s12 + $0x2e8] sm:$0xff]  ;;  %v9990_v42 = vpack.c.bf16 %v3083_v16, %v3082_v54  ;;  %v3118_v54 = vld [vmem:[%s14539_s12 + $0x370] sm:$0xff] }
 0xeb0   :  { %3341 = vmatmul.mubr.f32.gmra.mrb[52].mxu1 %v2960_v1  ;;  %3426 = vmatmul.mubr.f32.gmra.mrb[56].mxu0 %v2962_v3  ;;  %v3130_v1 = vld [vmem:[%s14539_s12 + $0x3d0] sm:$0xff]  ;;  %v3131_v3 = vld [vmem:[%s14539_s12 + $0x3d8] sm:$0xff] }
 0xeb1   :  { %9975 = vmatpush3.bf16.msra.mxu1 %v9974_v61  ;;  %10007 = vmatpush3.bf16.msra.mxu0 %v10006_v63 }
 0xeb2   :  { %9977 = vmatprep.subr.bf16.mxu1 %v9976_v7  ;;  %10009 = vmatprep.subr.bf16.mxu0 %v10008_v10 }
 0xeb4   :  { %v2310_v24 = vpop.f32.mrb[22].mxu1  ;;  %v2399_v22 = vpop.f32.mrb[26].mxu0 }
 0xeb5   :  { %9979 = vmatpush3.bf16.msra.mxu1 %v9978_v43  ;;  %10011 = vmatpush3.bf16.msra.mxu0 %v10010_v18  ;;  %v2311_v40 = vadd.f32 %v2310_v24, %v11887_v52  ;;  %v2312_v41 = vpop.f32.mrb[23].mxu1  ;;  %v2401_v29 = vpop.f32.mrb[27].mxu0  ;;  %v2400_v28 = vadd.f32 %v2399_v22, %v11891_v4  ;;  %v3132_v24 = vld [vmem:[%s14539_s12 + $0x3e0] sm:$0xff]  ;;  %v3133_v22 = vld [vmem:[%s14539_s12 + $0x3e8] sm:$0xff] }
 0xeb6   :  { %v2313_v30 = vadd.f32 %v2312_v41, %v11895_v5  ;;  %v2402_v55 = vadd.f32 %v2401_v29, %v11899_v6  ;;  %9981 = vmatprep.subr.bf16.mxu1 %v9980_v31  ;;  %10013 = vmatprep.subr.bf16.mxu0 %v10012_v17  ;;  %v3115_v31 = vld [vmem:[%s14539_s12 + $0x358] sm:$0xff]  ;;  %v3100_v17 = vld [vmem:[%s14539_s12 + $0x2e0] sm:$0xff] }
 0xeb7   :  { %v2976_v7 = vmax.f32 %v2311_v40, 0.0  ;;  %v2978_v43 = vmax.f32 %v2400_v28, 0.0  ;;  %v9992_v41 = vpack.c.bf16 %v3101_v58, %v3100_v17  ;;  %v3084_v29 = vld [vmem:[%s14539_s12 + $0x260] sm:$0xff] }
 0xeb8   :  { %v2977_v59 = vmax.f32 %v2313_v30, 0.0  ;;  %v2979_v60 = vmax.f32 %v2402_v55, 0.0  ;;  %v2316_v61 = vpop.f32.mrb[24].mxu1  ;;  %v2405_v63 = vpop.f32.mrb[28].mxu0  ;;  %v3116_v30 = vld [vmem:[%s14539_s12 + $0x360] sm:$0xff]  ;;  %v3117_v55 = vld [vmem:[%s14539_s12 + $0x368] sm:$0xff] }
 0xeb9   :  { %9983 = vmatpush3.bf16.msra.mxu1 %v9982_v35  ;;  %10015 = vmatpush3.bf16.msra.mxu0 %v10014_v23  ;;  %v2317_v10 = vadd.f32 %v2316_v61, %v11887_v52  ;;  %v2318_v13 = vpop.f32.mrb[25].mxu1  ;;  %v2407_v12 = vpop.f32.mrb[29].mxu0  ;;  %v3114_v52 = vld [vmem:[%s14539_s12 + $0x350] sm:$0xff]  ;;  %v2406_v18 = vadd.f32 %v2405_v63, %v11891_v4  ;;  %v12070_v4 = vsub.s32 4, %v11036_v2  ;;  %v12083_v35 = vsub.s32 6, %v11036_v2  ;;  %v3085_v23 = vld [vmem:[%s14539_s12 + $0x268] sm:$0xff] }
 0xeba   :  { %v2319_v20 = vadd.f32 %v2318_v13, %v11895_v5  ;;  %v2408_v21 = vadd.f32 %v2407_v12, %v11899_v6  ;;  %3345 = vmatprep.mubr.f32.mxu1 %v2977_v59  ;;  %3430 = vmatprep.mubr.f32.mxu0 %v2979_v60  ;;  %v9988_v5 = vpack.c.bf16 %v3099_v57, %v3098_v49  ;;  %v3103_v49 = vld [vmem:[%s14539_s12 + $0x2f8] sm:$0xff]  ;;  %v3134_v57 = vld [vmem:[%s14539_s12 + $0x3f0] sm:$0xff] }
 0xebb   :  { %9985 = vmatprep.subr.bf16.mxu1 %v9984_v56  ;;  %10017 = vmatprep.subr.bf16.mxu0 %v10016_v48  ;;  %v10020_v6 = vpack.c.bf16 %v3131_v3, %v3130_v1  ;;  %v10022_v40 = vpack.c.bf16 %v3115_v31, %v3114_v52  ;;  %v2992_v44 = vmax.f32 %v2317_v10, 0.0  ;;  %v2994_v45 = vmax.f32 %v2406_v18, 0.0  ;;  %v3102_v56 = vld [vmem:[%s14539_s12 + $0x2f0] sm:$0xff]  ;;  %v3135_v59 = vld [vmem:[%s14539_s12 + $0x3f8] sm:$0xff]  ;;  %v3185_v31 = vld [vmem:[%s14539_s12 + $0x588] sm:$0xff] }
 0xebc   :  { %v2993_v62 = vmax.f32 %v2319_v20, 0.0  ;;  %v2995_v32 = vmax.f32 %v2408_v21, 0.0  ;;  %3346 = vmatmul.mubr.f32.gmra.mrb[54].mxu1 %v2976_v7  ;;  %3431 = vmatmul.mubr.f32.gmra.mrb[58].mxu0 %v2978_v43  ;;  %v12072_v33 = vpop.f32.mrb[26].mxu1  ;;  %v12074_v34 = vpop.f32.mrb[30].mxu0  ;;  %v10024_v48 = vpack.c.bf16 %v3133_v22, %v3132_v24  ;;  %v9994_v7 = vpack.c.bf16 %v3085_v23, %v3084_v29  ;;  %v3086_v13 = vld [vmem:[%s14539_s12 + $0x270] sm:$0xff]  ;;  %v3087_v12 = vld [vmem:[%s14539_s12 + $0x278] sm:$0xff] }
 0xebd   :  { %9987 = vmatpush3.bf16.msra.mxu1 %v9986_v0  ;;  %10019 = vmatpush3.bf16.msra.mxu0 %v10018_v38  ;;  %v2478_v36 = vpop.f32.mrb[27].mxu1  ;;  %v2567_v39 = vpop.f32.mrb[31].mxu0  ;;  %v12117_v38 = vrot.slane %v11880_v26, %v12070_v4  ;;  %v10026_v10 = vpack.c.bf16 %v3117_v55, %v3116_v30  ;;  %v12130_v16 = vrot.slane %v11880_v26, %v12083_v35  ;;  %v3119_v18 = vld [vmem:[%s14539_s12 + $0x378] sm:$0xff]  ;;  %v3152_v20 = vld [vmem:[%s14539_s12 + $0x480] sm:$0xff]  ;;  %v3153_v21 = vld [vmem:[%s14539_s12 + $0x488] sm:$0xff] }
 0xebe   :  { %v2479_v28 = vadd.f32 %v2478_v36, %v12042_v11  ;;  %v2568_v2 = vadd.f32 %v2567_v39, %v12046_v15  ;;  %3350 = vmatprep.mubr.f32.mxu1 %v2993_v62  ;;  %3435 = vmatprep.mubr.f32.mxu0 %v2995_v32  ;;  %v9996_v52 = vpack.c.bf16 %v3103_v49, %v3102_v56  ;;  %v3184_v26 = vld [vmem:[%s14539_s12 + $0x580] sm:$0xff]  ;;  %v12206_v56 = vld [vmem:[%s14540_s11 + $0x8] sm:$0xff]  ;;  %v12216_v49 = vld [vmem:[%s14539_s12 + $0x418] sm:$0xff] }
 0xebf   :  { %9989 = vmatprep.subr.bf16.mxu1 %v9988_v5  ;;  %10021 = vmatprep.subr.bf16.mxu0 %v10020_v6  ;;  %v10028_v43 = vpack.c.bf16 %v3135_v59, %v3134_v57  ;;  %v12154_v5 = vld [vmem:[%s14539_s12 + $0x400] sm:$0xff]  ;;  %v12159_v6 = vld [vmem:[%s14539_s12 + $0x408] sm:$0xff]  ;;  %v9998_v24 = vpack.c.bf16 %v3087_v12, %v3086_v13  ;;  %v10030_v22 = vpack.c.bf16 %v3119_v18, %v3118_v54 }
 0xec0   :  { %v2949_v60 = vmax.f32 %v2479_v28, 0.0  ;;  %v2951_v61 = vmax.f32 %v2568_v2, 0.0  ;;  %3351 = vmatmul.mubr.f32.gmra.mrb[56].mxu1 %v2992_v44  ;;  %3436 = vmatmul.mubr.f32.gmra.mrb[60].mxu0 %v2994_v45  ;;  %v12111_v63 = vpop.f32.mrb[28].mxu1  ;;  %v12113_v0 = vpop.f32.mrb[32].mxu0  ;;  %v10032_v36 = vpack.c.bf16 %v3153_v21, %v3152_v20  ;;  %v12164_v39 = vld [vmem:[%s14539_s12 + $0x500] sm:$0xff]  ;;  %v2566_v29 = vadd.f32 %v12074_v34, %v12130_v16  ;;  %v12183_v44 = vld [vmem:[%s14539_s12 + $0x498] sm:$0xff] }
 0xec1   :  { %9991 = vmatpush3.bf16.msra.mxu1 %v9990_v42  ;;  %10023 = vmatpush3.bf16.msra.mxu0 %v10022_v40  ;;  %v2484_v1 = vpop.f32.mrb[29].mxu1  ;;  %v2573_v3 = vpop.f32.mrb[33].mxu0  ;;  %v12169_v42 = vld [vmem:[%s14539_s12 + $0x508] sm:$0xff]  ;;  %v12174_v40 = vld [vmem:[%s14539_s12 + $0x490] sm:$0xff]  ;;  %v10064_v23 = vpack.c.bf16 %v3185_v31, %v3184_v26  ;;  %v10034_v55 = vpack.c.bf16 %v12159_v6, %v12154_v5  ;;  %v2483_v54 = vadd.f32 %v12111_v63, %v12117_v38  ;;  %v12251_v18 = vld [vmem:[%s14539_s12 + $0x5a0] sm:$0xff] }
 0xec2   :  { %9993 = vmatprep.subr.bf16.mxu1 %v9992_v41  ;;  %3505 = vmatprep.mubr.f32.mxu1 %v2949_v60  ;;  %v2477_v41 = vadd.f32 %v12072_v33, %v12117_v38  ;;  %v12188_v45 = vld [vmem:[%s14539_s12 + $0x590] sm:$0xff]  ;;  %v12193_v33 = vld [vmem:[%s14539_s12 + $0x598] sm:$0xff]  ;;  %v2485_v34 = vadd.f32 %v2484_v1, %v12042_v11  ;;  %v2574_v28 = vadd.f32 %v2573_v3, %v12046_v15  ;;  %v2950_v12 = vmax.f32 %v2566_v29, 0.0  ;;  %v12256_v20 = vld [vmem:[%s14539_s12 + $0x5a8] sm:$0xff] }
 0xec3   :  { %10025 = vmatprep.subr.bf16.mxu0 %v10024_v48  ;;  %3590 = vmatprep.mubr.f32.mxu0 %v2951_v61  ;;  %v12211_v48 = vld [vmem:[%s14539_s12 + $0x410] sm:$0xff]  ;;  %v10066_v60 = vpack.c.bf16 %v12169_v42, %v12164_v39  ;;  %v10036_v61 = vpack.c.bf16 %v12183_v44, %v12174_v40  ;;  %v10068_v1 = vpack.c.bf16 %v12193_v33, %v12188_v45  ;;  %v3172_v29 = vld [vmem:[%s14539_s12 + $0x520] sm:$0xff]  ;;  %v2964_v45 = vmax.f32 %v2483_v54, 0.0 }
 0xec4   :  { %v12147_v17 = vpop.f32.mrb[30].mxu1  ;;  %v12149_v58 = vpop.f32.mrb[34].mxu0  ;;  %v12227_v3 = vld [vmem:[%s14539_s12 + $0x510] sm:$0xff]  ;;  %v2948_v13 = vmax.f32 %v2477_v41, 0.0  ;;  %v2965_v63 = vmax.f32 %v2485_v34, 0.0  ;;  %v2967_v21 = vmax.f32 %v2574_v28, 0.0  ;;  %v12266_v6 = vrot.slane %v12206_v56, %v11054_v9 }
 0xec5   :  { %9995 = vmatpush3.bf16.msra.mxu1 %v9994_v7  ;;  %10027 = vmatpush3.bf16.msra.mxu0 %v10026_v10  ;;  %v2490_v62 = vpop.f32.mrb[31].mxu1  ;;  %v2579_v32 = vpop.f32.mrb[35].mxu0  ;;  %v12232_v7 = vld [vmem:[%s14539_s12 + $0x518] sm:$0xff]  ;;  %v12237_v10 = vld [vmem:[%s14539_s12 + $0x4a0] sm:$0xff]  ;;  %v10072_v41 = vpack.c.bf16 %v12256_v20, %v12251_v18  ;;  %v12299_v44 = vld [vmem:[%s14539_s12 + $0x4b0] sm:$0xff]  ;;  %v2489_v34 = vadd.f32 %v12147_v17, %v12117_v38  ;;  %v2578_v28 = vadd.f32 %v12149_v58, %v12130_v16 }
 0xec6   :  { %9997 = vmatprep.subr.bf16.mxu1 %v9996_v52  ;;  %10029 = vmatprep.subr.bf16.mxu0 %v10028_v43  ;;  %v2572_v52 = vadd.f32 %v12113_v0, %v12130_v16  ;;  %v12246_v43 = vld [vmem:[%s14539_s12 + $0x4a8] sm:$0xff]  ;;  %v2491_v0 = vadd.f32 %v2490_v62, %v12042_v11  ;;  %v2580_v26 = vadd.f32 %v2579_v32, %v12046_v15  ;;  %v12277_v62 = vld [vmem:[%s14539_s12 + $0x420] sm:$0xff]  ;;  %v3143_v18 = vld [vmem:[%s14539_s12 + $0x438] sm:$0xff] }
 0xec7   :  { %v12282_v32 = vld [vmem:[%s14539_s12 + $0x428] sm:$0xff]  ;;  %v10070_v42 = vpack.c.bf16 %v12232_v7, %v12227_v3  ;;  %v10040_v40 = vpack.c.bf16 %v12246_v43, %v12237_v10  ;;  %v3191_v3 = vld [vmem:[%s14539_s12 + $0x5b8] sm:$0xff]  ;;  %v3142_v43 = vld [vmem:[%s14539_s12 + $0x430] sm:$0xff] }
 0xec8   :  { %v12197_v2 = vpop.f32.mrb[32].mxu1  ;;  %v12199_v30 = vpop.f32.mrb[36].mxu0  ;;  %v2966_v33 = vmax.f32 %v2572_v52, 0.0  ;;  %v2981_v7 = vmax.f32 %v2491_v0, 0.0  ;;  %v2983_v10 = vmax.f32 %v2580_v26, 0.0 }
 0xec9   :  { %9999 = vmatpush3.bf16.msra.mxu1 %v9998_v24  ;;  %10031 = vmatpush3.bf16.msra.mxu0 %v10030_v22  ;;  %v2496_v57 = vpop.f32.mrb[33].mxu1  ;;  %v2585_v59 = vpop.f32.mrb[37].mxu0  ;;  %v12270_v24 = vrot.slane %v12206_v56, %v11883_v51  ;;  %v10038_v22 = vpack.c.bf16 %v12216_v49, %v12211_v48  ;;  %v3159_v48 = vld [vmem:[%s14539_s12 + $0x4b8] sm:$0xff]  ;;  %v3190_v49 = vld [vmem:[%s14539_s12 + $0x5b0] sm:$0xff]  ;;  %v2584_v52 = vadd.f32 %v12199_v30, %v12130_v16 }
 0xeca   :  { %10033 = vmatprep.subr.bf16.mxu1 %v10032_v36  ;;  %10065 = vmatprep.subr.bf16.mxu0 %v10064_v23  ;;  %v3173_v23 = vld [vmem:[%s14539_s12 + $0x528] sm:$0xff]  ;;  %v2497_v17 = vadd.f32 %v2496_v57, %v12042_v11  ;;  %v2586_v58 = vadd.f32 %v2585_v59, %v12046_v15  ;;  %v10044_v15 = vpack.c.bf16 %v3159_v48, %v12299_v44  ;;  %v2980_v59 = vmax.f32 %v2489_v34, 0.0  ;;  %v3175_v16 = vld [vmem:[%s14539_s12 + $0x538] sm:$0xff]  ;;  %v3176_v48 = vld [vmem:[%s14539_s12 + $0x540] sm:$0xff] }
 0xecb   :  { %v10074_v11 = vpack.c.bf16 %v3173_v23, %v3172_v29  ;;  %v10076_v57 = vpack.c.bf16 %v3191_v3, %v3190_v49  ;;  %v3144_v23 = vld [vmem:[%s14539_s12 + $0x440] sm:$0xff]  ;;  %v3145_v44 = vld [vmem:[%s14539_s12 + $0x448] sm:$0xff]  ;;  %v3162_v3 = vld [vmem:[%s14539_s12 + $0x4d0] sm:$0xff] }
 0xecc   :  { %3506 = vmatmul.mubr.f32.vlgmr.msra.gmra.mrb[58].mxu1 %v2948_v13  ;;  %3591 = vmatmul.mubr.f32.vlgmr.msra.gmra.mrb[62].mxu0 %v2950_v12  ;;  %v12260_v31 = vpop.f32.mrb[34].mxu1  ;;  %v12262_v5 = vpop.f32.mrb[38].mxu0  ;;  %v10042_v13 = vpack.c.bf16 %v12282_v32, %v12277_v62  ;;  %v2997_v20 = vmax.f32 %v2497_v17, 0.0  ;;  %v3192_v62 = vld [vmem:[%s14539_s12 + $0x5c0] sm:$0xff]  ;;  %v3193_v32 = vld [vmem:[%s14539_s12 + $0x5c8] sm:$0xff]  ;;  %v3163_v17 = vld [vmem:[%s14539_s12 + $0x4d8] sm:$0xff] }
 0xecd   :  { %3510 = vmatprep.mubr.f32.mxu1 %v2965_v63  ;;  %3595 = vmatprep.mubr.f32.mxu0 %v2967_v21  ;;  %v2656_v36 = vpop.f32.mrb[35].mxu1  ;;  %v2745_v39 = vpop.f32.mrb[39].mxu0  ;;  %v2999_v63 = vmax.f32 %v2586_v58, 0.0  ;;  %v3177_v49 = vld [vmem:[%s14539_s12 + $0x548] sm:$0xff]  ;;  %v3194_v58 = vld [vmem:[%s14539_s12 + $0x5d0] sm:$0xff] }
 0xece   :  { %10035 = vmatpush3.bf16.msra.mxu1 %v10034_v55  ;;  %10067 = vmatpush3.bf16.msra.mxu0 %v10066_v60  ;;  %v2657_v21 = vadd.f32 %v2656_v36, %v12266_v6  ;;  %v2746_v0 = vadd.f32 %v2745_v39, %v12270_v24 }
 0xecf   :  { %10037 = vmatprep.subr.bf16.mxu1 %v10036_v61  ;;  %10069 = vmatprep.subr.bf16.mxu0 %v10068_v1  ;;  %v2982_v61 = vmax.f32 %v2578_v28, 0.0  ;;  %v2495_v1 = vadd.f32 %v12197_v2, %v12117_v38  ;;  %v3174_v38 = vld [vmem:[%s14539_s12 + $0x530] sm:$0xff]  ;;  %v3160_v2 = vld [vmem:[%s14539_s12 + $0x4c0] sm:$0xff]  ;;  %v10080_v28 = vpack.c.bf16 %v3193_v32, %v3192_v62 }
 0xed0   :  { %3511 = vmatmul.mubr.f32.gmra.mrb[60].mxu1 %v2964_v45  ;;  %3596 = vmatmul.mubr.f32.gmra.mrb[64].mxu0 %v2966_v33  ;;  %v12316_v55 = vpop.f32.mrb[36].mxu1  ;;  %v12318_v60 = vpop.f32.mrb[40].mxu0  ;;  %v10078_v29 = vpack.c.bf16 %v3175_v16, %v3174_v38  ;;  %v2953_v45 = vmax.f32 %v2657_v21, 0.0  ;;  %v2955_v33 = vmax.f32 %v2746_v0, 0.0  ;;  %v3165_v38 = vld [vmem:[%s14539_s12 + $0x4e8] sm:$0xff]  ;;  %v3196_v16 = vld [vmem:[%s14539_s12 + $0x5e0] sm:$0xff] }
 0xed1   :  { %3515 = vmatprep.mubr.f32.mxu1 %v2981_v7  ;;  %3600 = vmatprep.mubr.f32.mxu0 %v2983_v10  ;;  %v12322_v12 = vpop.f32.mrb[37].mxu1  ;;  %v12324_v54 = vpop.f32.mrb[41].mxu0 }
 0xed2   :  { %10039 = vmatpush3.bf16.msra.mxu1 %v10038_v22  ;;  %10071 = vmatpush3.bf16.msra.mxu0 %v10070_v42  ;;  %v3161_v22 = vld [vmem:[%s14539_s12 + $0x4c8] sm:$0xff]  ;;  %v2996_v42 = vmax.f32 %v2495_v1, 0.0  ;;  %v3147_v1 = vld [vmem:[%s14539_s12 + $0x458] sm:$0xff] }
 0xed3   :  { %10041 = vmatprep.subr.bf16.mxu1 %v10040_v40  ;;  %10073 = vmatprep.subr.bf16.mxu0 %v10072_v41  ;;  %v2998_v40 = vmax.f32 %v2584_v52, 0.0  ;;  %v10046_v41 = vpack.c.bf16 %v3143_v18, %v3142_v43  ;;  %v10048_v34 = vpack.c.bf16 %v3161_v22, %v3160_v2  ;;  %v10052_v52 = vpack.c.bf16 %v3163_v17, %v3162_v3  ;;  %v3178_v18 = vld [vmem:[%s14539_s12 + $0x550] sm:$0xff]  ;;  %v3197_v2 = vld [vmem:[%s14539_s12 + $0x5e8] sm:$0xff]  ;;  %v3199_v3 = vld [vmem:[%s14539_s12 + $0x5f8] sm:$0xff] }
 0xed4   :  { %3516 = vmatmul.mubr.f32.gmra.mrb[62].mxu1 %v2980_v59  ;;  %3601 = vmatmul.mubr.f32.gmra.mrb[66].mxu0 %v2982_v61  ;;  %v12348_v30 = vpop.f32.mrb[38].mxu1  ;;  %v12350_v26 = vpop.f32.mrb[42].mxu0  ;;  %v10082_v59 = vpack.c.bf16 %v3177_v49, %v3176_v48  ;;  %v3146_v61 = vld [vmem:[%s14539_s12 + $0x450] sm:$0xff]  ;;  %v3167_v48 = vld [vmem:[%s14539_s12 + $0x4f8] sm:$0xff] }
 0xed5   :  { %3520 = vmatprep.mubr.f32.mxu1 %v2997_v20  ;;  %3605 = vmatprep.mubr.f32.mxu0 %v2999_v63  ;;  %v12361_v36 = vpop.f32.mrb[39].mxu1  ;;  %v12363_v39 = vpop.f32.mrb[43].mxu0  ;;  %v3179_v20 = vld [vmem:[%s14539_s12 + $0x558] sm:$0xff]  ;;  %v3164_v63 = vld [vmem:[%s14539_s12 + $0x4e0] sm:$0xff]  ;;  %v10054_v32 = vpack.c.bf16 %v3147_v1, %v3146_v61  ;;  %v3198_v49 = vld [vmem:[%s14539_s12 + $0x5f0] sm:$0xff] }
 0xed6   :  { %10043 = vmatpush3.bf16.msra.mxu1 %v10042_v13  ;;  %10075 = vmatpush3.bf16.msra.mxu0 %v10074_v11  ;;  %v3195_v13 = vld [vmem:[%s14539_s12 + $0x5d8] sm:$0xff]  ;;  %v3150_v61 = vld [vmem:[%s14539_s12 + $0x470] sm:$0xff] }
 0xed7   :  { %10045 = vmatprep.subr.bf16.mxu1 %v10044_v15  ;;  %10077 = vmatprep.subr.bf16.mxu0 %v10076_v57  ;;  %v10050_v57 = vpack.c.bf16 %v3145_v44, %v3144_v23  ;;  %v10084_v43 = vpack.c.bf16 %v3195_v13, %v3194_v58  ;;  %v10088_v23 = vpack.c.bf16 %v3197_v2, %v3196_v16  ;;  %v3180_v44 = vld [vmem:[%s14539_s12 + $0x560] sm:$0xff]  ;;  %v3151_v1 = vld [vmem:[%s14539_s12 + $0x478] sm:$0xff]  ;;  %v3217_v16 = vld [vmem:[%s14539_s12 + $0x688] sm:$0xff] }
 0xed8   :  { %3521 = vmatmul.mubr.f32.gmra.mrb[64].mxu1 %v2996_v42  ;;  %3606 = vmatmul.mubr.f32.gmra.mrb[68].mxu0 %v2998_v40  ;;  %v12380_v7 = vpop.f32.mrb[40].mxu1  ;;  %v12382_v10 = vpop.f32.mrb[44].mxu0  ;;  %v10086_v42 = vpack.c.bf16 %v3179_v20, %v3178_v18  ;;  %v3148_v40 = vld [vmem:[%s14539_s12 + $0x460] sm:$0xff]  ;;  %v12463_v13 = vrot.slane %v12206_v56, %v11051_v8  ;;  %v10092_v20 = vpack.c.bf16 %v3199_v3, %v3198_v49  ;;  %v3233_v3 = vld [vmem:[%s14539_s12 + $0x708] sm:$0xff] }
 0xed9   :  { %3675 = vmatprep.mubr.f32.mxu1 %v2953_v45  ;;  %3760 = vmatprep.mubr.f32.mxu0 %v2955_v33  ;;  %v12393_v11 = vpop.f32.mrb[41].mxu1  ;;  %v12395_v15 = vpop.f32.mrb[45].mxu0  ;;  %v3181_v45 = vld [vmem:[%s14539_s12 + $0x568] sm:$0xff]  ;;  %v3166_v33 = vld [vmem:[%s14539_s12 + $0x4f0] sm:$0xff]  ;;  %v3232_v49 = vld [vmem:[%s14539_s12 + $0x700] sm:$0xff] }
 0xeda   :  { %10047 = vmatpush3.bf16.msra.mxu1 %v10046_v41  ;;  %10079 = vmatpush3.bf16.msra.mxu0 %v10078_v29  ;;  %v3149_v41 = vld [vmem:[%s14539_s12 + $0x468] sm:$0xff]  ;;  %v10056_v29 = vpack.c.bf16 %v3165_v38, %v3164_v63  ;;  %v10060_v18 = vpack.c.bf16 %v3167_v48, %v3166_v33  ;;  %v3183_v63 = vld [vmem:[%s14539_s12 + $0x578] sm:$0xff]  ;;  %v3216_v38 = vld [vmem:[%s14539_s12 + $0x680] sm:$0xff] }
 0xedb   :  { %10049 = vmatprep.subr.bf16.mxu1 %v10048_v34  ;;  %10081 = vmatprep.subr.bf16.mxu0 %v10080_v28  ;;  %v10096_v48 = vpack.c.bf16 %v3217_v16, %v3216_v38 }
 0xedc   :  { %v12412_v21 = vpop.f32.mrb[42].mxu1  ;;  %v12414_v0 = vpop.f32.mrb[46].mxu0 }
 0xedd   :  { %v12425_v22 = vpop.f32.mrb[43].mxu1  ;;  %v12427_v62 = vpop.f32.mrb[47].mxu0 }
 0xede   :  { %10051 = vmatpush3.bf16.msra.mxu1 %v10050_v57  ;;  %10083 = vmatpush3.bf16.msra.mxu0 %v10082_v59  ;;  %v10058_v57 = vpack.c.bf16 %v3149_v41, %v3148_v40  ;;  %v10090_v59 = vpack.c.bf16 %v3181_v45, %v3180_v44  ;;  %v3249_v40 = vld [vmem:[%s14539_s12 + $0x788] sm:$0xff]  ;;  %v10062_v45 = vpack.c.bf16 %v3151_v1, %v3150_v61  ;;  %v3219_v1 = vld [vmem:[%s14539_s12 + $0x698] sm:$0xff] }
 0xedf   :  { %10053 = vmatprep.subr.bf16.mxu1 %v10052_v52  ;;  %10085 = vmatprep.subr.bf16.mxu0 %v10084_v43  ;;  %v3182_v52 = vld [vmem:[%s14539_s12 + $0x570] sm:$0xff]  ;;  %v12476_v43 = vrot.slane %v12206_v56, %v11875_v25  ;;  %v12509_v44 = vld [vmem:[%s14539_s12 + $0x608] sm:$0xff]  ;;  %v10100_v51 = vpack.c.bf16 %v3219_v1, %v12520_v27  ;;  %v12569_v25 = vld [vmem:[%s14539_s12 + $0x6a0] sm:$0xff] }
 0xee0   :  { %v12444_v34 = vpop.f32.mrb[44].mxu1  ;;  %v12446_v28 = vpop.f32.mrb[48].mxu0  ;;  %v10094_v33 = vpack.c.bf16 %v3183_v63, %v3182_v52  ;;  %v3250_v52 = vld [vmem:[%s14539_s12 + $0x790] sm:$0xff]  ;;  %v3251_v63 = vld [vmem:[%s14539_s12 + $0x798] sm:$0xff] }
 0xee1   :  { %v12457_v17 = vpop.f32.mrb[45].mxu1  ;;  %v12459_v58 = vpop.f32.mrb[49].mxu0  ;;  %v10132_v9 = vpack.c.bf16 %v3251_v63, %v3250_v52  ;;  %v2750_v27 = vadd.f32 %v12318_v60, %v12476_v43  ;;  %v2758_v60 = vadd.f32 %v12363_v39, %v12270_v24  ;;  %v3205_v39 = vld [vmem:[%s14539_s12 + $0x628] sm:$0xff] }
 0xee2   :  { %10055 = vmatpush3.bf16.msra.mxu1 %v10054_v32  ;;  %10087 = vmatpush3.bf16.msra.mxu0 %v10086_v42  ;;  %v3248_v42 = vld [vmem:[%s14539_s12 + $0x780] sm:$0xff] }
 0xee3   :  { %10057 = vmatprep.subr.bf16.mxu1 %v10056_v29  ;;  %10089 = vmatprep.subr.bf16.mxu0 %v10088_v23  ;;  %v12504_v23 = vld [vmem:[%s14539_s12 + $0x600] sm:$0xff]  ;;  %v10128_v61 = vpack.c.bf16 %v3249_v40, %v3248_v42  ;;  %v12552_v40 = vld [vmem:[%s14539_s12 + $0x610] sm:$0xff] }
 0xee4   :  { %v12487_v2 = vpop.f32.mrb[46].mxu1  ;;  %v12489_v32 = vpop.f32.mrb[50].mxu0  ;;  %v10098_v42 = vpack.c.bf16 %v12509_v44, %v12504_v23  ;;  %v3234_v23 = vld [vmem:[%s14539_s12 + $0x710] sm:$0xff]  ;;  %v3235_v44 = vld [vmem:[%s14539_s12 + $0x718] sm:$0xff] }
 0xee5   :  { %v12497_v41 = vpop.f32.mrb[47].mxu1  ;;  %v12499_v29 = vpop.f32.mrb[51].mxu0  ;;  %v10134_v63 = vpack.c.bf16 %v3235_v44, %v3234_v23  ;;  %v2667_v23 = vadd.f32 %v12348_v30, %v12463_v13  ;;  %v3223_v44 = vld [vmem:[%s14539_s12 + $0x6b8] sm:$0xff]  ;;  %v2675_v30 = vadd.f32 %v12393_v11, %v12266_v6 }
 0xee6   :  { %10059 = vmatpush3.bf16.msra.mxu1 %v10058_v57  ;;  %10091 = vmatpush3.bf16.msra.mxu0 %v10090_v59  ;;  %v2655_v57 = vadd.f32 %v12260_v31, %v12463_v13  ;;  %v2744_v59 = vadd.f32 %v12262_v5, %v12476_v43  ;;  %v2663_v31 = vadd.f32 %v12322_v12, %v12266_v6  ;;  %v12557_v12 = vld [vmem:[%s14539_s12 + $0x618] sm:$0xff] }
 0xee7   :  { %10061 = vmatprep.subr.bf16.mxu1 %v10060_v18  ;;  %10093 = vmatprep.subr.bf16.mxu0 %v10092_v20  ;;  %v2752_v5 = vadd.f32 %v12324_v54, %v12270_v24  ;;  %v10130_v54 = vpack.c.bf16 %v3233_v3, %v3232_v49  ;;  %v3221_v49 = vld [vmem:[%s14539_s12 + $0x6a8] sm:$0xff]  ;;  %v3252_v3 = vld [vmem:[%s14539_s12 + $0x7a0] sm:$0xff]  ;;  %v10102_v52 = vpack.c.bf16 %v12557_v12, %v12552_v40  ;;  %v3222_v12 = vld [vmem:[%s14539_s12 + $0x6b0] sm:$0xff] }
 0xee8   :  { %v12539_v18 = vpop.f32.mrb[48].mxu1  ;;  %v12541_v20 = vpop.f32.mrb[52].mxu0  ;;  %v2952_v8 = vmax.f32 %v2655_v57, 0.0  ;;  %v3253_v57 = vld [vmem:[%s14539_s12 + $0x7a8] sm:$0xff] }
 0xee9   :  { %v12543_v38 = vpop.f32.mrb[49].mxu1  ;;  %v12545_v16 = vpop.f32.mrb[53].mxu0  ;;  %v2971_v1 = vmax.f32 %v2752_v5, 0.0  ;;  %v10136_v5 = vpack.c.bf16 %v3253_v57, %v3252_v3  ;;  %v3237_v40 = vld [vmem:[%s14539_s12 + $0x728] sm:$0xff]  ;;  %v2987_v3 = vmax.f32 %v2758_v60, 0.0  ;;  %v10108_v57 = vpack.c.bf16 %v3223_v44, %v3222_v12  ;;  %v3240_v12 = vld [vmem:[%s14539_s12 + $0x740] sm:$0xff] }
 0xeea   :  { %10063 = vmatpush3.bf16.msra.mxu1 %v10062_v45  ;;  %10095 = vmatpush3.bf16.msra.mxu0 %v10094_v33  ;;  %v2954_v45 = vmax.f32 %v2744_v59, 0.0  ;;  %v2661_v33 = vadd.f32 %v12316_v55, %v12463_v13  ;;  %v2969_v59 = vmax.f32 %v2663_v31, 0.0  ;;  %v2669_v55 = vadd.f32 %v12361_v36, %v12266_v6  ;;  %v3204_v36 = vld [vmem:[%s14539_s12 + $0x620] sm:$0xff]  ;;  %v3258_v44 = vld [vmem:[%s14539_s12 + $0x7d0] sm:$0xff] }
 0xeeb   :  { %10097 = vmatprep.subr.bf16.mxu1 %v10096_v48  ;;  %10129 = vmatprep.subr.bf16.mxu0 %v10128_v61  ;;  %v12590_v48 = vrot.slane %v12206_v56, %v12019_v46  ;;  %v12594_v61 = vrot.slane %v12206_v56, %v12022_v50  ;;  %v10104_v31 = vpack.c.bf16 %v3221_v49, %v12569_v25  ;;  %v2970_v50 = vmax.f32 %v2750_v27, 0.0  ;;  %v3254_v49 = vld [vmem:[%s14539_s12 + $0x7b0] sm:$0xff] }
 0xeec   :  { %v2756_v25 = vadd.f32 %v12350_v26, %v12476_v43  ;;  %v2985_v27 = vmax.f32 %v2669_v55, 0.0  ;;  %v2764_v26 = vadd.f32 %v12395_v15, %v12270_v24  ;;  %v2673_v55 = vadd.f32 %v12380_v7, %v12463_v13  ;;  %v3239_v15 = vld [vmem:[%s14539_s12 + $0x738] sm:$0xff]  ;;  %v3224_v13 = vld [vmem:[%s14539_s12 + $0x6c0] sm:$0xff] }
 0xeed   :  { %3676 = vmatmul.mubr.f32.vlgmr.msra.gmra.mrb[66].mxu1 %v2952_v8  ;;  %3761 = vmatmul.mubr.f32.vlgmr.msra.gmra.mrb[70].mxu0 %v2954_v45  ;;  %v3236_v8 = vld [vmem:[%s14539_s12 + $0x720] sm:$0xff]  ;;  %v2968_v45 = vmax.f32 %v2661_v33, 0.0  ;;  %v3255_v33 = vld [vmem:[%s14539_s12 + $0x7b8] sm:$0xff]  ;;  %v2762_v6 = vadd.f32 %v12382_v10, %v12476_v43  ;;  %v2835_v11 = vadd.f32 %v12425_v22, %v12590_v48  ;;  %v2924_v7 = vadd.f32 %v12427_v62, %v12594_v61  ;;  %v3238_v10 = vld [vmem:[%s14539_s12 + $0x730] sm:$0xff] }
 0xeee   :  { %3680 = vmatprep.mubr.f32.mxu1 %v2969_v59  ;;  %3765 = vmatprep.mubr.f32.mxu0 %v2971_v1  ;;  %v10140_v59 = vpack.c.bf16 %v3255_v33, %v3254_v49  ;;  %v2984_v1 = vmax.f32 %v2667_v23, 0.0  ;;  %v2986_v46 = vmax.f32 %v2756_v25, 0.0  ;;  %v3003_v24 = vmax.f32 %v2764_v26, 0.0  ;;  %v3225_v22 = vld [vmem:[%s14539_s12 + $0x6c8] sm:$0xff]  ;;  %v3256_v62 = vld [vmem:[%s14539_s12 + $0x7c0] sm:$0xff]  ;;  %v3226_v23 = vld [vmem:[%s14539_s12 + $0x6d0] sm:$0xff] }
 0xeef   :  { %10099 = vmatpush3.bf16.msra.mxu1 %v10098_v42  ;;  %10131 = vmatpush3.bf16.msra.mxu0 %v10130_v54  ;;  %v10106_v42 = vpack.c.bf16 %v3205_v39, %v3204_v36  ;;  %v10138_v54 = vpack.c.bf16 %v3237_v40, %v3236_v8  ;;  %v3257_v43 = vld [vmem:[%s14539_s12 + $0x7c8] sm:$0xff]  ;;  %v3000_v60 = vmax.f32 %v2673_v55, 0.0  ;;  %v3208_v39 = vld [vmem:[%s14539_s12 + $0x640] sm:$0xff]  ;;  %v10112_v8 = vpack.c.bf16 %v3225_v22, %v3224_v13  ;;  %v3227_v25 = vld [vmem:[%s14539_s12 + $0x6d8] sm:$0xff] }
 0xef0   :  { %10101 = vmatprep.subr.bf16.mxu1 %v10100_v51  ;;  %10133 = vmatprep.subr.bf16.mxu0 %v10132_v9  ;;  %v3206_v9 = vld [vmem:[%s14539_s12 + $0x630] sm:$0xff]  ;;  %v3207_v51 = vld [vmem:[%s14539_s12 + $0x638] sm:$0xff]  ;;  %v10144_v40 = vpack.c.bf16 %v3257_v43, %v3256_v62  ;;  %v10116_v26 = vpack.c.bf16 %v3227_v25, %v3226_v23  ;;  %v3260_v55 = vld [vmem:[%s14539_s12 + $0x7e0] sm:$0xff]  ;;  %v2841_v25 = vadd.f32 %v12457_v17, %v12590_v48 }
 0xef1   :  { %3681 = vmatmul.mubr.f32.gmra.mrb[68].mxu1 %v2968_v45  ;;  %3766 = vmatmul.mubr.f32.gmra.mrb[72].mxu0 %v2970_v50  ;;  %v3001_v50 = vmax.f32 %v2675_v30, 0.0  ;;  %v10110_v36 = vpack.c.bf16 %v3207_v51, %v3206_v9  ;;  %v3241_v45 = vld [vmem:[%s14539_s12 + $0x748] sm:$0xff]  ;;  %v3259_v49 = vld [vmem:[%s14539_s12 + $0x7d8] sm:$0xff]  ;;  %v3230_v13 = vld [vmem:[%s14539_s12 + $0x6f0] sm:$0xff] }
 0xef2   :  { %3685 = vmatprep.mubr.f32.mxu1 %v2985_v27  ;;  %3770 = vmatprep.mubr.f32.mxu0 %v2987_v3  ;;  %v10146_v27 = vpack.c.bf16 %v3241_v45, %v3240_v12  ;;  %v3210_v3 = vld [vmem:[%s14539_s12 + $0x650] sm:$0xff]  ;;  %v3211_v30 = vld [vmem:[%s14539_s12 + $0x658] sm:$0xff] }
 0xef3   :  { %10103 = vmatpush3.bf16.msra.mxu1 %v10102_v52  ;;  %10135 = vmatpush3.bf16.msra.mxu0 %v10134_v63  ;;  %v3002_v52 = vmax.f32 %v2762_v6, 0.0  ;;  %v3209_v63 = vld [vmem:[%s14539_s12 + $0x648] sm:$0xff]  ;;  %v10118_v9 = vpack.c.bf16 %v3211_v30, %v3210_v3  ;;  %v3231_v22 = vld [vmem:[%s14539_s12 + $0x6f8] sm:$0xff]  ;;  %v3262_v62 = vld [vmem:[%s14539_s12 + $0x7f0] sm:$0xff]  ;;  %v2973_v30 = vmax.f32 %v2841_v25, 0.0 }
 0xef4   :  { %10105 = vmatprep.subr.bf16.mxu1 %v10104_v31  ;;  %10137 = vmatprep.subr.bf16.mxu0 %v10136_v5  ;;  %v2957_v31 = vmax.f32 %v2835_v11, 0.0  ;;  %v2959_v5 = vmax.f32 %v2924_v7, 0.0  ;;  %v10114_v33 = vpack.c.bf16 %v3209_v63, %v3208_v39  ;;  %v3261_v6 = vld [vmem:[%s14539_s12 + $0x7e8] sm:$0xff]  ;;  %v3263_v43 = vld [vmem:[%s14539_s12 + $0x7f8] sm:$0xff]  ;;  %v2199_v39 = vrot.slane %v12206_v56, %v12083_v35 }
 0xef5   :  { %3686 = vmatmul.mubr.f32.gmra.mrb[70].mxu1 %v2984_v1  ;;  %3771 = vmatmul.mubr.f32.gmra.mrb[74].mxu0 %v2986_v46  ;;  %v10142_v46 = vpack.c.bf16 %v3239_v15, %v3238_v10  ;;  %v3229_v1 = vld [vmem:[%s14539_s12 + $0x6e8] sm:$0xff]  ;;  %v10152_v7 = vpack.c.bf16 %v3261_v6, %v3260_v55  ;;  %v3244_v10 = vld [vmem:[%s14539_s12 + $0x760] sm:$0xff]  ;;  %v10124_v63 = vpack.c.bf16 %v3231_v22, %v3230_v13 }
 0xef6   :  { %3690 = vmatprep.mubr.f32.mxu1 %v3001_v50  ;;  %3775 = vmatprep.mubr.f32.mxu0 %v3003_v24  ;;  %v3212_v50 = vld [vmem:[%s14539_s12 + $0x660] sm:$0xff]  ;;  %v3213_v24 = vld [vmem:[%s14539_s12 + $0x668] sm:$0xff]  ;;  %v2922_v23 = vadd.f32 %v12414_v0, %v2199_v39  ;;  %v2928_v3 = vadd.f32 %v12446_v28, %v2199_v39  ;;  %v2847_v0 = vadd.f32 %v12497_v41, %v12590_v48 }
 0xef7   :  { %10107 = vmatpush3.bf16.msra.mxu1 %v10106_v42  ;;  %10139 = vmatpush3.bf16.msra.mxu0 %v10138_v54  ;;  %v10148_v42 = vpack.c.bf16 %v3259_v49, %v3258_v44  ;;  %v3242_v54 = vld [vmem:[%s14539_s12 + $0x750] sm:$0xff]  ;;  %v3245_v15 = vld [vmem:[%s14539_s12 + $0x768] sm:$0xff]  ;;  %v2930_v44 = vadd.f32 %v12459_v58, %v12594_v61  ;;  %v2942_v41 = vadd.f32 %v12545_v16, %v12594_v61  ;;  %v8144_v6 = vld [vmem:[%s14541_s13] ss:$0 sm:$0xff] }
 0xef8   :  { %10109 = vmatprep.subr.bf16.mxu1 %v10108_v57  ;;  %10141 = vmatprep.subr.bf16.mxu0 %v10140_v59  ;;  %v3243_v57 = vld [vmem:[%s14539_s12 + $0x758] sm:$0xff]  ;;  %v3228_v59 = vld [vmem:[%s14539_s12 + $0x6e0] sm:$0xff]  ;;  %v2974_v58 = vmax.f32 %v2928_v3, 0.0 }
 0xef9   :  { %3691 = vmatmul.mubr.f32.gmra.mrb[72].mxu1 %v3000_v60  ;;  %3776 = vmatmul.mubr.f32.gmra.mrb[76].mxu0 %v3002_v52  ;;  %v10150_v51 = vpack.c.bf16 %v3243_v57, %v3242_v54  ;;  %v10120_v11 = vpack.c.bf16 %v3229_v1, %v3228_v59  ;;  %v2191_v60 = vrot.slane %v12206_v56, %v12070_v4  ;;  %v2989_v54 = vmax.f32 %v2847_v0, 0.0 }
 0xefa   :  { %3845 = vmatprep.mubr.f32.mxu1 %v2957_v31  ;;  %3930 = vmatprep.mubr.f32.mxu0 %v2959_v5  ;;  %v10122_v52 = vpack.c.bf16 %v3213_v24, %v3212_v50  ;;  %v10156_v31 = vpack.c.bf16 %v3263_v43, %v3262_v62  ;;  %v3215_v5 = vld [vmem:[%s14539_s12 + $0x678] sm:$0xff]  ;;  %v2853_v57 = vadd.f32 %v12543_v38, %v12590_v48 }
 0xefb   :  { %10111 = vmatpush3.bf16.msra.mxu1 %v10110_v36  ;;  %10143 = vmatpush3.bf16.msra.mxu0 %v10142_v46  ;;  %v10154_v36 = vpack.c.bf16 %v3245_v15, %v3244_v10  ;;  %v3214_v46 = vld [vmem:[%s14539_s12 + $0x670] sm:$0xff]  ;;  %v2833_v45 = vadd.f32 %v12412_v21, %v2191_v60  ;;  %v2975_v21 = vmax.f32 %v2930_v44, 0.0  ;;  %v2851_v1 = vadd.f32 %v12539_v18, %v2191_v60 }
 0xefc   :  { %10113 = vmatprep.subr.bf16.mxu1 %v10112_v8  ;;  %10145 = vmatprep.subr.bf16.mxu0 %v10144_v40  ;;  %v3246_v8 = vld [vmem:[%s14539_s12 + $0x770] sm:$0xff]  ;;  %v3247_v40 = vld [vmem:[%s14539_s12 + $0x778] sm:$0xff]  ;;  %v10126_v12 = vpack.c.bf16 %v3215_v5, %v3214_v46  ;;  %v3005_v55 = vmax.f32 %v2853_v57, 0.0 }
 0xefd   :  { %v10158_v56 = vpack.c.bf16 %v3247_v40, %v3246_v8  ;;  %v2956_v49 = vmax.f32 %v2833_v45, 0.0  ;;  %v3004_v38 = vmax.f32 %v2851_v1, 0.0 }
 0xeff   :  { %10115 = vmatpush3.bf16.msra.mxu1 %v10114_v33  ;;  %10147 = vmatpush3.bf16.msra.mxu0 %v10146_v27  ;;  %v2958_v33 = vmax.f32 %v2922_v23, 0.0  ;;  %v2839_v27 = vadd.f32 %v12444_v34, %v2191_v60  ;;  %v2934_v34 = vadd.f32 %v12489_v32, %v2199_v39  ;;  %v3007_v32 = vmax.f32 %v2942_v41, 0.0 }
 0xf00   :  { %10117 = vmatprep.subr.bf16.mxu1 %v10116_v26  ;;  %10149 = vmatprep.subr.bf16.mxu0 %v10148_v42  ;;  %v2936_v26 = vadd.f32 %v12499_v29, %v12594_v61  ;;  %v2845_v42 = vadd.f32 %v12487_v2, %v2191_v60  ;;  %v2940_v2 = vadd.f32 %v12541_v20, %v2199_v39 }
 0xf01   :  { %v2972_v17 = vmax.f32 %v2839_v27, 0.0  ;;  %v2990_v59 = vmax.f32 %v2934_v34, 0.0 }
 0xf02   :  { %v2991_v28 = vmax.f32 %v2936_v26, 0.0  ;;  %v2988_v29 = vmax.f32 %v2845_v42, 0.0  ;;  %v3006_v48 = vmax.f32 %v2940_v2, 0.0 }
 0xf03   :  { %10119 = vmatpush3.bf16.msra.mxu1 %v10118_v9  ;;  %10151 = vmatpush3.bf16.msra.mxu0 %v10150_v51 }
 0xf04   :  { %10121 = vmatprep.subr.bf16.mxu1 %v10120_v11  ;;  %10153 = vmatprep.subr.bf16.mxu0 %v10152_v7 }
 0xf07   :  { %10123 = vmatpush3.bf16.msra.mxu1 %v10122_v52  ;;  %10155 = vmatpush3.bf16.msra.mxu0 %v10154_v36 }
 0xf08   :  { %10125 = vmatprep.subr.bf16.mxu1 %v10124_v63  ;;  %10157 = vmatprep.subr.bf16.mxu0 %v10156_v31 }
 0xf0b   :  { %10127 = vmatpush3.bf16.msra.mxu1 %v10126_v12  ;;  %10159 = vmatpush3.bf16.msra.mxu0 %v10158_v56 }
 0xf0e   :  { %3846 = vmatmul.mubr.f32.vlgmr.msra.gmra.mrb[74].mxu1 %v2956_v49  ;;  %3931 = vmatmul.mubr.f32.vlgmr.msra.gmra.mrb[78].mxu0 %v2958_v33 }
 0xf0f   :  { %3850 = vmatprep.mubr.f32.mxu1 %v2973_v30  ;;  %3935 = vmatprep.mubr.f32.mxu0 %v2975_v21 }
 0xf12   :  { %3851 = vmatmul.mubr.f32.gmra.mrb[76].mxu1 %v2972_v17  ;;  %3936 = vmatmul.mubr.f32.gmra.mrb[80].mxu0 %v2974_v58 }
 0xf13   :  { %3855 = vmatprep.mubr.f32.mxu1 %v2989_v54  ;;  %3940 = vmatprep.mubr.f32.mxu0 %v2991_v28 }
 0xf16   :  { %3856 = vmatmul.mubr.f32.gmra.mrb[78].mxu1 %v2988_v29  ;;  %3941 = vmatmul.mubr.f32.gmra.mrb[82].mxu0 %v2990_v59 }
 0xf17   :  { %3860 = vmatprep.mubr.f32.mxu1 %v3005_v55  ;;  %3945 = vmatprep.mubr.f32.mxu0 %v3007_v32 }
 0xf1a   :  { %3861 = vmatmul.mubr.f32.gmra.mrb[80].mxu1 %v3004_v38  ;;  %3946 = vmatmul.mubr.f32.gmra.mrb[84].mxu0 %v3006_v48 }
 0xf7f   :  { %v8696_v16 = vpop.f32.mrb[50].mxu1  ;;  %v8740_v61 = vpop.f32.mrb[54].mxu0 }
 0xf80   :  { %v8697_v9 = vpop.f32.mrb[51].mxu1  ;;  %v8741_v18 = vpop.f32.mrb[55].mxu0 }
 0xf81   :  { %v8698_v51 = vadd.f32 %v8697_v9, %v8696_v16  ;;  %v8742_v20 = vadd.f32 %v8741_v18, %v8740_v61 }
 0xf83   :  { %v3338_v50 = vadd.f32 %v8698_v51, %v8144_v6  ;;  %v8699_v24 = vpop.f32.mrb[52].mxu1  ;;  %v8743_v11 = vpop.f32.mrb[56].mxu0 }
 0xf84   :  { %v8700_v7 = vpop.f32.mrb[53].mxu1  ;;  %v8744_v10 = vpop.f32.mrb[57].mxu0 }
 0xf85   :  { %v3423_v15 = vadd.f32 %v8742_v20, %v3338_v50  ;;  %v8701_v13 = vadd.f32 %v8700_v7, %v8699_v24  ;;  %v8745_v22 = vadd.f32 %v8744_v10, %v8743_v11 }
 0xf87   :  { %v3343_v62 = vadd.f32 %v8701_v13, %v8144_v6 }
 0xf89   :  { %v3428_v43 = vadd.f32 %v8745_v22, %v3343_v62 }
 0xf8f   :  { %v8702_v60 = vpop.f32.mrb[54].mxu1  ;;  %v8746_v52 = vpop.f32.mrb[58].mxu0 }
 0xf90   :  { %v8703_v36 = vpop.f32.mrb[55].mxu1  ;;  %v8747_v46 = vpop.f32.mrb[59].mxu0 }
 0xf91   :  { %v8704_v39 = vadd.f32 %v8703_v36, %v8702_v60  ;;  %v8748_v63 = vadd.f32 %v8747_v46, %v8746_v52 }
 0xf93   :  { %v3348_v31 = vadd.f32 %v8704_v39, %v8144_v6  ;;  %v8705_v5 = vpop.f32.mrb[56].mxu1  ;;  %v8749_v8 = vpop.f32.mrb[60].mxu0 }
 0xf94   :  { %v8706_v40 = vpop.f32.mrb[57].mxu1  ;;  %v8750_v12 = vpop.f32.mrb[61].mxu0 }
 0xf95   :  { %v3433_v56 = vadd.f32 %v8748_v63, %v3348_v31  ;;  %v8707_v45 = vadd.f32 %v8706_v40, %v8705_v5  ;;  %v8751_v23 = vadd.f32 %v8750_v12, %v8749_v8 }
 0xf97   :  { %v3353_v25 = vadd.f32 %v8707_v45, %v8144_v6 }
 0xf99   :  { %v3438_v44 = vadd.f32 %v8751_v23, %v3353_v25 }
 0xf9f   :  { %v8784_v49 = vpop.f32.mrb[58].mxu1  ;;  %v8828_v33 = vpop.f32.mrb[62].mxu0 }
 0xfa0   :  { %v8785_v27 = vpop.f32.mrb[59].mxu1  ;;  %v8829_v3 = vpop.f32.mrb[63].mxu0 }
 0xfa1   :  { %v8786_v30 = vadd.f32 %v8785_v27, %v8784_v49  ;;  %v8830_v21 = vadd.f32 %v8829_v3, %v8828_v33 }
 0xfa3   :  { %v3508_v0 = vadd.f32 %v8786_v30, %v3423_v15  ;;  %v8787_v26 = vpop.f32.mrb[60].mxu1  ;;  %v8831_v17 = vpop.f32.mrb[64].mxu0 }
 0xfa4   :  { %v8788_v58 = vpop.f32.mrb[61].mxu1  ;;  %v8832_v42 = vpop.f32.mrb[65].mxu0 }
 0xfa5   :  { %v3593_v34 = vadd.f32 %v8830_v21, %v3508_v0  ;;  %v8789_v54 = vadd.f32 %v8788_v58, %v8787_v26  ;;  %v8833_v28 = vadd.f32 %v8832_v42, %v8831_v17 }
 0xfa7   :  { %v3513_v57 = vadd.f32 %v8789_v54, %v3428_v43  ;;  %v8790_v41 = vpop.f32.mrb[62].mxu1  ;;  %v8834_v29 = vpop.f32.mrb[66].mxu0 }
 0xfa8   :  { %v8791_v59 = vpop.f32.mrb[63].mxu1  ;;  %v8835_v1 = vpop.f32.mrb[67].mxu0 }
 0xfa9   :  { %v3598_v2 = vadd.f32 %v8833_v28, %v3513_v57  ;;  %v8792_v55 = vadd.f32 %v8791_v59, %v8790_v41  ;;  %v8836_v32 = vadd.f32 %v8835_v1, %v8834_v29 }
 0xfab   :  { %v3518_v38 = vadd.f32 %v8792_v55, %v3433_v56  ;;  %v8793_v48 = vpop.f32.mrb[64].mxu1  ;;  %v8837_v16 = vpop.f32.mrb[68].mxu0 }
 0xfac   :  { %v8794_v61 = vpop.f32.mrb[65].mxu1  ;;  %v8838_v6 = vpop.f32.mrb[69].mxu0 }
 0xfad   :  { %v3603_v9 = vadd.f32 %v8836_v32, %v3518_v38  ;;  %v8795_v18 = vadd.f32 %v8794_v61, %v8793_v48  ;;  %v8839_v51 = vadd.f32 %v8838_v6, %v8837_v16 }
 0xfaf   :  { %v3523_v20 = vadd.f32 %v8795_v18, %v3438_v44 }
 0xfb1   :  { %v3608_v50 = vadd.f32 %v8839_v51, %v3523_v20 }
 0xfc0   :  { %v8872_v24 = vpop.f32.mrb[66].mxu1  ;;  %v8916_v11 = vpop.f32.mrb[70].mxu0 }
 0xfc1   :  { %v8873_v7 = vpop.f32.mrb[67].mxu1  ;;  %v8917_v10 = vpop.f32.mrb[71].mxu0 }
 0xfc2   :  { %v8874_v15 = vadd.f32 %v8873_v7, %v8872_v24  ;;  %v8918_v13 = vadd.f32 %v8917_v10, %v8916_v11 }
 0xfc4   :  { %v3678_v22 = vadd.f32 %v8874_v15, %v3593_v34  ;;  %v8875_v62 = vpop.f32.mrb[68].mxu1  ;;  %v8919_v43 = vpop.f32.mrb[72].mxu0 }
 0xfc5   :  { %v8876_v60 = vpop.f32.mrb[69].mxu1  ;;  %v8920_v52 = vpop.f32.mrb[73].mxu0 }
 0xfc6   :  { %v3763_v36 = vadd.f32 %v8918_v13, %v3678_v22  ;;  %v8877_v46 = vadd.f32 %v8876_v60, %v8875_v62  ;;  %v8921_v39 = vadd.f32 %v8920_v52, %v8919_v43 }
 0xfc8   :  { %v3683_v63 = vadd.f32 %v8877_v46, %v3598_v2  ;;  %v8878_v31 = vpop.f32.mrb[70].mxu1  ;;  %v8922_v5 = vpop.f32.mrb[74].mxu0 }
 0xfc9   :  { %v8879_v8 = vpop.f32.mrb[71].mxu1  ;;  %v8923_v40 = vpop.f32.mrb[75].mxu0 }
 0xfca   :  { %v3768_v12 = vadd.f32 %v8921_v39, %v3683_v63  ;;  %v8880_v56 = vadd.f32 %v8879_v8, %v8878_v31  ;;  %v8924_v45 = vadd.f32 %v8923_v40, %v8922_v5 }
 0xfcc   :  { %v3688_v23 = vadd.f32 %v8880_v56, %v3603_v9  ;;  %v8881_v25 = vpop.f32.mrb[72].mxu1  ;;  %v8925_v44 = vpop.f32.mrb[76].mxu0 }
 0xfcd   :  { %v8882_v49 = vpop.f32.mrb[73].mxu1  ;;  %v8926_v33 = vpop.f32.mrb[77].mxu0 }
 0xfce   :  { %v3773_v27 = vadd.f32 %v8924_v45, %v3688_v23  ;;  %v8883_v3 = vadd.f32 %v8882_v49, %v8881_v25  ;;  %v8927_v30 = vadd.f32 %v8926_v33, %v8925_v44 }
 0xfd0   :  { %v3693_v21 = vadd.f32 %v8883_v3, %v3608_v50 }
 0xfd2   :  { %v3778_v0 = vadd.f32 %v8927_v30, %v3693_v21 }
 0xfe1   :  { %v8960_v26 = vpop.f32.mrb[74].mxu1  ;;  %v9004_v17 = vpop.f32.mrb[78].mxu0 }
 0xfe2   :  { %v8961_v58 = vpop.f32.mrb[75].mxu1  ;;  %v9005_v42 = vpop.f32.mrb[79].mxu0 }
 0xfe3   :  { %v8962_v34 = vadd.f32 %v8961_v58, %v8960_v26  ;;  %v9006_v54 = vadd.f32 %v9005_v42, %v9004_v17  ;;  %v8148_v26 = vld [vmem:[%s14586_s29 + $0x28] sm:$0xff]  ;;  %v8149_v58 = vld [vmem:[%s14586_s29 + $0x30] sm:$0xff]  ;;  %v8150_v42 = vld [vmem:[%s14586_s29 + $0x38] sm:$0xff] }
 0xfe5   :  { %v3848_v28 = vadd.f32 %v8962_v34, %v3763_v36  ;;  %v8963_v57 = vpop.f32.mrb[76].mxu1  ;;  %v9007_v41 = vpop.f32.mrb[80].mxu0  ;;  %v10164_v34 = vpack.c.bf16 %v8150_v42, %v8149_v58 }
 0xfe6   :  { %v8964_v29 = vpop.f32.mrb[77].mxu1  ;;  %v9008_v59 = vpop.f32.mrb[81].mxu0 }
 0xfe7   :  { %v3933_v1 = vadd.f32 %v9006_v54, %v3848_v28  ;;  %v8965_v2 = vadd.f32 %v8964_v29, %v8963_v57  ;;  %v9009_v55 = vadd.f32 %v9008_v59, %v9007_v41 }
 0xfe9   :  { %v3853_v32 = vadd.f32 %v8965_v2, %v3768_v12  ;;  %v8966_v38 = vpop.f32.mrb[78].mxu1  ;;  %v9010_v48 = vpop.f32.mrb[82].mxu0  ;;  %v3951_v16 = vadd.f32 %v3933_v1, %v11458_v53 }
 0xfea   :  { %v8967_v61 = vpop.f32.mrb[79].mxu1  ;;  %v9011_v6 = vpop.f32.mrb[83].mxu0 }
 0xfeb   :  { %v3938_v9 = vadd.f32 %v9009_v55, %v3853_v32  ;;  %v8968_v18 = vadd.f32 %v8967_v61, %v8966_v38  ;;  %v9012_v51 = vadd.f32 %v9011_v6, %v9010_v48  ;;  %v3955_v20 = vsel %vm120_vm0, %v3951_v16, 0.0  ;;  %v8145_v61 = vld [vmem:[%s14542_s14] ss:$0 sm:$0xff] }
 0xfec   :  { %3956 = vadd.xlane.f32.xlu1 %v3955_v20 }
 0xfed   :  { %v3858_v50 = vadd.f32 %v8968_v18, %v3773_v27  ;;  %v8969_v24 = vpop.f32.mrb[80].mxu1  ;;  %v9013_v11 = vpop.f32.mrb[84].mxu0  ;;  %v3952_v7 = vadd.f32 %v3938_v9, %v11490_v14  ;;  %v8146_v9 = vld [vmem:[%s14543_s15] ss:$0 sm:$0xff] }
 0xfee   :  { %v8970_v10 = vpop.f32.mrb[81].mxu1  ;;  %v9014_v15 = vpop.f32.mrb[85].mxu0 }
 0xfef   :  { %v3943_v13 = vadd.f32 %v9012_v51, %v3858_v50  ;;  %v8971_v22 = vadd.f32 %v8970_v10, %v8969_v24  ;;  %v9015_v62 = vadd.f32 %v9014_v15, %v9013_v11  ;;  %v3958_v53 = vsel %vm120_vm0, %v3952_v7, 0.0 }
 0xff0   :  { %3959 = vadd.xlane.f32.xlu0 %v3958_v53 }
 0xff1   :  { %v3863_v43 = vadd.f32 %v8971_v22, %v3778_v0  ;;  %v3953_v60 = vadd.f32 %v3943_v13, %v11499_v19  ;;  %v8147_v0 = vld [vmem:[%s14586_s29 + $0x20] sm:$0xff] }
 0xff2   :  { %v10160_v17 = vpack.c.bf16 %v8148_v26, %v8147_v0 }
 0xff3   :  { %v3948_v52 = vadd.f32 %v9015_v62, %v3863_v43  ;;  %v3961_v36 = vsel %vm120_vm0, %v3953_v60, 0.0 }
 0xff4   :  { %3962 = vadd.xlane.f32.xlu1 %v3961_v36  ;;  %10161 = vmatprep.subr.bf16.mxu1 %v10160_v17 }
 0xff5   :  { %v3954_v46 = vadd.f32 %v3948_v52, %v11508_v37  ;;  %10163 = vmatpush3.bf16.msra.mxu1 %v10160_v17 }
 0xff6   :  { %10165 = vmatprep.subr.bf16.mxu1 %v10164_v34 }
 0xff7   :  { %v3964_v39 = vsel %vm120_vm0, %v3954_v46, 0.0 }
 0xff8   :  { %3965 = vadd.xlane.f32.xlu0 %v3964_v39 }
 0xff9   :  { %10167 = vmatpush3.bf16.msra.mxu1 %v10164_v34 }
0x1079   :  { %v3957_v14 = vpop.xlane.xlu1 %3956 }
0x107a   :  { %v3967_v63 = vmul.f32 0.03125, %v3957_v14 }
0x107c   :  { %v3971_v31 = vsub.f32 %v3951_v16, %v3967_v63 }
0x107d   :  { %v3960_v5 = vpop.xlane.xlu0 %3959 }
0x107e   :  { %v3968_v8 = vmul.f32 0.03125, %v3960_v5  ;;  %v3975_v40 = vmul.f32 %v3971_v31, %v3971_v31 }
0x1080   :  { %v3972_v12 = vsub.f32 %v3952_v7, %v3968_v8  ;;  %v3979_v56 = vsel %vm120_vm0, %v3975_v40, 0.0 }
0x1081   :  { %3980 = vadd.xlane.f32.xlu1 %v3979_v56  ;;  %v3963_v19 = vpop.xlane.xlu1 %3962 }
0x1082   :  { %v3969_v45 = vmul.f32 0.03125, %v3963_v19  ;;  %v3976_v23 = vmul.f32 %v3972_v12, %v3972_v12 }
0x1084   :  { %v3973_v25 = vsub.f32 %v3953_v60, %v3969_v45  ;;  %v3982_v44 = vsel %vm120_vm0, %v3976_v23, 0.0  ;;  %v8152_v60 = vld [vmem:[%s14533_s5 + $0x1] ss:$0 sm:$0xff]  ;;  %s14597_s5 = smov 56  }
0x1085   :  { %3983 = vadd.xlane.f32.xlu0 %v3982_v44  ;;  %v3966_v37 = vpop.xlane.xlu0 %3965 }
0x1086   :  { %v3970_v49 = vmul.f32 0.03125, %v3966_v37  ;;  %v3977_v33 = vmul.f32 %v3973_v25, %v3973_v25 }
0x1088   :  { %v3974_v27 = vsub.f32 %v3954_v46, %v3970_v49  ;;  %v3985_v3 = vsel %vm120_vm0, %v3977_v33, 0.0 }
0x1089   :  { %3986 = vadd.xlane.f32.xlu1 %v3985_v3 }
0x108a   :  { %v3978_v30 = vmul.f32 %v3974_v27, %v3974_v27 }
0x108c   :  { %v3988_v21 = vsel %vm120_vm0, %v3978_v30, 0.0 }
0x108d   :  { %3989 = vadd.xlane.f32.xlu0 %v3988_v21 }
0x110e   :  { %v3981_v54 = vpop.xlane.xlu1 %3980 }
0x110f   :  { %v3991_v28 = vmul.f32 0.03125, %v3981_v54 }
0x1111   :  { %v3995_v57 = vadd.f32 1e-05, %v3991_v28 }
0x1112   :  { %v3984_v41 = vpop.xlane.xlu0 %3983 }
0x1113   :  { %10833 = vrsqrt.f32 %v3995_v57  ;;  %v3992_v29 = vmul.f32 0.03125, %v3984_v41 }
0x1115   :  { %v3996_v59 = vadd.f32 1e-05, %v3992_v29 }
0x1116   :  { %v3987_v1 = vpop.xlane.xlu1 %3986 }
0x1117   :  { %10835 = vrsqrt.f32 %v3996_v59  ;;  %v3993_v2 = vmul.f32 0.03125, %v3987_v1 }
0x1119   :  { %v3997_v55 = vadd.f32 1e-05, %v3993_v2 }
0x111a   :  { %v3990_v32 = vpop.xlane.xlu0 %3989 }
0x111b   :  { %10837 = vrsqrt.f32 %v3997_v55  ;;  %v3994_v38 = vmul.f32 0.03125, %v3990_v32 }
0x111d   :  { %v10834_v48 = vpop.eup %10833  ;;  %v3998_v16 = vadd.f32 1e-05, %v3994_v38 }
0x111e   :  { %v4003_v6 = vmul.f32 %v10834_v48, %v3971_v31 }
0x111f   :  { %10839 = vrsqrt.f32 %v3998_v16 }
0x1120   :  { %v4014_v18 = vmul.f32 %v8145_v61, %v4003_v6 }
0x1121   :  { %v10836_v51 = vpop.eup %10835 }
0x1122   :  { %v4004_v20 = vmul.f32 %v10836_v51, %v3972_v12  ;;  %v12804_v50 = vadd.f32 %v8146_v9, %v4014_v18 }
0x1124   :  { %v4015_v24 = vmul.f32 %v8145_v61, %v4004_v20  ;;  %9601 = vmatprep.mubr.msk.f32.mxu1 %vm120_vm0, %v12804_v50 }
0x1125   :  { %v10838_v11 = vpop.eup %10837 }
0x1126   :  { %v12808_v7 = vadd.f32 %v8146_v9, %v4015_v24  ;;  %v4005_v10 = vmul.f32 %v10838_v11, %v3973_v25 }
0x1128   :  { %9602 = vmatmul.mubr.msk.f32.vlgmr.msra.gmra.mrb[82].mxu1 %vm120_vm0, %v12808_v7  ;;  %v4016_v15 = vmul.f32 %v8145_v61, %v4005_v10 }
0x1129   :  { %v10840_v13 = vpop.eup %10839 }
0x112a   :  { %v12812_v22 = vadd.f32 %v8146_v9, %v4016_v15  ;;  %v4006_v62 = vmul.f32 %v10840_v13, %v3974_v27 }
0x112c   :  { %9604 = vmatprep.mubr.msk.f32.mxu1 %vm120_vm0, %v12812_v22  ;;  %v4017_v53 = vmul.f32 %v8145_v61, %v4006_v62 }
0x112e   :  { %v12816_v43 = vadd.f32 %v8146_v9, %v4017_v53 }
0x1130   :  { %9605 = vmatmul.mubr.msk.f32.gmra.mrb[84].mxu1 %vm120_vm0, %v12816_v43 }
0x11fb   :  { %v9603_v52 = vpop.f32.mrb[82].mxu1 }
0x11fc   :  { %v4126_v36 = vadd.f32 %v9603_v52, %v8152_v60  ;;  %v4120_v46 = vpop.f32.mrb[83].mxu1 }
0x11fd   :  { %v4121_v39 = vadd.f32 %v8152_v60, %v4120_v46 }
0x11fe   :  { %v12843_v27 = vmul.f32 0.35355338, %v4126_v36 }
0x11ff   :  { %v12823_v14 = vpack.i.bf16 %v4126_v36, %v4121_v39  ;;  %v12825_v63 = vmul.f32 0.35355338, %v4121_v39 }
0x1201   :  { %10682 = vrot.lane.b32.xlu1 %v12823_v14, %s10921_s20  ;;  %9611 = vmatprep.mubr.msk.f32.mxu0 %vm228_vm1, %v12825_v63 }
0x1203   :  { %v9606_v31 = vpop.f32.mrb[84].mxu1 }
0x1204   :  { %v4136_v5 = vadd.f32 %v9606_v31, %v8152_v60  ;;  %v4130_v8 = vpop.f32.mrb[85].mxu1 }
0x1205   :  { %v4131_v40 = vadd.f32 %v8152_v60, %v4130_v8 }
0x1206   :  { %v12851_v3 = vmul.f32 0.35355338, %v4136_v5 }
0x1207   :  { %v12831_v12 = vpack.i.bf16 %v4136_v5, %v4131_v40  ;;  %v12833_v56 = vmul.f32 0.35355338, %v4131_v40 }
0x1209   :  { %10687 = vrot.lane.b32.xlu0 %v12831_v12, %s10921_s20  ;;  %9618 = vmatprep.mubr.msk.f32.mxu1 %vm228_vm1, %v12833_v56  ;;  %s14598_s20 = smov 112  }
0x1273   :  { %v10683_v19 = vpop.permute.xlu1 %10682 }
0x1274   :  { %v10685_v45 = vunpack.i.h.bf16 %v10683_v19  ;;  %v10684_v23 = vunpack.i.l.bf16 %v10683_v19 }
0x1276   :  { %v10168_v25 = vpack.c.bf16 %v10685_v45, %v10684_v23 }
0x1278   :  { %10170 = vmatprep.subr.msk.bf16.mxu0 %vm11107_vm2, %v10168_v25 }
0x1279   :  { %10173 = vmatpush3.bf16.xpose.msk.msra.mxu0 %vm11107_vm2, %v10168_v25 }
0x127b   :  { %v10688_v44 = vpop.permute.xlu0 %10687 }
0x127c   :  { %v10690_v37 = vunpack.i.h.bf16 %v10688_v44  ;;  %v10689_v49 = vunpack.i.l.bf16 %v10688_v44 }
0x127e   :  { %v10174_v33 = vpack.c.bf16 %v10690_v37, %v10689_v49 }
0x1280   :  { %9612 = vmatmul.mubr.msk.f32.vlgmr.msra.gmra.mrb[86].mxu0 %vm228_vm1, %v12843_v27  ;;  %10176 = vmatprep.subr.msk.bf16.mxu1 %vm11107_vm2, %v10174_v33 }
0x1281   :  { %10179 = vmatpush3.bf16.xpose.msk.msra.mxu1 %vm11107_vm2, %v10174_v33 }
0x1288   :  { %9619 = vmatmul.mubr.msk.f32.vlgmr.msra.gmra.mrb[86].mxu1 %vm228_vm1, %v12851_v3 }
0x1353   :  { %v9613_v30 = vpop.f32.mrb[86].mxu0 }
0x1354   :  { %v4225_v21 = vpop.f32.mrb[87].mxu0  ;;  %v4328_v0 = vsel %vm405_vm3, %v9613_v30, -inf }
0x1355   :  { %4329 = vmax.xlane.f32.xlu0 %v4328_v0  ;;  %v4325_v26 = vsel %vm405_vm3, %v4225_v21, -inf }
0x1356   :  { %4326 = vmax.xlane.f32.xlu1 %v4325_v26 }
0x135b   :  { %v9620_v17 = vpop.f32.mrb[86].mxu1 }
0x135c   :  { %v4316_v58 = vpop.f32.mrb[87].mxu1  ;;  %v4334_v42 = vsel %vm405_vm3, %v9620_v17, -inf }
0x135d   :  { %4335 = vmax.xlane.f32.xlu0 %v4334_v42  ;;  %v4331_v34 = vsel %vm405_vm3, %v4316_v58, -inf }
0x135e   :  { %4332 = vmax.xlane.f32.xlu1 %v4331_v34 }
0x136f   :  { %10692 = vrot.lane.b32.xlu1 %v12823_v14, %s10924_s1 }
0x13e2   :  { %v4330_v54 = vpop.xlane.xlu0 %4329 }
0x13e3   :  { %v4338_v28 = vsub.f32 %v9613_v30, %v4330_v54  ;;  %v4327_v57 = vpop.xlane.xlu1 %4326 }
0x13e4   :  { %v4337_v41 = vsub.f32 %v4225_v21, %v4327_v57 }
0x13e5   :  { %v4343_v29 = vmul.f32 1.442695, %v4338_v28 }
0x13e6   :  { %v4341_v59 = vmul.f32 1.442695, %v4337_v41 }
0x13e7   :  { %10841 = vpow2.f32 %v4343_v29 }
0x13e8   :  { %10843 = vpow2.f32 %v4341_v59 }
0x13ea   :  { %v4336_v1 = vpop.xlane.xlu0 %4335 }
0x13eb   :  { %v4340_v2 = vsub.f32 %v9620_v17, %v4336_v1  ;;  %v4333_v55 = vpop.xlane.xlu1 %4332 }
0x13ec   :  { %v4339_v32 = vsub.f32 %v4316_v58, %v4333_v55 }
0x13ed   :  { %v4347_v38 = vmul.f32 1.442695, %v4340_v2 }
0x13ee   :  { %v4345_v48 = vmul.f32 1.442695, %v4339_v32 }
0x13ef   :  { %10845 = vpow2.f32 %v4347_v38  ;;  %v10693_v16 = vpop.permute.xlu1 %10692 }
0x13f0   :  { %v10695_v61 = vunpack.i.h.bf16 %v10693_v16  ;;  %v10694_v6 = vunpack.i.l.bf16 %v10693_v16  ;;  %10847 = vpow2.f32 %v4345_v48 }
0x13f1   :  { %v10842_v9 = vpop.eup %10841 }
0x13f2   :  { %v10844_v18 = vpop.eup %10843  ;;  %v10180_v51 = vpack.c.bf16 %v10695_v61, %v10694_v6  ;;  %v4352_v20 = vsel %vm405_vm3, %v10842_v9, 0.0 }
0x13f3   :  { %4353 = vadd.xlane.f32.xlu0 %v4352_v20  ;;  %v4349_v24 = vsel %vm405_vm3, %v10844_v18, 0.0 }
0x13f4   :  { %4350 = vadd.xlane.f32.xlu1 %v4349_v24  ;;  %10181 = vmatprep.subr.bf16.mxu0 %v10180_v51 }
0x13f5   :  { %10183 = vmatpush3.bf16.msra.mxu0 %v10180_v51 }
0x13f9   :  { %v10846_v11 = vpop.eup %10845 }
0x13fa   :  { %v4358_v10 = vsel %vm405_vm3, %v10846_v11, 0.0  ;;  %v10848_v15 = vpop.eup %10847 }
0x13fb   :  { %4359 = vadd.xlane.f32.xlu0 %v4358_v10  ;;  %v4355_v13 = vsel %vm405_vm3, %v10848_v15, 0.0 }
0x13ff   :  { %4356 = vadd.xlane.f32.xlu0 %v4355_v13 }
0x1405   :  { %4543 = vrot.lane.b32.xlu1 %v12825_v63, %s10923_s22 }
0x1409   :  { %4545 = vrot.lane.b32.xlu1 %v12843_v27, %s10923_s22 }
0x140d   :  { %10702 = vrot.lane.b32.xlu1 %v12831_v12, %s10924_s1  ;;  %s14601_s1 = smov 104  }
0x1411   :  { %10707 = vrot.lane.b32.xlu1 %v12831_v12, %s10922_s21 }
0x1415   :  { %4636 = vrot.lane.b32.xlu1 %v12851_v3, %s10923_s22  ;;  %10697 = vrot.lane.b32.xlu0 %v12823_v14, %s10922_s21  ;;  %s14599_s21 = smov 80  }
0x1419   :  { %4634 = vrot.lane.b32.xlu0 %v12833_v56, %s10923_s22  ;;  %s14600_s22 = smov 48  }
0x1480   :  { %v4354_v62 = vpop.xlane.xlu0 %4353 }
0x1481   :  { %10849 = vrcp.f32 %v4354_v62  ;;  %v4351_v53 = vpop.xlane.xlu1 %4350 }
0x1482   :  { %10851 = vrcp.f32 %v4351_v53 }
0x1485   :  { %v4544_v60 = vpop.permute.xlu1 %4543 }
0x1488   :  { %v4360_v52 = vpop.xlane.xlu0 %4359 }
0x1489   :  { %v4546_v36 = vpop.permute.xlu1 %4545  ;;  %10853 = vrcp.f32 %v4360_v52 }
0x148b   :  { %v10850_v46 = vpop.eup %10849 }
0x148c   :  { %v10852_v39 = vpop.eup %10851  ;;  %v4357_v31 = vpop.xlane.xlu0 %4356  ;;  %v4366_v40 = vmul.f32 %v10850_v46, %v10842_v9 }
0x148d   :  { %10855 = vrcp.f32 %v4357_v31  ;;  %v10703_v5 = vpop.permute.xlu1 %10702  ;;  %v4365_v8 = vmul.f32 %v10852_v39, %v10844_v18 }
0x148e   :  { %v10705_v19 = vunpack.i.h.bf16 %v10703_v5  ;;  %v10704_v45 = vunpack.i.l.bf16 %v10703_v5 }
0x148f   :  { %9625 = vmatprep.mubr.msk.f32.mxu0 %vm405_vm3, %v4365_v8 }
0x1490   :  { %v10184_v23 = vpack.c.bf16 %v10705_v19, %v10704_v45  ;;  %v10698_v25 = vpop.permute.xlu0 %10697  ;;  %9626 = vmatmul.mubr.msk.f32.vlgmr.msra.gmra.mrb[88].mxu0 %vm405_vm3, %v4366_v40 }
0x1491   :  { %v10700_v44 = vunpack.i.h.bf16 %v10698_v25  ;;  %v10699_v37 = vunpack.i.l.bf16 %v10698_v25  ;;  %v10708_v49 = vpop.permute.xlu1 %10707  ;;  %9639 = vmatprep.mubr.msk.f32.mxu0 %vm228_vm1, %v4544_v60 }
0x1492   :  { %v10710_v33 = vunpack.i.h.bf16 %v10708_v49  ;;  %v10709_v30 = vunpack.i.l.bf16 %v10708_v49  ;;  %10185 = vmatprep.subr.bf16.mxu1 %v10184_v23 }
0x1493   :  { %v10188_v21 = vpack.c.bf16 %v10700_v44, %v10699_v37  ;;  %10187 = vmatpush3.bf16.msra.mxu1 %v10184_v23  ;;  %v10854_v26 = vpop.eup %10853 }
0x1494   :  { %v10194_v0 = vpack.c.bf16 %v10710_v33, %v10709_v30  ;;  %v4368_v42 = vmul.f32 %v10854_v26, %v10846_v11  ;;  %v4635_v34 = vpop.permute.xlu0 %4634 }
0x1495   :  { %10190 = vmatprep.subr.msk.bf16.mxu0 %vm11107_vm2, %v10188_v21  ;;  %v4637_v54 = vpop.permute.xlu1 %4636 }
0x1496   :  { %10193 = vmatpush3.bf16.xpose.msk.msra.mxu0 %vm11107_vm2, %v10188_v21  ;;  %10196 = vmatprep.subr.msk.bf16.mxu1 %vm11107_vm2, %v10194_v0 }
0x1497   :  { %v10856_v17 = vpop.eup %10855 }
0x1498   :  { %v4367_v58 = vmul.f32 %v10856_v17, %v10848_v15 }
0x149a   :  { %9632 = vmatprep.mubr.msk.f32.mxu1 %vm405_vm3, %v4367_v58 }
0x149b   :  { %9633 = vmatmul.mubr.msk.f32.vlgmr.msra.gmra.mrb[88].mxu1 %vm405_vm3, %v4368_v42 }
0x149c   :  { %10199 = vmatpush3.bf16.xpose.msk.msra.mxu1 %vm11107_vm2, %v10194_v0  ;;  %9646 = vmatprep.mubr.msk.f32.mxu1 %vm228_vm1, %v4635_v34 }
0x149d   :  { %9640 = vmatmul.mubr.msk.f32.vlgmr.msra.gmra.mrb[90].mxu0 %vm228_vm1, %v4546_v36 }
0x14a3   :  { %9647 = vmatmul.mubr.msk.f32.vlgmr.msra.gmra.mrb[90].mxu1 %vm228_vm1, %v4637_v54 }
0x1563   :  { %v12895_v28 = vpop.f32.mrb[88].mxu0 }
0x1564   :  { %v12897_v57 = vpop.f32.mrb[89].mxu0 }
0x156e   :  { %v12899_v41 = vpop.f32.mrb[88].mxu1 }
0x156f   :  { %v12901_v29 = vpop.f32.mrb[89].mxu1 }
0x1570   :  { %v9641_v59 = vpop.f32.mrb[90].mxu0 }
0x1571   :  { %v4625_v1 = vpop.f32.mrb[91].mxu0  ;;  %v4728_v2 = vsel %vm405_vm3, %v9641_v59, -inf }
0x1572   :  { %4729 = vmax.xlane.f32.xlu1 %v4728_v2  ;;  %v4725_v55 = vsel %vm405_vm3, %v4625_v1, -inf }
0x1573   :  { %4726 = vmax.xlane.f32.xlu0 %v4725_v55 }
0x1576   :  { %v9648_v32 = vpop.f32.mrb[90].mxu1 }
0x1577   :  { %v4716_v38 = vpop.f32.mrb[91].mxu1  ;;  %v4734_v16 = vsel %vm405_vm3, %v9648_v32, -inf }
0x1578   :  { %v4731_v48 = vsel %vm405_vm3, %v4716_v38, -inf }
0x1579   :  { %4732 = vmax.xlane.f32.xlu0 %v4731_v48 }
0x157d   :  { %4735 = vmax.xlane.f32.xlu0 %v4734_v16 }
0x1583   :  { %10712 = vrot.lane.b32.xlu1 %v12823_v14, %s14597_s5 }
0x15ff   :  { %v4730_v61 = vpop.xlane.xlu1 %4729 }
0x1600   :  { %v4738_v6 = vsub.f32 %v9641_v59, %v4730_v61  ;;  %v4727_v9 = vpop.xlane.xlu0 %4726 }
0x1601   :  { %v4737_v18 = vsub.f32 %v4625_v1, %v4727_v9 }
0x1602   :  { %v4743_v51 = vmul.f32 1.442695, %v4738_v6 }
0x1603   :  { %v4741_v20 = vmul.f32 1.442695, %v4737_v18  ;;  %v10713_v24 = vpop.permute.xlu1 %10712 }
0x1604   :  { %10857 = vpow2.f32 %v4743_v51  ;;  %v10715_v11 = vunpack.i.h.bf16 %v10713_v24  ;;  %v10714_v10 = vunpack.i.l.bf16 %v10713_v24 }
0x1605   :  { %10859 = vpow2.f32 %v4741_v20 }
0x1606   :  { %v10200_v15 = vpack.c.bf16 %v10715_v11, %v10714_v10  ;;  %v4733_v13 = vpop.xlane.xlu0 %4732 }
0x1607   :  { %v4739_v62 = vsub.f32 %v4716_v38, %v4733_v13 }
0x1608   :  { %10201 = vmatprep.subr.bf16.mxu0 %v10200_v15 }
0x1609   :  { %10203 = vmatpush3.bf16.msra.mxu0 %v10200_v15  ;;  %v4745_v52 = vmul.f32 1.442695, %v4739_v62 }
0x160a   :  { %v4736_v53 = vpop.xlane.xlu0 %4735 }
0x160b   :  { %v4740_v60 = vsub.f32 %v9648_v32, %v4736_v53 }
0x160d   :  { %v4747_v36 = vmul.f32 1.442695, %v4740_v60 }
0x160e   :  { %v10858_v46 = vpop.eup %10857 }
0x160f   :  { %v10860_v39 = vpop.eup %10859  ;;  %10861 = vpow2.f32 %v4747_v36  ;;  %v4752_v31 = vsel %vm405_vm3, %v10858_v46, 0.0 }
0x1610   :  { %4753 = vadd.xlane.f32.xlu0 %v4752_v31  ;;  %v4749_v5 = vsel %vm405_vm3, %v10860_v39, 0.0  ;;  %10863 = vpow2.f32 %v4745_v52 }
0x1611   :  { %4750 = vadd.xlane.f32.xlu1 %v4749_v5 }
0x1619   :  { %v10862_v8 = vpop.eup %10861 }
0x161a   :  { %v4758_v40 = vsel %vm405_vm3, %v10862_v8, 0.0  ;;  %v10864_v19 = vpop.eup %10863 }
0x161b   :  { %4759 = vadd.xlane.f32.xlu0 %v4758_v40  ;;  %v4755_v45 = vsel %vm405_vm3, %v10864_v19, 0.0 }
0x161f   :  { %4756 = vadd.xlane.f32.xlu0 %v4755_v45 }
0x1622   :  { %4943 = vrot.lane.b32.xlu1 %v12825_v63, %s14598_s20 }
0x1626   :  { %4945 = vrot.lane.b32.xlu1 %v12843_v27, %s14598_s20 }
0x162a   :  { %10722 = vrot.lane.b32.xlu1 %v12831_v12, %s14597_s5 }
0x162e   :  { %10727 = vrot.lane.b32.xlu1 %v12831_v12, %s14599_s21 }
0x1632   :  { %5036 = vrot.lane.b32.xlu1 %v12851_v3, %s14598_s20 }
0x1635   :  { %10717 = vrot.lane.b32.xlu0 %v12823_v14, %s14599_s21 }
0x1639   :  { %5034 = vrot.lane.b32.xlu0 %v12833_v56, %s14598_s20 }
0x169d   :  { %v4754_v23 = vpop.xlane.xlu0 %4753 }
0x169e   :  { %10865 = vrcp.f32 %v4754_v23  ;;  %v4751_v25 = vpop.xlane.xlu1 %4750 }
0x169f   :  { %10867 = vrcp.f32 %v4751_v25 }
0x16a2   :  { %v4944_v44 = vpop.permute.xlu1 %4943 }
0x16a6   :  { %v4946_v37 = vpop.permute.xlu1 %4945 }
0x16a8   :  { %v10866_v49 = vpop.eup %10865  ;;  %v4760_v33 = vpop.xlane.xlu0 %4759 }
0x16a9   :  { %v10868_v30 = vpop.eup %10867  ;;  %v4766_v26 = vmul.f32 %v10866_v49, %v10858_v46  ;;  %10869 = vrcp.f32 %v4760_v33 }
0x16aa   :  { %v10723_v21 = vpop.permute.xlu1 %10722  ;;  %v4765_v0 = vmul.f32 %v10868_v30, %v10860_v39 }
0x16ab   :  { %v10725_v17 = vunpack.i.h.bf16 %v10723_v21  ;;  %v10724_v58 = vunpack.i.l.bf16 %v10723_v21 }
0x16ac   :  { %9653 = vmatprep.mubr.msk.f32.mxu0 %vm405_vm3, %v4765_v0  ;;  %v4757_v42 = vpop.xlane.xlu0 %4756 }
0x16ad   :  { %v10204_v34 = vpack.c.bf16 %v10725_v17, %v10724_v58  ;;  %10871 = vrcp.f32 %v4757_v42  ;;  %9654 = vmatmul.mubr.msk.f32.vlgmr.msra.gmra.mrb[92].mxu0 %vm405_vm3, %v4766_v26 }
0x16ae   :  { %v10728_v54 = vpop.permute.xlu1 %10727  ;;  %9667 = vmatprep.mubr.msk.f32.mxu0 %vm228_vm1, %v4944_v44 }
0x16af   :  { %v10730_v59 = vunpack.i.h.bf16 %v10728_v54  ;;  %v10729_v1 = vunpack.i.l.bf16 %v10728_v54  ;;  %10205 = vmatprep.subr.bf16.mxu1 %v10204_v34 }
0x16b0   :  { %10207 = vmatpush3.bf16.msra.mxu1 %v10204_v34  ;;  %v10718_v2 = vpop.permute.xlu0 %10717 }
0x16b1   :  { %v10214_v55 = vpack.c.bf16 %v10730_v59, %v10729_v1  ;;  %v10720_v32 = vunpack.i.h.bf16 %v10718_v2  ;;  %v10719_v38 = vunpack.i.l.bf16 %v10718_v2 }
0x16b2   :  { %v5037_v51 = vpop.permute.xlu1 %5036 }
0x16b3   :  { %v10208_v48 = vpack.c.bf16 %v10720_v32, %v10719_v38  ;;  %10216 = vmatprep.subr.msk.bf16.mxu1 %vm11107_vm2, %v10214_v55  ;;  %v10870_v16 = vpop.eup %10869 }
0x16b4   :  { %v4768_v9 = vmul.f32 %v10870_v16, %v10862_v8  ;;  %v5035_v18 = vpop.permute.xlu0 %5034 }
0x16b5   :  { %10210 = vmatprep.subr.msk.bf16.mxu0 %vm11107_vm2, %v10208_v48 }
0x16b6   :  { %10213 = vmatpush3.bf16.xpose.msk.msra.mxu0 %vm11107_vm2, %v10208_v48 }
0x16b7   :  { %v10872_v61 = vpop.eup %10871 }
0x16b8   :  { %v4767_v6 = vmul.f32 %v10872_v61, %v10864_v19 }
0x16ba   :  { %9660 = vmatprep.mubr.msk.f32.mxu1 %vm405_vm3, %v4767_v6 }
0x16bb   :  { %9661 = vmatmul.mubr.msk.f32.vlgmr.msra.gmra.mrb[92].mxu1 %vm405_vm3, %v4768_v9 }
0x16bc   :  { %10219 = vmatpush3.bf16.xpose.msk.msra.mxu1 %vm11107_vm2, %v10214_v55  ;;  %9674 = vmatprep.mubr.msk.f32.mxu1 %vm228_vm1, %v5035_v18 }
0x16bd   :  { %9668 = vmatmul.mubr.msk.f32.vlgmr.msra.gmra.mrb[94].mxu0 %vm228_vm1, %v4946_v37 }
0x16c3   :  { %9675 = vmatmul.mubr.msk.f32.vlgmr.msra.gmra.mrb[94].mxu1 %vm228_vm1, %v5037_v51 }
0x1780   :  { %v12943_v20 = vpop.f32.mrb[92].mxu0 }
0x1781   :  { %v12945_v24 = vpop.f32.mrb[93].mxu0 }
0x178e   :  { %v12947_v11 = vpop.f32.mrb[92].mxu1 }
0x178f   :  { %v12949_v10 = vpop.f32.mrb[93].mxu1 }
0x1790   :  { %v9669_v15 = vpop.f32.mrb[94].mxu0 }
0x1791   :  { %v5025_v13 = vpop.f32.mrb[95].mxu0  ;;  %v5128_v62 = vsel %vm405_vm3, %v9669_v15, -inf }
0x1792   :  { %5129 = vmax.xlane.f32.xlu1 %v5128_v62  ;;  %v5125_v53 = vsel %vm405_vm3, %v5025_v13, -inf }
0x1793   :  { %5126 = vmax.xlane.f32.xlu0 %v5125_v53 }
0x1796   :  { %v9676_v60 = vpop.f32.mrb[94].mxu1 }
0x1797   :  { %v5116_v52 = vpop.f32.mrb[95].mxu1  ;;  %v5134_v46 = vsel %vm405_vm3, %v9676_v60, -inf }
0x1798   :  { %v5131_v36 = vsel %vm405_vm3, %v5116_v52, -inf }
0x1799   :  { %5132 = vmax.xlane.f32.xlu0 %v5131_v36 }
0x179d   :  { %5135 = vmax.xlane.f32.xlu0 %v5134_v46 }
0x17a3   :  { %10732 = vrot.lane.b32.xlu1 %v12823_v14, %s14600_s22 }
0x181f   :  { %v5130_v39 = vpop.xlane.xlu1 %5129 }
0x1820   :  { %v5138_v31 = vsub.f32 %v9669_v15, %v5130_v39  ;;  %v5127_v5 = vpop.xlane.xlu0 %5126 }
0x1821   :  { %v5137_v8 = vsub.f32 %v5025_v13, %v5127_v5 }
0x1822   :  { %v5143_v40 = vmul.f32 1.442695, %v5138_v31 }
0x1823   :  { %v5141_v19 = vmul.f32 1.442695, %v5137_v8  ;;  %v10733_v45 = vpop.permute.xlu1 %10732 }
0x1824   :  { %10873 = vpow2.f32 %v5143_v40  ;;  %v10735_v23 = vunpack.i.h.bf16 %v10733_v45  ;;  %v10734_v25 = vunpack.i.l.bf16 %v10733_v45 }
0x1825   :  { %10875 = vpow2.f32 %v5141_v19 }
0x1826   :  { %v10220_v44 = vpack.c.bf16 %v10735_v23, %v10734_v25  ;;  %v5133_v37 = vpop.xlane.xlu0 %5132 }
0x1827   :  { %v5139_v49 = vsub.f32 %v5116_v52, %v5133_v37 }
0x1828   :  { %10221 = vmatprep.subr.bf16.mxu0 %v10220_v44 }
0x1829   :  { %10223 = vmatpush3.bf16.msra.mxu0 %v10220_v44  ;;  %v5145_v21 = vmul.f32 1.442695, %v5139_v49 }
0x182a   :  { %v5136_v33 = vpop.xlane.xlu0 %5135 }
0x182b   :  { %v5140_v30 = vsub.f32 %v9676_v60, %v5136_v33 }
0x182d   :  { %v5147_v0 = vmul.f32 1.442695, %v5140_v30 }
0x182e   :  { %v10874_v26 = vpop.eup %10873 }
0x182f   :  { %v10876_v17 = vpop.eup %10875  ;;  %10877 = vpow2.f32 %v5147_v0  ;;  %v5152_v58 = vsel %vm405_vm3, %v10874_v26, 0.0 }
0x1830   :  { %5153 = vadd.xlane.f32.xlu0 %v5152_v58  ;;  %v5149_v42 = vsel %vm405_vm3, %v10876_v17, 0.0  ;;  %10879 = vpow2.f32 %v5145_v21 }
0x1831   :  { %5150 = vadd.xlane.f32.xlu1 %v5149_v42 }
0x1839   :  { %v10878_v34 = vpop.eup %10877 }
0x183a   :  { %v5158_v54 = vsel %vm405_vm3, %v10878_v34, 0.0  ;;  %v10880_v59 = vpop.eup %10879 }
0x183b   :  { %5159 = vadd.xlane.f32.xlu0 %v5158_v54  ;;  %v5155_v1 = vsel %vm405_vm3, %v10880_v59, 0.0 }
0x183f   :  { %5156 = vadd.xlane.f32.xlu0 %v5155_v1 }
0x1842   :  { %5343 = vrot.lane.b32.xlu1 %v12825_v63, %s14601_s1 }
0x1846   :  { %5345 = vrot.lane.b32.xlu1 %v12843_v27, %s14601_s1 }
0x184a   :  { %10742 = vrot.lane.b32.xlu1 %v12831_v12, %s14600_s22 }
0x184e   :  { %10747 = vrot.lane.b32.xlu1 %v12831_v12, %s14602_s26 }
0x1852   :  { %5436 = vrot.lane.b32.xlu1 %v12851_v3, %s14601_s1 }
0x1855   :  { %10737 = vrot.lane.b32.xlu0 %v12823_v14, %s14602_s26 }
0x1859   :  { %5434 = vrot.lane.b32.xlu0 %v12833_v56, %s14601_s1 }
0x18bd   :  { %v5154_v2 = vpop.xlane.xlu0 %5153 }
0x18be   :  { %10881 = vrcp.f32 %v5154_v2  ;;  %v5151_v63 = vpop.xlane.xlu1 %5150 }
0x18bf   :  { %10883 = vrcp.f32 %v5151_v63 }
0x18c2   :  { %v5344_v27 = vpop.permute.xlu1 %5343 }
0x18c6   :  { %v5346_v55 = vpop.permute.xlu1 %5345 }
0x18c8   :  { %v10882_v32 = vpop.eup %10881  ;;  %v5160_v38 = vpop.xlane.xlu0 %5159 }
0x18c9   :  { %v10884_v48 = vpop.eup %10883  ;;  %v5166_v6 = vmul.f32 %v10882_v32, %v10874_v26  ;;  %10885 = vrcp.f32 %v5160_v38 }
0x18ca   :  { %v10743_v16 = vpop.permute.xlu1 %10742  ;;  %v5165_v61 = vmul.f32 %v10884_v48, %v10876_v17 }
0x18cb   :  { %v10745_v9 = vunpack.i.h.bf16 %v10743_v16  ;;  %v10744_v3 = vunpack.i.l.bf16 %v10743_v16 }
0x18cc   :  { %v5157_v18 = vpop.xlane.xlu0 %5156  ;;  %9681 = vmatprep.mubr.msk.f32.mxu0 %vm405_vm3, %v5165_v61 }
0x18cd   :  { %v10224_v51 = vpack.c.bf16 %v10745_v9, %v10744_v3  ;;  %10887 = vrcp.f32 %v5157_v18  ;;  %9682 = vmatmul.mubr.msk.f32.vlgmr.msra.gmra.mrb[96].mxu0 %vm405_vm3, %v5166_v6 }
0x18ce   :  { %v10748_v56 = vpop.permute.xlu1 %10747  ;;  %9695 = vmatprep.mubr.msk.f32.mxu0 %vm228_vm1, %v5344_v27 }
0x18cf   :  { %v10750_v15 = vunpack.i.h.bf16 %v10748_v56  ;;  %v10749_v13 = vunpack.i.l.bf16 %v10748_v56  ;;  %10225 = vmatprep.subr.bf16.mxu1 %v10224_v51 }
0x18d0   :  { %v10738_v62 = vpop.permute.xlu0 %10737  ;;  %10227 = vmatpush3.bf16.msra.mxu1 %v10224_v51 }
0x18d1   :  { %v10234_v53 = vpack.c.bf16 %v10750_v15, %v10749_v13  ;;  %v10740_v60 = vunpack.i.h.bf16 %v10738_v62  ;;  %v10739_v52 = vunpack.i.l.bf16 %v10738_v62 }
0x18d2   :  { %v5437_v40 = vpop.permute.xlu1 %5436 }
0x18d3   :  { %v10228_v36 = vpack.c.bf16 %v10740_v60, %v10739_v52  ;;  %10236 = vmatprep.subr.msk.bf16.mxu1 %vm11107_vm2, %v10234_v53  ;;  %v10886_v46 = vpop.eup %10885 }
0x18d4   :  { %v5168_v5 = vmul.f32 %v10886_v46, %v10878_v34  ;;  %v5435_v8 = vpop.permute.xlu0 %5434 }
0x18d5   :  { %10230 = vmatprep.subr.msk.bf16.mxu0 %vm11107_vm2, %v10228_v36 }
0x18d6   :  { %10233 = vmatpush3.bf16.xpose.msk.msra.mxu0 %vm11107_vm2, %v10228_v36 }
0x18d7   :  { %v10888_v39 = vpop.eup %10887 }
0x18d8   :  { %v5167_v31 = vmul.f32 %v10888_v39, %v10880_v59 }
0x18da   :  { %9688 = vmatprep.mubr.msk.f32.mxu1 %vm405_vm3, %v5167_v31 }
0x18db   :  { %9689 = vmatmul.mubr.msk.f32.vlgmr.msra.gmra.mrb[96].mxu1 %vm405_vm3, %v5168_v5 }
0x18dc   :  { %10239 = vmatpush3.bf16.xpose.msk.msra.mxu1 %vm11107_vm2, %v10234_v53  ;;  %9702 = vmatprep.mubr.msk.f32.mxu1 %vm228_vm1, %v5435_v8 }
0x18dd   :  { %9696 = vmatmul.mubr.msk.f32.vlgmr.msra.gmra.mrb[98].mxu0 %vm228_vm1, %v5346_v55 }
0x18e3   :  { %9703 = vmatmul.mubr.msk.f32.vlgmr.msra.gmra.mrb[98].mxu1 %vm228_vm1, %v5437_v40 }
0x19a0   :  { %v9683_v19 = vpop.f32.mrb[96].mxu0 }
0x19a1   :  { %v5247_v45 = vpop.f32.mrb[97].mxu0 }
0x19ae   :  { %v12991_v23 = vpop.f32.mrb[96].mxu1 }
0x19af   :  { %v12993_v25 = vpop.f32.mrb[97].mxu1 }
0x19b0   :  { %v9697_v44 = vpop.f32.mrb[98].mxu0 }
0x19b1   :  { %v5425_v37 = vpop.f32.mrb[99].mxu0  ;;  %v5528_v49 = vsel %vm405_vm3, %v9697_v44, -inf }
0x19b2   :  { %5529 = vmax.xlane.f32.xlu1 %v5528_v49  ;;  %v5525_v47 = vsel %vm405_vm3, %v5425_v37, -inf }
0x19b3   :  { %5526 = vmax.xlane.f32.xlu0 %v5525_v47  ;;  %v8208_v47 = vld [vmem:[%s14534_s6 + $0x38] sm:$0xff] }
0x19b6   :  { %v9704_v33 = vpop.f32.mrb[98].mxu1 }
0x19b7   :  { %v5516_v30 = vpop.f32.mrb[99].mxu1  ;;  %v5534_v0 = vsel %vm405_vm3, %v9704_v33, -inf }
0x19b8   :  { %v5531_v21 = vsel %vm405_vm3, %v5516_v30, -inf }
0x19b9   :  { %5532 = vmax.xlane.f32.xlu0 %v5531_v21 }
0x19bd   :  { %5535 = vmax.xlane.f32.xlu0 %v5534_v0 }
0x1a3f   :  { %v5530_v26 = vpop.xlane.xlu1 %5529 }
0x1a40   :  { %v5538_v17 = vsub.f32 %v9697_v44, %v5530_v26  ;;  %v5527_v58 = vpop.xlane.xlu0 %5526  ;;  %v8206_v44 = vld [vmem:[%s14534_s6 + $0x28] sm:$0xff] }
0x1a41   :  { %v5537_v42 = vsub.f32 %v5425_v37, %v5527_v58  ;;  %v8207_v37 = vld [vmem:[%s14534_s6 + $0x30] sm:$0xff] }
0x1a42   :  { %v5543_v34 = vmul.f32 1.442695, %v5538_v17 }
0x1a43   :  { %v5541_v54 = vmul.f32 1.442695, %v5537_v42 }
0x1a44   :  { %10889 = vpow2.f32 %v5543_v34 }
0x1a45   :  { %10891 = vpow2.f32 %v5541_v54 }
0x1a46   :  { %v5533_v59 = vpop.xlane.xlu0 %5532 }
0x1a47   :  { %v5539_v1 = vsub.f32 %v5516_v30, %v5533_v59 }
0x1a49   :  { %v5545_v27 = vmul.f32 1.442695, %v5539_v1 }
0x1a4a   :  { %v5536_v2 = vpop.xlane.xlu0 %5535 }
0x1a4b   :  { %v5540_v63 = vsub.f32 %v9704_v33, %v5536_v2  ;;  %v10252_v33 = vpack.c.bf16 %v8208_v47, %v8207_v37 }
0x1a4d   :  { %v5547_v55 = vmul.f32 1.442695, %v5540_v63 }
0x1a4e   :  { %v10890_v32 = vpop.eup %10889 }
0x1a4f   :  { %v10892_v38 = vpop.eup %10891  ;;  %10893 = vpow2.f32 %v5547_v55  ;;  %v5552_v48 = vsel %vm405_vm3, %v10890_v32, 0.0 }
0x1a50   :  { %5553 = vadd.xlane.f32.xlu0 %v5552_v48  ;;  %v5549_v16 = vsel %vm405_vm3, %v10892_v38, 0.0  ;;  %10895 = vpow2.f32 %v5545_v27 }
0x1a51   :  { %5550 = vadd.xlane.f32.xlu1 %v5549_v16 }
0x1a59   :  { %v10894_v61 = vpop.eup %10893 }
0x1a5a   :  { %v5558_v6 = vsel %vm405_vm3, %v10894_v61, 0.0  ;;  %v10896_v9 = vpop.eup %10895 }
0x1a5b   :  { %5559 = vadd.xlane.f32.xlu0 %v5558_v6  ;;  %v5555_v3 = vsel %vm405_vm3, %v10896_v9, 0.0 }
0x1a5f   :  { %5556 = vadd.xlane.f32.xlu0 %v5555_v3 }
0x1a62   :  { %10752 = vrot.lane.b32.xlu1 %v12823_v14, %s14603_s27 }
0x1a66   :  { %5747 = vrot.lane.b32.xlu1 %v12945_v24, %s14604_s28 }
0x1a6a   :  { %5749 = vrot.lane.b32.xlu1 %v12943_v20, %s14604_s28 }
0x1a6e   :  { %5763 = vrot.lane.b32.xlu1 %v5247_v45, %s14605_s30  ;;  %v8205_v45 = vld [vmem:[%s14534_s6 + $0x20] sm:$0xff] }
0x1a6f   :  { %v10248_v49 = vpack.c.bf16 %v8206_v44, %v8205_v45 }
0x1a72   :  { %5765 = vrot.lane.b32.xlu1 %v9683_v19, %s14605_s30  ;;  %v14606_v19 = vmov 0.0  }
0x1a75   :  { %10757 = vrot.lane.b32.xlu0 %v12831_v12, %s14603_s27 }
0x1add   :  { %v5554_v18 = vpop.xlane.xlu0 %5553 }
0x1ade   :  { %10897 = vrcp.f32 %v5554_v18  ;;  %v5551_v51 = vpop.xlane.xlu1 %5550 }
0x1adf   :  { %10899 = vrcp.f32 %v5551_v51 }
0x1ae2   :  { %v10753_v56 = vpop.permute.xlu1 %10752 }
0x1ae3   :  { %v10755_v15 = vunpack.i.h.bf16 %v10753_v56  ;;  %v10754_v14 = vunpack.i.l.bf16 %v10753_v56 }
0x1ae5   :  { %v10240_v13 = vpack.c.bf16 %v10755_v15, %v10754_v14 }
0x1ae6   :  { %v5748_v17 = vpop.permute.xlu1 %5747 }
0x1ae7   :  { %10241 = vmatprep.subr.bf16.mxu0 %v10240_v13 }
0x1ae8   :  { %v10898_v24 = vpop.eup %10897  ;;  %v5560_v62 = vpop.xlane.xlu0 %5559  ;;  %10243 = vmatpush3.bf16.msra.mxu0 %v10240_v13 }
0x1ae9   :  { %v10900_v20 = vpop.eup %10899  ;;  %v5566_v60 = vmul.f32 %v10898_v24, %v10890_v32  ;;  %10901 = vrcp.f32 %v5560_v62  ;;  %10249 = vmatprep.subr.bf16.mxu0 %v10248_v49 }
0x1aea   :  { %v5565_v53 = vmul.f32 %v10900_v20, %v10892_v38  ;;  %v5750_v58 = vpop.permute.xlu1 %5749 }
0x1aec   :  { %v5557_v52 = vpop.xlane.xlu0 %5556  ;;  %9709 = vmatprep.mubr.msk.f32.mxu0 %vm405_vm3, %v5565_v53 }
0x1aed   :  { %10903 = vrcp.f32 %v5557_v52  ;;  %9710 = vmatmul.mubr.msk.f32.vlgmr.msra.gmra.mrb[100].mxu0 %vm405_vm3, %v5566_v60 }
0x1aee   :  { %10251 = vmatpush3.bf16.msra.mxu0 %v10248_v49  ;;  %v5764_v42 = vpop.permute.xlu1 %5763 }
0x1aef   :  { %10253 = vmatprep.subr.bf16.mxu0 %v10252_v33 }
0x1af0   :  { %v10758_v12 = vpop.permute.xlu0 %10757 }
0x1af1   :  { %v10760_v36 = vunpack.i.h.bf16 %v10758_v12  ;;  %v10759_v46 = vunpack.i.l.bf16 %v10758_v12 }
0x1af2   :  { %10255 = vmatpush3.bf16.msra.mxu0 %v10252_v33  ;;  %v5766_v34 = vpop.permute.xlu1 %5765 }
0x1af3   :  { %v10244_v39 = vpack.c.bf16 %v10760_v36, %v10759_v46  ;;  %v10902_v31 = vpop.eup %10901 }
0x1af4   :  { %v5568_v40 = vmul.f32 %v10902_v31, %v10894_v61 }
0x1af5   :  { %10245 = vmatprep.subr.bf16.mxu1 %v10244_v39 }
0x1af6   :  { %10247 = vmatpush3.bf16.msra.mxu1 %v10244_v39 }
0x1af7   :  { %v10904_v5 = vpop.eup %10903 }
0x1af8   :  { %v5567_v8 = vmul.f32 %v10904_v5, %v10896_v9 }
0x1afa   :  { %9716 = vmatprep.mubr.msk.f32.mxu1 %vm405_vm3, %v5567_v8 }
0x1afb   :  { %9717 = vmatmul.mubr.msk.f32.vlgmr.msra.gmra.mrb[100].mxu1 %vm405_vm3, %v5568_v40 }
0x1afc   :  { %6219 = vmatprep.mubr.f32.mxu1 %v14606_v19 }
0x1bc0   :  { %v9711_v30 = vpop.f32.mrb[100].mxu0 }
0x1bc1   :  { %5781 = vrot.lane.b32.xlu1 %v9711_v30, %s14607_s23  ;;  %v5647_v21 = vpop.f32.mrb[101].mxu0 }
0x1bc2   :  { %5779 = vrot.lane.b32.xlu0 %v5647_v21, %s14607_s23 }
0x1bc5   :  { %5753 = vrot.lane.b32.xlu1 %v12947_v11, %s14604_s28  ;;  %v5791_v11 = vsel %vm228_vm1, %v12897_v57, %v5748_v17  ;;  %v8220_v17 = vld [vmem:[%s14536_s10 + $0x208] sm:$0xff] }
0x1bc6   :  { %5751 = vrot.lane.b32.xlu0 %v12949_v10, %s14604_s28  ;;  %v5795_v54 = vsel %vm405_vm3, %v5791_v11, %v5764_v42  ;;  %v8222_v42 = vld [vmem:[%s14536_s10 + $0x218] sm:$0xff] }
0x1bc7   :  { %v8238_v11 = vld [vmem:[%s14536_s10 + $0x298] sm:$0xff] }
0x1bc9   :  { %5769 = vrot.lane.b32.xlu1 %v12991_v23, %s14605_s30  ;;  %v5792_v23 = vsel %vm228_vm1, %v12895_v28, %v5750_v58  ;;  %v8236_v58 = vld [vmem:[%s14536_s10 + $0x288] sm:$0xff] }
0x1bca   :  { %5767 = vrot.lane.b32.xlu0 %v12993_v25, %s14605_s30  ;;  %v5796_v59 = vsel %vm405_vm3, %v5792_v23, %v5766_v34  ;;  %v10256_v34 = vpack.c.bf16 %v8236_v58, %v8220_v17  ;;  %v8235_v23 = vld [vmem:[%s14536_s10 + $0x280] sm:$0xff] }
0x1bcb   :  { %v8255_v58 = vld [vmem:[%s14536_s10 + $0x320] sm:$0xff] }
0x1bcc   :  { %10257 = vmatprep.subr.bf16.mxu1 %v10256_v34 }
0x1bce   :  { %v9718_v0 = vpop.f32.mrb[100].mxu1 }
0x1bcf   :  { %5785 = vrot.lane.b32.xlu1 %v9718_v0, %s14607_s23  ;;  %v5734_v26 = vpop.f32.mrb[101].mxu1 }
0x1bd0   :  { %5783 = vrot.lane.b32.xlu0 %v5734_v26, %s14607_s23 }
0x1c33   :  { %v5782_v10 = vpop.permute.xlu1 %5781 }
0x1c34   :  { %v5780_v25 = vpop.permute.xlu0 %5779  ;;  %v5800_v2 = vsel %vm1880_vm4, %v5796_v59, %v5782_v10  ;;  %v8219_v10 = vld [vmem:[%s14536_s10 + $0x200] sm:$0xff]  ;;  %v8221_v59 = vld [vmem:[%s14536_s10 + $0x210] sm:$0xff] }
0x1c35   :  { %v5799_v1 = vsel %vm1880_vm4, %v5795_v54, %v5780_v25  ;;  %v10264_v54 = vpack.c.bf16 %v8238_v11, %v8222_v42  ;;  %v10258_v25 = vpack.c.bf16 %v8235_v23, %v8219_v10  ;;  %v8271_v42 = vld [vmem:[%s14536_s10 + $0x3a0] sm:$0xff]  ;;  %v8257_v23 = vld [vmem:[%s14536_s10 + $0x330] sm:$0xff] }
0x1c36   :  { %9727 = vmatprep.mubr.msk.f32.mxu0 %vm120_vm0, %v5799_v1  ;;  %v8237_v1 = vld [vmem:[%s14536_s10 + $0x290] sm:$0xff] }
0x1c37   :  { %v5754_v63 = vpop.permute.xlu1 %5753  ;;  %9728 = vmatmul.mubr.msk.f32.vlgmr.msra.gmra.mrb[102].mxu0 %vm120_vm0, %v5800_v2  ;;  %v10266_v2 = vpack.c.bf16 %v8237_v1, %v8221_v59  ;;  %10265 = vmatprep.subr.bf16.mxu0 %v10264_v54  ;;  %v8273_v54 = vld [vmem:[%s14536_s10 + $0x3b0] sm:$0xff]  ;;  %v8244_v59 = vld [vmem:[%s14536_s10 + $0x2c8] sm:$0xff]  ;;  %v8230_v1 = vld [vmem:[%s14536_s10 + $0x258] sm:$0xff] }
0x1c38   :  { %v5752_v27 = vpop.permute.xlu0 %5751  ;;  %v5794_v38 = vsel %vm228_vm1, %v12899_v41, %v5754_v63  ;;  %10259 = vmatpush1.bf16.msra.mxu1 %v10258_v25  ;;  %v8252_v63 = vld [vmem:[%s14536_s10 + $0x308] sm:$0xff] }
0x1c39   :  { %v5793_v28 = vsel %vm228_vm1, %v12901_v29, %v5752_v27  ;;  %v8210_v29 = vld [vmem:[%s14535_s7 + $0x1] ss:$0 sm:$0xff]  ;;  %v8268_v27 = vld [vmem:[%s14536_s10 + $0x388] sm:$0xff]  ;;  %10267 = vmatpush1.bf16.msra.mxu0 %v10266_v2  ;;  %v8246_v2 = vld [vmem:[%s14536_s10 + $0x2d8] sm:$0xff] }
0x1c3a   :  { %v8228_v25 = vld [vmem:[%s14536_s10 + $0x248] sm:$0xff] }
0x1c3b   :  { %v5770_v57 = vpop.permute.xlu1 %5769 }
0x1c3c   :  { %v5768_v55 = vpop.permute.xlu0 %5767  ;;  %v5798_v61 = vsel %vm405_vm3, %v5794_v38, %v5770_v57  ;;  %v8254_v57 = vld [vmem:[%s14536_s10 + $0x318] sm:$0xff]  ;;  %v8267_v38 = vld [vmem:[%s14536_s10 + $0x380] sm:$0xff] }
0x1c3d   :  { %v5797_v48 = vsel %vm405_vm3, %v5793_v28, %v5768_v55  ;;  %v10260_v55 = vpack.c.bf16 %v8268_v27, %v8252_v63  ;;  %v8270_v28 = vld [vmem:[%s14536_s10 + $0x398] sm:$0xff]  ;;  %v10278_v27 = vpack.c.bf16 %v8271_v42, %v8255_v58 }
0x1c3f   :  { %10261 = vmatprep.subr.bf16.mxu1 %v10260_v55  ;;  %v10288_v55 = vpack.c.bf16 %v8244_v59, %v8228_v25  ;;  %v8366_v25 = vld [vmem:[%s14539_s12 + $0x988] sm:$0xff] }
0x1c41   :  { %v5786_v32 = vpop.permute.xlu1 %5785 }
0x1c42   :  { %v5784_v16 = vpop.permute.xlu0 %5783  ;;  %v5802_v9 = vsel %vm1880_vm4, %v5798_v61, %v5786_v32  ;;  %v8251_v32 = vld [vmem:[%s14536_s10 + $0x300] sm:$0xff]  ;;  %v8253_v61 = vld [vmem:[%s14536_s10 + $0x310] sm:$0xff] }
0x1c43   :  { %v5801_v6 = vsel %vm1880_vm4, %v5797_v48, %v5784_v16  ;;  %v10268_v48 = vpack.c.bf16 %v8270_v28, %v8254_v57  ;;  %v10262_v16 = vpack.c.bf16 %v8267_v38, %v8251_v32  ;;  %v10286_v57 = vpack.c.bf16 %v8273_v54, %v8257_v23  ;;  %v8334_v23 = vld [vmem:[%s14539_s12 + $0x888] sm:$0xff]  ;;  %v8365_v54 = vld [vmem:[%s14539_s12 + $0x980] sm:$0xff] }
0x1c44   :  { %9730 = vmatprep.mubr.msk.f32.mxu0 %vm120_vm0, %v5801_v6  ;;  %v8269_v6 = vld [vmem:[%s14536_s10 + $0x390] sm:$0xff]  ;;  %v10296_v28 = vpack.c.bf16 %v8246_v2, %v8230_v1 }
0x1c45   :  { %9731 = vmatmul.mubr.msk.f32.gmra.mrb[104].mxu0 %vm120_vm0, %v5802_v9  ;;  %v10270_v9 = vpack.c.bf16 %v8269_v6, %v8253_v61  ;;  %10269 = vmatprep.subr.bf16.mxu0 %v10268_v48 }
0x1c46   :  { %6308 = vmatprep.mubr.f32.mxu0 %v14606_v19  ;;  %10263 = vmatpush1.bf16.msra.mxu1 %v10262_v16 }
0x1c47   :  { %10271 = vmatpush1.bf16.msra.mxu0 %v10270_v9 }
0x1d0a   :  { %v9729_v41 = vpop.f32.mrb[102].mxu0 }
0x1d0b   :  { %v5900_v3 = vadd.f32 %v9729_v41, %v8210_v29  ;;  %v5894_v18 = vpop.f32.mrb[103].mxu0  ;;  %v8240_v41 = vld [vmem:[%s14536_s10 + $0x2a8] sm:$0xff] }
0x1d0c   :  { %v5895_v51 = vadd.f32 %v8210_v29, %v5894_v18 }
0x1d0d   :  { %v5914_v56 = vadd.f32 %v5900_v3, %v12808_v7  ;;  %v8226_v3 = vld [vmem:[%s14536_s10 + $0x238] sm:$0xff] }
0x1d0e   :  { %v5913_v15 = vadd.f32 %v5895_v51, %v12804_v50  ;;  %v8242_v51 = vld [vmem:[%s14536_s10 + $0x2b8] sm:$0xff] }
0x1d0f   :  { %v5920_v14 = vsel %vm120_vm0, %v5914_v56, 0.0 }
0x1d10   :  { %5921 = vadd.xlane.f32.xlu1 %v5920_v14  ;;  %v5917_v13 = vsel %vm120_vm0, %v5913_v15, 0.0 }
0x1d11   :  { %5918 = vadd.xlane.f32.xlu0 %v5917_v13 }
0x1d18   :  { %v9732_v24 = vpop.f32.mrb[104].mxu0 }
0x1d19   :  { %v5904_v62 = vpop.f32.mrb[105].mxu0  ;;  %v5910_v20 = vadd.f32 %v9732_v24, %v8210_v29 }
0x1d1a   :  { %v5905_v53 = vadd.f32 %v8210_v29, %v5904_v62  ;;  %v8224_v29 = vld [vmem:[%s14536_s10 + $0x228] sm:$0xff] }
0x1d1b   :  { %v5916_v52 = vadd.f32 %v5910_v20, %v12816_v43  ;;  %v10272_v18 = vpack.c.bf16 %v8240_v41, %v8224_v29  ;;  %v8227_v29 = vld [vmem:[%s14536_s10 + $0x240] sm:$0xff]  ;;  %v8229_v41 = vld [vmem:[%s14536_s10 + $0x250] sm:$0xff] }
0x1d1c   :  { %v5915_v60 = vadd.f32 %v5905_v53, %v12812_v22 }
0x1d1d   :  { %v5926_v7 = vsel %vm120_vm0, %v5916_v52, 0.0  ;;  %10273 = vmatprep.subr.bf16.mxu1 %v10272_v18  ;;  %v8260_v18 = vld [vmem:[%s14536_s10 + $0x348] sm:$0xff] }
0x1d1e   :  { %v5923_v12 = vsel %vm120_vm0, %v5915_v60, 0.0 }
0x1d1f   :  { %5924 = vadd.xlane.f32.xlu0 %v5923_v12  ;;  %v8216_v12 = vld [vmem:[%s14537_s8 + $0x1] ss:$0 sm:$0xff] }
0x1d23   :  { %5927 = vadd.xlane.f32.xlu0 %v5926_v7 }
0x1d9d   :  { %v5922_v50 = vpop.xlane.xlu1 %5921 }
0x1d9e   :  { %v5930_v36 = vmul.f32 0.03125, %v5922_v50  ;;  %v5919_v46 = vpop.xlane.xlu0 %5918  ;;  %v13160_v50 = vld [vmem:[%s14538_s9 + $0x1] ss:$0 sm:$0xff] }
0x1d9f   :  { %v5929_v39 = vmul.f32 0.03125, %v5919_v46 }
0x1da0   :  { %v13074_v31 = vsub.f32 %v5914_v56, %v5930_v36  ;;  %v10280_v56 = vpack.c.bf16 %v8242_v51, %v8226_v3  ;;  %v8245_v3 = vld [vmem:[%s14536_s10 + $0x2d0] sm:$0xff]  ;;  %v8276_v51 = vld [vmem:[%s14536_s10 + $0x3c8] sm:$0xff] }
0x1da1   :  { %v13076_v5 = vsub.f32 %v5913_v15, %v5929_v39  ;;  %v8223_v39 = vld [vmem:[%s14536_s10 + $0x220] sm:$0xff] }
0x1da2   :  { %v5938_v8 = vmul.f32 %v13074_v31, %v13074_v31  ;;  %10281 = vmatprep.subr.bf16.mxu0 %v10280_v56  ;;  %v8262_v56 = vld [vmem:[%s14536_s10 + $0x358] sm:$0xff] }
0x1da3   :  { %v5937_v22 = vmul.f32 %v13076_v5, %v13076_v5 }
0x1da4   :  { %v5944_v43 = vsel %vm120_vm0, %v5938_v8, 0.0  ;;  %v8239_v8 = vld [vmem:[%s14536_s10 + $0x2a0] sm:$0xff] }
0x1da5   :  { %5945 = vadd.xlane.f32.xlu0 %v5944_v43  ;;  %v5941_v40 = vsel %vm120_vm0, %v5937_v22, 0.0  ;;  %v8225_v43 = vld [vmem:[%s14536_s10 + $0x230] sm:$0xff] }
0x1da6   :  { %5942 = vadd.xlane.f32.xlu1 %v5941_v40  ;;  %v8241_v40 = vld [vmem:[%s14536_s10 + $0x2b0] sm:$0xff] }
0x1da7   :  { %v10282_v17 = vpack.c.bf16 %v8241_v40, %v8225_v43  ;;  %v8231_v43 = vld [vmem:[%s14536_s10 + $0x260] sm:$0xff] }
0x1da8   :  { %v8247_v40 = vld [vmem:[%s14536_s10 + $0x2e0] sm:$0xff] }
0x1dac   :  { %v5925_v45 = vpop.xlane.xlu0 %5924 }
0x1dad   :  { %v5931_v44 = vmul.f32 0.03125, %v5925_v45 }
0x1daf   :  { %v13084_v37 = vsub.f32 %v5915_v60, %v5931_v44  ;;  %v8272_v44 = vld [vmem:[%s14536_s10 + $0x3a8] sm:$0xff] }
0x1db0   :  { %v5928_v49 = vpop.xlane.xlu0 %5927 }
0x1db1   :  { %v5932_v47 = vmul.f32 0.03125, %v5928_v49  ;;  %v5939_v33 = vmul.f32 %v13084_v37, %v13084_v37  ;;  %v8258_v49 = vld [vmem:[%s14536_s10 + $0x338] sm:$0xff] }
0x1db3   :  { %v13088_v30 = vsub.f32 %v5916_v52, %v5932_v47  ;;  %v5947_v21 = vsel %vm120_vm0, %v5939_v33, 0.0  ;;  %v8274_v47 = vld [vmem:[%s14536_s10 + $0x3b8] sm:$0xff] }
0x1db4   :  { %5948 = vadd.xlane.f32.xlu1 %v5947_v21  ;;  %v10284_v10 = vpack.c.bf16 %v8274_v47, %v8258_v49  ;;  %v8266_v49 = vld [vmem:[%s14536_s10 + $0x378] sm:$0xff] }
0x1db5   :  { %v5940_v0 = vmul.f32 %v13088_v30, %v13088_v30  ;;  %v8282_v47 = vld [vmem:[%s14536_s10 + $0x3f8] sm:$0xff] }
0x1db6   :  { %v10316_v42 = vpack.c.bf16 %v8282_v47, %v8266_v49  ;;  %v8356_v49 = vld [vmem:[%s14539_s12 + $0x938] sm:$0xff]  ;;  %v8341_v47 = vld [vmem:[%s14539_s12 + $0x8c0] sm:$0xff] }
0x1db7   :  { %v5950_v26 = vsel %vm120_vm0, %v5940_v0, 0.0 }
0x1db8   :  { %5951 = vadd.xlane.f32.xlu0 %v5950_v26  ;;  %v10274_v26 = vpack.c.bf16 %v8239_v8, %v8223_v39 }
0x1e32   :  { %v5946_v15 = vpop.xlane.xlu0 %5945 }
0x1e33   :  { %v5954_v14 = vmul.f32 0.03125, %v5946_v15  ;;  %v5943_v13 = vpop.xlane.xlu1 %5942  ;;  %v8278_v15 = vld [vmem:[%s14536_s10 + $0x3d8] sm:$0xff] }
0x1e34   :  { %v5953_v24 = vmul.f32 0.03125, %v5943_v13  ;;  %v10298_v13 = vpack.c.bf16 %v8245_v3, %v8229_v41  ;;  %v8320_v41 = vld [vmem:[%s14539_s12 + $0x818] sm:$0xff] }
0x1e35   :  { %v5958_v62 = vadd.f32 1e-05, %v5954_v14 }
0x1e36   :  { %v5957_v20 = vadd.f32 1e-05, %v5953_v24  ;;  %v8259_v24 = vld [vmem:[%s14536_s10 + $0x340] sm:$0xff] }
0x1e37   :  { %10905 = vrsqrt.f32 %v5958_v62  ;;  %v8275_v62 = vld [vmem:[%s14536_s10 + $0x3c0] sm:$0xff] }
0x1e38   :  { %10907 = vrsqrt.f32 %v5957_v20  ;;  %v10292_v20 = vpack.c.bf16 %v8276_v51, %v8260_v18  ;;  %v8351_v51 = vld [vmem:[%s14539_s12 + $0x910] sm:$0xff] }
0x1e41   :  { %v10906_v53 = vpop.eup %10905  ;;  %v5949_v60 = vpop.xlane.xlu1 %5948 }
0x1e42   :  { %v10908_v52 = vpop.eup %10907  ;;  %v5955_v7 = vmul.f32 0.03125, %v5949_v60  ;;  %v5966_v36 = vmul.f32 %v10906_v53, %v13074_v31  ;;  %v8256_v31 = vld [vmem:[%s14536_s10 + $0x328] sm:$0xff]  ;;  %v10300_v53 = vpack.c.bf16 %v8278_v15, %v8262_v56  ;;  %v8261_v60 = vld [vmem:[%s14536_s10 + $0x350] sm:$0xff]  ;;  %v8352_v56 = vld [vmem:[%s14539_s12 + $0x918] sm:$0xff] }
0x1e43   :  { %v5965_v46 = vmul.f32 %v10908_v52, %v13076_v5  ;;  %v10276_v11 = vpack.c.bf16 %v8272_v44, %v8256_v31  ;;  %v8277_v52 = vld [vmem:[%s14536_s10 + $0x3d0] sm:$0xff]  ;;  %v8280_v44 = vld [vmem:[%s14536_s10 + $0x3e8] sm:$0xff]  ;;  %v8337_v15 = vld [vmem:[%s14539_s12 + $0x8a0] sm:$0xff] }
0x1e44   :  { %v5959_v22 = vadd.f32 1e-05, %v5955_v7  ;;  %v5978_v21 = vmul.f32 %v8216_v12, %v5966_v36  ;;  %v8248_v7 = vld [vmem:[%s14536_s10 + $0x2e8] sm:$0xff]  ;;  %v8250_v36 = vld [vmem:[%s14536_s10 + $0x2f8] sm:$0xff]  ;;  %v10302_v39 = vpack.c.bf16 %v8277_v52, %v8261_v60  ;;  %v8233_v31 = vld [vmem:[%s14536_s10 + $0x270] sm:$0xff] }
0x1e45   :  { %v5977_v5 = vmul.f32 %v8216_v12, %v5965_v46  ;;  %v5952_v45 = vpop.xlane.xlu0 %5951  ;;  %v10294_v46 = vpack.c.bf16 %v8275_v62, %v8259_v24  ;;  %v8370_v24 = vld [vmem:[%s14539_s12 + $0x9a8] sm:$0xff] }
0x1e46   :  { %10909 = vrsqrt.f32 %v5959_v22  ;;  %v5956_v33 = vmul.f32 0.03125, %v5952_v45  ;;  %v13222_v63 = vadd.f32 %v13160_v50, %v5978_v21  ;;  %v8264_v45 = vld [vmem:[%s14536_s10 + $0x368] sm:$0xff] }
0x1e47   :  { %v13189_v0 = vadd.f32 %v13160_v50, %v5977_v5  ;;  %v8249_v5 = vld [vmem:[%s14536_s10 + $0x2f0] sm:$0xff]  ;;  %v10308_v58 = vpack.c.bf16 %v8280_v44, %v8264_v45  ;;  %v8322_v60 = vld [vmem:[%s14539_s12 + $0x828] sm:$0xff] }
0x1e48   :  { %v5960_v34 = vadd.f32 1e-05, %v5956_v33  ;;  %v10306_v33 = vpack.c.bf16 %v8247_v40, %v8231_v43  ;;  %v10314_v21 = vpack.c.bf16 %v8249_v5, %v8233_v31  ;;  %v8323_v40 = vld [vmem:[%s14539_s12 + $0x830] sm:$0xff]  ;;  %v8324_v31 = vld [vmem:[%s14539_s12 + $0x838] sm:$0xff] }
0x1e49   :  { %8285 = vmatmul.mubr.msk.f32.vlgmr.msra.gmra.mrb[102].mxu1 %vm120_vm0, %v13189_v0  ;;  %8289 = vmatmul.mubr.msk.f32.vlgmr.msra.gmra.mrb[106].mxu0 %vm120_vm0, %v13189_v0  ;;  %v8355_v44 = vld [vmem:[%s14539_s12 + $0x930] sm:$0xff] }
0x1e4a   :  { %10911 = vrsqrt.f32 %v5960_v34  ;;  %6225 = vmatprep.mubr.f32.mxu1 %v14606_v19  ;;  %6314 = vmatprep.mubr.f32.mxu0 %v14606_v19  ;;  %v8265_v34 = vld [vmem:[%s14536_s10 + $0x370] sm:$0xff] }
0x1e4b   :  { %10275 = vmatpush1.bf16.msra.mxu1 %v10274_v26  ;;  %10283 = vmatpush1.bf16.msra.mxu0 %v10282_v17  ;;  %v8263_v26 = vld [vmem:[%s14536_s10 + $0x360] sm:$0xff] }
0x1e4c   :  { %10277 = vmatprep.subr.bf16.mxu1 %v10276_v11  ;;  %10285 = vmatprep.subr.bf16.mxu0 %v10284_v10  ;;  %v8279_v17 = vld [vmem:[%s14536_s10 + $0x3e0] sm:$0xff]  ;;  %v8281_v11 = vld [vmem:[%s14536_s10 + $0x3f0] sm:$0xff] }
0x1e4d   :  { %8286 = vmatmul.mubr.msk.f32.gmra.mrb[104].mxu1 %vm120_vm0, %v13222_v63  ;;  %8290 = vmatmul.mubr.msk.f32.gmra.mrb[108].mxu0 %vm120_vm0, %v13222_v63  ;;  %v8333_v10 = vld [vmem:[%s14539_s12 + $0x880] sm:$0xff]  ;;  %v10310_v59 = vpack.c.bf16 %v8279_v17, %v8263_v26  ;;  %v10318_v1 = vpack.c.bf16 %v8281_v11, %v8265_v34  ;;  %v8374_v26 = vld [vmem:[%s14539_s12 + $0x9c8] sm:$0xff]  ;;  %v10334_v17 = vpack.c.bf16 %v8324_v31, %v8323_v40 }
0x1e4e   :  { %6231 = vmatprep.mubr.f32.mxu1 %v14606_v19  ;;  %6320 = vmatprep.mubr.f32.mxu0 %v14606_v19  ;;  %v10320_v2 = vpack.c.bf16 %v8334_v23, %v8333_v10  ;;  %v8326_v34 = vld [vmem:[%s14539_s12 + $0x848] sm:$0xff]  ;;  %v8357_v23 = vld [vmem:[%s14539_s12 + $0x940] sm:$0xff] }
0x1e4f   :  { %10279 = vmatpush1.bf16.msra.mxu1 %v10278_v27  ;;  %10287 = vmatpush1.bf16.msra.mxu0 %v10286_v57  ;;  %v10352_v27 = vpack.c.bf16 %v8366_v25, %v8365_v54  ;;  %v8317_v57 = vld [vmem:[%s14539_s12 + $0x800] sm:$0xff]  ;;  %v8358_v54 = vld [vmem:[%s14539_s12 + $0x948] sm:$0xff]  ;;  %v8343_v25 = vld [vmem:[%s14539_s12 + $0x8d0] sm:$0xff] }
0x1e50   :  { %v10910_v32 = vpop.eup %10909  ;;  %10289 = vmatprep.subr.bf16.mxu1 %v10288_v55  ;;  %10297 = vmatprep.subr.bf16.mxu0 %v10296_v28  ;;  %v8318_v55 = vld [vmem:[%s14539_s12 + $0x808] sm:$0xff]  ;;  %v8349_v28 = vld [vmem:[%s14539_s12 + $0x900] sm:$0xff] }
0x1e51   :  { %v5967_v38 = vmul.f32 %v10910_v32, %v13084_v37  ;;  %v8350_v32 = vld [vmem:[%s14539_s12 + $0x908] sm:$0xff]  ;;  %v8429_v31 = vld [vmem:[%s14539_s12 + $0xb80] sm:$0xff] }
0x1e52   :  { %v8398_v40 = vld [vmem:[%s14539_s12 + $0xa88] sm:$0xff] }
0x1e53   :  { %v5979_v48 = vmul.f32 %v8216_v12, %v5967_v38  ;;  %v8335_v38 = vld [vmem:[%s14539_s12 + $0x890] sm:$0xff] }
0x1e54   :  { %v10912_v16 = vpop.eup %10911 }
0x1e55   :  { %v13232_v61 = vadd.f32 %v13160_v50, %v5979_v48  ;;  %v5968_v6 = vmul.f32 %v10912_v16, %v13088_v30  ;;  %v8243_v30 = vld [vmem:[%s14536_s10 + $0x2c0] sm:$0xff]  ;;  %v8336_v48 = vld [vmem:[%s14539_s12 + $0x898] sm:$0xff]  ;;  %v8367_v16 = vld [vmem:[%s14539_s12 + $0x990] sm:$0xff] }
0x1e56   :  { %v10290_v14 = vpack.c.bf16 %v8243_v30, %v8227_v29  ;;  %v10354_v29 = vpack.c.bf16 %v8350_v32, %v8349_v28  ;;  %v8319_v30 = vld [vmem:[%s14539_s12 + $0x810] sm:$0xff]  ;;  %v10324_v3 = vpack.c.bf16 %v8336_v48, %v8335_v38  ;;  %v8328_v28 = vld [vmem:[%s14539_s12 + $0x858] sm:$0xff] }
0x1e57   :  { %v5980_v9 = vmul.f32 %v8216_v12, %v5968_v6  ;;  %8287 = vmatmul.mubr.msk.f32.gmra.mrb[106].mxu1 %vm120_vm0, %v13232_v61  ;;  %8291 = vmatmul.mubr.msk.f32.gmra.mrb[110].mxu0 %vm120_vm0, %v13232_v61  ;;  %v8232_v12 = vld [vmem:[%s14536_s10 + $0x268] sm:$0xff]  ;;  %v8368_v6 = vld [vmem:[%s14539_s12 + $0x998] sm:$0xff]  ;;  %v10326_v62 = vpack.c.bf16 %v8320_v41, %v8319_v30  ;;  %v8359_v48 = vld [vmem:[%s14539_s12 + $0x950] sm:$0xff] }
0x1e58   :  { %6237 = vmatprep.mubr.f32.mxu1 %v14606_v19  ;;  %6326 = vmatprep.mubr.f32.mxu0 %v14606_v19  ;;  %v10304_v8 = vpack.c.bf16 %v8248_v7, %v8232_v12  ;;  %v10356_v18 = vpack.c.bf16 %v8368_v6, %v8367_v16  ;;  %v8353_v7 = vld [vmem:[%s14539_s12 + $0x920] sm:$0xff]  ;;  %v8360_v16 = vld [vmem:[%s14539_s12 + $0x958] sm:$0xff]  ;;  %v8378_v30 = vld [vmem:[%s14539_s12 + $0x9e8] sm:$0xff] }
0x1e59   :  { %v13242_v37 = vadd.f32 %v13160_v50, %v5980_v9  ;;  %v8234_v50 = vld [vmem:[%s14536_s10 + $0x278] sm:$0xff]  ;;  %v10322_v9 = vpack.c.bf16 %v8318_v55, %v8317_v57  ;;  %v10370_v57 = vpack.c.bf16 %v8358_v54, %v8357_v23  ;;  %v8327_v55 = vld [vmem:[%s14539_s12 + $0x850] sm:$0xff]  ;;  %v8345_v6 = vld [vmem:[%s14539_s12 + $0x8e0] sm:$0xff] }
0x1e5a   :  { %v10312_v22 = vpack.c.bf16 %v8250_v36, %v8234_v50  ;;  %v8354_v50 = vld [vmem:[%s14539_s12 + $0x928] sm:$0xff]  ;;  %v8339_v36 = vld [vmem:[%s14539_s12 + $0x8b0] sm:$0xff]  ;;  %v10342_v41 = vpack.c.bf16 %v8328_v28, %v8327_v55  ;;  %v8400_v28 = vld [vmem:[%s14539_s12 + $0xa98] sm:$0xff] }
0x1e5b   :  { %8288 = vmatmul.mubr.msk.f32.gmra.mrb[108].mxu1 %vm120_vm0, %v13242_v37  ;;  %8292 = vmatmul.mubr.msk.f32.gmra.mrb[112].mxu0 %vm120_vm0, %v13242_v37  ;;  %v10362_v43 = vpack.c.bf16 %v8354_v50, %v8353_v7  ;;  %v8331_v7 = vld [vmem:[%s14539_s12 + $0x870] sm:$0xff]  ;;  %v8332_v50 = vld [vmem:[%s14539_s12 + $0x878] sm:$0xff] }
0x1e5c   :  { %6397 = vmatprep.mubr.f32.mxu1 %v14606_v19  ;;  %6486 = vmatprep.mubr.f32.mxu0 %v14606_v19 }
0x1e5f   :  { %8293 = vmatmul.mubr.msk.f32.vlgmr.msra.gmra.mrb[110].mxu1 %vm120_vm0, %v13189_v0  ;;  %8297 = vmatmul.mubr.msk.f32.vlgmr.msra.gmra.mrb[114].mxu0 %vm120_vm0, %v13189_v0 }
0x1e60   :  { %6403 = vmatprep.mubr.f32.mxu1 %v14606_v19  ;;  %6492 = vmatprep.mubr.f32.mxu0 %v14606_v19 }
0x1e61   :  { %10291 = vmatpush1.bf16.msra.mxu1 %v10290_v14  ;;  %10299 = vmatpush1.bf16.msra.mxu0 %v10298_v13  ;;  %v8338_v14 = vld [vmem:[%s14539_s12 + $0x8a8] sm:$0xff]  ;;  %v8369_v13 = vld [vmem:[%s14539_s12 + $0x9a0] sm:$0xff] }
0x1e62   :  { %10293 = vmatprep.subr.bf16.mxu1 %v10292_v20  ;;  %10301 = vmatprep.subr.bf16.mxu0 %v10300_v53  ;;  %v10358_v20 = vpack.c.bf16 %v8352_v56, %v8351_v51  ;;  %v8321_v53 = vld [vmem:[%s14539_s12 + $0x820] sm:$0xff]  ;;  %v10328_v52 = vpack.c.bf16 %v8338_v14, %v8337_v15  ;;  %v10360_v12 = vpack.c.bf16 %v8370_v24, %v8369_v13  ;;  %v8330_v15 = vld [vmem:[%s14539_s12 + $0x868] sm:$0xff] }
0x1e63   :  { %8294 = vmatmul.mubr.msk.f32.gmra.mrb[112].mxu1 %vm120_vm0, %v13222_v63  ;;  %8298 = vmatmul.mubr.msk.f32.gmra.mrb[116].mxu0 %vm120_vm0, %v13222_v63  ;;  %v8361_v14 = vld [vmem:[%s14539_s12 + $0x960] sm:$0xff]  ;;  %v8362_v13 = vld [vmem:[%s14539_s12 + $0x968] sm:$0xff] }
0x1e64   :  { %6409 = vmatprep.mubr.f32.mxu1 %v14606_v19  ;;  %6498 = vmatprep.mubr.f32.mxu0 %v14606_v19 }
0x1e65   :  { %10295 = vmatpush1.bf16.msra.mxu1 %v10294_v46  ;;  %10303 = vmatpush1.bf16.msra.mxu0 %v10302_v39  ;;  %v8340_v46 = vld [vmem:[%s14539_s12 + $0x8b8] sm:$0xff]  ;;  %v8371_v39 = vld [vmem:[%s14539_s12 + $0x9b0] sm:$0xff] }
0x1e66   :  { %10305 = vmatprep.subr.bf16.mxu1 %v10304_v8  ;;  %10313 = vmatprep.subr.bf16.mxu0 %v10312_v22  ;;  %v8372_v8 = vld [vmem:[%s14539_s12 + $0x9b8] sm:$0xff]  ;;  %v10330_v22 = vpack.c.bf16 %v8322_v60, %v8321_v53  ;;  %v10332_v5 = vpack.c.bf16 %v8340_v46, %v8339_v36  ;;  %v8379_v60 = vld [vmem:[%s14539_s12 + $0x9f0] sm:$0xff]  ;;  %v10350_v46 = vpack.c.bf16 %v8332_v50, %v8331_v7 }
0x1e67   :  { %8295 = vmatmul.mubr.msk.f32.gmra.mrb[114].mxu1 %vm120_vm0, %v13232_v61  ;;  %8299 = vmatmul.mubr.msk.f32.gmra.mrb[118].mxu0 %vm120_vm0, %v13232_v61  ;;  %v10364_v45 = vpack.c.bf16 %v8372_v8, %v8371_v39  ;;  %v8348_v53 = vld [vmem:[%s14539_s12 + $0x8f8] sm:$0xff]  ;;  %v8363_v39 = vld [vmem:[%s14539_s12 + $0x970] sm:$0xff] }
0x1e68   :  { %6415 = vmatprep.mubr.f32.mxu1 %v14606_v19  ;;  %6504 = vmatprep.mubr.f32.mxu0 %v14606_v19  ;;  %v8364_v8 = vld [vmem:[%s14539_s12 + $0x978] sm:$0xff] }
0x1e6b   :  { %8296 = vmatmul.mubr.msk.f32.gmra.mrb[116].mxu1 %vm120_vm0, %v13242_v37  ;;  %8300 = vmatmul.mubr.msk.f32.gmra.mrb[120].mxu0 %vm120_vm0, %v13242_v37 }
0x1e6c   :  { %6575 = vmatprep.mubr.f32.mxu1 %v14606_v19  ;;  %6664 = vmatprep.mubr.f32.mxu0 %v14606_v19 }
0x1e6f   :  { %8301 = vmatmul.mubr.msk.f32.vlgmr.msra.gmra.mrb[118].mxu1 %vm120_vm0, %v13189_v0  ;;  %8305 = vmatmul.mubr.msk.f32.vlgmr.msra.gmra.mrb[122].mxu0 %vm120_vm0, %v13189_v0 }
0x1e70   :  { %6581 = vmatprep.mubr.f32.mxu1 %v14606_v19  ;;  %6670 = vmatprep.mubr.f32.mxu0 %v14606_v19 }
0x1e71   :  { %10307 = vmatpush1.bf16.msra.mxu1 %v10306_v33  ;;  %10315 = vmatpush1.bf16.msra.mxu0 %v10314_v21  ;;  %v8342_v33 = vld [vmem:[%s14539_s12 + $0x8c8] sm:$0xff]  ;;  %v8373_v21 = vld [vmem:[%s14539_s12 + $0x9c0] sm:$0xff] }
0x1e72   :  { %10309 = vmatprep.subr.bf16.mxu1 %v10308_v58  ;;  %10317 = vmatprep.subr.bf16.mxu0 %v10316_v42  ;;  %v10366_v58 = vpack.c.bf16 %v8356_v49, %v8355_v44  ;;  %v8325_v42 = vld [vmem:[%s14539_s12 + $0x840] sm:$0xff]  ;;  %v10336_v11 = vpack.c.bf16 %v8342_v33, %v8341_v47  ;;  %v10368_v10 = vpack.c.bf16 %v8374_v26, %v8373_v21  ;;  %v13611_v49 = vld [vmem:[%s14540_s11 + $0x10] sm:$0xff] }
0x1e73   :  { %8302 = vmatmul.mubr.msk.f32.gmra.mrb[120].mxu1 %vm120_vm0, %v13222_v63  ;;  %8306 = vmatmul.mubr.msk.f32.gmra.mrb[124].mxu0 %vm120_vm0, %v13222_v63  ;;  %v14608_v47 = vld [vmem:[#allocation3_spill] sm:$0xff]  ;;  %v14609_v21 = vld [vmem:[#allocation5_spill] sm:$0xff] }
0x1e74   :  { %6587 = vmatprep.mubr.f32.mxu1 %v14606_v19  ;;  %6676 = vmatprep.mubr.f32.mxu0 %v14606_v19  ;;  %v13615_v33 = vrot.slane %v13611_v49, %v14608_v47  ;;  %v13619_v26 = vrot.slane %v13611_v49, %v14609_v21 }
0x1e75   :  { %10311 = vmatpush1.bf16.msra.mxu1 %v10310_v59  ;;  %10319 = vmatpush1.bf16.msra.mxu0 %v10318_v1  ;;  %v8344_v59 = vld [vmem:[%s14539_s12 + $0x8d8] sm:$0xff]  ;;  %v8375_v1 = vld [vmem:[%s14539_s12 + $0x9d0] sm:$0xff] }
0x1e76   :  { %10321 = vmatprep.subr.bf16.mxu1 %v10320_v2  ;;  %10353 = vmatprep.subr.bf16.mxu0 %v10352_v27  ;;  %v8376_v2 = vld [vmem:[%s14539_s12 + $0x9d8] sm:$0xff]  ;;  %v10338_v27 = vpack.c.bf16 %v8326_v34, %v8325_v42  ;;  %v10340_v32 = vpack.c.bf16 %v8344_v59, %v8343_v25  ;;  %v8413_v25 = vld [vmem:[%s14539_s12 + $0xb00] sm:$0xff]  ;;  %v8414_v59 = vld [vmem:[%s14539_s12 + $0xb08] sm:$0xff] }
0x1e77   :  { %8303 = vmatmul.mubr.msk.f32.gmra.mrb[122].mxu1 %vm120_vm0, %v13232_v61  ;;  %8307 = vmatmul.mubr.msk.f32.gmra.mrb[126].mxu0 %vm120_vm0, %v13232_v61  ;;  %v10372_v38 = vpack.c.bf16 %v8376_v2, %v8375_v1  ;;  %v14611_v42 = vld [vmem:[#allocation6_spill] sm:$0xff]  ;;  %v8399_v1 = vld [vmem:[%s14539_s12 + $0xa90] sm:$0xff] }
0x1e78   :  { %6593 = vmatprep.mubr.f32.mxu1 %v14606_v19  ;;  %6682 = vmatprep.mubr.f32.mxu0 %v14606_v19  ;;  %v13627_v34 = vrot.slane %v13611_v49, %v14611_v42 }
0x1e7b   :  { %8304 = vmatmul.mubr.msk.f32.gmra.mrb[124].mxu1 %vm120_vm0, %v13242_v37  ;;  %8308 = vmatmul.mubr.msk.f32.gmra.mrb[128].mxu0 %vm120_vm0, %v13242_v37 }
0x1e7c   :  { %6753 = vmatprep.mubr.f32.mxu1 %v14606_v19  ;;  %6842 = vmatprep.mubr.f32.mxu0 %v14606_v19 }
0x1e7f   :  { %8309 = vmatmul.mubr.msk.f32.vlgmr.msra.gmra.mrb[126].mxu1 %vm120_vm0, %v13189_v0  ;;  %8313 = vmatmul.mubr.msk.f32.vlgmr.msra.gmra.mrb[130].mxu0 %vm120_vm0, %v13189_v0 }
0x1e80   :  { %6759 = vmatprep.mubr.f32.mxu1 %v14606_v19  ;;  %6848 = vmatprep.mubr.f32.mxu0 %v14606_v19 }
0x1e81   :  { %10323 = vmatpush3.bf16.msra.mxu1 %v10322_v9  ;;  %10355 = vmatpush3.bf16.msra.mxu0 %v10354_v29  ;;  %v8346_v9 = vld [vmem:[%s14539_s12 + $0x8e8] sm:$0xff]  ;;  %v8377_v29 = vld [vmem:[%s14539_s12 + $0x9e0] sm:$0xff] }
0x1e82   :  { %10325 = vmatprep.subr.bf16.mxu1 %v10324_v3  ;;  %10357 = vmatprep.subr.bf16.mxu0 %v10356_v18  ;;  %v10374_v3 = vpack.c.bf16 %v8360_v16, %v8359_v48  ;;  %v8329_v18 = vld [vmem:[%s14539_s12 + $0x860] sm:$0xff]  ;;  %v10344_v51 = vpack.c.bf16 %v8346_v9, %v8345_v6  ;;  %v10376_v56 = vpack.c.bf16 %v8378_v30, %v8377_v29  ;;  %v8383_v29 = vld [vmem:[%s14539_s12 + $0xa10] sm:$0xff] }
0x1e83   :  { %8310 = vmatmul.mubr.msk.f32.gmra.mrb[128].mxu1 %vm120_vm0, %v13222_v63  ;;  %8314 = vmatmul.mubr.msk.f32.gmra.mrb[132].mxu0 %vm120_vm0, %v13222_v63  ;;  %v10346_v24 = vpack.c.bf16 %v8330_v15, %v8329_v18  ;;  %v10418_v9 = vpack.c.bf16 %v8414_v59, %v8413_v25  ;;  %v8384_v15 = vld [vmem:[%s14539_s12 + $0xa18] sm:$0xff]  ;;  %v8403_v25 = vld [vmem:[%s14539_s12 + $0xab0] sm:$0xff] }
0x1e84   :  { %6765 = vmatprep.mubr.f32.mxu1 %v14606_v19  ;;  %6854 = vmatprep.mubr.f32.mxu0 %v14606_v19  ;;  %v8404_v59 = vld [vmem:[%s14539_s12 + $0xab8] sm:$0xff] }
0x1e85   :  { %10327 = vmatpush3.bf16.msra.mxu1 %v10326_v62  ;;  %10359 = vmatpush3.bf16.msra.mxu0 %v10358_v20  ;;  %v10378_v62 = vpack.c.bf16 %v8362_v13, %v8361_v14  ;;  %v8347_v20 = vld [vmem:[%s14539_s12 + $0x8f0] sm:$0xff] }
0x1e86   :  { %10329 = vmatprep.subr.bf16.mxu1 %v10328_v52  ;;  %10361 = vmatprep.subr.bf16.mxu0 %v10360_v12  ;;  %v10348_v52 = vpack.c.bf16 %v8348_v53, %v8347_v20  ;;  %v8380_v12 = vld [vmem:[%s14539_s12 + $0x9f8] sm:$0xff]  ;;  %v8415_v14 = vld [vmem:[%s14539_s12 + $0xb10] sm:$0xff] }
0x1e87   :  { %8311 = vmatmul.mubr.msk.f32.gmra.mrb[130].mxu1 %vm120_vm0, %v13232_v61  ;;  %8315 = vmatmul.mubr.msk.f32.gmra.mrb[134].mxu0 %vm120_vm0, %v13232_v61  ;;  %v10380_v36 = vpack.c.bf16 %v8380_v12, %v8379_v60  ;;  %v8401_v12 = vld [vmem:[%s14539_s12 + $0xaa0] sm:$0xff] }
0x1e88   :  { %6771 = vmatprep.mubr.f32.mxu1 %v14606_v19  ;;  %6860 = vmatprep.mubr.f32.mxu0 %v14606_v19 }
0x1e89   :  { %10331 = vmatpush3.bf16.msra.mxu1 %v10330_v22  ;;  %10363 = vmatpush3.bf16.msra.mxu0 %v10362_v43  ;;  %v10382_v22 = vpack.c.bf16 %v8364_v8, %v8363_v39  ;;  %v8397_v43 = vld [vmem:[%s14539_s12 + $0xa80] sm:$0xff]  ;;  %v8434_v39 = vld [vmem:[%s14539_s12 + $0xba8] sm:$0xff] }
0x1e8a   :  { %10333 = vmatprep.subr.bf16.mxu1 %v10332_v5  ;;  %10365 = vmatprep.subr.bf16.mxu0 %v10364_v45  ;;  %v10384_v5 = vpack.c.bf16 %v8398_v40, %v8397_v43  ;;  %v8430_v45 = vld [vmem:[%s14539_s12 + $0xb88] sm:$0xff]  ;;  %v10390_v43 = vpack.c.bf16 %v8384_v15, %v8383_v29 }
0x1e8b   :  { %8312 = vmatmul.mubr.msk.f32.gmra.mrb[132].mxu1 %vm120_vm0, %v13242_v37  ;;  %8316 = vmatmul.mubr.msk.f32.gmra.mrb[136].mxu0 %vm120_vm0, %v13242_v37  ;;  %v10416_v44 = vpack.c.bf16 %v8430_v45, %v8429_v31  ;;  %v8385_v31 = vld [vmem:[%s14539_s12 + $0xa20] sm:$0xff] }
0x1e8d   :  { %10335 = vmatpush3.bf16.msra.mxu1 %v10334_v17  ;;  %10367 = vmatpush3.bf16.msra.mxu0 %v10366_v58  ;;  %v14610_v17 = vld [vmem:[#allocation4_spill] sm:$0xff] }
0x1e8e   :  { %10337 = vmatprep.subr.bf16.mxu1 %v10336_v11  ;;  %10369 = vmatprep.subr.bf16.mxu0 %v10368_v10  ;;  %v13623_v58 = vrot.slane %v13611_v49, %v14610_v17  ;;  %v8381_v11 = vld [vmem:[%s14539_s12 + $0xa00] sm:$0xff]  ;;  %v8382_v10 = vld [vmem:[%s14539_s12 + $0xa08] sm:$0xff] }
0x1e8f   :  { %v10386_v6 = vpack.c.bf16 %v8382_v10, %v8381_v11 }
0x1e91   :  { %10339 = vmatpush3.bf16.msra.mxu1 %v10338_v27  ;;  %10371 = vmatpush3.bf16.msra.mxu0 %v10370_v57 }
0x1e92   :  { %10341 = vmatprep.subr.bf16.mxu1 %v10340_v32  ;;  %10373 = vmatprep.subr.bf16.mxu0 %v10372_v38  ;;  %v8431_v32 = vld [vmem:[%s14539_s12 + $0xb90] sm:$0xff]  ;;  %v8432_v38 = vld [vmem:[%s14539_s12 + $0xb98] sm:$0xff] }
0x1e95   :  { %10343 = vmatpush3.bf16.msra.mxu1 %v10342_v41  ;;  %10375 = vmatpush3.bf16.msra.mxu0 %v10374_v3 }
0x1e96   :  { %10345 = vmatprep.subr.bf16.mxu1 %v10344_v51  ;;  %10377 = vmatprep.subr.bf16.mxu0 %v10376_v56  ;;  %v10388_v51 = vpack.c.bf16 %v8400_v28, %v8399_v1  ;;  %v10420_v56 = vpack.c.bf16 %v8432_v38, %v8431_v32  ;;  %v8435_v1 = vld [vmem:[%s14539_s12 + $0xbb0] sm:$0xff] }
0x1e97   :  { %v8387_v32 = vld [vmem:[%s14539_s12 + $0xa30] sm:$0xff] }
0x1e99   :  { %10347 = vmatpush3.bf16.msra.mxu1 %v10346_v24  ;;  %10379 = vmatpush3.bf16.msra.mxu0 %v10378_v62 }
0x1e9a   :  { %10349 = vmatprep.subr.bf16.mxu1 %v10348_v52  ;;  %10381 = vmatprep.subr.bf16.mxu0 %v10380_v36  ;;  %v8416_v52 = vld [vmem:[%s14539_s12 + $0xb18] sm:$0xff]  ;;  %v8402_v36 = vld [vmem:[%s14539_s12 + $0xaa8] sm:$0xff] }
0x1e9b   :  { %v10422_v40 = vpack.c.bf16 %v8416_v52, %v8415_v14  ;;  %v10392_v11 = vpack.c.bf16 %v8402_v36, %v8401_v12  ;;  %v8437_v14 = vld [vmem:[%s14539_s12 + $0xbc0] sm:$0xff] }
0x1e9d   :  { %10351 = vmatpush3.bf16.msra.mxu1 %v10350_v46  ;;  %10383 = vmatpush3.bf16.msra.mxu0 %v10382_v22  ;;  %v8433_v46 = vld [vmem:[%s14539_s12 + $0xba0] sm:$0xff] }
0x1e9e   :  { %10385 = vmatprep.subr.bf16.mxu1 %v10384_v5  ;;  %10417 = vmatprep.subr.bf16.mxu0 %v10416_v44  ;;  %v8386_v5 = vld [vmem:[%s14539_s12 + $0xa28] sm:$0xff]  ;;  %v10424_v10 = vpack.c.bf16 %v8434_v39, %v8433_v46  ;;  %v8421_v39 = vld [vmem:[%s14539_s12 + $0xb40] sm:$0xff] }
0x1f1c   :  { %v6221_v23 = vpop.f32.mrb[102].mxu1  ;;  %v6310_v54 = vpop.f32.mrb[106].mxu0 }
0x1f1d   :  { %v6222_v2 = vadd.f32 %v6221_v23, %v13615_v33  ;;  %v6311_v27 = vadd.f32 %v6310_v54, %v13619_v26  ;;  %v6223_v57 = vpop.f32.mrb[103].mxu1  ;;  %v6312_v55 = vpop.f32.mrb[107].mxu0  ;;  %v8417_v23 = vld [vmem:[%s14539_s12 + $0xb20] sm:$0xff]  ;;  %v8418_v54 = vld [vmem:[%s14539_s12 + $0xb28] sm:$0xff] }
0x1f1e   :  { %v6224_v48 = vadd.f32 %v6223_v57, %v13623_v58  ;;  %v6313_v16 = vadd.f32 %v6312_v55, %v13627_v34  ;;  %v10426_v57 = vpack.c.bf16 %v8418_v54, %v8417_v23  ;;  %v10396_v55 = vpack.c.bf16 %v8404_v59, %v8403_v25  ;;  %v8439_v59 = vld [vmem:[%s14539_s12 + $0xbd0] sm:$0xff] }
0x1f1f   :  { %v6867_v13 = vmax.f32 %v6222_v2, 0.0  ;;  %v6869_v24 = vmax.f32 %v6311_v27, 0.0  ;;  %v8436_v2 = vld [vmem:[%s14539_s12 + $0xbb8] sm:$0xff]  ;;  %v10394_v27 = vpack.c.bf16 %v8386_v5, %v8385_v31  ;;  %v14613_v5 = vld [vmem:[#allocation8_spill] sm:$0xff] }
0x1f20   :  { %v6868_v30 = vmax.f32 %v6224_v48, 0.0  ;;  %v6870_v41 = vmax.f32 %v6313_v16, 0.0  ;;  %v6227_v3 = vpop.f32.mrb[104].mxu1  ;;  %v6316_v18 = vpop.f32.mrb[108].mxu0  ;;  %v10428_v28 = vpack.c.bf16 %v8436_v2, %v8435_v1  ;;  %v8388_v16 = vld [vmem:[%s14539_s12 + $0xa38] sm:$0xff] }
0x1f21   :  { %v6228_v62 = vadd.f32 %v6227_v3, %v13615_v33  ;;  %v6317_v20 = vadd.f32 %v6316_v18, %v13619_v26  ;;  %v6229_v53 = vpop.f32.mrb[105].mxu1  ;;  %v6318_v60 = vpop.f32.mrb[109].mxu0  ;;  %v8405_v3 = vld [vmem:[%s14539_s12 + $0xac0] sm:$0xff]  ;;  %v8406_v18 = vld [vmem:[%s14539_s12 + $0xac8] sm:$0xff]  ;;  %v8440_v1 = vld [vmem:[%s14539_s12 + $0xbd8] sm:$0xff] }
0x1f22   :  { %v6230_v7 = vadd.f32 %v6229_v53, %v13623_v58  ;;  %v6319_v50 = vadd.f32 %v6318_v60, %v13627_v34  ;;  %7260 = vmatprep.mubr.f32.mxu1 %v6868_v30  ;;  %7345 = vmatprep.mubr.f32.mxu0 %v6870_v41  ;;  %v8390_v53 = vld [vmem:[%s14539_s12 + $0xa48] sm:$0xff]  ;;  %v10400_v46 = vpack.c.bf16 %v8406_v18, %v8405_v3  ;;  %v8392_v2 = vld [vmem:[%s14539_s12 + $0xa58] sm:$0xff] }
0x1f23   :  { %7261 = vmatmul.mubr.f32.vlgmr.msra.gmra.mrb[134].mxu1 %v6867_v13  ;;  %7346 = vmatmul.mubr.f32.vlgmr.msra.gmra.mrb[138].mxu0 %v6869_v24  ;;  %v6883_v45 = vmax.f32 %v6228_v62, 0.0  ;;  %v6885_v44 = vmax.f32 %v6317_v20, 0.0  ;;  %v8438_v13 = vld [vmem:[%s14539_s12 + $0xbc8] sm:$0xff]  ;;  %v10398_v24 = vpack.c.bf16 %v8388_v16, %v8387_v32  ;;  %v8389_v20 = vld [vmem:[%s14539_s12 + $0xa40] sm:$0xff] }
0x1f24   :  { %v6884_v8 = vmax.f32 %v6230_v7, 0.0  ;;  %v6886_v22 = vmax.f32 %v6319_v50, 0.0  ;;  %10387 = vmatpush3.bf16.msra.mxu1 %v10386_v6  ;;  %10419 = vmatpush3.bf16.msra.mxu0 %v10418_v9  ;;  %v8419_v6 = vld [vmem:[%s14539_s12 + $0xb30] sm:$0xff]  ;;  %v8420_v9 = vld [vmem:[%s14539_s12 + $0xb38] sm:$0xff]  ;;  %v14612_v50 = vld [vmem:[#allocation7_spill] sm:$0xff] }
0x1f25   :  { %10389 = vmatprep.subr.bf16.mxu1 %v10388_v51  ;;  %10421 = vmatprep.subr.bf16.mxu0 %v10420_v56  ;;  %v10430_v62 = vpack.c.bf16 %v8420_v9, %v8419_v6  ;;  %v13745_v36 = vrot.slane %v13611_v49, %v14612_v50  ;;  %v8442_v3 = vld [vmem:[%s14539_s12 + $0xbe8] sm:$0xff] }
0x1f26   :  { %7265 = vmatprep.mubr.f32.mxu1 %v6884_v8  ;;  %7350 = vmatprep.mubr.f32.mxu0 %v6886_v22  ;;  %v8422_v8 = vld [vmem:[%s14539_s12 + $0xb48] sm:$0xff] }
0x1f27   :  { %7266 = vmatmul.mubr.f32.gmra.mrb[136].mxu1 %v6883_v45  ;;  %7351 = vmatmul.mubr.f32.gmra.mrb[140].mxu0 %v6885_v44  ;;  %v13756_v45 = vrot.slane %v13611_v49, %v14613_v5  ;;  %v10432_v44 = vpack.c.bf16 %v8438_v13, %v8437_v14 }
0x1f28   :  { %10391 = vmatpush3.bf16.msra.mxu1 %v10390_v43  ;;  %10423 = vmatpush3.bf16.msra.mxu0 %v10422_v40 }
0x1f29   :  { %10393 = vmatprep.subr.bf16.mxu1 %v10392_v11  ;;  %10425 = vmatprep.subr.bf16.mxu0 %v10424_v10  ;;  %v8407_v11 = vld [vmem:[%s14539_s12 + $0xad0] sm:$0xff] }
0x1f2a   :  { %v6233_v38 = vpop.f32.mrb[106].mxu1  ;;  %v6322_v48 = vpop.f32.mrb[110].mxu0 }
0x1f2b   :  { %v6234_v29 = vadd.f32 %v6233_v38, %v13615_v33  ;;  %v6235_v30 = vpop.f32.mrb[107].mxu1  ;;  %v6324_v41 = vpop.f32.mrb[111].mxu0  ;;  %v6323_v51 = vadd.f32 %v6322_v48, %v13619_v26  ;;  %v8424_v38 = vld [vmem:[%s14539_s12 + $0xb58] sm:$0xff]  ;;  %v8409_v48 = vld [vmem:[%s14539_s12 + $0xae0] sm:$0xff] }
0x1f2c   :  { %v6236_v56 = vadd.f32 %v6235_v30, %v13623_v58  ;;  %v6325_v15 = vadd.f32 %v6324_v41, %v13627_v34  ;;  %10395 = vmatpush3.bf16.msra.mxu1 %v10394_v27  ;;  %10427 = vmatpush3.bf16.msra.mxu0 %v10426_v57  ;;  %v8423_v27 = vld [vmem:[%s14539_s12 + $0xb50] sm:$0xff]  ;;  %v8410_v30 = vld [vmem:[%s14539_s12 + $0xae8] sm:$0xff]  ;;  %v8441_v41 = vld [vmem:[%s14539_s12 + $0xbe0] sm:$0xff] }
0x1f2d   :  { %10397 = vmatprep.subr.bf16.mxu1 %v10396_v55  ;;  %10429 = vmatprep.subr.bf16.mxu0 %v10428_v28  ;;  %v6899_v22 = vmax.f32 %v6234_v29, 0.0  ;;  %v6901_v10 = vmax.f32 %v6323_v51, 0.0  ;;  %v10436_v29 = vpack.c.bf16 %v8440_v1, %v8439_v59  ;;  %v10438_v13 = vpack.c.bf16 %v8424_v38, %v8423_v27  ;;  %v8461_v27 = vld [vmem:[%s14539_s12 + $0xc80] sm:$0xff] }
0x1f2e   :  { %v6900_v60 = vmax.f32 %v6236_v56, 0.0  ;;  %v6902_v52 = vmax.f32 %v6325_v15, 0.0  ;;  %v6239_v12 = vpop.f32.mrb[108].mxu1  ;;  %v6328_v7 = vpop.f32.mrb[112].mxu0  ;;  %v13846_v59 = vrot.slane %v13611_v49, %v12083_v35  ;;  %v8493_v38 = vld [vmem:[%s14539_s12 + $0xd80] sm:$0xff] }
0x1f2f   :  { %v6240_v43 = vadd.f32 %v6239_v12, %v13615_v33  ;;  %v6241_v40 = vpop.f32.mrb[109].mxu1  ;;  %v6330_v31 = vpop.f32.mrb[113].mxu0  ;;  %v6329_v23 = vadd.f32 %v6328_v7, %v13619_v26  ;;  %v8408_v33 = vld [vmem:[%s14539_s12 + $0xad8] sm:$0xff]  ;;  %v10402_v26 = vpack.c.bf16 %v8390_v53, %v8389_v20  ;;  %v8425_v20 = vld [vmem:[%s14539_s12 + $0xb60] sm:$0xff]  ;;  %v10408_v7 = vpack.c.bf16 %v8410_v30, %v8409_v48  ;;  %v8494_v48 = vld [vmem:[%s14539_s12 + $0xd88] sm:$0xff] }
0x1f30   :  { %v6242_v54 = vadd.f32 %v6241_v40, %v13623_v58  ;;  %v6331_v25 = vadd.f32 %v6330_v31, %v13627_v34  ;;  %7270 = vmatprep.mubr.f32.mxu1 %v6900_v60  ;;  %7355 = vmatprep.mubr.f32.mxu0 %v6902_v52  ;;  %v10434_v58 = vpack.c.bf16 %v8422_v8, %v8421_v39  ;;  %v8391_v34 = vld [vmem:[%s14539_s12 + $0xa50] sm:$0xff]  ;;  %v8426_v39 = vld [vmem:[%s14539_s12 + $0xb68] sm:$0xff]  ;;  %v8412_v40 = vld [vmem:[%s14539_s12 + $0xaf8] sm:$0xff] }
0x1f31   :  { %10399 = vmatpush3.bf16.msra.mxu1 %v10398_v24  ;;  %10431 = vmatpush3.bf16.msra.mxu0 %v10430_v62  ;;  %v10404_v9 = vpack.c.bf16 %v8408_v33, %v8407_v11  ;;  %v6915_v18 = vmax.f32 %v6240_v43, 0.0  ;;  %v6917_v51 = vmax.f32 %v6329_v23, 0.0  ;;  %v10406_v14 = vpack.c.bf16 %v8392_v2, %v8391_v34  ;;  %v8393_v24 = vld [vmem:[%s14539_s12 + $0xa60] sm:$0xff]  ;;  %v8394_v62 = vld [vmem:[%s14539_s12 + $0xa68] sm:$0xff]  ;;  %v8411_v8 = vld [vmem:[%s14539_s12 + $0xaf0] sm:$0xff] }
0x1f32   :  { %v6916_v57 = vmax.f32 %v6242_v54, 0.0  ;;  %v6918_v55 = vmax.f32 %v6331_v25, 0.0  ;;  %7271 = vmatmul.mubr.f32.gmra.mrb[138].mxu1 %v6899_v22  ;;  %7356 = vmatmul.mubr.f32.gmra.mrb[142].mxu0 %v6901_v10  ;;  %v13782_v28 = vpop.f32.mrb[110].mxu1  ;;  %v13784_v32 = vpop.f32.mrb[114].mxu0  ;;  %v8443_v31 = vld [vmem:[%s14539_s12 + $0xbf0] sm:$0xff]  ;;  %v13833_v11 = vrot.slane %v13611_v49, %v12070_v4  ;;  %v10410_v10 = vpack.c.bf16 %v8394_v62, %v8393_v24  ;;  %v8396_v25 = vld [vmem:[%s14539_s12 + $0xa78] sm:$0xff] }
0x1f33   :  { %v6401_v16 = vpop.f32.mrb[111].mxu1  ;;  %v6490_v6 = vpop.f32.mrb[115].mxu0  ;;  %10401 = vmatprep.subr.bf16.mxu1 %v10400_v46  ;;  %10433 = vmatprep.subr.bf16.mxu0 %v10432_v44  ;;  %v10440_v46 = vpack.c.bf16 %v8442_v3, %v8441_v41  ;;  %v8444_v44 = vld [vmem:[%s14539_s12 + $0xbf8] sm:$0xff]  ;;  %v10442_v23 = vpack.c.bf16 %v8426_v39, %v8425_v20  ;;  %v8395_v54 = vld [vmem:[%s14539_s12 + $0xa70] sm:$0xff]  ;;  %v8462_v49 = vld [vmem:[%s14539_s12 + $0xc88] sm:$0xff] }
0x1f34   :  { %v6402_v56 = vadd.f32 %v6401_v16, %v13745_v36  ;;  %v6491_v15 = vadd.f32 %v6490_v6, %v13756_v45  ;;  %7275 = vmatprep.mubr.f32.mxu1 %v6916_v57  ;;  %7360 = vmatprep.mubr.f32.mxu0 %v6918_v55  ;;  %v8427_v33 = vld [vmem:[%s14539_s12 + $0xb70] sm:$0xff]  ;;  %v10444_v34 = vpack.c.bf16 %v8444_v44, %v8443_v31  ;;  %v8428_v2 = vld [vmem:[%s14539_s12 + $0xb78] sm:$0xff]  ;;  %v13870_v16 = vld [vmem:[%s14539_s12 + $0xc00] sm:$0xff] }
0x1f35   :  { %10403 = vmatpush3.bf16.msra.mxu1 %v10402_v26  ;;  %10435 = vmatpush3.bf16.msra.mxu0 %v10434_v58  ;;  %v10412_v58 = vpack.c.bf16 %v8412_v40, %v8411_v8  ;;  %v13875_v6 = vld [vmem:[%s14539_s12 + $0xc08] sm:$0xff]  ;;  %v10448_v30 = vpack.c.bf16 %v8462_v49, %v8461_v27  ;;  %v13880_v41 = vld [vmem:[%s14539_s12 + $0xd00] sm:$0xff]  ;;  %v13903_v24 = vld [vmem:[%s14539_s12 + $0xc98] sm:$0xff] }
0x1f36   :  { %v6872_v53 = vmax.f32 %v6402_v56, 0.0  ;;  %v6874_v60 = vmax.f32 %v6491_v15, 0.0  ;;  %7276 = vmatmul.mubr.f32.gmra.mrb[140].mxu1 %v6915_v18  ;;  %7361 = vmatmul.mubr.f32.gmra.mrb[144].mxu0 %v6917_v51  ;;  %v13812_v52 = vpop.f32.mrb[112].mxu1  ;;  %v13814_v12 = vpop.f32.mrb[116].mxu0  ;;  %v13885_v3 = vld [vmem:[%s14539_s12 + $0xd08] sm:$0xff]  ;;  %v13890_v18 = vld [vmem:[%s14539_s12 + $0xc90] sm:$0xff]  ;;  %v6400_v51 = vadd.f32 %v13782_v28, %v13833_v11  ;;  %v6489_v56 = vadd.f32 %v13784_v32, %v13846_v59 }
0x1f37   :  { %v6407_v22 = vpop.f32.mrb[113].mxu1  ;;  %v6496_v43 = vpop.f32.mrb[117].mxu0  ;;  %10405 = vmatprep.subr.bf16.mxu1 %v10404_v9  ;;  %10437 = vmatprep.subr.bf16.mxu0 %v10436_v29  ;;  %v10414_v9 = vpack.c.bf16 %v8396_v25, %v8395_v54  ;;  %v10446_v29 = vpack.c.bf16 %v8428_v2, %v8427_v33  ;;  %v13908_v62 = vld [vmem:[%s14539_s12 + $0xd90] sm:$0xff]  ;;  %v13913_v28 = vld [vmem:[%s14539_s12 + $0xd98] sm:$0xff]  ;;  %v10452_v40 = vpack.c.bf16 %v13903_v24, %v13890_v18  ;;  %v13971_v27 = vld [vmem:[%s14539_s12 + $0xda0] sm:$0xff] }
0x1f38   :  { %7430 = vmatprep.mubr.f32.mxu1 %v6872_v53  ;;  %7515 = vmatprep.mubr.f32.mxu0 %v6874_v60  ;;  %v6408_v32 = vadd.f32 %v6407_v22, %v13745_v36  ;;  %v6497_v20 = vadd.f32 %v6496_v43, %v13756_v45  ;;  %v13927_v39 = vld [vmem:[%s14539_s12 + $0xc10] sm:$0xff]  ;;  %v13932_v8 = vld [vmem:[%s14539_s12 + $0xc18] sm:$0xff]  ;;  %v10482_v43 = vpack.c.bf16 %v13885_v3, %v13880_v41  ;;  %v6871_v54 = vmax.f32 %v6400_v51, 0.0  ;;  %v13976_v49 = vld [vmem:[%s14539_s12 + $0xda8] sm:$0xff] }
0x1f39   :  { %10407 = vmatpush3.bf16.msra.mxu1 %v10406_v14  ;;  %10439 = vmatpush3.bf16.msra.mxu0 %v10438_v13  ;;  %v10480_v13 = vpack.c.bf16 %v8494_v48, %v8493_v38  ;;  %v13937_v22 = vld [vmem:[%s14539_s12 + $0xd10] sm:$0xff]  ;;  %v10484_v31 = vpack.c.bf16 %v13913_v28, %v13908_v62  ;;  %v13948_v44 = vld [vmem:[%s14539_s12 + $0xd18] sm:$0xff]  ;;  %v6873_v25 = vmax.f32 %v6489_v56, 0.0  ;;  %v6406_v33 = vadd.f32 %v13812_v52, %v13833_v11  ;;  %v8482_v18 = vld [vmem:[%s14539_s12 + $0xd28] sm:$0xff] }
0x1f3a   :  { %v13848_v1 = vpop.f32.mrb[114].mxu1  ;;  %v13850_v26 = vpop.f32.mrb[118].mxu0  ;;  %10409 = vmatprep.subr.bf16.mxu1 %v10408_v7  ;;  %10441 = vmatprep.subr.bf16.mxu0 %v10440_v46  ;;  %v13920_v7 = vld [vmem:[%s14540_s11 + $0x18] sm:$0xff]  ;;  %v10450_v46 = vpack.c.bf16 %v13875_v6, %v13870_v16  ;;  %v6888_v52 = vmax.f32 %v6408_v32, 0.0  ;;  %v6890_v38 = vmax.f32 %v6497_v20, 0.0  ;;  %v10488_v3 = vpack.c.bf16 %v13976_v49, %v13971_v27  ;;  %v14017_v51 = vld [vmem:[%s14539_s12 + $0xcb0] sm:$0xff] }
0x1f3b   :  { %v6413_v57 = vpop.f32.mrb[115].mxu1  ;;  %v6502_v55 = vpop.f32.mrb[119].mxu0  ;;  %v14022_v56 = vld [vmem:[%s14539_s12 + $0xcb8] sm:$0xff]  ;;  %v6412_v62 = vadd.f32 %v13848_v1, %v13833_v11  ;;  %v6501_v28 = vadd.f32 %v13850_v26, %v13846_v59  ;;  %v8483_v27 = vld [vmem:[%s14539_s12 + $0xd30] sm:$0xff] }
0x1f3c   :  { %v6503_v48 = vadd.f32 %v6502_v55, %v13756_v45  ;;  %v13998_v55 = vld [vmem:[%s14539_s12 + $0xc28] sm:$0xff] }
0x1f3d   :  { %10411 = vmatpush3.bf16.msra.mxu1 %v10410_v10  ;;  %10443 = vmatpush3.bf16.msra.mxu0 %v10442_v23  ;;  %v13953_v10 = vld [vmem:[%s14539_s12 + $0xca0] sm:$0xff]  ;;  %v13958_v23 = vld [vmem:[%s14539_s12 + $0xca8] sm:$0xff] }
0x1f3e   :  { %v13896_v15 = vpop.f32.mrb[116].mxu1  ;;  %v13898_v14 = vpop.f32.mrb[120].mxu0  ;;  %10413 = vmatprep.subr.bf16.mxu1 %v10412_v58  ;;  %10445 = vmatprep.subr.bf16.mxu0 %v10444_v34  ;;  %v6495_v58 = vadd.f32 %v13814_v12, %v13846_v59  ;;  %v6414_v12 = vadd.f32 %v6413_v57, %v13745_v36  ;;  %v13993_v57 = vld [vmem:[%s14539_s12 + $0xc20] sm:$0xff]  ;;  %v10456_v41 = vpack.c.bf16 %v13958_v23, %v13953_v10 }
0x1f3f   :  { %v6419_v53 = vpop.f32.mrb[117].mxu1  ;;  %v6508_v60 = vpop.f32.mrb[121].mxu0  ;;  %v10458_v10 = vpack.c.bf16 %v13998_v55, %v13993_v57 }
0x1f40   :  { %v6889_v24 = vmax.f32 %v6495_v58, 0.0  ;;  %v6420_v1 = vadd.f32 %v6419_v53, %v13745_v36  ;;  %v6509_v26 = vadd.f32 %v6508_v60, %v13756_v45  ;;  %v10460_v36 = vpack.c.bf16 %v14022_v56, %v14017_v51  ;;  %v8451_v45 = vld [vmem:[%s14539_s12 + $0xc30] sm:$0xff]  ;;  %v8452_v58 = vld [vmem:[%s14539_s12 + $0xc38] sm:$0xff]  ;;  %v8485_v51 = vld [vmem:[%s14539_s12 + $0xd40] sm:$0xff] }
0x1f41   :  { %10415 = vmatpush3.bf16.msra.mxu1 %v10414_v9  ;;  %10447 = vmatpush3.bf16.msra.mxu0 %v10446_v29  ;;  %v13982_v9 = vrot.slane %v13920_v7, %v14610_v17  ;;  %v13986_v29 = vrot.slane %v13920_v7, %v14611_v42  ;;  %v14003_v17 = vld [vmem:[%s14539_s12 + $0xd20] sm:$0xff]  ;;  %v10486_v42 = vpack.c.bf16 %v13948_v44, %v13937_v22  ;;  %v6904_v22 = vmax.f32 %v6414_v12, 0.0 }
0x1f42   :  { %v13964_v34 = vpop.f32.mrb[118].mxu1  ;;  %v13966_v2 = vpop.f32.mrb[122].mxu0  ;;  %10449 = vmatprep.subr.bf16.mxu1 %v10448_v30  ;;  %10481 = vmatprep.subr.bf16.mxu0 %v10480_v13  ;;  %v10454_v30 = vpack.c.bf16 %v13932_v8, %v13927_v39  ;;  %v6887_v13 = vmax.f32 %v6406_v33, 0.0  ;;  %v8499_v39 = vld [vmem:[%s14539_s12 + $0xdb0] sm:$0xff]  ;;  %v8500_v8 = vld [vmem:[%s14539_s12 + $0xdb8] sm:$0xff]  ;;  %v6906_v44 = vmax.f32 %v6503_v48, 0.0  ;;  %v10490_v23 = vpack.c.bf16 %v8482_v18, %v14003_v17 }
0x1f43   :  { %v6579_v16 = vpop.f32.mrb[119].mxu1  ;;  %v6668_v6 = vpop.f32.mrb[123].mxu0  ;;  %v10492_v53 = vpack.c.bf16 %v8500_v8, %v8499_v39  ;;  %v6903_v60 = vmax.f32 %v6412_v62, 0.0  ;;  %v6920_v49 = vmax.f32 %v6420_v1, 0.0  ;;  %v8469_v12 = vld [vmem:[%s14539_s12 + $0xcc0] sm:$0xff]  ;;  %v8470_v48 = vld [vmem:[%s14539_s12 + $0xcc8] sm:$0xff] }
0x1f44   :  { %7431 = vmatmul.mubr.f32.vlgmr.msra.gmra.mrb[142].mxu1 %v6871_v54  ;;  %7516 = vmatmul.mubr.f32.vlgmr.msra.gmra.mrb[146].mxu0 %v6873_v25  ;;  %v6507_v54 = vadd.f32 %v13898_v14, %v13846_v59  ;;  %v6669_v59 = vadd.f32 %v6668_v6, %v13986_v29  ;;  %v8502_v6 = vld [vmem:[%s14539_s12 + $0xdc8] sm:$0xff]  ;;  %v8503_v1 = vld [vmem:[%s14539_s12 + $0xdd0] sm:$0xff] }
0x1f45   :  { %7435 = vmatprep.mubr.f32.mxu1 %v6888_v52  ;;  %7520 = vmatprep.mubr.f32.mxu0 %v6890_v38  ;;  %v6922_v52 = vmax.f32 %v6509_v26, 0.0  ;;  %v8484_v38 = vld [vmem:[%s14539_s12 + $0xd38] sm:$0xff]  ;;  %v8454_v18 = vld [vmem:[%s14539_s12 + $0xc48] sm:$0xff] }
0x1f46   :  { %10451 = vmatpush3.bf16.msra.mxu1 %v10450_v46  ;;  %10483 = vmatpush3.bf16.msra.mxu0 %v10482_v43  ;;  %v14028_v32 = vpop.f32.mrb[120].mxu1  ;;  %v14030_v20 = vpop.f32.mrb[124].mxu0  ;;  %v6921_v55 = vmax.f32 %v6507_v54, 0.0  ;;  %v8486_v8 = vld [vmem:[%s14539_s12 + $0xd48] sm:$0xff]  ;;  %v8504_v26 = vld [vmem:[%s14539_s12 + $0xdd8] sm:$0xff] }
0x1f47   :  { %v14040_v46 = vpop.f32.mrb[121].mxu1  ;;  %v14042_v43 = vpop.f32.mrb[125].mxu0  ;;  %10453 = vmatprep.subr.bf16.mxu1 %v10452_v40  ;;  %10485 = vmatprep.subr.bf16.mxu0 %v10484_v31  ;;  %v6905_v40 = vmax.f32 %v6501_v28, 0.0  ;;  %v6418_v31 = vadd.f32 %v13896_v15, %v13833_v11  ;;  %v6580_v11 = vadd.f32 %v6579_v16, %v13982_v9  ;;  %v8501_v16 = vld [vmem:[%s14539_s12 + $0xdc0] sm:$0xff]  ;;  %v10464_v28 = vpack.c.bf16 %v8470_v48, %v8469_v12 }
0x1f48   :  { %7436 = vmatmul.mubr.f32.gmra.mrb[144].mxu1 %v6887_v13  ;;  %7521 = vmatmul.mubr.f32.gmra.mrb[148].mxu0 %v6889_v24  ;;  %v6878_v13 = vmax.f32 %v6669_v59, 0.0  ;;  %v10496_v39 = vpack.c.bf16 %v8502_v6, %v8501_v16  ;;  %v8505_v59 = vld [vmem:[%s14539_s12 + $0xde0] sm:$0xff] }
0x1f49   :  { %7440 = vmatprep.mubr.f32.mxu1 %v6904_v22  ;;  %7525 = vmatprep.mubr.f32.mxu0 %v6906_v44  ;;  %v6919_v57 = vmax.f32 %v6418_v31, 0.0  ;;  %v6876_v56 = vmax.f32 %v6580_v11, 0.0  ;;  %v8471_v22 = vld [vmem:[%s14539_s12 + $0xcd0] sm:$0xff]  ;;  %v8472_v44 = vld [vmem:[%s14539_s12 + $0xcd8] sm:$0xff]  ;;  %v8474_v11 = vld [vmem:[%s14539_s12 + $0xce8] sm:$0xff] }
0x1f4a   :  { %10455 = vmatpush3.bf16.msra.mxu1 %v10454_v30  ;;  %10487 = vmatpush3.bf16.msra.mxu0 %v10486_v42  ;;  %v14056_v25 = vpop.f32.mrb[122].mxu1  ;;  %v14058_v33 = vpop.f32.mrb[126].mxu0  ;;  %v8453_v30 = vld [vmem:[%s14539_s12 + $0xc40] sm:$0xff]  ;;  %v10468_v54 = vpack.c.bf16 %v8472_v44, %v8471_v22  ;;  %v14185_v22 = vrot.slane %v13920_v7, %v14608_v47  ;;  %v8491_v47 = vld [vmem:[%s14539_s12 + $0xd70] sm:$0xff] }
0x1f4b   :  { %v14068_v15 = vpop.f32.mrb[123].mxu1  ;;  %v14070_v14 = vpop.f32.mrb[127].mxu0  ;;  %10457 = vmatprep.subr.bf16.mxu1 %v10456_v41  ;;  %10489 = vmatprep.subr.bf16.mxu0 %v10488_v3  ;;  %v10462_v41 = vpack.c.bf16 %v8452_v58, %v8451_v45  ;;  %v10494_v3 = vpack.c.bf16 %v8484_v38, %v8483_v27  ;;  %v8455_v45 = vld [vmem:[%s14539_s12 + $0xc50] sm:$0xff]  ;;  %v10500_v58 = vpack.c.bf16 %v8504_v26, %v8503_v1  ;;  %v8506_v38 = vld [vmem:[%s14539_s12 + $0xde8] sm:$0xff] }
0x1f4c   :  { %7441 = vmatmul.mubr.f32.gmra.mrb[146].mxu1 %v6903_v60  ;;  %7526 = vmatmul.mubr.f32.gmra.mrb[150].mxu0 %v6905_v40  ;;  %v8456_v60 = vld [vmem:[%s14539_s12 + $0xc58] sm:$0xff]  ;;  %v8487_v27 = vld [vmem:[%s14539_s12 + $0xd50] sm:$0xff] }
0x1f4d   :  { %7445 = vmatprep.mubr.f32.mxu1 %v6920_v49  ;;  %7530 = vmatprep.mubr.f32.mxu0 %v6922_v52  ;;  %v8488_v49 = vld [vmem:[%s14539_s12 + $0xd58] sm:$0xff]  ;;  %v8473_v52 = vld [vmem:[%s14539_s12 + $0xce0] sm:$0xff]  ;;  %v10470_v16 = vpack.c.bf16 %v8456_v60, %v8455_v45  ;;  %v14202_v60 = vrot.slane %v13920_v7, %v14609_v21  ;;  %v8526_v21 = vld [vmem:[%s14539_s12 + $0xe88] sm:$0xff] }
0x1f4e   :  { %10459 = vmatpush3.bf16.msra.mxu1 %v10458_v10  ;;  %10491 = vmatpush3.bf16.msra.mxu0 %v10490_v23  ;;  %v14090_v17 = vpop.f32.mrb[124].mxu1  ;;  %v14092_v42 = vpop.f32.mrb[128].mxu0  ;;  %v10502_v6 = vpack.c.bf16 %v8488_v49, %v8487_v27  ;;  %v8460_v45 = vld [vmem:[%s14539_s12 + $0xc78] sm:$0xff] }
0x1f4f   :  { %v14100_v24 = vpop.f32.mrb[125].mxu1  ;;  %v14102_v62 = vpop.f32.mrb[129].mxu0  ;;  %10461 = vmatprep.subr.bf16.mxu1 %v10460_v36  ;;  %10493 = vmatprep.subr.bf16.mxu0 %v10492_v53  ;;  %v10466_v36 = vpack.c.bf16 %v8454_v18, %v8453_v30  ;;  %v10498_v53 = vpack.c.bf16 %v8486_v8, %v8485_v51  ;;  %v8457_v30 = vld [vmem:[%s14539_s12 + $0xc60] sm:$0xff]  ;;  %v10504_v18 = vpack.c.bf16 %v8506_v38, %v8505_v59  ;;  %v8508_v8 = vld [vmem:[%s14539_s12 + $0xdf8] sm:$0xff]  ;;  %v8558_v38 = vld [vmem:[%s14539_s12 + $0xf88] sm:$0xff] }
0x1f50   :  { %7446 = vmatmul.mubr.f32.gmra.mrb[148].mxu1 %v6919_v57  ;;  %7531 = vmatmul.mubr.f32.gmra.mrb[152].mxu0 %v6921_v55  ;;  %v8458_v57 = vld [vmem:[%s14539_s12 + $0xc68] sm:$0xff]  ;;  %v8489_v51 = vld [vmem:[%s14539_s12 + $0xd60] sm:$0xff] }
0x1f51   :  { %7600 = vmatprep.mubr.f32.mxu1 %v6876_v56  ;;  %7685 = vmatprep.mubr.f32.mxu0 %v6878_v13  ;;  %v8490_v56 = vld [vmem:[%s14539_s12 + $0xd68] sm:$0xff]  ;;  %v8475_v13 = vld [vmem:[%s14539_s12 + $0xcf0] sm:$0xff]  ;;  %v10474_v26 = vpack.c.bf16 %v8458_v57, %v8457_v30  ;;  %v8557_v59 = vld [vmem:[%s14539_s12 + $0xf80] sm:$0xff] }
0x1f52   :  { %10463 = vmatpush3.bf16.msra.mxu1 %v10462_v41  ;;  %10495 = vmatpush3.bf16.msra.mxu0 %v10494_v3  ;;  %v14119_v10 = vpop.f32.mrb[126].mxu1  ;;  %v14121_v23 = vpop.f32.mrb[130].mxu0  ;;  %v10472_v3 = vpack.c.bf16 %v8474_v11, %v8473_v52  ;;  %v8492_v52 = vld [vmem:[%s14539_s12 + $0xd78] sm:$0xff]  ;;  %v8525_v11 = vld [vmem:[%s14539_s12 + $0xe80] sm:$0xff] }
0x1f53   :  { %v14129_v40 = vpop.f32.mrb[127].mxu1  ;;  %v14131_v31 = vpop.f32.mrb[131].mxu0  ;;  %10465 = vmatprep.subr.bf16.mxu1 %v10464_v28  ;;  %10497 = vmatprep.subr.bf16.mxu0 %v10496_v39  ;;  %v8476_v28 = vld [vmem:[%s14539_s12 + $0xcf8] sm:$0xff]  ;;  %v8507_v39 = vld [vmem:[%s14539_s12 + $0xdf0] sm:$0xff] }
0x1f54   :  { %v10476_v27 = vpack.c.bf16 %v8476_v28, %v8475_v13  ;;  %v10508_v49 = vpack.c.bf16 %v8508_v8, %v8507_v39  ;;  %v8542_v13 = vld [vmem:[%s14539_s12 + $0xf08] sm:$0xff]  ;;  %v14246_v28 = vld [vmem:[%s14539_s12 + $0xe90] sm:$0xff]  ;;  %v6578_v39 = vadd.f32 %v13964_v34, %v14185_v22  ;;  %v6667_v8 = vadd.f32 %v13966_v2, %v14202_v60  ;;  %v8560_v34 = vld [vmem:[%s14539_s12 + $0xf98] sm:$0xff] }
0x1f55   :  { %v6586_v2 = vadd.f32 %v14040_v46, %v13982_v9 }
0x1f56   :  { %10467 = vmatpush3.bf16.msra.mxu1 %v10466_v36  ;;  %10499 = vmatpush3.bf16.msra.mxu0 %v10498_v53  ;;  %v14151_v12 = vpop.f32.mrb[128].mxu1  ;;  %v14153_v48 = vpop.f32.mrb[132].mxu0  ;;  %v10506_v36 = vpack.c.bf16 %v8490_v56, %v8489_v51  ;;  %v8459_v53 = vld [vmem:[%s14539_s12 + $0xc70] sm:$0xff]  ;;  %v10512_v51 = vpack.c.bf16 %v8526_v21, %v8525_v11  ;;  %v8541_v56 = vld [vmem:[%s14539_s12 + $0xf00] sm:$0xff]  ;;  %v14279_v11 = vld [vmem:[%s14539_s12 + $0xe18] sm:$0xff] }
0x1f57   :  { %v14161_v55 = vpop.f32.mrb[129].mxu1  ;;  %v14163_v41 = vpop.f32.mrb[133].mxu0  ;;  %10469 = vmatprep.subr.bf16.mxu1 %v10468_v54  ;;  %10501 = vmatprep.subr.bf16.mxu0 %v10500_v58  ;;  %v10546_v21 = vpack.c.bf16 %v8542_v13, %v8541_v56  ;;  %v6673_v56 = vadd.f32 %v14030_v20, %v14202_v60  ;;  %v8530_v13 = vld [vmem:[%s14539_s12 + $0xea8] sm:$0xff]  ;;  %v6681_v20 = vadd.f32 %v14070_v14, %v13986_v29 }
0x1f58   :  { %v8514_v14 = vld [vmem:[%s14539_s12 + $0xe28] sm:$0xff] }
0x1f5a   :  { %10471 = vmatpush3.bf16.msra.mxu1 %v10470_v16  ;;  %10503 = vmatpush3.bf16.msra.mxu0 %v10502_v6  ;;  %v14187_v44 = vpop.f32.mrb[130].mxu1  ;;  %v14189_v1 = vpop.f32.mrb[134].mxu0  ;;  %v14226_v16 = vld [vmem:[%s14539_s12 + $0xe00] sm:$0xff]  ;;  %v14231_v6 = vld [vmem:[%s14539_s12 + $0xe08] sm:$0xff] }
0x1f5b   :  { %v14204_v54 = vpop.f32.mrb[131].mxu1  ;;  %v14206_v58 = vpop.f32.mrb[135].mxu0  ;;  %10473 = vmatprep.subr.bf16.mxu1 %v10472_v3  ;;  %10505 = vmatprep.subr.bf16.mxu0 %v10504_v18  ;;  %v10478_v3 = vpack.c.bf16 %v8460_v45, %v8459_v53  ;;  %v10510_v18 = vpack.c.bf16 %v8492_v52, %v8491_v47  ;;  %v10544_v53 = vpack.c.bf16 %v8558_v38, %v8557_v59  ;;  %v8528_v45 = vld [vmem:[%s14539_s12 + $0xe98] sm:$0xff]  ;;  %v8559_v47 = vld [vmem:[%s14539_s12 + $0xf90] sm:$0xff] }
0x1f5c   :  { %v14274_v52 = vld [vmem:[%s14539_s12 + $0xe10] sm:$0xff]  ;;  %v10516_v46 = vpack.c.bf16 %v8528_v45, %v14246_v28  ;;  %v10548_v59 = vpack.c.bf16 %v8560_v34, %v8559_v47  ;;  %v8544_v38 = vld [vmem:[%s14539_s12 + $0xf18] sm:$0xff]  ;;  %v8561_v28 = vld [vmem:[%s14539_s12 + $0xfa0] sm:$0xff] }
0x1f5d   :  { %v10518_v47 = vpack.c.bf16 %v14279_v11, %v14274_v52  ;;  %v8531_v52 = vld [vmem:[%s14539_s12 + $0xeb0] sm:$0xff] }
0x1f5e   :  { %10475 = vmatpush3.bf16.msra.mxu1 %v10474_v26  ;;  %10507 = vmatpush3.bf16.msra.mxu0 %v10506_v36  ;;  %v14233_v30 = vpop.f32.mrb[132].mxu1  ;;  %v14235_v57 = vpop.f32.mrb[136].mxu0 }
0x1f5f   :  { %v14252_v26 = vpop.f32.mrb[133].mxu1  ;;  %v14254_v36 = vpop.f32.mrb[137].mxu0  ;;  %10477 = vmatprep.subr.bf16.mxu1 %v10476_v27  ;;  %10509 = vmatprep.subr.bf16.mxu0 %v10508_v49  ;;  %v6675_v27 = vadd.f32 %v14042_v43, %v13986_v29  ;;  %v10514_v49 = vpack.c.bf16 %v14231_v6, %v14226_v16  ;;  %v8543_v43 = vld [vmem:[%s14539_s12 + $0xf10] sm:$0xff]  ;;  %v14291_v16 = vld [vmem:[%s14539_s12 + $0xea0] sm:$0xff]  ;;  %v6875_v6 = vmax.f32 %v6578_v39, 0.0  ;;  %v8562_v39 = vld [vmem:[%s14539_s12 + $0xfa8] sm:$0xff] }
0x1f60   :  { %v10520_v34 = vpack.c.bf16 %v8530_v13, %v14291_v16  ;;  %v8532_v16 = vld [vmem:[%s14539_s12 + $0xeb8] sm:$0xff]  ;;  %v6910_v13 = vmax.f32 %v6681_v20, 0.0  ;;  %v8566_v20 = vld [vmem:[%s14539_s12 + $0xfc8] sm:$0xff] }
0x1f61   :  { %v6894_v45 = vmax.f32 %v6675_v27, 0.0  ;;  %v8546_v27 = vld [vmem:[%s14539_s12 + $0xf28] sm:$0xff] }
0x1f62   :  { %10479 = vmatpush3.bf16.msra.mxu1 %v10478_v3  ;;  %10511 = vmatpush3.bf16.msra.mxu0 %v10510_v18  ;;  %v6877_v3 = vmax.f32 %v6667_v8, 0.0  ;;  %v6584_v18 = vadd.f32 %v14028_v32, %v14185_v22  ;;  %v6892_v8 = vmax.f32 %v6586_v2, 0.0  ;;  %v6592_v32 = vadd.f32 %v14068_v15, %v13982_v9  ;;  %v8513_v15 = vld [vmem:[%s14539_s12 + $0xe20] sm:$0xff] }
0x1f63   :  { %10513 = vmatprep.subr.bf16.mxu1 %v10512_v51  ;;  %10545 = vmatprep.subr.bf16.mxu0 %v10544_v53  ;;  %v14312_v51 = vrot.slane %v13920_v7, %v14612_v50  ;;  %v14316_v53 = vrot.slane %v13920_v7, %v14613_v5  ;;  %v10550_v50 = vpack.c.bf16 %v8544_v38, %v8543_v43  ;;  %v8545_v2 = vld [vmem:[%s14539_s12 + $0xf20] sm:$0xff] }
0x1f64   :  { %v10552_v5 = vpack.c.bf16 %v8562_v39, %v8561_v28  ;;  %v6891_v11 = vmax.f32 %v6584_v18, 0.0  ;;  %v6590_v43 = vadd.f32 %v14056_v25, %v14185_v22  ;;  %v6679_v38 = vadd.f32 %v14058_v33, %v14202_v60  ;;  %v8564_v18 = vld [vmem:[%s14539_s12 + $0xfb8] sm:$0xff] }
0x1f65   :  { %7601 = vmatmul.mubr.f32.vlgmr.msra.gmra.mrb[150].mxu1 %v6875_v6  ;;  %7686 = vmatmul.mubr.f32.vlgmr.msra.gmra.mrb[154].mxu0 %v6877_v3  ;;  %v6893_v6 = vmax.f32 %v6673_v56, 0.0  ;;  %v8563_v3 = vld [vmem:[%s14539_s12 + $0xfb0] sm:$0xff]  ;;  %v6908_v56 = vmax.f32 %v6592_v32, 0.0  ;;  %v6598_v25 = vadd.f32 %v14100_v24, %v13982_v9  ;;  %v6687_v33 = vadd.f32 %v14102_v62, %v13986_v29  ;;  %v8516_v24 = vld [vmem:[%s14539_s12 + $0xe38] sm:$0xff] }
0x1f66   :  { %7605 = vmatprep.mubr.f32.mxu1 %v6892_v8  ;;  %7690 = vmatprep.mubr.f32.mxu0 %v6894_v45  ;;  %v10524_v28 = vpack.c.bf16 %v8532_v16, %v8531_v52  ;;  %v10556_v39 = vpack.c.bf16 %v8564_v18, %v8563_v3  ;;  %v6907_v8 = vmax.f32 %v6590_v43, 0.0  ;;  %v6909_v45 = vmax.f32 %v6679_v38, 0.0  ;;  %v8515_v29 = vld [vmem:[%s14539_s12 + $0xe30] sm:$0xff]  ;;  %v8550_v43 = vld [vmem:[%s14539_s12 + $0xf48] sm:$0xff]  ;;  %v8536_v16 = vld [vmem:[%s14539_s12 + $0xed8] sm:$0xff] }
0x1f67   :  { %10515 = vmatpush3.bf16.msra.mxu1 %v10514_v49  ;;  %10547 = vmatpush3.bf16.msra.mxu0 %v10546_v21  ;;  %v10522_v49 = vpack.c.bf16 %v8514_v14, %v8513_v15  ;;  %v10554_v21 = vpack.c.bf16 %v8546_v27, %v8545_v2  ;;  %v6596_v32 = vadd.f32 %v14090_v17, %v14185_v22  ;;  %v6924_v62 = vmax.f32 %v6598_v25, 0.0  ;;  %v8548_v22 = vld [vmem:[%s14539_s12 + $0xf38] sm:$0xff]  ;;  %v8535_v38 = vld [vmem:[%s14539_s12 + $0xed0] sm:$0xff] }
0x1f68   :  { %10517 = vmatprep.subr.bf16.mxu1 %v10516_v46  ;;  %10549 = vmatprep.subr.bf16.mxu0 %v10548_v59  ;;  %v6685_v9 = vadd.f32 %v14092_v42, %v14202_v60  ;;  %v6926_v46 = vmax.f32 %v6687_v33, 0.0  ;;  %v6758_v59 = vadd.f32 %v14129_v40, %v14312_v51  ;;  %v6847_v17 = vadd.f32 %v14131_v31, %v14316_v53  ;;  %v8547_v42 = vld [vmem:[%s14539_s12 + $0xf30] sm:$0xff]  ;;  %v8533_v60 = vld [vmem:[%s14539_s12 + $0xec0] sm:$0xff]  ;;  %v8534_v40 = vld [vmem:[%s14539_s12 + $0xec8] sm:$0xff] }
0x1f69   :  { %7606 = vmatmul.mubr.f32.gmra.mrb[152].mxu1 %v6891_v11  ;;  %7691 = vmatmul.mubr.f32.gmra.mrb[156].mxu0 %v6893_v6  ;;  %v8565_v31 = vld [vmem:[%s14539_s12 + $0xfc0] sm:$0xff]  ;;  %v10526_v14 = vpack.c.bf16 %v8516_v24, %v8515_v29  ;;  %v10528_v52 = vpack.c.bf16 %v8534_v40, %v8533_v60  ;;  %v8567_v3 = vld [vmem:[%s14539_s12 + $0xfd0] sm:$0xff]  ;;  %v8568_v18 = vld [vmem:[%s14539_s12 + $0xfd8] sm:$0xff] }
0x1f6a   :  { %7610 = vmatprep.mubr.f32.mxu1 %v6908_v56  ;;  %7695 = vmatprep.mubr.f32.mxu0 %v6910_v13  ;;  %v6925_v15 = vmax.f32 %v6685_v9, 0.0  ;;  %v6880_v2 = vmax.f32 %v6758_v59, 0.0  ;;  %v6882_v27 = vmax.f32 %v6847_v17, 0.0  ;;  %v10560_v11 = vpack.c.bf16 %v8566_v20, %v8565_v31  ;;  %v8549_v6 = vld [vmem:[%s14539_s12 + $0xf40] sm:$0xff]  ;;  %v8519_v25 = vld [vmem:[%s14539_s12 + $0xe50] sm:$0xff]  ;;  %v8520_v33 = vld [vmem:[%s14539_s12 + $0xe58] sm:$0xff] }
0x1f6b   :  { %10519 = vmatpush3.bf16.msra.mxu1 %v10518_v47  ;;  %10551 = vmatpush3.bf16.msra.mxu0 %v10550_v50  ;;  %v6923_v47 = vmax.f32 %v6596_v32, 0.0  ;;  %v10558_v50 = vpack.c.bf16 %v8548_v22, %v8547_v42  ;;  %v10562_v13 = vpack.c.bf16 %v8550_v43, %v8549_v6  ;;  %v8569_v32 = vld [vmem:[%s14539_s12 + $0xfe0] sm:$0xff]  ;;  %v8570_v9 = vld [vmem:[%s14539_s12 + $0xfe8] sm:$0xff]  ;;  %v10534_v29 = vpack.c.bf16 %v8520_v33, %v8519_v25  ;;  %v8539_v60 = vld [vmem:[%s14539_s12 + $0xef0] sm:$0xff] }
0x1f6c   :  { %10521 = vmatprep.subr.bf16.mxu1 %v10520_v34  ;;  %10553 = vmatprep.subr.bf16.mxu0 %v10552_v5  ;;  %v8517_v34 = vld [vmem:[%s14539_s12 + $0xe40] sm:$0xff]  ;;  %v8518_v5 = vld [vmem:[%s14539_s12 + $0xe48] sm:$0xff]  ;;  %v10568_v17 = vpack.c.bf16 %v8570_v9, %v8569_v32  ;;  %v8540_v40 = vld [vmem:[%s14539_s12 + $0xef8] sm:$0xff]  ;;  %v6764_v43 = vadd.f32 %v14161_v55, %v14312_v51  ;;  %v6859_v25 = vadd.f32 %v14206_v58, %v14316_v53 }
0x1f6d   :  { %7611 = vmatmul.mubr.f32.gmra.mrb[154].mxu1 %v6907_v8  ;;  %7696 = vmatmul.mubr.f32.gmra.mrb[158].mxu0 %v6909_v45  ;;  %v10530_v56 = vpack.c.bf16 %v8518_v5, %v8517_v34  ;;  %v8537_v8 = vld [vmem:[%s14539_s12 + $0xee0] sm:$0xff]  ;;  %v8538_v45 = vld [vmem:[%s14539_s12 + $0xee8] sm:$0xff]  ;;  %v8571_v31 = vld [vmem:[%s14539_s12 + $0xff0] sm:$0xff]  ;;  %v6122_v34 = vrot.slane %v13920_v7, %v12083_v35  ;;  %v10540_v5 = vpack.c.bf16 %v8540_v40, %v8539_v60 }
0x1f6e   :  { %7615 = vmatprep.mubr.f32.mxu1 %v6924_v62  ;;  %7700 = vmatprep.mubr.f32.mxu0 %v6926_v46  ;;  %v8521_v62 = vld [vmem:[%s14539_s12 + $0xe60] sm:$0xff]  ;;  %v8522_v46 = vld [vmem:[%s14539_s12 + $0xe68] sm:$0xff]  ;;  %v10536_v59 = vpack.c.bf16 %v8538_v45, %v8537_v8  ;;  %v8572_v20 = vld [vmem:[%s14539_s12 + $0xff8] sm:$0xff] }
0x1f6f   :  { %10523 = vmatpush3.bf16.msra.mxu1 %v10522_v49  ;;  %10555 = vmatpush3.bf16.msra.mxu0 %v10554_v21  ;;  %v10532_v49 = vpack.c.bf16 %v8536_v16, %v8535_v38  ;;  %v10564_v21 = vpack.c.bf16 %v8568_v18, %v8567_v3  ;;  %v8553_v42 = vld [vmem:[%s14539_s12 + $0xf60] sm:$0xff]  ;;  %v8554_v22 = vld [vmem:[%s14539_s12 + $0xf68] sm:$0xff]  ;;  %v6845_v6 = vadd.f32 %v14121_v23, %v6122_v34 }
0x1f70   :  { %10525 = vmatprep.subr.bf16.mxu1 %v10524_v28  ;;  %10557 = vmatprep.subr.bf16.mxu0 %v10556_v39  ;;  %v8551_v28 = vld [vmem:[%s14539_s12 + $0xf50] sm:$0xff]  ;;  %v8552_v39 = vld [vmem:[%s14539_s12 + $0xf58] sm:$0xff]  ;;  %v6853_v38 = vadd.f32 %v14163_v41, %v14316_v53  ;;  %v6770_v23 = vadd.f32 %v14204_v54, %v14312_v51  ;;  %v6865_v54 = vadd.f32 %v14254_v36, %v14316_v53  ;;  %v8574_v45 = vld [vmem:[%s14541_s13 + $0x1] ss:$0 sm:$0xff] }
0x1f71   :  { %7616 = vmatmul.mubr.f32.gmra.mrb[156].mxu1 %v6923_v47  ;;  %7701 = vmatmul.mubr.f32.gmra.mrb[160].mxu0 %v6925_v15  ;;  %v10566_v24 = vpack.c.bf16 %v8552_v39, %v8551_v28  ;;  %v6114_v47 = vrot.slane %v13920_v7, %v12070_v4  ;;  %v10538_v15 = vpack.c.bf16 %v8522_v46, %v8521_v62  ;;  %v8555_v4 = vld [vmem:[%s14539_s12 + $0xf70] sm:$0xff]  ;;  %v6881_v3 = vmax.f32 %v6845_v6, 0.0 }
0x1f72   :  { %7770 = vmatprep.mubr.f32.mxu1 %v6880_v2  ;;  %7855 = vmatprep.mubr.f32.mxu0 %v6882_v27  ;;  %v10572_v2 = vpack.c.bf16 %v8572_v20, %v8571_v31  ;;  %v8524_v27 = vld [vmem:[%s14539_s12 + $0xe78] sm:$0xff] }
0x1f73   :  { %10527 = vmatpush3.bf16.msra.mxu1 %v10526_v14  ;;  %10559 = vmatpush3.bf16.msra.mxu0 %v10558_v50  ;;  %v10570_v14 = vpack.c.bf16 %v8554_v22, %v8553_v42  ;;  %v8523_v50 = vld [vmem:[%s14539_s12 + $0xe70] sm:$0xff]  ;;  %v6756_v7 = vadd.f32 %v14119_v10, %v6114_v47  ;;  %v6762_v18 = vadd.f32 %v14151_v12, %v6114_v47  ;;  %v6898_v10 = vmax.f32 %v6853_v38, 0.0 }
0x1f74   :  { %10529 = vmatprep.subr.bf16.mxu1 %v10528_v52  ;;  %10561 = vmatprep.subr.bf16.mxu0 %v10560_v11  ;;  %v8556_v52 = vld [vmem:[%s14539_s12 + $0xf78] sm:$0xff]  ;;  %v10542_v11 = vpack.c.bf16 %v8524_v27, %v8523_v50  ;;  %v6768_v33 = vadd.f32 %v14187_v44, %v6114_v47  ;;  %v6857_v12 = vadd.f32 %v14189_v1, %v6122_v34  ;;  %v6930_v1 = vmax.f32 %v6865_v54, 0.0 }
0x1f75   :  { %v10574_v35 = vpack.c.bf16 %v8556_v52, %v8555_v4  ;;  %v6879_v16 = vmax.f32 %v6756_v7, 0.0  ;;  %v6895_v55 = vmax.f32 %v6762_v18, 0.0  ;;  %v6774_v39 = vadd.f32 %v14233_v30, %v6114_v47 }
0x1f76   :  { %v6911_v58 = vmax.f32 %v6768_v33, 0.0  ;;  %v6913_v28 = vmax.f32 %v6857_v12, 0.0  ;;  %v6863_v44 = vadd.f32 %v14235_v57, %v6122_v34 }
0x1f77   :  { %10531 = vmatpush3.bf16.msra.mxu1 %v10530_v56  ;;  %10563 = vmatpush3.bf16.msra.mxu0 %v10562_v13  ;;  %v6851_v56 = vadd.f32 %v14153_v48, %v6122_v34  ;;  %v6896_v13 = vmax.f32 %v6764_v43, 0.0  ;;  %v6914_v48 = vmax.f32 %v6859_v25, 0.0 }
0x1f78   :  { %10533 = vmatprep.subr.bf16.mxu1 %v10532_v49  ;;  %10565 = vmatprep.subr.bf16.mxu0 %v10564_v21  ;;  %v6912_v49 = vmax.f32 %v6770_v23, 0.0  ;;  %v6776_v21 = vadd.f32 %v14252_v26, %v14312_v51  ;;  %v6927_v26 = vmax.f32 %v6774_v39, 0.0  ;;  %v6929_v51 = vmax.f32 %v6863_v44, 0.0 }
0x1f79   :  { %v6897_v41 = vmax.f32 %v6851_v56, 0.0 }
0x1f7a   :  { %v6928_v8 = vmax.f32 %v6776_v21, 0.0 }
0x1f7b   :  { %10535 = vmatpush3.bf16.msra.mxu1 %v10534_v29  ;;  %10567 = vmatpush3.bf16.msra.mxu0 %v10566_v24 }
0x1f7c   :  { %10537 = vmatprep.subr.bf16.mxu1 %v10536_v59  ;;  %10569 = vmatprep.subr.bf16.mxu0 %v10568_v17 }
0x1f7f   :  { %10539 = vmatpush3.bf16.msra.mxu1 %v10538_v15  ;;  %10571 = vmatpush3.bf16.msra.mxu0 %v10570_v14 }
0x1f80   :  { %10541 = vmatprep.subr.bf16.mxu1 %v10540_v5  ;;  %10573 = vmatprep.subr.bf16.mxu0 %v10572_v2 }
0x1f83   :  { %10543 = vmatpush3.bf16.msra.mxu1 %v10542_v11  ;;  %10575 = vmatpush3.bf16.msra.mxu0 %v10574_v35 }
0x1f86   :  { %7771 = vmatmul.mubr.f32.vlgmr.msra.gmra.mrb[158].mxu1 %v6879_v16  ;;  %7856 = vmatmul.mubr.f32.vlgmr.msra.gmra.mrb[162].mxu0 %v6881_v3 }
0x1f87   :  { %7775 = vmatprep.mubr.f32.mxu1 %v6896_v13  ;;  %7860 = vmatprep.mubr.f32.mxu0 %v6898_v10 }
0x1f8a   :  { %7776 = vmatmul.mubr.f32.gmra.mrb[160].mxu1 %v6895_v55  ;;  %7861 = vmatmul.mubr.f32.gmra.mrb[164].mxu0 %v6897_v41 }
0x1f8b   :  { %7780 = vmatprep.mubr.f32.mxu1 %v6912_v49  ;;  %7865 = vmatprep.mubr.f32.mxu0 %v6914_v48 }
0x1f8e   :  { %7781 = vmatmul.mubr.f32.gmra.mrb[162].mxu1 %v6911_v58  ;;  %7866 = vmatmul.mubr.f32.gmra.mrb[166].mxu0 %v6913_v28 }
0x1f8f   :  { %7785 = vmatprep.mubr.f32.mxu1 %v6928_v8  ;;  %7870 = vmatprep.mubr.f32.mxu0 %v6930_v1 }
0x1f92   :  { %7786 = vmatmul.mubr.f32.gmra.mrb[164].mxu1 %v6927_v26  ;;  %7871 = vmatmul.mubr.f32.gmra.mrb[168].mxu0 %v6929_v51 }
0x1f93   :  { %9741 = vmatprep.mubr.msk.f32.mxu1 %vm10937_vm5, %v14606_v19 }
0x1ff6   :  { %v9128_v36 = vpop.f32.mrb[134].mxu1  ;;  %v9172_v53 = vpop.f32.mrb[138].mxu0 }
0x1ff7   :  { %v9129_v32 = vpop.f32.mrb[135].mxu1  ;;  %v9173_v30 = vpop.f32.mrb[139].mxu0 }
0x1ff8   :  { %v9130_v9 = vadd.f32 %v9129_v32, %v9128_v36  ;;  %v9174_v57 = vadd.f32 %v9173_v30, %v9172_v53 }
0x1ffa   :  { %v7263_v29 = vadd.f32 %v9130_v9, %v8574_v45  ;;  %v9131_v24 = vpop.f32.mrb[136].mxu1  ;;  %v9175_v62 = vpop.f32.mrb[140].mxu0 }
0x1ffb   :  { %v9132_v46 = vpop.f32.mrb[137].mxu1  ;;  %v9176_v59 = vpop.f32.mrb[141].mxu0 }
0x1ffc   :  { %v7348_v17 = vadd.f32 %v9174_v57, %v7263_v29  ;;  %v9133_v42 = vadd.f32 %v9132_v46, %v9131_v24  ;;  %v9177_v22 = vadd.f32 %v9176_v59, %v9175_v62 }
0x1ffe   :  { %v7268_v60 = vadd.f32 %v9133_v42, %v8574_v45 }
0x2000   :  { %v7353_v40 = vadd.f32 %v9177_v22, %v7268_v60 }
0x2005   :  { %v9134_v31 = vpop.f32.mrb[138].mxu1  ;;  %v9178_v20 = vpop.f32.mrb[142].mxu0 }
0x2006   :  { %v9135_v47 = vpop.f32.mrb[139].mxu1  ;;  %v9179_v15 = vpop.f32.mrb[143].mxu0 }
0x2007   :  { %v9136_v14 = vadd.f32 %v9135_v47, %v9134_v31  ;;  %v9180_v50 = vadd.f32 %v9179_v15, %v9178_v20 }
0x2009   :  { %v7273_v34 = vadd.f32 %v9136_v14, %v8574_v45  ;;  %v9137_v5 = vpop.f32.mrb[140].mxu1  ;;  %v9181_v2 = vpop.f32.mrb[144].mxu0 }
0x200a   :  { %v9138_v27 = vpop.f32.mrb[141].mxu1  ;;  %v9182_v4 = vpop.f32.mrb[145].mxu0 }
0x200b   :  { %v7358_v52 = vadd.f32 %v9180_v50, %v7273_v34  ;;  %v9139_v11 = vadd.f32 %v9138_v27, %v9137_v5  ;;  %v9183_v35 = vadd.f32 %v9182_v4, %v9181_v2 }
0x200d   :  { %v7278_v7 = vadd.f32 %v9139_v11, %v8574_v45 }
0x200f   :  { %v7363_v6 = vadd.f32 %v9183_v35, %v7278_v7 }
0x2017   :  { %v9216_v43 = vpop.f32.mrb[142].mxu1  ;;  %v9260_v38 = vpop.f32.mrb[146].mxu0 }
0x2018   :  { %v9217_v16 = vpop.f32.mrb[143].mxu1  ;;  %v9261_v3 = vpop.f32.mrb[147].mxu0 }
0x2019   :  { %v9218_v18 = vadd.f32 %v9217_v16, %v9216_v43  ;;  %v9262_v56 = vadd.f32 %v9261_v3, %v9260_v38 }
0x201b   :  { %v7433_v13 = vadd.f32 %v9218_v18, %v7348_v17  ;;  %v9219_v10 = vpop.f32.mrb[144].mxu1  ;;  %v9263_v23 = vpop.f32.mrb[148].mxu0 }
0x201c   :  { %v9220_v25 = vpop.f32.mrb[145].mxu1  ;;  %v9264_v55 = vpop.f32.mrb[149].mxu0 }
0x201d   :  { %v7518_v41 = vadd.f32 %v9262_v56, %v7433_v13  ;;  %v9221_v33 = vadd.f32 %v9220_v25, %v9219_v10  ;;  %v9265_v12 = vadd.f32 %v9264_v55, %v9263_v23 }
0x201f   :  { %v7438_v49 = vadd.f32 %v9221_v33, %v7353_v40  ;;  %v9222_v48 = vpop.f32.mrb[146].mxu1  ;;  %v9266_v21 = vpop.f32.mrb[150].mxu0 }
0x2020   :  { %v9223_v54 = vpop.f32.mrb[147].mxu1  ;;  %v9267_v58 = vpop.f32.mrb[151].mxu0 }
0x2021   :  { %v7523_v28 = vadd.f32 %v9265_v12, %v7438_v49  ;;  %v9224_v39 = vadd.f32 %v9223_v54, %v9222_v48  ;;  %v9268_v44 = vadd.f32 %v9267_v58, %v9266_v21 }
0x2023   :  { %v7443_v8 = vadd.f32 %v9224_v39, %v7358_v52  ;;  %v9225_v1 = vpop.f32.mrb[148].mxu1  ;;  %v9269_v26 = vpop.f32.mrb[152].mxu0 }
0x2024   :  { %v9226_v51 = vpop.f32.mrb[149].mxu1  ;;  %v9270_v36 = vpop.f32.mrb[153].mxu0 }
0x2025   :  { %v7528_v53 = vadd.f32 %v9268_v44, %v7443_v8  ;;  %v9227_v45 = vadd.f32 %v9226_v51, %v9225_v1  ;;  %v9271_v32 = vadd.f32 %v9270_v36, %v9269_v26 }
0x2027   :  { %v7448_v30 = vadd.f32 %v9227_v45, %v7363_v6 }
0x2029   :  { %v7533_v9 = vadd.f32 %v9271_v32, %v7448_v30 }
0x2038   :  { %v9304_v57 = vpop.f32.mrb[150].mxu1  ;;  %v9348_v29 = vpop.f32.mrb[154].mxu0 }
0x2039   :  { %v9305_v24 = vpop.f32.mrb[151].mxu1  ;;  %v9349_v62 = vpop.f32.mrb[155].mxu0 }
0x203a   :  { %v9306_v46 = vadd.f32 %v9305_v24, %v9304_v57  ;;  %v9350_v59 = vadd.f32 %v9349_v62, %v9348_v29 }
0x203c   :  { %v7603_v17 = vadd.f32 %v9306_v46, %v7518_v41  ;;  %v9307_v42 = vpop.f32.mrb[152].mxu1  ;;  %v9351_v22 = vpop.f32.mrb[156].mxu0 }
0x203d   :  { %v9308_v60 = vpop.f32.mrb[153].mxu1  ;;  %v9352_v40 = vpop.f32.mrb[157].mxu0 }
0x203e   :  { %v7688_v31 = vadd.f32 %v9350_v59, %v7603_v17  ;;  %v9309_v20 = vadd.f32 %v9308_v60, %v9307_v42  ;;  %v9353_v47 = vadd.f32 %v9352_v40, %v9351_v22 }
0x2040   :  { %v7608_v15 = vadd.f32 %v9309_v20, %v7523_v28  ;;  %v9310_v14 = vpop.f32.mrb[154].mxu1  ;;  %v9354_v50 = vpop.f32.mrb[158].mxu0 }
0x2041   :  { %v9311_v34 = vpop.f32.mrb[155].mxu1  ;;  %v9355_v5 = vpop.f32.mrb[159].mxu0 }
0x2042   :  { %v7693_v2 = vadd.f32 %v9353_v47, %v7608_v15  ;;  %v9312_v27 = vadd.f32 %v9311_v34, %v9310_v14  ;;  %v9356_v4 = vadd.f32 %v9355_v5, %v9354_v50 }
0x2044   :  { %v7613_v52 = vadd.f32 %v9312_v27, %v7528_v53  ;;  %v9313_v11 = vpop.f32.mrb[156].mxu1  ;;  %v9357_v35 = vpop.f32.mrb[160].mxu0 }
0x2045   :  { %v9314_v7 = vpop.f32.mrb[157].mxu1  ;;  %v9358_v6 = vpop.f32.mrb[161].mxu0 }
0x2046   :  { %v7698_v43 = vadd.f32 %v9356_v4, %v7613_v52  ;;  %v9315_v38 = vadd.f32 %v9314_v7, %v9313_v11  ;;  %v9359_v16 = vadd.f32 %v9358_v6, %v9357_v35 }
0x2048   :  { %v7618_v3 = vadd.f32 %v9315_v38, %v7533_v9 }
0x204a   :  { %v7703_v18 = vadd.f32 %v9359_v16, %v7618_v3  ;;  %v10936_v16 = vmov 0.0|0.0  }
0x204b   :  { %10576 = vmatprep.subr.bf16.mxu1 %v10936_v16 }
0x2059   :  { %v9392_v56 = vpop.f32.mrb[158].mxu1  ;;  %v9436_v13 = vpop.f32.mrb[162].mxu0 }
0x205a   :  { %v9393_v10 = vpop.f32.mrb[159].mxu1  ;;  %v9437_v23 = vpop.f32.mrb[163].mxu0 }
0x205b   :  { %v9394_v25 = vadd.f32 %v9393_v10, %v9392_v56  ;;  %v9438_v55 = vadd.f32 %v9437_v23, %v9436_v13 }
0x205d   :  { %v7773_v41 = vadd.f32 %v9394_v25, %v7688_v31  ;;  %v9395_v33 = vpop.f32.mrb[160].mxu1  ;;  %v9439_v12 = vpop.f32.mrb[164].mxu0 }
0x205e   :  { %v9396_v49 = vpop.f32.mrb[161].mxu1  ;;  %v9440_v48 = vpop.f32.mrb[165].mxu0 }
0x205f   :  { %v7858_v21 = vadd.f32 %v9438_v55, %v7773_v41  ;;  %v9397_v54 = vadd.f32 %v9396_v49, %v9395_v33  ;;  %v9441_v58 = vadd.f32 %v9440_v48, %v9439_v12  ;;  %v8576_v48 = vld [vmem:[%s14542_s14 + $0x1] ss:$0 sm:$0xff] }
0x2061   :  { %v7778_v28 = vadd.f32 %v9397_v54, %v7693_v2  ;;  %v9398_v39 = vpop.f32.mrb[162].mxu1  ;;  %v9442_v44 = vpop.f32.mrb[166].mxu0  ;;  %v7876_v8 = vadd.f32 %v7858_v21, %v13189_v0  ;;  %v8578_v54 = vld [vmem:[%s14543_s15 + $0x1] ss:$0 sm:$0xff] }
0x2062   :  { %v9399_v1 = vpop.f32.mrb[163].mxu1  ;;  %v9443_v26 = vpop.f32.mrb[167].mxu0 }
0x2063   :  { %v7863_v51 = vadd.f32 %v9441_v58, %v7778_v28  ;;  %v9400_v36 = vadd.f32 %v9399_v1, %v9398_v39  ;;  %v9444_v53 = vadd.f32 %v9443_v26, %v9442_v44  ;;  %v7880_v45 = vsel %vm120_vm0, %v7876_v8, 0.0 }
0x2064   :  { %7881 = vadd.xlane.f32.xlu1 %v7880_v45 }
0x2065   :  { %v7783_v32 = vadd.f32 %v9400_v36, %v7698_v43  ;;  %v9401_v30 = vpop.f32.mrb[164].mxu1  ;;  %v9445_v9 = vpop.f32.mrb[168].mxu0  ;;  %v7877_v57 = vadd.f32 %v7863_v51, %v13222_v63 }
0x2066   :  { %v9402_v29 = vpop.f32.mrb[165].mxu1  ;;  %v9446_v24 = vpop.f32.mrb[169].mxu0 }
0x2067   :  { %v7868_v62 = vadd.f32 %v9444_v53, %v7783_v32  ;;  %v9403_v46 = vadd.f32 %v9402_v29, %v9401_v30  ;;  %v9447_v59 = vadd.f32 %v9446_v24, %v9445_v9  ;;  %v7883_v0 = vsel %vm120_vm0, %v7877_v57, 0.0  ;;  %v7956_v24 = vld [vmem:[%s14544_s16] sm:$0x1] }
0x2068   :  { %7884 = vadd.xlane.f32.xlu0 %v7883_v0 }
0x2069   :  { %v7788_v17 = vadd.f32 %v9403_v46, %v7703_v18  ;;  %v7878_v42 = vadd.f32 %v7868_v62, %v13232_v61  ;;  %v7958_v62 = vstv %s14545_s17 }
0x206b   :  { %v7873_v22 = vadd.f32 %v9447_v59, %v7788_v17  ;;  %v7886_v60 = vsel %vm120_vm0, %v7878_v42, 0.0 }
0x206c   :  { %7887 = vadd.xlane.f32.xlu1 %v7886_v60 }
0x206d   :  { %v7879_v40 = vadd.f32 %v7873_v22, %v13242_v37 }
0x206f   :  { %v7889_v31 = vsel %vm120_vm0, %v7879_v40, 0.0 }
0x2070   :  { %7890 = vadd.xlane.f32.xlu0 %v7889_v31 }
0x20f1   :  { %v7882_v63 = vpop.xlane.xlu1 %7881 }
0x20f2   :  { %v7892_v20 = vmul.f32 0.03125, %v7882_v63 }
0x20f4   :  { %v7896_v47 = vsub.f32 %v7876_v8, %v7892_v20 }
0x20f5   :  { %v7885_v15 = vpop.xlane.xlu0 %7884 }
0x20f6   :  { %v7893_v14 = vmul.f32 0.03125, %v7885_v15  ;;  %v7900_v50 = vmul.f32 %v7896_v47, %v7896_v47 }
0x20f8   :  { %v7897_v34 = vsub.f32 %v7877_v57, %v7893_v14  ;;  %v7904_v5 = vsel %vm120_vm0, %v7900_v50, 0.0 }
0x20f9   :  { %7905 = vadd.xlane.f32.xlu1 %v7904_v5  ;;  %v7888_v61 = vpop.xlane.xlu1 %7887 }
0x20fa   :  { %v7894_v2 = vmul.f32 0.03125, %v7888_v61  ;;  %v7901_v27 = vmul.f32 %v7897_v34, %v7897_v34 }
0x20fc   :  { %v7898_v4 = vsub.f32 %v7878_v42, %v7894_v2  ;;  %v7907_v52 = vsel %vm120_vm0, %v7901_v27, 0.0 }
0x20fd   :  { %7908 = vadd.xlane.f32.xlu0 %v7907_v52  ;;  %v7891_v37 = vpop.xlane.xlu0 %7890 }
0x20fe   :  { %v7895_v11 = vmul.f32 0.03125, %v7891_v37  ;;  %v7902_v35 = vmul.f32 %v7898_v4, %v7898_v4 }
0x2100   :  { %v7899_v7 = vsub.f32 %v7879_v40, %v7895_v11  ;;  %v7910_v6 = vsel %vm120_vm0, %v7902_v35, 0.0 }
0x2101   :  { %7911 = vadd.xlane.f32.xlu1 %v7910_v6 }
0x2102   :  { %v7903_v43 = vmul.f32 %v7899_v7, %v7899_v7 }
0x2104   :  { %v7913_v38 = vsel %vm120_vm0, %v7903_v43, 0.0 }
0x2105   :  { %7914 = vadd.xlane.f32.xlu0 %v7913_v38 }
0x2186   :  { %v7906_v3 = vpop.xlane.xlu1 %7905 }
0x2187   :  { %v7916_v18 = vmul.f32 0.03125, %v7906_v3 }
0x2189   :  { %v7920_v56 = vadd.f32 1e-05, %v7916_v18 }
0x218a   :  { %v7909_v13 = vpop.xlane.xlu0 %7908 }
0x218b   :  { %10913 = vrsqrt.f32 %v7920_v56  ;;  %v7917_v10 = vmul.f32 0.03125, %v7909_v13 }
0x218d   :  { %v7921_v23 = vadd.f32 1e-05, %v7917_v10 }
0x218e   :  { %v7912_v25 = vpop.xlane.xlu1 %7911 }
0x218f   :  { %10915 = vrsqrt.f32 %v7921_v23  ;;  %v7918_v55 = vmul.f32 0.03125, %v7912_v25 }
0x2191   :  { %v7922_v41 = vadd.f32 1e-05, %v7918_v55 }
0x2192   :  { %v7915_v33 = vpop.xlane.xlu0 %7914 }
0x2193   :  { %10917 = vrsqrt.f32 %v7922_v41  ;;  %v7919_v12 = vmul.f32 0.03125, %v7915_v33 }
0x2195   :  { %v10914_v49 = vpop.eup %10913  ;;  %v7923_v19 = vadd.f32 1e-05, %v7919_v12 }
0x2196   :  { %v7928_v21 = vmul.f32 %v10914_v49, %v7896_v47 }
0x2197   :  { %10919 = vrsqrt.f32 %v7923_v19 }
0x2198   :  { %v7940_v58 = vmul.f32 %v8576_v48, %v7928_v21 }
0x2199   :  { %v10916_v28 = vpop.eup %10915 }
0x219a   :  { %v7929_v39 = vmul.f32 %v10916_v28, %v7897_v34  ;;  %v7952_v44 = vadd.f32 %v8578_v54, %v7940_v58 }
0x219c   :  { %v7941_v8 = vmul.f32 %v8576_v48, %v7929_v39 }
0x219d   :  { %v10918_v1 = vpop.eup %10917 }
0x219e   :  { %v7930_v26 = vmul.f32 %v10918_v1, %v7898_v4  ;;  %v7953_v51 = vadd.f32 %v8578_v54, %v7941_v8 }
0x21a0   :  { %v7942_v36 = vmul.f32 %v8576_v48, %v7930_v26  ;;  %v10577_v53 = vpack.c.bf16 %v7953_v51, %v7952_v44 }
0x21a1   :  { %v10920_v45 = vpop.eup %10919 }
0x21a2   :  { %v7931_v32 = vmul.f32 %v10920_v45, %v7899_v7  ;;  %10579 = vmatpush3.bf16.xpose.msk.msra.mxu1 %vm10578_vm6, %v10577_v53  ;;  %v7954_v30 = vadd.f32 %v8578_v54, %v7942_v36 }
0x21a3   :  { %10580 = vmatprep.subr.bf16.mxu1 %v10936_v16 }
0x21a4   :  { %v7943_v9 = vmul.f32 %v8576_v48, %v7931_v32 }
0x21a6   :  { %v7955_v57 = vadd.f32 %v8578_v54, %v7943_v9 }
0x21a8   :  { %v10581_v29 = vpack.c.bf16 %v7955_v57, %v7954_v30 }
0x21aa   :  { %10583 = vmatpush3.bf16.xpose.msk.msra.mxu1 %vm10578_vm6, %v10581_v29 }
0x21b1   :  { %9742 = vmatmul.mubr.msk.f32.vlgmr.msra.gmra.mrb[166].mxu1 %vm120_vm0, %v7956_v24 }
0x2284   :  { %v8040_v46 = vpop.f32.mrb[166].mxu1 }
0x2285   :  { %v8041_v59 = vadd.f32 %v8040_v46, %v7958_v62  ;;  %v9743_v0 = vpop.f32.mrb[167].mxu1 }
0x2287   :  { %v8044_v17 = vsel %vm120_vm0, %v8041_v59, 0.0 }
0x2288   :  { %8045 = vst [vmem:[%s14546_s18] sm:$0x1] %v8044_v17 }

</bundles_post_ra>
